<compile_context>
chip_gen: v6e
topology: v6e:2x2x1
jax: 0.10.0
libtpu: 0.0.40
codegen_flags: <defaults>
</compile_context>

<pallas_src>
import jax
import jax.numpy as jnp
from jax.experimental import pallas as pl
from jax.experimental.pallas import tpu as pltpu

SELECTOR_INPUT_CHANNEL = [16, 32, 64, 128, 256, 512, 64, 128, 256, 512, 64, 64, 64]
SELECTOR_OUTPUT_CHANNEL = [32] * 13          # non-nuscenes / non-pixset branch
FINAL_NET = [sum(SELECTOR_OUTPUT_CHANNEL) * 2, 512, 256, 128, 64, 1]   # [832, ...]
FALSE_CONSTANT = 1.0
BN_EPS = 1e-5
N_SRC = len(SELECTOR_INPUT_CHANNEL)
COUT = SELECTOR_OUTPUT_CHANNEL[0]            # 32

# sources bucketed by input-channel count (per-bucket pallas_call, K = 16*cin)
_BUCKETS = {}
for _i, _c in enumerate(SELECTOR_INPUT_CHANNEL):
    _BUCKETS.setdefault(_c, []).append(_i)


def _pick_row_tile(q, cap=256):
    """Largest row tile <= cap dividing q (multiple of 16 when < q)."""
    if q <= cap:
        return q
    for t in range(cap - cap % 16, 15, -16):
        if q % t == 0:
            return t
    return q


# ----------------------------------------------------------------------------
# Kernel A: conv3x3+bias+ReLU at the 4 bilinear corners of every query (all 4
# corners evaluated by one matmul over the shared 4x4 window), then the
# bilinear blend.  One launch per channel bucket; grid = (member, row tile).
# ----------------------------------------------------------------------------
def _selector_kernel(patch_ref, w_ref, b_ref, cw_ref, sum_ref, out_ref):
    # patch_ref: (1, TQ, 16*Cin) bf16  4x4 input windows, features = (dy,dx,cin)
    # w_ref:     (1, 16*Cin, 128) bf16 4 shifted copies of the 3x3 conv weight
    # b_ref:     (1, 1, 128)      f32  conv bias tiled over the 4 corners
    # cw_ref:    (1, TQ, 128)     f32  bilinear corner weights (32-lane bands)
    # sum_ref:   (128, 32)        f32  corner-summing matrix (4 stacked I_32)
    # out_ref:   (1, TQ, 32)      bf16
    z = jnp.dot(patch_ref[0], w_ref[0], preferred_element_type=jnp.float32)
    z = jnp.maximum(z + b_ref[0], 0.0)          # conv3x3 + bias + ReLU, 4 corners
    zw = z * cw_ref[0]                          # weight each corner's 32-lane band
    out_ref[0] = jnp.dot(zw, sum_ref[...],      # sum the 4 corner bands
                         preferred_element_type=jnp.float32).astype(out_ref.dtype)


def _corner_base_and_weights(grid_xy, H, W):
    """grid_xy: [S,N,2] (x,y) in [-1,1] -> top-left corner (y0,x0) int32 [S,N]
    and the 4 bilinear corner weights [S,N,4] (order (y0,x0),(y0,x1),(y1,x0),
    (y1,x1)).  Matches F.grid_sample(align_corners=False, padding_mode='border')."""
    gx, gy = grid_xy[..., 0], grid_xy[..., 1]
    x = jnp.clip(((gx + 1.0) * W - 1.0) * 0.5, 0.0, W - 1.0)
    y = jnp.clip(((gy + 1.0) * H - 1.0) * 0.5, 0.0, H - 1.0)
    x0 = jnp.floor(x)
    y0 = jnp.floor(y)
    tx = x - x0
    ty = y - y0
    wts = jnp.stack([(1.0 - ty) * (1.0 - tx), (1.0 - ty) * tx,
                     ty * (1.0 - tx), ty * tx], axis=-1)      # [S,N,4]
    # when x == W-1 exactly the (x0+1) corners get weight exactly 0, so using
    # x1 = x0+1 unconditionally (into the zero-padded border) is exact.
    return y0.astype(jnp.int32), x0.astype(jnp.int32), wts


def _gather_windows(x, y0, x0):
    """x: [S,H,W,C] (bf16); y0/x0: [S,N].  Returns the 4x4 zero-padded input
    windows covering all 4 corner conv patches, flattened to [S*N, 16*C]."""
    S, H, W, C = x.shape
    N = y0.shape[1]
    Wp = W + 3
    xp = jnp.pad(x, ((0, 0), (1, 2), (1, 2), (0, 0))).reshape(S, (H + 3) * Wp, C)
    off = (jnp.arange(4)[:, None] * Wp + jnp.arange(4)[None, :]).reshape(1, 1, 16)
    idx = (y0 * Wp + x0)[..., None] + off                     # [S,N,16] (padded coords)
    idx = idx.reshape(S, N * 16)
    g = jnp.take_along_axis(xp, idx[:, :, None], axis=1)      # [S, N*16, C]
    return g.reshape(S * N, 16 * C)                           # rows (s,n); feat (dy,dx,c)


def selector_stacker1(sources_pre, sources_next, l_pre, l_next, p):
    """Both streams, all 13 sources, one pallas_call per channel bucket.
    Returns x_pre, x_next each of shape [B, N, 416] (bf16)."""
    B, N = l_pre.shape[0], l_pre.shape[1]
    S = 2 * B                      # streams folded into rows: [pre batches, next batches]
    Q = S * N
    assert Q % 8 == 0, "2*B*N must be a multiple of 8"
    TQ = _pick_row_tile(Q)
    grid_xy = jnp.concatenate([l_pre.reshape(B, N, 2),
                               l_next.reshape(B, N, 2)], axis=0)     # [S,N,2]

    sum_mat = jnp.tile(jnp.eye(COUT, dtype=jnp.float32), (4, 1))     # (128, 32)

    feats_by_src = [None] * N_SRC
    for cin, members in _BUCKETS.items():
        K = 16 * cin
        nm = len(members)
        patches, cws = [], []
        for s in members:
            # bf16 BEFORE gather/pad/stack (halves wrapper + kernel DMA bytes)
            x = jnp.concatenate([sources_pre[s], sources_next[s]],
                                axis=0).astype(jnp.bfloat16)          # [S,H,W,C]
            assert x.shape[3] == cin
            Hs, Ws = x.shape[1], x.shape[2]
            y0, x0, wts = _corner_base_and_weights(grid_xy, Hs, Ws)
            patches.append(_gather_windows(x, y0, x0))                # [Q, 16C] bf16
            cws.append(jnp.repeat(wts.reshape(Q, 4).astype(jnp.float32),
                                  COUT, axis=-1))                     # [Q, 128] f32
        patches_b = jnp.stack(patches, axis=0)                        # [nm, Q, 16C]
        cw_b = jnp.stack(cws, axis=0)                                 # [nm, Q, 128]

        out_b = pl.pallas_call(
            _selector_kernel,
            out_shape=jax.ShapeDtypeStruct((nm, Q, COUT), jnp.bfloat16),
            grid_spec=pltpu.PrefetchScalarGridSpec(
                num_scalar_prefetch=0,
                grid=(nm, Q // TQ),
                in_specs=[
                    pl.BlockSpec((1, TQ, K), lambda m, r: (m, r, 0)),
                    pl.BlockSpec((1, K, 4 * COUT), lambda m, r: (m, 0, 0)),
                    pl.BlockSpec((1, 1, 4 * COUT), lambda m, r: (m, 0, 0)),
                    pl.BlockSpec((1, TQ, 4 * COUT), lambda m, r: (m, r, 0)),
                    pl.BlockSpec((4 * COUT, COUT), lambda m, r: (0, 0)),
                ],
                out_specs=pl.BlockSpec((1, TQ, COUT), lambda m, r: (m, r, 0)),
            ),
            # disjoint output blocks on both axes -> shard across v7x's 2 TCs
            compiler_params=pltpu.CompilerParams(
                dimension_semantics=("parallel", "parallel")),
        )(patches_b, p["sel_w"][cin], p["sel_b"][cin], cw_b, sum_mat)

        for j, s in enumerate(members):
            feats_by_src[s] = out_b[j]                                # [Q, 32] bf16

    feats = jnp.concatenate(feats_by_src, axis=-1)                    # [Q, 416] bf16
    x_pre = feats[:B * N].reshape(B, N, N_SRC * COUT)
    x_next = feats[B * N:].reshape(B, N, N_SRC * COUT)
    return x_pre, x_next


# ----------------------------------------------------------------------------
# Kernel B: stacker2 (pairwise concat; BN already folded into layer-1 weights)
# fused with the final 1x1 MLP.  Grid over batch, one batch per step.
# ----------------------------------------------------------------------------
def _stacker_final_kernel(xpre_ref, xnext_ref,
                          w1a_ref, w1b_ref, b1_ref,
                          w2_ref, b2_ref, w3_ref, b3_ref,
                          w4_ref, b4_ref, w5_ref, b5_ref, out_ref):
    M = xpre_ref.shape[1]
    pre = xpre_ref[0]                                                 # (M, 416) bf16
    nxt = xnext_ref[0]
    # layer 1 on concat([BN(pre_i), BN(next_j)]) == pre_i @ W1a' + next_j @ W1b' + b1'
    a = jnp.dot(pre, w1a_ref[...], preferred_element_type=jnp.float32)   # (M, 512)
    c = jnp.dot(nxt, w1b_ref[...], preferred_element_type=jnp.float32)   # (M, 512)
    F1 = a.shape[-1]
    h = (a[:, None, :] + c[None, :, :]).reshape(M * M, F1)
    h = jnp.maximum(h + b1_ref[...], 0.0)
    for w_ref, b_ref in ((w2_ref, b2_ref), (w3_ref, b3_ref), (w4_ref, b4_ref)):
        h = jnp.maximum(
            jnp.dot(h.astype(jnp.bfloat16), w_ref[...],
                    preferred_element_type=jnp.float32) + b_ref[...],
            0.0)                                                      # ReLU every layer
    # final 64 -> 1 layer: elementwise multiply + lane reduction (no N=1 matmul,
    # no 1-lane masked stores), then ReLU (add_final puts ReLU after the last conv).
    h3 = h.reshape(M, M, h.shape[-1])
    o = jnp.sum(h3 * w5_ref[...], axis=-1) + b5_ref[...]
    out_ref[0] = jnp.maximum(o, 0.0)                                  # (M, M)


def stacker2_and_final(x_pre, x_next, p):
    B, M, C1 = x_pre.shape

    def _const2(a):
        return pl.BlockSpec(a.shape, lambda b: (0, 0))

    def _const3(a):
        return pl.BlockSpec(a.shape, lambda b: (0, 0, 0))

    in_specs = [
        pl.BlockSpec((1, M, C1), lambda b: (b, 0, 0)),
        pl.BlockSpec((1, M, C1), lambda b: (b, 0, 0)),
        _const2(p["w1a"]), _const2(p["w1b"]), _const2(p["b1"]),
        _const2(p["w2"]), _const2(p["b2"]),
        _const2(p["w3"]), _const2(p["b3"]),
        _const2(p["w4"]), _const2(p["b4"]),
        _const3(p["w5"]), _const2(p["b5"]),
    ]

    out = pl.pallas_call(
        _stacker_final_kernel,
        out_shape=jax.ShapeDtypeStruct((B, M, M), jnp.float32),
        grid_spec=pltpu.PrefetchScalarGridSpec(
            num_scalar_prefetch=0,
            grid=(B,),
            in_specs=in_specs,
            out_specs=pl.BlockSpec((1, M, M), lambda b: (b, 0, 0)),
        ),
        # independent per-batch blocks -> use v7x's second TensorCore
        compiler_params=pltpu.CompilerParams(dimension_semantics=("parallel",)),
    )(x_pre, x_next, p["w1a"], p["w1b"], p["b1"], p["w2"], p["b2"],
      p["w3"], p["b3"], p["w4"], p["b4"], p["w5"], p["b5"])
    return out.reshape(B, 1, M, M)


# ----------------------------------------------------------------------------
# AFE forward
# ----------------------------------------------------------------------------
def afe_forward(sources_pre, sources_next, l_pre, l_next, params):
    x_pre, x_next = selector_stacker1(sources_pre, sources_next, l_pre, l_next, params)
    x = stacker2_and_final(x_pre, x_next, params)        # [B, 1, M, M]
    B, _, M, _ = x.shape
    col = jnp.full((B, 1, M, 1), FALSE_CONSTANT, x.dtype)
    x = jnp.concatenate([x, col], axis=3)
    row = jnp.full((B, 1, 1, M + 1), FALSE_CONSTANT, x.dtype)
    x = jnp.concatenate([x, row], axis=2)                # add_unmatched_dim
    return x


# ----------------------------------------------------------------------------
# Deterministic parameter initialization (synthetic, no checkpoint).
# ----------------------------------------------------------------------------
def _bn_affine(key, c):
    k1, k2, k3, k4 = jax.random.split(key, 4)
    gamma = 1.0 + 0.1 * jax.random.normal(k1, (c,), jnp.float32)
    beta = 0.1 * jax.random.normal(k2, (c,), jnp.float32)
    mean = 0.1 * jax.random.normal(k3, (c,), jnp.float32)
    var = 1.0 + 0.1 * jnp.abs(jax.random.normal(k4, (c,), jnp.float32))
    scale = gamma / jnp.sqrt(var + BN_EPS)
    bias = beta - mean * scale
    return scale, bias


def init_params(key):
    p = {"sel_w": {}, "sel_b": {}}
    # selector conv3x3 weights, packed per bucket as the shifted 4-corner form:
    # W4[dy,dx,cin, 4*32] holds the 3x3 kernel at the 4 offsets of the 4x4 window.
    for cin, members in _BUCKETS.items():
        ws, bs = [], []
        for s in members:
            kw, kb = jax.random.split(jax.random.fold_in(key, s))
            w = jax.random.normal(kw, (3, 3, cin, COUT), jnp.float32) / jnp.sqrt(9.0 * cin)
            b = 0.01 * jax.random.normal(kb, (COUT,), jnp.float32)
            w4 = jnp.zeros((4, 4, cin, 4 * COUT), jnp.float32)
            w4 = w4.at[0:3, 0:3, :, 0 * COUT:1 * COUT].set(w)   # corner (y0, x0)
            w4 = w4.at[0:3, 1:4, :, 1 * COUT:2 * COUT].set(w)   # corner (y0, x1)
            w4 = w4.at[1:4, 0:3, :, 2 * COUT:3 * COUT].set(w)   # corner (y1, x0)
            w4 = w4.at[1:4, 1:4, :, 3 * COUT:4 * COUT].set(w)   # corner (y1, x1)
            ws.append(w4.reshape(16 * cin, 4 * COUT))
            bs.append(jnp.tile(b, 4).reshape(1, 4 * COUT))
        p["sel_w"][cin] = jnp.stack(ws, axis=0).astype(jnp.bfloat16)  # [nm, 16*cin, 128]
        p["sel_b"][cin] = jnp.stack(bs, axis=0)                       # [nm, 1, 128] f32

    c1 = FINAL_NET[0] // 2                                            # 416
    bn_s, bn_b = _bn_affine(jax.random.fold_in(key, 100), c1)         # stacker2_bn

    # final_net: 832->512->256->128->64->1; BN folded into the first 3 layers.
    dims = list(zip(FINAL_NET[:-1], FINAL_NET[1:]))
    has_bn = [True, True, True, False, False]
    fw, fb = [], []
    for li, ((ci, co), bn) in enumerate(zip(dims, has_bn)):
        kw, kb, kbn = jax.random.split(jax.random.fold_in(key, 200 + li), 3)
        w = jax.random.normal(kw, (ci, co), jnp.float32) / jnp.sqrt(float(ci))
        b = 0.01 * jax.random.normal(kb, (co,), jnp.float32)
        if bn:
            s, t = _bn_affine(kbn, co)
            w = w * s[None, :]
            b = b * s + t
        fw.append(w)
        fb.append(b)

    # fold the stacker2_bn inference affine into layer 1 (applied to BOTH streams).
    w1a, w1b = fw[0][:c1], fw[0][c1:]
    b1 = fb[0] + bn_b @ w1a + bn_b @ w1b
    w1a = bn_s[:, None] * w1a
    w1b = bn_s[:, None] * w1b
    p["w1a"] = w1a.astype(jnp.bfloat16)
    p["w1b"] = w1b.astype(jnp.bfloat16)
    p["b1"] = b1.reshape(1, -1)
    p["w2"], p["b2"] = fw[1].astype(jnp.bfloat16), fb[1].reshape(1, -1)
    p["w3"], p["b3"] = fw[2].astype(jnp.bfloat16), fb[2].reshape(1, -1)
    p["w4"], p["b4"] = fw[3].astype(jnp.bfloat16), fb[3].reshape(1, -1)
    p["w5"] = fw[4].reshape(1, 1, -1)                                 # (1,1,64) f32
    p["b5"] = fb[4].reshape(1, 1)                                     # (1,1)   f32
    return p


if __name__ == "__main__":
    key = jax.random.PRNGKey(0)
    B, M = 2, 8                       # batch, max_object (== number of labels)
    HS = [16, 16, 8, 8, 8, 4, 8, 8, 8, 4, 4, 4, 4]   # small synthetic spatial sizes

    params = init_params(jax.random.fold_in(key, 1))

    src_key = jax.random.fold_in(key, 2)
    sources_pre, sources_next = [], []
    for i, (cin, h) in enumerate(zip(SELECTOR_INPUT_CHANNEL, HS)):
        k1, k2 = jax.random.split(jax.random.fold_in(src_key, i))
        sources_pre.append(jax.random.normal(k1, (B, h, h, cin), jnp.float32))
        sources_next.append(jax.random.normal(k2, (B, h, h, cin), jnp.float32))

    kl1, kl2 = jax.random.split(jax.random.fold_in(key, 3))
    l_pre = jax.random.uniform(kl1, (B, M, 1, 1, 2), jnp.float32, -1.0, 1.0)
    l_next = jax.random.uniform(kl2, (B, M, 1, 1, 2), jnp.float32, -1.0, 1.0)

    afe = jax.jit(afe_forward)
    out = afe(sources_pre, sources_next, l_pre, l_next, params)
    out = jax.block_until_ready(out)
    assert out.shape == (B, 1, M + 1, M + 1), out.shape
    assert bool(jnp.all(jnp.isfinite(out)))
    print("KERNEL_OK")
</pallas_src>

<mosaic_0001>
module attributes {stable_mosaic.version = 11 : i64} {
  func.func @_selector_kernel(%arg0: i32, %arg1: i32, %arg2: memref<1x32x1024xbf16, #tpu.memory_space<vmem>>, %arg3: memref<1x1024x128xbf16, #tpu.memory_space<vmem>>, %arg4: memref<1x1x128xf32, #tpu.memory_space<vmem>>, %arg5: memref<1x32x128xf32, #tpu.memory_space<vmem>>, %arg6: memref<128x32xf32, #tpu.memory_space<vmem>>, %arg7: memref<1x32x32xbf16, #tpu.memory_space<vmem>>) attributes {dimension_semantics = [#tpu.dimension_semantics<parallel>, #tpu.dimension_semantics<parallel>], iteration_bounds = array<i64: 5, 1>, scalar_prefetch = 0 : i64, scratch_operands = 0 : i64, tpu.core_type = #tpu.core_type<tc>, window_params = [{transform_indices = @transform_0, window_bounds = array<i64: 1, 32, 1024>}, {transform_indices = @transform_1, window_bounds = array<i64: 1, 1024, 128>}, {transform_indices = @transform_2, window_bounds = array<i64: 1, 1, 128>}, {transform_indices = @transform_3, window_bounds = array<i64: 1, 32, 128>}, {pipeline_mode = #tpu.pipeline_mode<synchronous>, transform_indices = @transform_4, window_bounds = array<i64: 128, 32>}, {transform_indices = @transform_5, window_bounds = array<i64: 1, 32, 32>}]} {
    %c0 = arith.constant 0 : index
    %c0_0 = arith.constant 0 : index
    %c0_1 = arith.constant 0 : index
    %0 = vector.load %arg2[%c0, %c0_0, %c0_1] : memref<1x32x1024xbf16, #tpu.memory_space<vmem>>, vector<1x32x1024xbf16>
    %1 = vector.shape_cast %0 : vector<1x32x1024xbf16> to vector<32x1024xbf16>
    %c0_2 = arith.constant 0 : index
    %c0_3 = arith.constant 0 : index
    %c0_4 = arith.constant 0 : index
    %2 = vector.load %arg3[%c0_2, %c0_3, %c0_4] : memref<1x1024x128xbf16, #tpu.memory_space<vmem>>, vector<1x1024x128xbf16>
    %3 = vector.shape_cast %2 : vector<1x1024x128xbf16> to vector<1024x128xbf16>
    %cst = arith.constant dense<0.000000e+00> : vector<32x128xf32>
    %4 = tpu.matmul %1, %3, %cst {dimension_numbers = #tpu.dot_dimension_numbers<[1], [0], [0], [1], [0, 0, 1, 1], [], []>} : vector<32x1024xbf16>, vector<1024x128xbf16>, vector<32x128xf32> -> vector<32x128xf32>
    %c0_5 = arith.constant 0 : index
    %c0_6 = arith.constant 0 : index
    %c0_7 = arith.constant 0 : index
    %5 = vector.load %arg4[%c0_5, %c0_6, %c0_7] : memref<1x1x128xf32, #tpu.memory_space<vmem>>, vector<1x1x128xf32>
    %6 = vector.shape_cast %5 : vector<1x1x128xf32> to vector<1x128xf32>
    %7 = vector.broadcast %6 : vector<1x128xf32> to vector<32x128xf32>
    %8 = arith.addf %4, %7 : vector<32x128xf32>
    %cst_8 = arith.constant 0.000000e+00 : f32
    %9 = vector.broadcast %cst_8 : f32 to vector<32x128xf32>
    %10 = arith.maximumf %8, %9 : vector<32x128xf32>
    %c0_9 = arith.constant 0 : index
    %c0_10 = arith.constant 0 : index
    %c0_11 = arith.constant 0 : index
    %11 = vector.load %arg5[%c0_9, %c0_10, %c0_11] : memref<1x32x128xf32, #tpu.memory_space<vmem>>, vector<1x32x128xf32>
    %12 = vector.shape_cast %11 : vector<1x32x128xf32> to vector<32x128xf32>
    %13 = arith.mulf %10, %12 : vector<32x128xf32>
    %c0_12 = arith.constant 0 : index
    %c0_13 = arith.constant 0 : index
    %14 = vector.load %arg6[%c0_12, %c0_13] : memref<128x32xf32, #tpu.memory_space<vmem>>, vector<128x32xf32>
    %cst_14 = arith.constant dense<0.000000e+00> : vector<32x32xf32>
    %15 = tpu.matmul %13, %14, %cst_14 {dimension_numbers = #tpu.dot_dimension_numbers<[1], [0], [0], [1], [0, 0, 1, 1], [], []>} : vector<32x128xf32>, vector<128x32xf32>, vector<32x32xf32> -> vector<32x32xf32>
    %16 = arith.truncf %15 : vector<32x32xf32> to vector<32x32xbf16>
    %c0_15 = arith.constant 0 : index
    %c0_16 = arith.constant 0 : index
    %c0_17 = arith.constant 0 : index
    %17 = vector.load %arg7[%c0_15, %c0_16, %c0_17] : memref<1x32x32xbf16, #tpu.memory_space<vmem>>, vector<1x32x32xbf16>
    %18 = vector.shape_cast %17 : vector<1x32x32xbf16> to vector<32x32xbf16>
    %19 = vector.shape_cast %16 : vector<32x32xbf16> to vector<1x32x32xbf16>
    tpu.vector_store %arg7[%c0_15, %c0_16, %c0_17], %19 {strides = array<i32>} : memref<1x32x32xbf16, #tpu.memory_space<vmem>>, vector<1x32x32xbf16>,
    return
  }
  func.func @transform_0(%arg0: i32, %arg1: i32) -> (i32, i32, i32) {
    %c0_i32 = arith.constant 0 : i32
    %c0_i32_0 = arith.constant 0 : i32
    return %arg0, %arg1, %c0_i32 : i32, i32, i32
  }
  func.func @transform_1(%arg0: i32, %arg1: i32) -> (i32, i32, i32) {
    %c0_i32 = arith.constant 0 : i32
    %c0_i32_0 = arith.constant 0 : i32
    %c0_i32_1 = arith.constant 0 : i32
    return %arg0, %c0_i32, %c0_i32_0 : i32, i32, i32
  }
  func.func @transform_2(%arg0: i32, %arg1: i32) -> (i32, i32, i32) {
    %c0_i32 = arith.constant 0 : i32
    %c0_i32_0 = arith.constant 0 : i32
    %c0_i32_1 = arith.constant 0 : i32
    return %arg0, %c0_i32, %c0_i32_0 : i32, i32, i32
  }
  func.func @transform_3(%arg0: i32, %arg1: i32) -> (i32, i32, i32) {
    %c0_i32 = arith.constant 0 : i32
    %c0_i32_0 = arith.constant 0 : i32
    return %arg0, %arg1, %c0_i32 : i32, i32, i32
  }
  func.func @transform_4(%arg0: i32, %arg1: i32) -> (i32, i32) {
    %c0_i32 = arith.constant 0 : i32
    %c0_i32_0 = arith.constant 0 : i32
    %c0_i32_1 = arith.constant 0 : i32
    return %c0_i32, %c0_i32_0 : i32, i32
  }
  func.func @transform_5(%arg0: i32, %arg1: i32) -> (i32, i32, i32) {
    %c0_i32 = arith.constant 0 : i32
    %c0_i32_0 = arith.constant 0 : i32
    return %arg0, %arg1, %c0_i32 : i32, i32, i32
  }
}

module attributes {stable_mosaic.version = 11 : i64} {
  func.func @_selector_kernel(%arg0: i32, %arg1: i32, %arg2: memref<1x32x8192xbf16, #tpu.memory_space<vmem>>, %arg3: memref<1x8192x128xbf16, #tpu.memory_space<vmem>>, %arg4: memref<1x1x128xf32, #tpu.memory_space<vmem>>, %arg5: memref<1x32x128xf32, #tpu.memory_space<vmem>>, %arg6: memref<128x32xf32, #tpu.memory_space<vmem>>, %arg7: memref<1x32x32xbf16, #tpu.memory_space<vmem>>) attributes {dimension_semantics = [#tpu.dimension_semantics<parallel>, #tpu.dimension_semantics<parallel>], iteration_bounds = array<i64: 2, 1>, scalar_prefetch = 0 : i64, scratch_operands = 0 : i64, tpu.core_type = #tpu.core_type<tc>, window_params = [{transform_indices = @transform_0, window_bounds = array<i64: 1, 32, 8192>}, {transform_indices = @transform_1, window_bounds = array<i64: 1, 8192, 128>}, {transform_indices = @transform_2, window_bounds = array<i64: 1, 1, 128>}, {transform_indices = @transform_3, window_bounds = array<i64: 1, 32, 128>}, {pipeline_mode = #tpu.pipeline_mode<synchronous>, transform_indices = @transform_4, window_bounds = array<i64: 128, 32>}, {transform_indices = @transform_5, window_bounds = array<i64: 1, 32, 32>}]} {
    %c0 = arith.constant 0 : index
    %c0_0 = arith.constant 0 : index
    %c0_1 = arith.constant 0 : index
    %0 = vector.load %arg2[%c0, %c0_0, %c0_1] : memref<1x32x8192xbf16, #tpu.memory_space<vmem>>, vector<1x32x8192xbf16>
    %1 = vector.shape_cast %0 : vector<1x32x8192xbf16> to vector<32x8192xbf16>
    %c0_2 = arith.constant 0 : index
    %c0_3 = arith.constant 0 : index
    %c0_4 = arith.constant 0 : index
    %2 = vector.load %arg3[%c0_2, %c0_3, %c0_4] : memref<1x8192x128xbf16, #tpu.memory_space<vmem>>, vector<1x8192x128xbf16>
    %3 = vector.shape_cast %2 : vector<1x8192x128xbf16> to vector<8192x128xbf16>
    %cst = arith.constant dense<0.000000e+00> : vector<32x128xf32>
    %4 = tpu.matmul %1, %3, %cst {dimension_numbers = #tpu.dot_dimension_numbers<[1], [0], [0], [1], [0, 0, 1, 1], [], []>} : vector<32x8192xbf16>, vector<8192x128xbf16>, vector<32x128xf32> -> vector<32x128xf32>
    %c0_5 = arith.constant 0 : index
    %c0_6 = arith.constant 0 : index
    %c0_7 = arith.constant 0 : index
    %5 = vector.load %arg4[%c0_5, %c0_6, %c0_7] : memref<1x1x128xf32, #tpu.memory_space<vmem>>, vector<1x1x128xf32>
    %6 = vector.shape_cast %5 : vector<1x1x128xf32> to vector<1x128xf32>
    %7 = vector.broadcast %6 : vector<1x128xf32> to vector<32x128xf32>
    %8 = arith.addf %4, %7 : vector<32x128xf32>
    %cst_8 = arith.constant 0.000000e+00 : f32
    %9 = vector.broadcast %cst_8 : f32 to vector<32x128xf32>
    %10 = arith.maximumf %8, %9 : vector<32x128xf32>
    %c0_9 = arith.constant 0 : index
    %c0_10 = arith.constant 0 : index
    %c0_11 = arith.constant 0 : index
    %11 = vector.load %arg5[%c0_9, %c0_10, %c0_11] : memref<1x32x128xf32, #tpu.memory_space<vmem>>, vector<1x32x128xf32>
    %12 = vector.shape_cast %11 : vector<1x32x128xf32> to vector<32x128xf32>
    %13 = arith.mulf %10, %12 : vector<32x128xf32>
    %c0_12 = arith.constant 0 : index
    %c0_13 = arith.constant 0 : index
    %14 = vector.load %arg6[%c0_12, %c0_13] : memref<128x32xf32, #tpu.memory_space<vmem>>, vector<128x32xf32>
    %cst_14 = arith.constant dense<0.000000e+00> : vector<32x32xf32>
    %15 = tpu.matmul %13, %14, %cst_14 {dimension_numbers = #tpu.dot_dimension_numbers<[1], [0], [0], [1], [0, 0, 1, 1], [], []>} : vector<32x128xf32>, vector<128x32xf32>, vector<32x32xf32> -> vector<32x32xf32>
    %16 = arith.truncf %15 : vector<32x32xf32> to vector<32x32xbf16>
    %c0_15 = arith.constant 0 : index
    %c0_16 = arith.constant 0 : index
    %c0_17 = arith.constant 0 : index
    %17 = vector.load %arg7[%c0_15, %c0_16, %c0_17] : memref<1x32x32xbf16, #tpu.memory_space<vmem>>, vector<1x32x32xbf16>
    %18 = vector.shape_cast %17 : vector<1x32x32xbf16> to vector<32x32xbf16>
    %19 = vector.shape_cast %16 : vector<32x32xbf16> to vector<1x32x32xbf16>
    tpu.vector_store %arg7[%c0_15, %c0_16, %c0_17], %19 {strides = array<i32>} : memref<1x32x32xbf16, #tpu.memory_space<vmem>>, vector<1x32x32xbf16>,
    return
  }
  func.func @transform_0(%arg0: i32, %arg1: i32) -> (i32, i32, i32) {
    %c0_i32 = arith.constant 0 : i32
    %c0_i32_0 = arith.constant 0 : i32
    return %arg0, %arg1, %c0_i32 : i32, i32, i32
  }
  func.func @transform_1(%arg0: i32, %arg1: i32) -> (i32, i32, i32) {
    %c0_i32 = arith.constant 0 : i32
    %c0_i32_0 = arith.constant 0 : i32
    %c0_i32_1 = arith.constant 0 : i32
    return %arg0, %c0_i32, %c0_i32_0 : i32, i32, i32
  }
  func.func @transform_2(%arg0: i32, %arg1: i32) -> (i32, i32, i32) {
    %c0_i32 = arith.constant 0 : i32
    %c0_i32_0 = arith.constant 0 : i32
    %c0_i32_1 = arith.constant 0 : i32
    return %arg0, %c0_i32, %c0_i32_0 : i32, i32, i32
  }
  func.func @transform_3(%arg0: i32, %arg1: i32) -> (i32, i32, i32) {
    %c0_i32 = arith.constant 0 : i32
    %c0_i32_0 = arith.constant 0 : i32
    return %arg0, %arg1, %c0_i32 : i32, i32, i32
  }
  func.func @transform_4(%arg0: i32, %arg1: i32) -> (i32, i32) {
    %c0_i32 = arith.constant 0 : i32
    %c0_i32_0 = arith.constant 0 : i32
    %c0_i32_1 = arith.constant 0 : i32
    return %c0_i32, %c0_i32_0 : i32, i32
  }
  func.func @transform_5(%arg0: i32, %arg1: i32) -> (i32, i32, i32) {
    %c0_i32 = arith.constant 0 : i32
    %c0_i32_0 = arith.constant 0 : i32
    return %arg0, %arg1, %c0_i32 : i32, i32, i32
  }
}

module attributes {stable_mosaic.version = 11 : i64} {
  func.func @_selector_kernel(%arg0: i32, %arg1: i32, %arg2: memref<1x32x4096xbf16, #tpu.memory_space<vmem>>, %arg3: memref<1x4096x128xbf16, #tpu.memory_space<vmem>>, %arg4: memref<1x1x128xf32, #tpu.memory_space<vmem>>, %arg5: memref<1x32x128xf32, #tpu.memory_space<vmem>>, %arg6: memref<128x32xf32, #tpu.memory_space<vmem>>, %arg7: memref<1x32x32xbf16, #tpu.memory_space<vmem>>) attributes {dimension_semantics = [#tpu.dimension_semantics<parallel>, #tpu.dimension_semantics<parallel>], iteration_bounds = array<i64: 2, 1>, scalar_prefetch = 0 : i64, scratch_operands = 0 : i64, tpu.core_type = #tpu.core_type<tc>, window_params = [{transform_indices = @transform_0, window_bounds = array<i64: 1, 32, 4096>}, {transform_indices = @transform_1, window_bounds = array<i64: 1, 4096, 128>}, {transform_indices = @transform_2, window_bounds = array<i64: 1, 1, 128>}, {transform_indices = @transform_3, window_bounds = array<i64: 1, 32, 128>}, {pipeline_mode = #tpu.pipeline_mode<synchronous>, transform_indices = @transform_4, window_bounds = array<i64: 128, 32>}, {transform_indices = @transform_5, window_bounds = array<i64: 1, 32, 32>}]} {
    %c0 = arith.constant 0 : index
    %c0_0 = arith.constant 0 : index
    %c0_1 = arith.constant 0 : index
    %0 = vector.load %arg2[%c0, %c0_0, %c0_1] : memref<1x32x4096xbf16, #tpu.memory_space<vmem>>, vector<1x32x4096xbf16>
    %1 = vector.shape_cast %0 : vector<1x32x4096xbf16> to vector<32x4096xbf16>
    %c0_2 = arith.constant 0 : index
    %c0_3 = arith.constant 0 : index
    %c0_4 = arith.constant 0 : index
    %2 = vector.load %arg3[%c0_2, %c0_3, %c0_4] : memref<1x4096x128xbf16, #tpu.memory_space<vmem>>, vector<1x4096x128xbf16>
    %3 = vector.shape_cast %2 : vector<1x4096x128xbf16> to vector<4096x128xbf16>
    %cst = arith.constant dense<0.000000e+00> : vector<32x128xf32>
    %4 = tpu.matmul %1, %3, %cst {dimension_numbers = #tpu.dot_dimension_numbers<[1], [0], [0], [1], [0, 0, 1, 1], [], []>} : vector<32x4096xbf16>, vector<4096x128xbf16>, vector<32x128xf32> -> vector<32x128xf32>
    %c0_5 = arith.constant 0 : index
    %c0_6 = arith.constant 0 : index
    %c0_7 = arith.constant 0 : index
    %5 = vector.load %arg4[%c0_5, %c0_6, %c0_7] : memref<1x1x128xf32, #tpu.memory_space<vmem>>, vector<1x1x128xf32>
    %6 = vector.shape_cast %5 : vector<1x1x128xf32> to vector<1x128xf32>
    %7 = vector.broadcast %6 : vector<1x128xf32> to vector<32x128xf32>
    %8 = arith.addf %4, %7 : vector<32x128xf32>
    %cst_8 = arith.constant 0.000000e+00 : f32
    %9 = vector.broadcast %cst_8 : f32 to vector<32x128xf32>
    %10 = arith.maximumf %8, %9 : vector<32x128xf32>
    %c0_9 = arith.constant 0 : index
    %c0_10 = arith.constant 0 : index
    %c0_11 = arith.constant 0 : index
    %11 = vector.load %arg5[%c0_9, %c0_10, %c0_11] : memref<1x32x128xf32, #tpu.memory_space<vmem>>, vector<1x32x128xf32>
    %12 = vector.shape_cast %11 : vector<1x32x128xf32> to vector<32x128xf32>
    %13 = arith.mulf %10, %12 : vector<32x128xf32>
    %c0_12 = arith.constant 0 : index
    %c0_13 = arith.constant 0 : index
    %14 = vector.load %arg6[%c0_12, %c0_13] : memref<128x32xf32, #tpu.memory_space<vmem>>, vector<128x32xf32>
    %cst_14 = arith.constant dense<0.000000e+00> : vector<32x32xf32>
    %15 = tpu.matmul %13, %14, %cst_14 {dimension_numbers = #tpu.dot_dimension_numbers<[1], [0], [0], [1], [0, 0, 1, 1], [], []>} : vector<32x128xf32>, vector<128x32xf32>, vector<32x32xf32> -> vector<32x32xf32>
    %16 = arith.truncf %15 : vector<32x32xf32> to vector<32x32xbf16>
    %c0_15 = arith.constant 0 : index
    %c0_16 = arith.constant 0 : index
    %c0_17 = arith.constant 0 : index
    %17 = vector.load %arg7[%c0_15, %c0_16, %c0_17] : memref<1x32x32xbf16, #tpu.memory_space<vmem>>, vector<1x32x32xbf16>
    %18 = vector.shape_cast %17 : vector<1x32x32xbf16> to vector<32x32xbf16>
    %19 = vector.shape_cast %16 : vector<32x32xbf16> to vector<1x32x32xbf16>
    tpu.vector_store %arg7[%c0_15, %c0_16, %c0_17], %19 {strides = array<i32>} : memref<1x32x32xbf16, #tpu.memory_space<vmem>>, vector<1x32x32xbf16>,
    return
  }
  func.func @transform_0(%arg0: i32, %arg1: i32) -> (i32, i32, i32) {
    %c0_i32 = arith.constant 0 : i32
    %c0_i32_0 = arith.constant 0 : i32
    return %arg0, %arg1, %c0_i32 : i32, i32, i32
  }
  func.func @transform_1(%arg0: i32, %arg1: i32) -> (i32, i32, i32) {
    %c0_i32 = arith.constant 0 : i32
    %c0_i32_0 = arith.constant 0 : i32
    %c0_i32_1 = arith.constant 0 : i32
    return %arg0, %c0_i32, %c0_i32_0 : i32, i32, i32
  }
  func.func @transform_2(%arg0: i32, %arg1: i32) -> (i32, i32, i32) {
    %c0_i32 = arith.constant 0 : i32
    %c0_i32_0 = arith.constant 0 : i32
    %c0_i32_1 = arith.constant 0 : i32
    return %arg0, %c0_i32, %c0_i32_0 : i32, i32, i32
  }
  func.func @transform_3(%arg0: i32, %arg1: i32) -> (i32, i32, i32) {
    %c0_i32 = arith.constant 0 : i32
    %c0_i32_0 = arith.constant 0 : i32
    return %arg0, %arg1, %c0_i32 : i32, i32, i32
  }
  func.func @transform_4(%arg0: i32, %arg1: i32) -> (i32, i32) {
    %c0_i32 = arith.constant 0 : i32
    %c0_i32_0 = arith.constant 0 : i32
    %c0_i32_1 = arith.constant 0 : i32
    return %c0_i32, %c0_i32_0 : i32, i32
  }
  func.func @transform_5(%arg0: i32, %arg1: i32) -> (i32, i32, i32) {
    %c0_i32 = arith.constant 0 : i32
    %c0_i32_0 = arith.constant 0 : i32
    return %arg0, %arg1, %c0_i32 : i32, i32, i32
  }
}

module attributes {stable_mosaic.version = 11 : i64} {
  func.func @_selector_kernel(%arg0: i32, %arg1: i32, %arg2: memref<1x32x2048xbf16, #tpu.memory_space<vmem>>, %arg3: memref<1x2048x128xbf16, #tpu.memory_space<vmem>>, %arg4: memref<1x1x128xf32, #tpu.memory_space<vmem>>, %arg5: memref<1x32x128xf32, #tpu.memory_space<vmem>>, %arg6: memref<128x32xf32, #tpu.memory_space<vmem>>, %arg7: memref<1x32x32xbf16, #tpu.memory_space<vmem>>) attributes {dimension_semantics = [#tpu.dimension_semantics<parallel>, #tpu.dimension_semantics<parallel>], iteration_bounds = array<i64: 2, 1>, scalar_prefetch = 0 : i64, scratch_operands = 0 : i64, tpu.core_type = #tpu.core_type<tc>, window_params = [{transform_indices = @transform_0, window_bounds = array<i64: 1, 32, 2048>}, {transform_indices = @transform_1, window_bounds = array<i64: 1, 2048, 128>}, {transform_indices = @transform_2, window_bounds = array<i64: 1, 1, 128>}, {transform_indices = @transform_3, window_bounds = array<i64: 1, 32, 128>}, {pipeline_mode = #tpu.pipeline_mode<synchronous>, transform_indices = @transform_4, window_bounds = array<i64: 128, 32>}, {transform_indices = @transform_5, window_bounds = array<i64: 1, 32, 32>}]} {
    %c0 = arith.constant 0 : index
    %c0_0 = arith.constant 0 : index
    %c0_1 = arith.constant 0 : index
    %0 = vector.load %arg2[%c0, %c0_0, %c0_1] : memref<1x32x2048xbf16, #tpu.memory_space<vmem>>, vector<1x32x2048xbf16>
    %1 = vector.shape_cast %0 : vector<1x32x2048xbf16> to vector<32x2048xbf16>
    %c0_2 = arith.constant 0 : index
    %c0_3 = arith.constant 0 : index
    %c0_4 = arith.constant 0 : index
    %2 = vector.load %arg3[%c0_2, %c0_3, %c0_4] : memref<1x2048x128xbf16, #tpu.memory_space<vmem>>, vector<1x2048x128xbf16>
    %3 = vector.shape_cast %2 : vector<1x2048x128xbf16> to vector<2048x128xbf16>
    %cst = arith.constant dense<0.000000e+00> : vector<32x128xf32>
    %4 = tpu.matmul %1, %3, %cst {dimension_numbers = #tpu.dot_dimension_numbers<[1], [0], [0], [1], [0, 0, 1, 1], [], []>} : vector<32x2048xbf16>, vector<2048x128xbf16>, vector<32x128xf32> -> vector<32x128xf32>
    %c0_5 = arith.constant 0 : index
    %c0_6 = arith.constant 0 : index
    %c0_7 = arith.constant 0 : index
    %5 = vector.load %arg4[%c0_5, %c0_6, %c0_7] : memref<1x1x128xf32, #tpu.memory_space<vmem>>, vector<1x1x128xf32>
    %6 = vector.shape_cast %5 : vector<1x1x128xf32> to vector<1x128xf32>
    %7 = vector.broadcast %6 : vector<1x128xf32> to vector<32x128xf32>
    %8 = arith.addf %4, %7 : vector<32x128xf32>
    %cst_8 = arith.constant 0.000000e+00 : f32
    %9 = vector.broadcast %cst_8 : f32 to vector<32x128xf32>
    %10 = arith.maximumf %8, %9 : vector<32x128xf32>
    %c0_9 = arith.constant 0 : index
    %c0_10 = arith.constant 0 : index
    %c0_11 = arith.constant 0 : index
    %11 = vector.load %arg5[%c0_9, %c0_10, %c0_11] : memref<1x32x128xf32, #tpu.memory_space<vmem>>, vector<1x32x128xf32>
    %12 = vector.shape_cast %11 : vector<1x32x128xf32> to vector<32x128xf32>
    %13 = arith.mulf %10, %12 : vector<32x128xf32>
    %c0_12 = arith.constant 0 : index
    %c0_13 = arith.constant 0 : index
    %14 = vector.load %arg6[%c0_12, %c0_13] : memref<128x32xf32, #tpu.memory_space<vmem>>, vector<128x32xf32>
    %cst_14 = arith.constant dense<0.000000e+00> : vector<32x32xf32>
    %15 = tpu.matmul %13, %14, %cst_14 {dimension_numbers = #tpu.dot_dimension_numbers<[1], [0], [0], [1], [0, 0, 1, 1], [], []>} : vector<32x128xf32>, vector<128x32xf32>, vector<32x32xf32> -> vector<32x32xf32>
    %16 = arith.truncf %15 : vector<32x32xf32> to vector<32x32xbf16>
    %c0_15 = arith.constant 0 : index
    %c0_16 = arith.constant 0 : index
    %c0_17 = arith.constant 0 : index
    %17 = vector.load %arg7[%c0_15, %c0_16, %c0_17] : memref<1x32x32xbf16, #tpu.memory_space<vmem>>, vector<1x32x32xbf16>
    %18 = vector.shape_cast %17 : vector<1x32x32xbf16> to vector<32x32xbf16>
    %19 = vector.shape_cast %16 : vector<32x32xbf16> to vector<1x32x32xbf16>
    tpu.vector_store %arg7[%c0_15, %c0_16, %c0_17], %19 {strides = array<i32>} : memref<1x32x32xbf16, #tpu.memory_space<vmem>>, vector<1x32x32xbf16>,
    return
  }
  func.func @transform_0(%arg0: i32, %arg1: i32) -> (i32, i32, i32) {
    %c0_i32 = arith.constant 0 : i32
    %c0_i32_0 = arith.constant 0 : i32
    return %arg0, %arg1, %c0_i32 : i32, i32, i32
  }
  func.func @transform_1(%arg0: i32, %arg1: i32) -> (i32, i32, i32) {
    %c0_i32 = arith.constant 0 : i32
    %c0_i32_0 = arith.constant 0 : i32
    %c0_i32_1 = arith.constant 0 : i32
    return %arg0, %c0_i32, %c0_i32_0 : i32, i32, i32
  }
  func.func @transform_2(%arg0: i32, %arg1: i32) -> (i32, i32, i32) {
    %c0_i32 = arith.constant 0 : i32
    %c0_i32_0 = arith.constant 0 : i32
    %c0_i32_1 = arith.constant 0 : i32
    return %arg0, %c0_i32, %c0_i32_0 : i32, i32, i32
  }
  func.func @transform_3(%arg0: i32, %arg1: i32) -> (i32, i32, i32) {
    %c0_i32 = arith.constant 0 : i32
    %c0_i32_0 = arith.constant 0 : i32
    return %arg0, %arg1, %c0_i32 : i32, i32, i32
  }
  func.func @transform_4(%arg0: i32, %arg1: i32) -> (i32, i32) {
    %c0_i32 = arith.constant 0 : i32
    %c0_i32_0 = arith.constant 0 : i32
    %c0_i32_1 = arith.constant 0 : i32
    return %c0_i32, %c0_i32_0 : i32, i32
  }
  func.func @transform_5(%arg0: i32, %arg1: i32) -> (i32, i32, i32) {
    %c0_i32 = arith.constant 0 : i32
    %c0_i32_0 = arith.constant 0 : i32
    return %arg0, %arg1, %c0_i32 : i32, i32, i32
  }
}

module attributes {stable_mosaic.version = 11 : i64} {
  func.func @_selector_kernel(%arg0: i32, %arg1: i32, %arg2: memref<1x32x512xbf16, #tpu.memory_space<vmem>>, %arg3: memref<1x512x128xbf16, #tpu.memory_space<vmem>>, %arg4: memref<1x1x128xf32, #tpu.memory_space<vmem>>, %arg5: memref<1x32x128xf32, #tpu.memory_space<vmem>>, %arg6: memref<128x32xf32, #tpu.memory_space<vmem>>, %arg7: memref<1x32x32xbf16, #tpu.memory_space<vmem>>) attributes {dimension_semantics = [#tpu.dimension_semantics<parallel>, #tpu.dimension_semantics<parallel>], iteration_bounds = array<i64: 1, 1>, scalar_prefetch = 0 : i64, scratch_operands = 0 : i64, tpu.core_type = #tpu.core_type<tc>, window_params = [{transform_indices = @transform_0, window_bounds = array<i64: 1, 32, 512>}, {transform_indices = @transform_1, window_bounds = array<i64: 1, 512, 128>}, {transform_indices = @transform_2, window_bounds = array<i64: 1, 1, 128>}, {transform_indices = @transform_3, window_bounds = array<i64: 1, 32, 128>}, {pipeline_mode = #tpu.pipeline_mode<synchronous>, transform_indices = @transform_4, window_bounds = array<i64: 128, 32>}, {transform_indices = @transform_5, window_bounds = array<i64: 1, 32, 32>}]} {
    %c0 = arith.constant 0 : index
    %c0_0 = arith.constant 0 : index
    %c0_1 = arith.constant 0 : index
    %0 = vector.load %arg2[%c0, %c0_0, %c0_1] : memref<1x32x512xbf16, #tpu.memory_space<vmem>>, vector<1x32x512xbf16>
    %1 = vector.shape_cast %0 : vector<1x32x512xbf16> to vector<32x512xbf16>
    %c0_2 = arith.constant 0 : index
    %c0_3 = arith.constant 0 : index
    %c0_4 = arith.constant 0 : index
    %2 = vector.load %arg3[%c0_2, %c0_3, %c0_4] : memref<1x512x128xbf16, #tpu.memory_space<vmem>>, vector<1x512x128xbf16>
    %3 = vector.shape_cast %2 : vector<1x512x128xbf16> to vector<512x128xbf16>
    %cst = arith.constant dense<0.000000e+00> : vector<32x128xf32>
    %4 = tpu.matmul %1, %3, %cst {dimension_numbers = #tpu.dot_dimension_numbers<[1], [0], [0], [1], [0, 0, 1, 1], [], []>} : vector<32x512xbf16>, vector<512x128xbf16>, vector<32x128xf32> -> vector<32x128xf32>
    %c0_5 = arith.constant 0 : index
    %c0_6 = arith.constant 0 : index
    %c0_7 = arith.constant 0 : index
    %5 = vector.load %arg4[%c0_5, %c0_6, %c0_7] : memref<1x1x128xf32, #tpu.memory_space<vmem>>, vector<1x1x128xf32>
    %6 = vector.shape_cast %5 : vector<1x1x128xf32> to vector<1x128xf32>
    %7 = vector.broadcast %6 : vector<1x128xf32> to vector<32x128xf32>
    %8 = arith.addf %4, %7 : vector<32x128xf32>
    %cst_8 = arith.constant 0.000000e+00 : f32
    %9 = vector.broadcast %cst_8 : f32 to vector<32x128xf32>
    %10 = arith.maximumf %8, %9 : vector<32x128xf32>
    %c0_9 = arith.constant 0 : index
    %c0_10 = arith.constant 0 : index
    %c0_11 = arith.constant 0 : index
    %11 = vector.load %arg5[%c0_9, %c0_10, %c0_11] : memref<1x32x128xf32, #tpu.memory_space<vmem>>, vector<1x32x128xf32>
    %12 = vector.shape_cast %11 : vector<1x32x128xf32> to vector<32x128xf32>
    %13 = arith.mulf %10, %12 : vector<32x128xf32>
    %c0_12 = arith.constant 0 : index
    %c0_13 = arith.constant 0 : index
    %14 = vector.load %arg6[%c0_12, %c0_13] : memref<128x32xf32, #tpu.memory_space<vmem>>, vector<128x32xf32>
    %cst_14 = arith.constant dense<0.000000e+00> : vector<32x32xf32>
    %15 = tpu.matmul %13, %14, %cst_14 {dimension_numbers = #tpu.dot_dimension_numbers<[1], [0], [0], [1], [0, 0, 1, 1], [], []>} : vector<32x128xf32>, vector<128x32xf32>, vector<32x32xf32> -> vector<32x32xf32>
    %16 = arith.truncf %15 : vector<32x32xf32> to vector<32x32xbf16>
    %c0_15 = arith.constant 0 : index
    %c0_16 = arith.constant 0 : index
    %c0_17 = arith.constant 0 : index
    %17 = vector.load %arg7[%c0_15, %c0_16, %c0_17] : memref<1x32x32xbf16, #tpu.memory_space<vmem>>, vector<1x32x32xbf16>
    %18 = vector.shape_cast %17 : vector<1x32x32xbf16> to vector<32x32xbf16>
    %19 = vector.shape_cast %16 : vector<32x32xbf16> to vector<1x32x32xbf16>
    tpu.vector_store %arg7[%c0_15, %c0_16, %c0_17], %19 {strides = array<i32>} : memref<1x32x32xbf16, #tpu.memory_space<vmem>>, vector<1x32x32xbf16>,
    return
  }
  func.func @transform_0(%arg0: i32, %arg1: i32) -> (i32, i32, i32) {
    %c0_i32 = arith.constant 0 : i32
    %c0_i32_0 = arith.constant 0 : i32
    return %arg0, %arg1, %c0_i32 : i32, i32, i32
  }
  func.func @transform_1(%arg0: i32, %arg1: i32) -> (i32, i32, i32) {
    %c0_i32 = arith.constant 0 : i32
    %c0_i32_0 = arith.constant 0 : i32
    %c0_i32_1 = arith.constant 0 : i32
    return %arg0, %c0_i32, %c0_i32_0 : i32, i32, i32
  }
  func.func @transform_2(%arg0: i32, %arg1: i32) -> (i32, i32, i32) {
    %c0_i32 = arith.constant 0 : i32
    %c0_i32_0 = arith.constant 0 : i32
    %c0_i32_1 = arith.constant 0 : i32
    return %arg0, %c0_i32, %c0_i32_0 : i32, i32, i32
  }
  func.func @transform_3(%arg0: i32, %arg1: i32) -> (i32, i32, i32) {
    %c0_i32 = arith.constant 0 : i32
    %c0_i32_0 = arith.constant 0 : i32
    return %arg0, %arg1, %c0_i32 : i32, i32, i32
  }
  func.func @transform_4(%arg0: i32, %arg1: i32) -> (i32, i32) {
    %c0_i32 = arith.constant 0 : i32
    %c0_i32_0 = arith.constant 0 : i32
    %c0_i32_1 = arith.constant 0 : i32
    return %c0_i32, %c0_i32_0 : i32, i32
  }
  func.func @transform_5(%arg0: i32, %arg1: i32) -> (i32, i32, i32) {
    %c0_i32 = arith.constant 0 : i32
    %c0_i32_0 = arith.constant 0 : i32
    return %arg0, %arg1, %c0_i32 : i32, i32, i32
  }
}

module attributes {stable_mosaic.version = 11 : i64} {
  func.func @_selector_kernel(%arg0: i32, %arg1: i32, %arg2: memref<1x32x256xbf16, #tpu.memory_space<vmem>>, %arg3: memref<1x256x128xbf16, #tpu.memory_space<vmem>>, %arg4: memref<1x1x128xf32, #tpu.memory_space<vmem>>, %arg5: memref<1x32x128xf32, #tpu.memory_space<vmem>>, %arg6: memref<128x32xf32, #tpu.memory_space<vmem>>, %arg7: memref<1x32x32xbf16, #tpu.memory_space<vmem>>) attributes {dimension_semantics = [#tpu.dimension_semantics<parallel>, #tpu.dimension_semantics<parallel>], iteration_bounds = array<i64: 1, 1>, scalar_prefetch = 0 : i64, scratch_operands = 0 : i64, tpu.core_type = #tpu.core_type<tc>, window_params = [{transform_indices = @transform_0, window_bounds = array<i64: 1, 32, 256>}, {transform_indices = @transform_1, window_bounds = array<i64: 1, 256, 128>}, {transform_indices = @transform_2, window_bounds = array<i64: 1, 1, 128>}, {transform_indices = @transform_3, window_bounds = array<i64: 1, 32, 128>}, {pipeline_mode = #tpu.pipeline_mode<synchronous>, transform_indices = @transform_4, window_bounds = array<i64: 128, 32>}, {transform_indices = @transform_5, window_bounds = array<i64: 1, 32, 32>}]} {
    %c0 = arith.constant 0 : index
    %c0_0 = arith.constant 0 : index
    %c0_1 = arith.constant 0 : index
    %0 = vector.load %arg2[%c0, %c0_0, %c0_1] : memref<1x32x256xbf16, #tpu.memory_space<vmem>>, vector<1x32x256xbf16>
    %1 = vector.shape_cast %0 : vector<1x32x256xbf16> to vector<32x256xbf16>
    %c0_2 = arith.constant 0 : index
    %c0_3 = arith.constant 0 : index
    %c0_4 = arith.constant 0 : index
    %2 = vector.load %arg3[%c0_2, %c0_3, %c0_4] : memref<1x256x128xbf16, #tpu.memory_space<vmem>>, vector<1x256x128xbf16>
    %3 = vector.shape_cast %2 : vector<1x256x128xbf16> to vector<256x128xbf16>
    %cst = arith.constant dense<0.000000e+00> : vector<32x128xf32>
    %4 = tpu.matmul %1, %3, %cst {dimension_numbers = #tpu.dot_dimension_numbers<[1], [0], [0], [1], [0, 0, 1, 1], [], []>} : vector<32x256xbf16>, vector<256x128xbf16>, vector<32x128xf32> -> vector<32x128xf32>
    %c0_5 = arith.constant 0 : index
    %c0_6 = arith.constant 0 : index
    %c0_7 = arith.constant 0 : index
    %5 = vector.load %arg4[%c0_5, %c0_6, %c0_7] : memref<1x1x128xf32, #tpu.memory_space<vmem>>, vector<1x1x128xf32>
    %6 = vector.shape_cast %5 : vector<1x1x128xf32> to vector<1x128xf32>
    %7 = vector.broadcast %6 : vector<1x128xf32> to vector<32x128xf32>
    %8 = arith.addf %4, %7 : vector<32x128xf32>
    %cst_8 = arith.constant 0.000000e+00 : f32
    %9 = vector.broadcast %cst_8 : f32 to vector<32x128xf32>
    %10 = arith.maximumf %8, %9 : vector<32x128xf32>
    %c0_9 = arith.constant 0 : index
    %c0_10 = arith.constant 0 : index
    %c0_11 = arith.constant 0 : index
    %11 = vector.load %arg5[%c0_9, %c0_10, %c0_11] : memref<1x32x128xf32, #tpu.memory_space<vmem>>, vector<1x32x128xf32>
    %12 = vector.shape_cast %11 : vector<1x32x128xf32> to vector<32x128xf32>
    %13 = arith.mulf %10, %12 : vector<32x128xf32>
    %c0_12 = arith.constant 0 : index
    %c0_13 = arith.constant 0 : index
    %14 = vector.load %arg6[%c0_12, %c0_13] : memref<128x32xf32, #tpu.memory_space<vmem>>, vector<128x32xf32>
    %cst_14 = arith.constant dense<0.000000e+00> : vector<32x32xf32>
    %15 = tpu.matmul %13, %14, %cst_14 {dimension_numbers = #tpu.dot_dimension_numbers<[1], [0], [0], [1], [0, 0, 1, 1], [], []>} : vector<32x128xf32>, vector<128x32xf32>, vector<32x32xf32> -> vector<32x32xf32>
    %16 = arith.truncf %15 : vector<32x32xf32> to vector<32x32xbf16>
    %c0_15 = arith.constant 0 : index
    %c0_16 = arith.constant 0 : index
    %c0_17 = arith.constant 0 : index
    %17 = vector.load %arg7[%c0_15, %c0_16, %c0_17] : memref<1x32x32xbf16, #tpu.memory_space<vmem>>, vector<1x32x32xbf16>
    %18 = vector.shape_cast %17 : vector<1x32x32xbf16> to vector<32x32xbf16>
    %19 = vector.shape_cast %16 : vector<32x32xbf16> to vector<1x32x32xbf16>
    tpu.vector_store %arg7[%c0_15, %c0_16, %c0_17], %19 {strides = array<i32>} : memref<1x32x32xbf16, #tpu.memory_space<vmem>>, vector<1x32x32xbf16>,
    return
  }
  func.func @transform_0(%arg0: i32, %arg1: i32) -> (i32, i32, i32) {
    %c0_i32 = arith.constant 0 : i32
    %c0_i32_0 = arith.constant 0 : i32
    return %arg0, %arg1, %c0_i32 : i32, i32, i32
  }
  func.func @transform_1(%arg0: i32, %arg1: i32) -> (i32, i32, i32) {
    %c0_i32 = arith.constant 0 : i32
    %c0_i32_0 = arith.constant 0 : i32
    %c0_i32_1 = arith.constant 0 : i32
    return %arg0, %c0_i32, %c0_i32_0 : i32, i32, i32
  }
  func.func @transform_2(%arg0: i32, %arg1: i32) -> (i32, i32, i32) {
    %c0_i32 = arith.constant 0 : i32
    %c0_i32_0 = arith.constant 0 : i32
    %c0_i32_1 = arith.constant 0 : i32
    return %arg0, %c0_i32, %c0_i32_0 : i32, i32, i32
  }
  func.func @transform_3(%arg0: i32, %arg1: i32) -> (i32, i32, i32) {
    %c0_i32 = arith.constant 0 : i32
    %c0_i32_0 = arith.constant 0 : i32
    return %arg0, %arg1, %c0_i32 : i32, i32, i32
  }
  func.func @transform_4(%arg0: i32, %arg1: i32) -> (i32, i32) {
    %c0_i32 = arith.constant 0 : i32
    %c0_i32_0 = arith.constant 0 : i32
    %c0_i32_1 = arith.constant 0 : i32
    return %c0_i32, %c0_i32_0 : i32, i32
  }
  func.func @transform_5(%arg0: i32, %arg1: i32) -> (i32, i32, i32) {
    %c0_i32 = arith.constant 0 : i32
    %c0_i32_0 = arith.constant 0 : i32
    return %arg0, %arg1, %c0_i32 : i32, i32, i32
  }
}

module attributes {stable_mosaic.version = 11 : i64} {
  func.func @_stacker_final_kernel(%arg0: i32, %arg1: memref<1x8x416xbf16, #tpu.memory_space<vmem>>, %arg2: memref<1x8x416xbf16, #tpu.memory_space<vmem>>, %arg3: memref<416x512xbf16, #tpu.memory_space<vmem>>, %arg4: memref<416x512xbf16, #tpu.memory_space<vmem>>, %arg5: memref<1x512xf32, #tpu.memory_space<vmem>>, %arg6: memref<512x256xbf16, #tpu.memory_space<vmem>>, %arg7: memref<1x256xf32, #tpu.memory_space<vmem>>, %arg8: memref<256x128xbf16, #tpu.memory_space<vmem>>, %arg9: memref<1x128xf32, #tpu.memory_space<vmem>>, %arg10: memref<128x64xbf16, #tpu.memory_space<vmem>>, %arg11: memref<1x64xf32, #tpu.memory_space<vmem>>, %arg12: memref<1x1x64xf32, #tpu.memory_space<vmem>>, %arg13: memref<1x1xf32, #tpu.memory_space<vmem>>, %arg14: memref<1x8x8xf32, #tpu.memory_space<vmem>>) attributes {dimension_semantics = [#tpu.dimension_semantics<parallel>], iteration_bounds = array<i64: 2>, scalar_prefetch = 0 : i64, scratch_operands = 0 : i64, tpu.core_type = #tpu.core_type<tc>, window_params = [{transform_indices = @transform_0, window_bounds = array<i64: 1, 8, 416>}, {transform_indices = @transform_1, window_bounds = array<i64: 1, 8, 416>}, {pipeline_mode = #tpu.pipeline_mode<synchronous>, transform_indices = @transform_2, window_bounds = array<i64: 416, 512>}, {pipeline_mode = #tpu.pipeline_mode<synchronous>, transform_indices = @transform_3, window_bounds = array<i64: 416, 512>}, {pipeline_mode = #tpu.pipeline_mode<synchronous>, transform_indices = @transform_4, window_bounds = array<i64: 1, 512>}, {pipeline_mode = #tpu.pipeline_mode<synchronous>, transform_indices = @transform_5, window_bounds = array<i64: 512, 256>}, {pipeline_mode = #tpu.pipeline_mode<synchronous>, transform_indices = @transform_6, window_bounds = array<i64: 1, 256>}, {pipeline_mode = #tpu.pipeline_mode<synchronous>, transform_indices = @transform_7, window_bounds = array<i64: 256, 128>}, {pipeline_mode = #tpu.pipeline_mode<synchronous>, transform_indices = @transform_8, window_bounds = array<i64: 1, 128>}, {pipeline_mode = #tpu.pipeline_mode<synchronous>, transform_indices = @transform_9, window_bounds = array<i64: 128, 64>}, {pipeline_mode = #tpu.pipeline_mode<synchronous>, transform_indices = @transform_10, window_bounds = array<i64: 1, 64>}, {pipeline_mode = #tpu.pipeline_mode<synchronous>, transform_indices = @transform_11, window_bounds = array<i64: 1, 1, 64>}, {pipeline_mode = #tpu.pipeline_mode<synchronous>, transform_indices = @transform_12, window_bounds = array<i64: 1, 1>}, {transform_indices = @transform_13, window_bounds = array<i64: 1, 8, 8>}]} {
    %c0 = arith.constant 0 : index
    %c0_0 = arith.constant 0 : index
    %c0_1 = arith.constant 0 : index
    %0 = vector.load %arg1[%c0, %c0_0, %c0_1] : memref<1x8x416xbf16, #tpu.memory_space<vmem>>, vector<1x8x416xbf16>
    %1 = vector.shape_cast %0 : vector<1x8x416xbf16> to vector<8x416xbf16>
    %c0_2 = arith.constant 0 : index
    %c0_3 = arith.constant 0 : index
    %c0_4 = arith.constant 0 : index
    %2 = vector.load %arg2[%c0_2, %c0_3, %c0_4] : memref<1x8x416xbf16, #tpu.memory_space<vmem>>, vector<1x8x416xbf16>
    %3 = vector.shape_cast %2 : vector<1x8x416xbf16> to vector<8x416xbf16>
    %c0_5 = arith.constant 0 : index
    %c0_6 = arith.constant 0 : index
    %4 = vector.load %arg3[%c0_5, %c0_6] : memref<416x512xbf16, #tpu.memory_space<vmem>>, vector<416x512xbf16>
    %cst = arith.constant dense<0.000000e+00> : vector<8x512xf32>
    %5 = tpu.matmul %1, %4, %cst {dimension_numbers = #tpu.dot_dimension_numbers<[1], [0], [0], [1], [0, 0, 1, 1], [], []>} : vector<8x416xbf16>, vector<416x512xbf16>, vector<8x512xf32> -> vector<8x512xf32>
    %c0_7 = arith.constant 0 : index
    %c0_8 = arith.constant 0 : index
    %6 = vector.load %arg4[%c0_7, %c0_8] : memref<416x512xbf16, #tpu.memory_space<vmem>>, vector<416x512xbf16>
    %cst_9 = arith.constant dense<0.000000e+00> : vector<8x512xf32>
    %7 = tpu.matmul %3, %6, %cst_9 {dimension_numbers = #tpu.dot_dimension_numbers<[1], [0], [0], [1], [0, 0, 1, 1], [], []>} : vector<8x416xbf16>, vector<416x512xbf16>, vector<8x512xf32> -> vector<8x512xf32>
    %8 = vector.shape_cast %5 : vector<8x512xf32> to vector<8x1x512xf32>
    %9 = vector.shape_cast %7 : vector<8x512xf32> to vector<1x8x512xf32>
    %10 = vector.broadcast %8 : vector<8x1x512xf32> to vector<8x8x512xf32>
    %11 = vector.broadcast %9 : vector<1x8x512xf32> to vector<8x8x512xf32>
    %12 = arith.addf %10, %11 : vector<8x8x512xf32>
    %13 = vector.shape_cast %12 : vector<8x8x512xf32> to vector<64x512xf32>
    %c0_10 = arith.constant 0 : index
    %c0_11 = arith.constant 0 : index
    %14 = vector.load %arg5[%c0_10, %c0_11] : memref<1x512xf32, #tpu.memory_space<vmem>>, vector<1x512xf32>
    %15 = vector.broadcast %14 : vector<1x512xf32> to vector<64x512xf32>
    %16 = arith.addf %13, %15 : vector<64x512xf32>
    %cst_12 = arith.constant 0.000000e+00 : f32
    %17 = vector.broadcast %cst_12 : f32 to vector<64x512xf32>
    %18 = arith.maximumf %16, %17 : vector<64x512xf32>
    %19 = arith.truncf %18 : vector<64x512xf32> to vector<64x512xbf16>
    %c0_13 = arith.constant 0 : index
    %c0_14 = arith.constant 0 : index
    %20 = vector.load %arg6[%c0_13, %c0_14] : memref<512x256xbf16, #tpu.memory_space<vmem>>, vector<512x256xbf16>
    %cst_15 = arith.constant dense<0.000000e+00> : vector<64x256xf32>
    %21 = tpu.matmul %19, %20, %cst_15 {dimension_numbers = #tpu.dot_dimension_numbers<[1], [0], [0], [1], [0, 0, 1, 1], [], []>} : vector<64x512xbf16>, vector<512x256xbf16>, vector<64x256xf32> -> vector<64x256xf32>
    %c0_16 = arith.constant 0 : index
    %c0_17 = arith.constant 0 : index
    %22 = vector.load %arg7[%c0_16, %c0_17] : memref<1x256xf32, #tpu.memory_space<vmem>>, vector<1x256xf32>
    %23 = vector.broadcast %22 : vector<1x256xf32> to vector<64x256xf32>
    %24 = arith.addf %21, %23 : vector<64x256xf32>
    %cst_18 = arith.constant 0.000000e+00 : f32
    %25 = vector.broadcast %cst_18 : f32 to vector<64x256xf32>
    %26 = arith.maximumf %24, %25 : vector<64x256xf32>
    %27 = arith.truncf %26 : vector<64x256xf32> to vector<64x256xbf16>
    %c0_19 = arith.constant 0 : index
    %c0_20 = arith.constant 0 : index
    %28 = vector.load %arg8[%c0_19, %c0_20] : memref<256x128xbf16, #tpu.memory_space<vmem>>, vector<256x128xbf16>
    %cst_21 = arith.constant dense<0.000000e+00> : vector<64x128xf32>
    %29 = tpu.matmul %27, %28, %cst_21 {dimension_numbers = #tpu.dot_dimension_numbers<[1], [0], [0], [1], [0, 0, 1, 1], [], []>} : vector<64x256xbf16>, vector<256x128xbf16>, vector<64x128xf32> -> vector<64x128xf32>
    %c0_22 = arith.constant 0 : index
    %c0_23 = arith.constant 0 : index
    %30 = vector.load %arg9[%c0_22, %c0_23] : memref<1x128xf32, #tpu.memory_space<vmem>>, vector<1x128xf32>
    %31 = vector.broadcast %30 : vector<1x128xf32> to vector<64x128xf32>
    %32 = arith.addf %29, %31 : vector<64x128xf32>
    %cst_24 = arith.constant 0.000000e+00 : f32
    %33 = vector.broadcast %cst_24 : f32 to vector<64x128xf32>
    %34 = arith.maximumf %32, %33 : vector<64x128xf32>
    %35 = arith.truncf %34 : vector<64x128xf32> to vector<64x128xbf16>
    %c0_25 = arith.constant 0 : index
    %c0_26 = arith.constant 0 : index
    %36 = vector.load %arg10[%c0_25, %c0_26] : memref<128x64xbf16, #tpu.memory_space<vmem>>, vector<128x64xbf16>
    %cst_27 = arith.constant dense<0.000000e+00> : vector<64x64xf32>
    %37 = tpu.matmul %35, %36, %cst_27 {dimension_numbers = #tpu.dot_dimension_numbers<[1], [0], [0], [1], [0, 0, 1, 1], [], []>} : vector<64x128xbf16>, vector<128x64xbf16>, vector<64x64xf32> -> vector<64x64xf32>
    %c0_28 = arith.constant 0 : index
    %c0_29 = arith.constant 0 : index
    %38 = vector.load %arg11[%c0_28, %c0_29] : memref<1x64xf32, #tpu.memory_space<vmem>>, vector<1x64xf32>
    %39 = vector.broadcast %38 : vector<1x64xf32> to vector<64x64xf32>
    %40 = arith.addf %37, %39 : vector<64x64xf32>
    %cst_30 = arith.constant 0.000000e+00 : f32
    %41 = vector.broadcast %cst_30 : f32 to vector<64x64xf32>
    %42 = arith.maximumf %40, %41 : vector<64x64xf32>
    %43 = vector.shape_cast %42 : vector<64x64xf32> to vector<8x8x64xf32>
    %c0_31 = arith.constant 0 : index
    %c0_32 = arith.constant 0 : index
    %c0_33 = arith.constant 0 : index
    %44 = vector.load %arg12[%c0_31, %c0_32, %c0_33] : memref<1x1x64xf32, #tpu.memory_space<vmem>>, vector<1x1x64xf32>
    %45 = vector.broadcast %44 : vector<1x1x64xf32> to vector<8x8x64xf32>
    %46 = arith.mulf %43, %45 : vector<8x8x64xf32>
    %cst_34 = arith.constant dense<0.000000e+00> : vector<8x8xf32>
    %47 = vector.multi_reduction <add>, %46, %cst_34 [2] : vector<8x8x64xf32> to vector<8x8xf32>
    %c0_35 = arith.constant 0 : index
    %c0_36 = arith.constant 0 : index
    %48 = vector.load %arg13[%c0_35, %c0_36] : memref<1x1xf32, #tpu.memory_space<vmem>>, vector<1x1xf32>
    %49 = vector.broadcast %48 : vector<1x1xf32> to vector<8x8xf32>
    %50 = arith.addf %47, %49 : vector<8x8xf32>
    %cst_37 = arith.constant 0.000000e+00 : f32
    %51 = vector.broadcast %cst_37 : f32 to vector<8x8xf32>
    %52 = arith.maximumf %50, %51 : vector<8x8xf32>
    %c0_38 = arith.constant 0 : index
    %c0_39 = arith.constant 0 : index
    %c0_40 = arith.constant 0 : index
    %53 = vector.load %arg14[%c0_38, %c0_39, %c0_40] : memref<1x8x8xf32, #tpu.memory_space<vmem>>, vector<1x8x8xf32>
    %54 = vector.shape_cast %53 : vector<1x8x8xf32> to vector<8x8xf32>
    %55 = vector.shape_cast %52 : vector<8x8xf32> to vector<1x8x8xf32>
    tpu.vector_store %arg14[%c0_38, %c0_39, %c0_40], %55 {strides = array<i32>} : memref<1x8x8xf32, #tpu.memory_space<vmem>>, vector<1x8x8xf32>,
    return
  }
  func.func @transform_0(%arg0: i32) -> (i32, i32, i32) {
    %c0_i32 = arith.constant 0 : i32
    %c0_i32_0 = arith.constant 0 : i32
    %c0_i32_1 = arith.constant 0 : i32
    return %arg0, %c0_i32, %c0_i32_0 : i32, i32, i32
  }
  func.func @transform_1(%arg0: i32) -> (i32, i32, i32) {
    %c0_i32 = arith.constant 0 : i32
    %c0_i32_0 = arith.constant 0 : i32
    %c0_i32_1 = arith.constant 0 : i32
    return %arg0, %c0_i32, %c0_i32_0 : i32, i32, i32
  }
  func.func @transform_2(%arg0: i32) -> (i32, i32) {
    %c0_i32 = arith.constant 0 : i32
    %c0_i32_0 = arith.constant 0 : i32
    %c0_i32_1 = arith.constant 0 : i32
    return %c0_i32, %c0_i32_0 : i32, i32
  }
  func.func @transform_3(%arg0: i32) -> (i32, i32) {
    %c0_i32 = arith.constant 0 : i32
    %c0_i32_0 = arith.constant 0 : i32
    %c0_i32_1 = arith.constant 0 : i32
    return %c0_i32, %c0_i32_0 : i32, i32
  }
  func.func @transform_4(%arg0: i32) -> (i32, i32) {
    %c0_i32 = arith.constant 0 : i32
    %c0_i32_0 = arith.constant 0 : i32
    %c0_i32_1 = arith.constant 0 : i32
    return %c0_i32, %c0_i32_0 : i32, i32
  }
  func.func @transform_5(%arg0: i32) -> (i32, i32) {
    %c0_i32 = arith.constant 0 : i32
    %c0_i32_0 = arith.constant 0 : i32
    %c0_i32_1 = arith.constant 0 : i32
    return %c0_i32, %c0_i32_0 : i32, i32
  }
  func.func @transform_6(%arg0: i32) -> (i32, i32) {
    %c0_i32 = arith.constant 0 : i32
    %c0_i32_0 = arith.constant 0 : i32
    %c0_i32_1 = arith.constant 0 : i32
    return %c0_i32, %c0_i32_0 : i32, i32
  }
  func.func @transform_7(%arg0: i32) -> (i32, i32) {
    %c0_i32 = arith.constant 0 : i32
    %c0_i32_0 = arith.constant 0 : i32
    %c0_i32_1 = arith.constant 0 : i32
    return %c0_i32, %c0_i32_0 : i32, i32
  }
  func.func @transform_8(%arg0: i32) -> (i32, i32) {
    %c0_i32 = arith.constant 0 : i32
    %c0_i32_0 = arith.constant 0 : i32
    %c0_i32_1 = arith.constant 0 : i32
    return %c0_i32, %c0_i32_0 : i32, i32
  }
  func.func @transform_9(%arg0: i32) -> (i32, i32) {
    %c0_i32 = arith.constant 0 : i32
    %c0_i32_0 = arith.constant 0 : i32
    %c0_i32_1 = arith.constant 0 : i32
    return %c0_i32, %c0_i32_0 : i32, i32
  }
  func.func @transform_10(%arg0: i32) -> (i32, i32) {
    %c0_i32 = arith.constant 0 : i32
    %c0_i32_0 = arith.constant 0 : i32
    %c0_i32_1 = arith.constant 0 : i32
    return %c0_i32, %c0_i32_0 : i32, i32
  }
  func.func @transform_11(%arg0: i32) -> (i32, i32, i32) {
    %c0_i32 = arith.constant 0 : i32
    %c0_i32_0 = arith.constant 0 : i32
    %c0_i32_1 = arith.constant 0 : i32
    %c0_i32_2 = arith.constant 0 : i32
    return %c0_i32, %c0_i32_0, %c0_i32_1 : i32, i32, i32
  }
  func.func @transform_12(%arg0: i32) -> (i32, i32) {
    %c0_i32 = arith.constant 0 : i32
    %c0_i32_0 = arith.constant 0 : i32
    %c0_i32_1 = arith.constant 0 : i32
    return %c0_i32, %c0_i32_0 : i32, i32
  }
  func.func @transform_13(%arg0: i32) -> (i32, i32, i32) {
    %c0_i32 = arith.constant 0 : i32
    %c0_i32_0 = arith.constant 0 : i32
    %c0_i32_1 = arith.constant 0 : i32
    return %arg0, %c0_i32, %c0_i32_0 : i32, i32, i32
  }
}

</mosaic_0001>

<bundles_post_ra>
// kernel: afe_forward.9
= control target key start
LH: loop header
LB: loop body
LE: loop exit
PB: predicated region body
PF: predicated region fallthrough
CT: control target
= control target key end

     0   :  { %s1864_s18 = smov 0   ;;  %s1866_s19 = smov 0   ;;  %s2051_s0 = inlined_call_operand.vmem [shape: bf16[5,32,1024], index: 0, kind: input, shape index: {}]   ;;  %s2052_s1 = inlined_call_operand.vmem [shape: bf16[5,1024,128], index: 1, kind: input, shape index: {}]   ;;  %s2053_s2 = inlined_call_operand.vmem [shape: f32[5,1,128], index: 2, kind: input, shape index: {}]   ;;  %s2054_s3 = inlined_call_operand.vmem [shape: f32[5,32,128], index: 3, kind: input, shape index: {}]   ;;  %s2055_s4 = inlined_call_operand.vmem [shape: f32[128,32], index: 4, kind: input, shape index: {}]   ;;  %s2056_s5 = inlined_call_operand.vmem [shape: bf16[5,32,32], index: 5, kind: output, shape index: {}]  }
   0x1   :  { %s1868_s20 = smov 0  }
   0x2 LB: > { %s27_s21 = sadd.s32 1, %s1828_s19  ;;  %p1416_p0 = scmp.ge.s32.totalorder %s1832_s20, 1  ;;  %s1832_s20 = sphi %s1868_s20, %s15_s20   ;;  %s1828_s19 = sphi %s1866_s19, %s2058_s19   ;;  %s1824_s18 = sphi %s1864_s18, %s2057_s18  }
   0x3   : > { %p29_p1 = scmp.ge.s32.totalorder %s27_s21, 5  ;;  %p244_p2 = scmp.lt.s32.totalorder %s1832_s20, 6 }
   0x5   : > { %s2060_s21 = smov (%p29_p1, %s27_s21), 0  ;;  %p245_p3 = pnand %p1416_p0, %p244_p2 }
   0x6   : > { %p299_p4 = scmp.lt.s32.totalorder (!%p245_p3), %s1824_s18, 4 }
   0x7   : > { %248 = sbr.rel (%p245_p3) target bundleno = 496 (0x1f0), region = 40 }
   0xc   : > { %s2062_s18 = smov (!%p299_p4, %s1824_s18), 4  ;;  %vm1278_vm0 = vcmask 257024  }
   0xd   : > { %s1513_s22 = sshll.u32 %s2062_s18, 9  ;;  %s1512_s26 = sshll.u32 %s2062_s18, 7 }
   0xe   : > { %s1888_s25 = scalar_lea.vmem %s2052_s1, %s1513_s22  ;;  %s1924_s29 = scalar_lea.vmem %s2051_s0, %s1512_s26 }
   0xf   : > { %v1746_v0 = vld [vmem:[%s1888_s25 + $0x78] sm:$0xff]   ;;  %v1750_v4 = vld [vmem:[%s1888_s25 + $0x70] sm:$0xff]   ;;  %v1754_v8 = vld [vmem:[%s1888_s25 + $0x68] sm:$0xff]   ;;  %s316_s22 = scalar_lea.vmem %s2053_s2, %s2062_s18  ;;  %s1514_s23 = sshll.u32 %s2062_s18, 5 }
  0x10   : > { %v1747_v1 = vld [vmem:[%s1888_s25 + $0xf8] sm:$0xff]   ;;  %1520 = vmatprep.subr.bf16.mxu0 %v1746_v0  ;;  %v1751_v5 = vld [vmem:[%s1888_s25 + $0xf0] sm:$0xff]   ;;  %v1755_v9 = vld [vmem:[%s1888_s25 + $0xe8] sm:$0xff]   ;;  %s2032_s26 = scalar_lea.vmem %s2054_s3, %s1514_s23  ;;  %s1515_s27 = sshll.u32 %s2062_s18, 4 }
  0x11   : > { %v1748_v2 = vld [vmem:[%s1888_s25 + $0x38] sm:$0xff]   ;;  %1548 = vmatprep.subr.bf16.mxu1 %v1747_v1  ;;  %v1752_v6 = vld [vmem:[%s1888_s25 + $0x30] sm:$0xff]   ;;  %v1756_v10 = vld [vmem:[%s1888_s25 + $0x28] sm:$0xff]   ;;  %s335_s30 = scalar_lea.vmem %s2056_s5, %s1515_s27 }
  0x12   : > { %v1749_v3 = vld [vmem:[%s1888_s25 + $0xb8] sm:$0xff]   ;;  %1521 = vmatpush3.bf16.msra.mxu0 %v1748_v2  ;;  %v1753_v7 = vld [vmem:[%s1888_s25 + $0xb0] sm:$0xff]   ;;  %v1757_v11 = vld [vmem:[%s1888_s25 + $0xa8] sm:$0xff]  }
  0x13   : > { %1549 = vmatpush3.bf16.msra.mxu1 %v1749_v3  ;;  %1522 = vmatprep.subr.bf16.mxu0 %v1750_v4  ;;  %v1758_v12 = vld [vmem:[%s1888_s25 + $0x60] sm:$0xff]   ;;  %v1762_v16 = vld [vmem:[%s1888_s25 + $0x58] sm:$0xff]   ;;  %v1766_v20 = vld [vmem:[%s1888_s25 + $0x50] sm:$0xff]  }
  0x14   : > { %1550 = vmatprep.subr.bf16.mxu1 %v1751_v5  ;;  %v1759_v13 = vld [vmem:[%s1888_s25 + $0xe0] sm:$0xff]   ;;  %v1763_v17 = vld [vmem:[%s1888_s25 + $0xd8] sm:$0xff]   ;;  %v1767_v21 = vld [vmem:[%s1888_s25 + $0xd0] sm:$0xff]  }
  0x15   : > { %v1760_v14 = vld [vmem:[%s1888_s25 + $0x20] sm:$0xff]   ;;  %v1764_v18 = vld [vmem:[%s1888_s25 + $0x18] sm:$0xff]   ;;  %v1768_v22 = vld [vmem:[%s1888_s25 + $0x10] sm:$0xff]  }
  0x16   : > { %1523 = vmatpush3.bf16.msra.mxu0 %v1752_v6  ;;  %v1761_v15 = vld [vmem:[%s1888_s25 + $0xa0] sm:$0xff]   ;;  %v1765_v19 = vld [vmem:[%s1888_s25 + $0x98] sm:$0xff]   ;;  %v1769_v23 = vld [vmem:[%s1888_s25 + $0x90] sm:$0xff]  }
  0x17   : > { %1551 = vmatpush3.bf16.msra.mxu1 %v1753_v7  ;;  %1524 = vmatprep.subr.bf16.mxu0 %v1754_v8  ;;  %v1770_v24 = vld [vmem:[%s1888_s25 + $0x48] sm:$0xff]   ;;  %v1774_v28 = vld [vmem:[%s1888_s25 + $0x40] sm:$0xff]   ;;  %v1778_v40 = vld [vmem:[%s1888_s25 + $0x178] sm:$0xff]  }
  0x18   : > { %1552 = vmatprep.subr.bf16.mxu1 %v1755_v9  ;;  %v1771_v25 = vld [vmem:[%s1888_s25 + $0xc8] sm:$0xff]   ;;  %v1775_v29 = vld [vmem:[%s1888_s25 + $0xc0] sm:$0xff]   ;;  %v1779_v41 = vld [vmem:[%s1888_s25 + $0x1f8] sm:$0xff]  }
  0x19   : > { %v1772_v26 = vld [vmem:[%s1888_s25 + $0x8] sm:$0xff]   ;;  %v1776_v30 = vld [vmem:[%s1888_s25] sm:$0xff]   ;;  %v1780_v42 = vld [vmem:[%s1888_s25 + $0x138] sm:$0xff]  }
  0x1a   : > { %1525 = vmatpush3.bf16.msra.mxu0 %v1756_v10  ;;  %v1773_v27 = vld [vmem:[%s1888_s25 + $0x88] sm:$0xff]   ;;  %v1777_v31 = vld [vmem:[%s1888_s25 + $0x80] sm:$0xff]   ;;  %v1781_v43 = vld [vmem:[%s1888_s25 + $0x1b8] sm:$0xff]  }
  0x1b   : > { %1553 = vmatpush3.bf16.msra.mxu1 %v1757_v11  ;;  %1526 = vmatprep.subr.bf16.mxu0 %v1758_v12  ;;  %v338_v32 = vld [vmem:[%s1924_s29] sm:$0xff]  ;;  %v339_v34 = vld [vmem:[%s1924_s29 + $0x8] sm:$0xff]  ;;  %v1782_v44 = vld [vmem:[%s1888_s25 + $0x170] sm:$0xff]  }
  0x1c   : > { %1554 = vmatprep.subr.bf16.mxu1 %v1759_v13  ;;  %v342_v33 = vld [vmem:[%s1924_s29 + $0x20] sm:$0xff]  ;;  %v343_v37 = vld [vmem:[%s1924_s29 + $0x28] sm:$0xff]  ;;  %v1783_v45 = vld [vmem:[%s1888_s25 + $0x1f0] sm:$0xff]  }
  0x1d   : > { %v1426_v35 = vcombine.low %v338_v32, %v342_v33  ;;  %v1427_v36 = vcombine.high %v338_v32, %v342_v33  ;;  %v1428_v38 = vcombine.low %v339_v34, %v343_v37  ;;  %v1429_v39 = vcombine.high %v339_v34, %v343_v37  ;;  %v1784_v46 = vld [vmem:[%s1888_s25 + $0x130] sm:$0xff]   ;;  %v1786_v48 = vld [vmem:[%s1888_s25 + $0x168] sm:$0xff]   ;;  %v1790_v52 = vld [vmem:[%s1888_s25 + $0x160] sm:$0xff]  }
  0x1e   : > { %1527 = vmatpush3.bf16.msra.mxu0 %v1760_v14  ;;  %v1785_v47 = vld [vmem:[%s1888_s25 + $0x1b0] sm:$0xff]   ;;  %v1787_v49 = vld [vmem:[%s1888_s25 + $0x1e8] sm:$0xff]   ;;  %v1791_v53 = vld [vmem:[%s1888_s25 + $0x1e0] sm:$0xff]  }
  0x1f   : > { %1555 = vmatpush3.bf16.msra.mxu1 %v1761_v15  ;;  %1528 = vmatprep.subr.bf16.mxu0 %v1762_v16  ;;  %v1788_v50 = vld [vmem:[%s1888_s25 + $0x128] sm:$0xff]   ;;  %v1792_v54 = vld [vmem:[%s1888_s25 + $0x120] sm:$0xff]   ;;  %v1794_v56 = vld [vmem:[%s1888_s25 + $0x158] sm:$0xff]  }
  0x20   : > { %1556 = vmatprep.subr.bf16.mxu1 %v1763_v17  ;;  %985 = vmatprep.mubr.bf16.mxu0 %v1427_v36  ;;  %v1789_v51 = vld [vmem:[%s1888_s25 + $0x1a8] sm:$0xff]   ;;  %v1793_v55 = vld [vmem:[%s1888_s25 + $0x1a0] sm:$0xff]   ;;  %v1795_v57 = vld [vmem:[%s1888_s25 + $0x1d8] sm:$0xff]  }
  0x21   : > { %1034 = vmatprep.mubr.bf16.mxu1 %v1429_v39  ;;  %v346_v58 = vld [vmem:[%s1924_s29 + $0x40] sm:$0xff]  ;;  %v1796_v61 = vld [vmem:[%s1888_s25 + $0x118] sm:$0xff]   ;;  %v347_v0 = vld [vmem:[%s1924_s29 + $0x48] sm:$0xff] }
  0x22   : > { %1529 = vmatpush3.bf16.msra.mxu0 %v1764_v18  ;;  %v350_v59 = vld [vmem:[%s1924_s29 + $0x60] sm:$0xff]  ;;  %v1797_v63 = vld [vmem:[%s1888_s25 + $0x198] sm:$0xff]   ;;  %v351_v1 = vld [vmem:[%s1924_s29 + $0x68] sm:$0xff] }
  0x23   : > { %1557 = vmatpush3.bf16.msra.mxu1 %v1765_v19  ;;  %1530 = vmatprep.subr.bf16.mxu0 %v1766_v20  ;;  %v1435_v60 = vcombine.high %v346_v58, %v350_v59  ;;  %v1434_v62 = vcombine.low %v346_v58, %v350_v59  ;;  %v1437_v2 = vcombine.high %v347_v0, %v351_v1  ;;  %v1798_v4 = vld [vmem:[%s1888_s25 + $0x150] sm:$0xff]   ;;  %v1802_v8 = vld [vmem:[%s1888_s25 + $0x148] sm:$0xff]   ;;  %v1806_v12 = vld [vmem:[%s1888_s25 + $0x140] sm:$0xff]  }
  0x24   : > { %1558 = vmatprep.subr.bf16.mxu1 %v1767_v21  ;;  %v1436_v3 = vcombine.low %v347_v0, %v351_v1  ;;  %v1799_v5 = vld [vmem:[%s1888_s25 + $0x1d0] sm:$0xff]   ;;  %v1803_v9 = vld [vmem:[%s1888_s25 + $0x1c8] sm:$0xff]   ;;  %v1807_v13 = vld [vmem:[%s1888_s25 + $0x1c0] sm:$0xff]  }
  0x25   : > { %v1800_v6 = vld [vmem:[%s1888_s25 + $0x110] sm:$0xff]   ;;  %v1804_v10 = vld [vmem:[%s1888_s25 + $0x108] sm:$0xff]   ;;  %v1808_v14 = vld [vmem:[%s1888_s25 + $0x100] sm:$0xff]  }
  0x26   : > { %1531 = vmatpush3.bf16.msra.mxu0 %v1768_v22  ;;  %v1801_v7 = vld [vmem:[%s1888_s25 + $0x190] sm:$0xff]   ;;  %v1805_v11 = vld [vmem:[%s1888_s25 + $0x188] sm:$0xff]   ;;  %v1809_v15 = vld [vmem:[%s1888_s25 + $0x180] sm:$0xff]  }
  0x27   : > { %1559 = vmatpush3.bf16.msra.mxu1 %v1769_v23  ;;  %1532 = vmatprep.subr.bf16.mxu0 %v1770_v24  ;;  %v340_v16 = vld [vmem:[%s1924_s29 + $0x10] sm:$0xff]  ;;  %v341_v18 = vld [vmem:[%s1924_s29 + $0x18] sm:$0xff]  ;;  %v1174_v34 = vld [vmem:[%s2055_s4 + $0x68] sm:$0xff] }
  0x28   : > { %1560 = vmatprep.subr.bf16.mxu1 %v1771_v25  ;;  %v344_v17 = vld [vmem:[%s1924_s29 + $0x30] sm:$0xff]  ;;  %v345_v19 = vld [vmem:[%s1924_s29 + $0x38] sm:$0xff]  ;;  %v1169_v39 = vld [vmem:[%s2055_s4 + $0x40] sm:$0xff] }
  0x29   : > { %v1430_v20 = vcombine.low %v340_v16, %v344_v17  ;;  %v1431_v21 = vcombine.high %v340_v16, %v344_v17  ;;  %v1432_v22 = vcombine.low %v341_v18, %v345_v19  ;;  %v1433_v23 = vcombine.high %v341_v18, %v345_v19  ;;  %v348_v24 = vld [vmem:[%s1924_s29 + $0x50] sm:$0xff]  ;;  %v1176_v32 = vld [vmem:[%s2055_s4 + $0x78] sm:$0xff] }
  0x2a   : > { %1533 = vmatpush3.bf16.msra.mxu0 %v1772_v26  ;;  %v352_v25 = vld [vmem:[%s1924_s29 + $0x70] sm:$0xff]  ;;  %v349_v26 = vld [vmem:[%s1924_s29 + $0x58] sm:$0xff] }
  0x2b   : > { %1561 = vmatpush3.bf16.msra.mxu1 %v1773_v27  ;;  %1534 = vmatprep.subr.bf16.mxu0 %v1774_v28  ;;  %v1439_v27 = vcombine.high %v348_v24, %v352_v25  ;;  %v353_v28 = vld [vmem:[%s1924_s29 + $0x78] sm:$0xff]  ;;  %v1175_v33 = vld [vmem:[%s2055_s4 + $0x70] sm:$0xff] }
  0x2c   : > { %1562 = vmatprep.subr.bf16.mxu1 %v1775_v29  ;;  %v1441_v29 = vcombine.high %v349_v26, %v353_v28  ;;  %v1172_v36 = vld [vmem:[%s2055_s4 + $0x58] sm:$0xff]  ;;  %v1171_v37 = vld [vmem:[%s2055_s4 + $0x50] sm:$0xff] }
  0x2e   : > { %1535 = vmatpush3.bf16.msra.mxu0 %v1776_v30  ;;  %v1438_v30 = vcombine.low %v348_v24, %v352_v25 }
  0x2f   : > { %1563 = vmatpush3.bf16.msra.mxu1 %v1777_v31  ;;  %1576 = vmatprep.subr.bf16.mxu0 %v1778_v40  ;;  %v1440_v31 = vcombine.low %v349_v26, %v353_v28  ;;  %v1168_v40 = vld [vmem:[%s2055_s4 + $0x38] sm:$0xff]  ;;  %v1153_v28 = vld [vmem:[%s2032_s26] sm:$0xff] }
  0x30   : > { %1604 = vmatprep.subr.bf16.mxu1 %v1779_v41  ;;  %v1167_v41 = vld [vmem:[%s2055_s4 + $0x30] sm:$0xff] }
  0x31   : > { %986 = vmatmul.mubr.bf16.vlgmr.msra.gmra.mxu0 %v1426_v35  ;;  %v1173_v35 = vld [vmem:[%s2055_s4 + $0x60] sm:$0xff] }
  0x32   : > { %1035 = vmatmul.mubr.bf16.vlgmr.msra.gmra.mxu1 %v1428_v38  ;;  %1577 = vmatpush3.bf16.msra.mxu0 %v1780_v42  ;;  %v1170_v38 = vld [vmem:[%s2055_s4 + $0x48] sm:$0xff] }
  0x33   : > { %1605 = vmatpush3.bf16.msra.mxu1 %v1781_v43  ;;  %1578 = vmatprep.subr.bf16.mxu0 %v1782_v44  ;;  %v1166_v42 = vld [vmem:[%s2055_s4 + $0x28] sm:$0xff]  ;;  %v1165_v43 = vld [vmem:[%s2055_s4 + $0x20] sm:$0xff]  ;;  %v1164_v44 = vld [vmem:[%s2055_s4 + $0x18] sm:$0xff] }
  0x34   : > { %1606 = vmatprep.subr.bf16.mxu1 %v1783_v45  ;;  %993 = vmatprep.mubr.bf16.mxu0 %v1435_v60  ;;  %v1163_v45 = vld [vmem:[%s2055_s4 + $0x10] sm:$0xff] }
  0x35   : > { %1042 = vmatprep.mubr.bf16.mxu1 %v1437_v2 }
  0x36   : > { %1579 = vmatpush3.bf16.msra.mxu0 %v1784_v46  ;;  %v1162_v46 = vld [vmem:[%s2055_s4 + $0x8] sm:$0xff] }
  0x37   : > { %1607 = vmatpush3.bf16.msra.mxu1 %v1785_v47  ;;  %1580 = vmatprep.subr.bf16.mxu0 %v1786_v48  ;;  %v1161_v47 = vld [vmem:[%s2055_s4] sm:$0xff] }
  0x38   : > { %1608 = vmatprep.subr.bf16.mxu1 %v1787_v49 }
  0x39   : > { %994 = vmatmul.mubr.bf16.gmra.mxu0 %v1434_v62 }
  0x3a   : > { %1581 = vmatpush3.bf16.msra.mxu0 %v1788_v50  ;;  %1043 = vmatmul.mubr.bf16.gmra.mxu1 %v1436_v3 }
  0x3b   : > { %1609 = vmatpush3.bf16.msra.mxu1 %v1789_v51  ;;  %1582 = vmatprep.subr.bf16.mxu0 %v1790_v52 }
  0x3c   : > { %1610 = vmatprep.subr.bf16.mxu1 %v1791_v53  ;;  %1083 = vmatprep.mubr.bf16.mxu0 %v1431_v21 }
  0x3d   : > { %1132 = vmatprep.mubr.bf16.mxu1 %v1433_v23 }
  0x3e   : > { %1583 = vmatpush3.bf16.msra.mxu0 %v1792_v54 }
  0x3f   : > { %1611 = vmatpush3.bf16.msra.mxu1 %v1793_v55  ;;  %1584 = vmatprep.subr.bf16.mxu0 %v1794_v56 }
  0x40   : > { %1612 = vmatprep.subr.bf16.mxu1 %v1795_v57 }
  0x42   : > { %1585 = vmatpush3.bf16.msra.mxu0 %v1796_v61 }
  0x43   : > { %1613 = vmatpush3.bf16.msra.mxu1 %v1797_v63  ;;  %1586 = vmatprep.subr.bf16.mxu0 %v1798_v4  ;;  %v1425_v63 = vld [vmem:[%s316_s22] ss:$0 sm:$0xff] }
  0x44   : > { %1614 = vmatprep.subr.bf16.mxu1 %v1799_v5 }
  0x46   : > { %1587 = vmatpush3.bf16.msra.mxu0 %v1800_v6 }
  0x47   : > { %1615 = vmatpush3.bf16.msra.mxu1 %v1801_v7  ;;  %1588 = vmatprep.subr.bf16.mxu0 %v1802_v8 }
  0x48   : > { %1616 = vmatprep.subr.bf16.mxu1 %v1803_v9 }
  0x4a   : > { %1589 = vmatpush3.bf16.msra.mxu0 %v1804_v10 }
  0x4b   : > { %1617 = vmatpush3.bf16.msra.mxu1 %v1805_v11  ;;  %1590 = vmatprep.subr.bf16.mxu0 %v1806_v12 }
  0x4c   : > { %1618 = vmatprep.subr.bf16.mxu1 %v1807_v13 }
  0x4e   : > { %1591 = vmatpush3.bf16.msra.mxu0 %v1808_v14 }
  0x4f   : > { %1619 = vmatpush3.bf16.msra.mxu1 %v1809_v15  ;;  %1652 = vmatprep.subr.mxu0 %v1176_v32 }
  0x50   : > { %1690 = vmatprep.subr.mxu1 %v1176_v32 }
  0x51   : > { %1084 = vmatmul.mubr.bf16.vlgmr.msra.gmra.mxu0 %v1430_v20 }
  0x52   : > { %1133 = vmatmul.mubr.bf16.vlgmr.msra.gmra.mxu1 %v1432_v22  ;;  %1091 = vmatprep.mubr.bf16.mxu0 %v1439_v27 }
  0x53   : > { %1140 = vmatprep.mubr.bf16.mxu1 %v1441_v29  ;;  %1653 = vmatpush3.msra.mxu0 %v1176_v32 }
  0x54   : > { %1706 = vmatpush3.msra.mxu1 %v1176_v32  ;;  %1654 = vmatprep.subr.mxu0 %v1175_v33 }
  0x55   : > { %1691 = vmatprep.subr.mxu1 %v1175_v33  ;;  %1655 = vmatpush3.msra.mxu0 %v1175_v33 }
  0x56   : > { %1707 = vmatpush3.msra.mxu1 %v1175_v33  ;;  %1656 = vmatprep.subr.mxu0 %v1174_v34 }
  0x57   : > { %1692 = vmatprep.subr.mxu1 %v1174_v34  ;;  %1657 = vmatpush3.msra.mxu0 %v1174_v34 }
  0x58   : > { %1708 = vmatpush3.msra.mxu1 %v1174_v34  ;;  %1658 = vmatprep.subr.mxu0 %v1173_v35 }
  0x59   : > { %1092 = vmatmul.mubr.bf16.gmra.mxu0 %v1438_v30  ;;  %1693 = vmatprep.subr.mxu1 %v1173_v35 }
  0x5a   : > { %1141 = vmatmul.mubr.bf16.gmra.mxu1 %v1440_v31  ;;  %1659 = vmatpush3.msra.mxu0 %v1173_v35 }
  0x5b   : > { %1709 = vmatpush3.msra.mxu1 %v1173_v35  ;;  %1660 = vmatprep.subr.mxu0 %v1172_v36 }
  0x5c   : > { %1694 = vmatprep.subr.mxu1 %v1172_v36  ;;  %1661 = vmatpush3.msra.mxu0 %v1172_v36 }
  0x5d   : > { %1710 = vmatpush3.msra.mxu1 %v1172_v36  ;;  %1662 = vmatprep.subr.mxu0 %v1171_v37 }
  0x5e   : > { %1695 = vmatprep.subr.mxu1 %v1171_v37  ;;  %1663 = vmatpush3.msra.mxu0 %v1171_v37 }
  0x5f   : > { %1711 = vmatpush3.msra.mxu1 %v1171_v37  ;;  %1664 = vmatprep.subr.mxu0 %v1170_v38 }
  0x60   : > { %1696 = vmatprep.subr.mxu1 %v1170_v38  ;;  %1665 = vmatpush3.msra.mxu0 %v1170_v38 }
  0x61   : > { %1712 = vmatpush3.msra.mxu1 %v1170_v38  ;;  %1666 = vmatprep.subr.mxu0 %v1169_v39 }
  0x62   : > { %1697 = vmatprep.subr.mxu1 %v1169_v39  ;;  %1667 = vmatpush3.msra.mxu0 %v1169_v39 }
  0x63   : > { %1713 = vmatpush3.msra.mxu1 %v1169_v39  ;;  %1668 = vmatprep.subr.mxu0 %v1168_v40 }
  0x64   : > { %1698 = vmatprep.subr.mxu1 %v1168_v40  ;;  %1669 = vmatpush3.msra.mxu0 %v1168_v40 }
  0x65   : > { %1714 = vmatpush3.msra.mxu1 %v1168_v40  ;;  %1670 = vmatprep.subr.mxu0 %v1167_v41  ;;  %v1154_v40 = vld [vmem:[%s2032_s26 + $0x8] sm:$0xff] }
  0x66   : > { %1699 = vmatprep.subr.mxu1 %v1167_v41  ;;  %1671 = vmatpush3.msra.mxu0 %v1167_v41 }
  0x67   : > { %1715 = vmatpush3.msra.mxu1 %v1167_v41  ;;  %1672 = vmatprep.subr.mxu0 %v1166_v42 }
  0x68   : > { %1700 = vmatprep.subr.mxu1 %v1166_v42  ;;  %1673 = vmatpush3.msra.mxu0 %v1166_v42 }
  0x69   : > { %1716 = vmatpush3.msra.mxu1 %v1166_v42  ;;  %1674 = vmatprep.subr.mxu0 %v1165_v43 }
  0x6a   : > { %1701 = vmatprep.subr.mxu1 %v1165_v43  ;;  %1675 = vmatpush3.msra.mxu0 %v1165_v43 }
  0x6b   : > { %1717 = vmatpush3.msra.mxu1 %v1165_v43  ;;  %1676 = vmatprep.subr.mxu0 %v1164_v44 }
  0x6c   : > { %1702 = vmatprep.subr.mxu1 %v1164_v44  ;;  %1677 = vmatpush3.msra.mxu0 %v1164_v44 }
  0x6d   : > { %1718 = vmatpush3.msra.mxu1 %v1164_v44  ;;  %1678 = vmatprep.subr.mxu0 %v1163_v45 }
  0x6e   : > { %1703 = vmatprep.subr.mxu1 %v1163_v45  ;;  %1679 = vmatpush3.msra.mxu0 %v1163_v45 }
  0x6f   : > { %1719 = vmatpush3.msra.mxu1 %v1163_v45  ;;  %1680 = vmatprep.subr.mxu0 %v1162_v46 }
  0x70   : > { %1704 = vmatprep.subr.mxu1 %v1162_v46  ;;  %1681 = vmatpush3.msra.mxu0 %v1162_v46 }
  0x71   : > { %1720 = vmatpush3.msra.mxu1 %v1162_v46  ;;  %1682 = vmatprep.subr.mxu0 %v1161_v47 }
  0x72   : > { %1705 = vmatprep.subr.mxu1 %v1161_v47  ;;  %1683 = vmatpush3.msra.mxu0 %v1161_v47 }
  0x73   : > { %1721 = vmatpush3.msra.mxu1 %v1161_v47 }
  0xf1   : > { %v1536_v48 = vpop.f32.mrf.mxu0 }
  0xf2   : > { %v1564_v49 = vpop.f32.mrf.mxu1 }
  0xf3   : > { %v1537_v50 = vpop.f32.mrf.mxu0 }
  0xf4   : > { %v1565_v51 = vpop.f32.mrf.mxu1  ;;  %v1538_v62 = vadd.f32 %v1537_v50, %v1536_v48 }
  0xf5   : > { %v1539_v52 = vpop.f32.mrf.mxu0  ;;  %v1566_v3 = vadd.f32 %v1565_v51, %v1564_v49 }
  0xf6   : > { %v1567_v53 = vpop.f32.mrf.mxu1  ;;  %v988_v2 = vadd.f32 %v1538_v62, %v1425_v63 }
  0xf7   : > { %v1540_v54 = vpop.f32.mrf.mxu0 }
  0xf8   : > { %v1568_v55 = vpop.f32.mrf.mxu1  ;;  %v1541_v4 = vadd.f32 %v1540_v54, %v1539_v52  ;;  %v1037_v10 = vadd.f32 %v1566_v3, %v988_v2  ;;  %v1155_v52 = vld [vmem:[%s2032_s26 + $0x10] sm:$0xff] }
  0xf9   : > { %v1542_v56 = vpop.f32.mrf.mxu0  ;;  %v1569_v15 = vadd.f32 %v1568_v55, %v1567_v53 }
  0xfa   : > { %v1570_v57 = vpop.f32.mrf.mxu1  ;;  %v991_v11 = vadd.f32 %v1541_v4, %v1425_v63 }
  0xfb   : > { %v1543_v58 = vpop.f32.mrf.mxu0 }
  0xfc   : > { %v1571_v59 = vpop.f32.mrf.mxu1  ;;  %v1544_v7 = vadd.f32 %v1543_v58, %v1542_v56  ;;  %v1040_v23 = vadd.f32 %v1569_v15, %v991_v11  ;;  %v1156_v58 = vld [vmem:[%s2032_s26 + $0x18] sm:$0xff] }
  0xfd   : > { %v1545_v60 = vpop.f32.mrf.mxu0  ;;  %v1572_v19 = vadd.f32 %v1571_v59, %v1570_v57 }
  0xfe   : > { %v1573_v61 = vpop.f32.mrf.mxu1  ;;  %v996_v18 = vadd.f32 %v1544_v7, %v1425_v63 }
  0xff   : > { %v1546_v0 = vpop.f32.mrf.mxu0 }
 0x100   : > { %v1574_v1 = vpop.f32.mrf.mxu1  ;;  %v1547_v20 = vadd.f32 %v1546_v0, %v1545_v60  ;;  %v1045_v32 = vadd.f32 %v1572_v19, %v996_v18 }
 0x101   : > { %v1575_v36 = vadd.f32 %v1574_v1, %v1573_v61 }
 0x102   : > { %v999_v33 = vadd.f32 %v1547_v20, %v1425_v63 }
 0x104   : > { %v1048_v48 = vadd.f32 %v1575_v36, %v999_v33 }
 0x111   : > { %v1592_v5 = vpop.f32.mrf.mxu0 }
 0x112   : > { %v1620_v6 = vpop.f32.mrf.mxu1 }
 0x113   : > { %v1593_v8 = vpop.f32.mrf.mxu0 }
 0x114   : > { %v1621_v9 = vpop.f32.mrf.mxu1  ;;  %v1594_v12 = vadd.f32 %v1593_v8, %v1592_v5 }
 0x115   : > { %v1595_v13 = vpop.f32.mrf.mxu0  ;;  %v1622_v17 = vadd.f32 %v1621_v9, %v1620_v6 }
 0x116   : > { %v1623_v14 = vpop.f32.mrf.mxu1  ;;  %v1086_v16 = vadd.f32 %v1594_v12, %v1037_v10 }
 0x117   : > { %v1596_v21 = vpop.f32.mrf.mxu0 }
 0x118   : > { %v1624_v22 = vpop.f32.mrf.mxu1  ;;  %v1135_v24 = vadd.f32 %v1622_v17, %v1086_v16  ;;  %v1597_v25 = vadd.f32 %v1596_v21, %v1595_v13 }
 0x119   : > { %v1598_v26 = vpop.f32.mrf.mxu0  ;;  %v1625_v31 = vadd.f32 %v1624_v22, %v1623_v14 }
 0x11a   : > { %v1626_v27 = vpop.f32.mrf.mxu1  ;;  %v1149_v29 = vmax.f32 %v1135_v24, 0.0  ;;  %v1089_v30 = vadd.f32 %v1597_v25, %v1040_v23 }
 0x11b   : > { %v1599_v34 = vpop.f32.mrf.mxu0 }
 0x11c   : > { %v1627_v35 = vpop.f32.mrf.mxu1  ;;  %v1138_v37 = vadd.f32 %v1625_v31, %v1089_v30  ;;  %v1600_v38 = vadd.f32 %v1599_v34, %v1598_v26  ;;  %v1157_v39 = vmul.f32 %v1153_v28, %v1149_v29 }
 0x11d   : > { %v1601_v41 = vpop.f32.mrf.mxu0  ;;  %v1628_v45 = vadd.f32 %v1627_v35, %v1626_v27 }
 0x11e   : > { %v1629_v42 = vpop.f32.mrf.mxu1  ;;  %v1150_v43 = vmax.f32 %v1138_v37, 0.0  ;;  %v1094_v44 = vadd.f32 %v1600_v38, %v1045_v32  ;;  %1684 = vmatprep.mubr.f32.mxu0 %v1157_v39 }
 0x11f   : > { %v1602_v46 = vpop.f32.mrf.mxu0 }
 0x120   : > { %v1630_v47 = vpop.f32.mrf.mxu1  ;;  %v1158_v49 = vmul.f32 %v1154_v40, %v1150_v43  ;;  %v1143_v50 = vadd.f32 %v1628_v45, %v1094_v44  ;;  %v1603_v51 = vadd.f32 %v1602_v46, %v1601_v41 }
 0x121   : > { %v1631_v55 = vadd.f32 %v1630_v47, %v1629_v42 }
 0x122   : > { %v1151_v53 = vmax.f32 %v1143_v50, 0.0  ;;  %v1097_v54 = vadd.f32 %v1603_v51, %v1048_v48  ;;  %1685 = vmatmul.mubr.f32.vlgmr.msra.gmra.mxu0 %v1158_v49 }
 0x124   : > { %v1146_v56 = vadd.f32 %v1631_v55, %v1097_v54  ;;  %v1159_v57 = vmul.f32 %v1155_v52, %v1151_v53 }
 0x126   : > { %v1152_v59 = vmax.f32 %v1146_v56, 0.0  ;;  %1687 = vmatprep.mubr.f32.mxu1 %v1159_v57 }
 0x128   : > { %v1160_v60 = vmul.f32 %v1156_v58, %v1152_v59 }
 0x12a   : > { %1688 = vmatmul.mubr.f32.vlgmr.msra.gmra.mxu1 %v1160_v60 }
 0x1e2   : > { %v1686_v61 = vpop.f32.mrf.mxu0 }
 0x1e3   : > { %v1517_v62 = vpack.c.bf16 %v1686_v61, %v1686_v61 }
 0x1e4   : > { %v1243_v63 = vpop.f32.mrf.mxu0 }
 0x1e5   : > { %1280 = vst.msk [vmem:[%s335_s30 + $0x4] sm:$0xf] %vm1278_vm0, %v1517_v62  ;;  %v1516_v0 = vpack.c.bf16 %v1243_v63, %v1243_v63 }
 0x1e7   : > { %1279 = vst.msk [vmem:[%s335_s30] sm:$0xf] %vm1278_vm0, %v1516_v0 }
 0x1ea   : > { %v1689_v1 = vpop.f32.mrf.mxu1 }
 0x1eb   : > { %v1519_v2 = vpack.c.bf16 %v1689_v1, %v1689_v1 }
 0x1ec   : > { %v1253_v3 = vpop.f32.mrf.mxu1 }
 0x1ed   : > { %1282 = vst.msk [vmem:[%s335_s30 + $0xc] sm:$0xf] %vm1278_vm0, %v1519_v2  ;;  %v1518_v4 = vpack.c.bf16 %v1253_v3, %v1253_v3 }
 0x1ef   : > { %1281 = vst.msk [vmem:[%s335_s30 + $0x8] sm:$0xf] %vm1278_vm0, %v1518_v4 }
 0x1f0 PF: > { %s15_s20 = sadd.s32 1, %s1832_s20   ;;  %s2057_s18 = smov %s1828_s19 }
 0x1f1   : > { %p12_p5 = scmp.ge.s32.totalorder %s15_s20, 7   ;;  %s2058_s19 = smov %s2060_s21 }
 0x1f3   :  { %14 = sbr.rel (!%p12_p5) target bundleno = 2 (0x2), region = 79 }

// kernel: afe_forward.12
= control target key start
LH: loop header
LB: loop body
LE: loop exit
PB: predicated region body
PF: predicated region fallthrough
CT: control target
= control target key end

     0   :  { %s9284_s18 = smov 0   ;;  %s9286_s19 = smov 0   ;;  %s10334_s0 = inlined_call_operand.vmem [shape: bf16[2,32,8192], index: 0, kind: input, shape index: {}]   ;;  %s10335_s1 = inlined_call_operand.vmem [shape: bf16[2,8192,128], index: 1, kind: input, shape index: {}]   ;;  %s10336_s2 = inlined_call_operand.vmem [shape: f32[2,1,128], index: 2, kind: input, shape index: {}]   ;;  %s10337_s3 = inlined_call_operand.vmem [shape: f32[2,32,128], index: 3, kind: input, shape index: {}]   ;;  %s10338_s4 = inlined_call_operand.vmem [shape: f32[128,32], index: 4, kind: input, shape index: {}]   ;;  %s10339_s5 = inlined_call_operand.vmem [shape: bf16[2,32,32], index: 5, kind: output, shape index: {}]  }
   0x1   :  { %s9288_s20 = smov 0  }
   0x2 LB: > { %s27_s21 = sadd.s32 1, %s9248_s19  ;;  %p7044_p0 = scmp.ge.s32.totalorder %s9252_s20, 1  ;;  %s9252_s20 = sphi %s9288_s20, %s15_s20   ;;  %s9248_s19 = sphi %s9286_s19, %s10371_s19   ;;  %s9244_s18 = sphi %s9284_s18, %s10370_s18  }
   0x3   : > { %p29_p1 = scmp.ge.s32.totalorder %s27_s21, 2  ;;  %p244_p2 = scmp.lt.s32.totalorder %s9252_s20, 3 }
   0x5   : > { %s10373_s21 = smov (%p29_p1, %s27_s21), 0  ;;  %p245_p3 = pnand %p7044_p0, %p244_p2 }
   0x7   : > { %248 = sbr.rel (%p245_p3) target bundleno = 970 (0x3ca), region = 40 }
   0xc   : > { %p299_p4 = scmp.lt.s32.totalorder %s9244_s18, 1  ;;  %vm6906_vm0 = vcmask 257024  }
   0xe   : > { %s10375_s18 = smov (!%p299_p4, %s9244_s18), 1 }
   0xf   : > { %s7701_s22 = sshll.u32 %s10375_s18, 12  ;;  %s7700_s26 = sshll.u32 %s10375_s18, 10 }
  0x10   : > { %s9308_s25 = scalar_lea.vmem %s10335_s1, %s7701_s22  ;;  %s9344_s29 = scalar_lea.vmem %s10334_s0, %s7700_s26 }
  0x11   : > { %v8718_v0 = vld [vmem:[%s9308_s25 + $0x78] sm:$0xff]   ;;  %v8722_v4 = vld [vmem:[%s9308_s25 + $0x70] sm:$0xff]   ;;  %v8726_v8 = vld [vmem:[%s9308_s25 + $0x68] sm:$0xff]   ;;  %s316_s7 = scalar_lea.vmem %s10336_s2, %s10375_s18  ;;  %s7702_s23 = sshll.u32 %s10375_s18, 5 }
  0x12   : > { %v8719_v1 = vld [vmem:[%s9308_s25 + $0xf8] sm:$0xff]   ;;  %7708 = vmatprep.subr.bf16.mxu0 %v8718_v0  ;;  %v8723_v5 = vld [vmem:[%s9308_s25 + $0xf0] sm:$0xff]   ;;  %v8727_v9 = vld [vmem:[%s9308_s25 + $0xe8] sm:$0xff]   ;;  %s10314_s26 = scalar_lea.vmem %s10337_s3, %s7702_s23  ;;  %s7703_s27 = sshll.u32 %s10375_s18, 4 }
  0x13   : > { %v8720_v2 = vld [vmem:[%s9308_s25 + $0x38] sm:$0xff]   ;;  %7736 = vmatprep.subr.bf16.mxu1 %v8719_v1  ;;  %v8724_v6 = vld [vmem:[%s9308_s25 + $0x30] sm:$0xff]   ;;  %v8728_v10 = vld [vmem:[%s9308_s25 + $0x28] sm:$0xff]   ;;  %s335_s30 = scalar_lea.vmem %s10339_s5, %s7703_s27 }
  0x14   : > { %v8721_v3 = vld [vmem:[%s9308_s25 + $0xb8] sm:$0xff]   ;;  %7709 = vmatpush3.bf16.msra.mxu0 %v8720_v2  ;;  %v8725_v7 = vld [vmem:[%s9308_s25 + $0xb0] sm:$0xff]   ;;  %v8729_v11 = vld [vmem:[%s9308_s25 + $0xa8] sm:$0xff]  }
  0x15   : > { %7737 = vmatpush3.bf16.msra.mxu1 %v8721_v3  ;;  %7710 = vmatprep.subr.bf16.mxu0 %v8722_v4  ;;  %v8730_v12 = vld [vmem:[%s9308_s25 + $0x60] sm:$0xff]   ;;  %v8734_v16 = vld [vmem:[%s9308_s25 + $0x58] sm:$0xff]   ;;  %v8738_v20 = vld [vmem:[%s9308_s25 + $0x50] sm:$0xff]  }
  0x16   : > { %7738 = vmatprep.subr.bf16.mxu1 %v8723_v5  ;;  %v8731_v13 = vld [vmem:[%s9308_s25 + $0xe0] sm:$0xff]   ;;  %v8735_v17 = vld [vmem:[%s9308_s25 + $0xd8] sm:$0xff]   ;;  %v8739_v21 = vld [vmem:[%s9308_s25 + $0xd0] sm:$0xff]  }
  0x17   : > { %v8732_v14 = vld [vmem:[%s9308_s25 + $0x20] sm:$0xff]   ;;  %v8736_v18 = vld [vmem:[%s9308_s25 + $0x18] sm:$0xff]   ;;  %v8740_v22 = vld [vmem:[%s9308_s25 + $0x10] sm:$0xff]  }
  0x18   : > { %7711 = vmatpush3.bf16.msra.mxu0 %v8724_v6  ;;  %v8733_v15 = vld [vmem:[%s9308_s25 + $0xa0] sm:$0xff]   ;;  %v8737_v19 = vld [vmem:[%s9308_s25 + $0x98] sm:$0xff]   ;;  %v8741_v23 = vld [vmem:[%s9308_s25 + $0x90] sm:$0xff]  }
  0x19   : > { %7739 = vmatpush3.bf16.msra.mxu1 %v8725_v7  ;;  %7712 = vmatprep.subr.bf16.mxu0 %v8726_v8  ;;  %v8742_v24 = vld [vmem:[%s9308_s25 + $0x48] sm:$0xff]   ;;  %v8746_v28 = vld [vmem:[%s9308_s25 + $0x40] sm:$0xff]   ;;  %v8750_v40 = vld [vmem:[%s9308_s25 + $0x178] sm:$0xff]  }
  0x1a   : > { %7740 = vmatprep.subr.bf16.mxu1 %v8727_v9  ;;  %v8743_v25 = vld [vmem:[%s9308_s25 + $0xc8] sm:$0xff]   ;;  %v8747_v29 = vld [vmem:[%s9308_s25 + $0xc0] sm:$0xff]   ;;  %v8751_v41 = vld [vmem:[%s9308_s25 + $0x1f8] sm:$0xff]  }
  0x1b   : > { %v8744_v26 = vld [vmem:[%s9308_s25 + $0x8] sm:$0xff]   ;;  %v8748_v30 = vld [vmem:[%s9308_s25] sm:$0xff]   ;;  %v8752_v42 = vld [vmem:[%s9308_s25 + $0x138] sm:$0xff]  }
  0x1c   : > { %7713 = vmatpush3.bf16.msra.mxu0 %v8728_v10  ;;  %v8745_v27 = vld [vmem:[%s9308_s25 + $0x88] sm:$0xff]   ;;  %v8749_v31 = vld [vmem:[%s9308_s25 + $0x80] sm:$0xff]   ;;  %v8753_v43 = vld [vmem:[%s9308_s25 + $0x1b8] sm:$0xff]  }
  0x1d   : > { %7741 = vmatpush3.bf16.msra.mxu1 %v8729_v11  ;;  %7714 = vmatprep.subr.bf16.mxu0 %v8730_v12  ;;  %v338_v32 = vld [vmem:[%s9344_s29] sm:$0xff]  ;;  %v339_v34 = vld [vmem:[%s9344_s29 + $0x8] sm:$0xff]  ;;  %v8754_v44 = vld [vmem:[%s9308_s25 + $0x170] sm:$0xff]  }
  0x1e   : > { %7742 = vmatprep.subr.bf16.mxu1 %v8731_v13  ;;  %v370_v33 = vld [vmem:[%s9344_s29 + $0x100] sm:$0xff]  ;;  %v371_v37 = vld [vmem:[%s9344_s29 + $0x108] sm:$0xff]  ;;  %v8755_v45 = vld [vmem:[%s9308_s25 + $0x1f0] sm:$0xff]  }
  0x1f   : > { %v7054_v35 = vcombine.low %v338_v32, %v370_v33  ;;  %v7055_v36 = vcombine.high %v338_v32, %v370_v33  ;;  %v7056_v38 = vcombine.low %v339_v34, %v371_v37  ;;  %v7057_v39 = vcombine.high %v339_v34, %v371_v37  ;;  %v8756_v46 = vld [vmem:[%s9308_s25 + $0x130] sm:$0xff]   ;;  %v8758_v48 = vld [vmem:[%s9308_s25 + $0x168] sm:$0xff]   ;;  %v8762_v52 = vld [vmem:[%s9308_s25 + $0x160] sm:$0xff]  }
  0x20   : > { %7715 = vmatpush3.bf16.msra.mxu0 %v8732_v14  ;;  %v8757_v47 = vld [vmem:[%s9308_s25 + $0x1b0] sm:$0xff]   ;;  %v8759_v49 = vld [vmem:[%s9308_s25 + $0x1e8] sm:$0xff]   ;;  %v8763_v53 = vld [vmem:[%s9308_s25 + $0x1e0] sm:$0xff]  }
  0x21   : > { %7743 = vmatpush3.bf16.msra.mxu1 %v8733_v15  ;;  %7716 = vmatprep.subr.bf16.mxu0 %v8734_v16  ;;  %v8760_v50 = vld [vmem:[%s9308_s25 + $0x128] sm:$0xff]   ;;  %v8764_v54 = vld [vmem:[%s9308_s25 + $0x120] sm:$0xff]   ;;  %v8766_v56 = vld [vmem:[%s9308_s25 + $0x158] sm:$0xff]  }
  0x22   : > { %7744 = vmatprep.subr.bf16.mxu1 %v8735_v17  ;;  %5241 = vmatprep.mubr.bf16.mxu0 %v7055_v36  ;;  %v8761_v51 = vld [vmem:[%s9308_s25 + $0x1a8] sm:$0xff]   ;;  %v8765_v55 = vld [vmem:[%s9308_s25 + $0x1a0] sm:$0xff]   ;;  %v8767_v57 = vld [vmem:[%s9308_s25 + $0x1d8] sm:$0xff]  }
  0x23   : > { %5290 = vmatprep.mubr.bf16.mxu1 %v7057_v39  ;;  %v8768_v58 = vld [vmem:[%s9308_s25 + $0x118] sm:$0xff]   ;;  %v402_v60 = vld [vmem:[%s9344_s29 + $0x200] sm:$0xff]  ;;  %v403_v0 = vld [vmem:[%s9344_s29 + $0x208] sm:$0xff] }
  0x24   : > { %7717 = vmatpush3.bf16.msra.mxu0 %v8736_v18  ;;  %v8769_v59 = vld [vmem:[%s9308_s25 + $0x198] sm:$0xff]   ;;  %v434_v61 = vld [vmem:[%s9344_s29 + $0x300] sm:$0xff]  ;;  %v435_v1 = vld [vmem:[%s9344_s29 + $0x308] sm:$0xff] }
  0x25   : > { %7745 = vmatpush3.bf16.msra.mxu1 %v8737_v19  ;;  %7718 = vmatprep.subr.bf16.mxu0 %v8738_v20  ;;  %v7119_v62 = vcombine.high %v402_v60, %v434_v61  ;;  %v7118_v63 = vcombine.low %v402_v60, %v434_v61  ;;  %v7121_v2 = vcombine.high %v403_v0, %v435_v1  ;;  %v8770_v3 = vld [vmem:[%s9308_s25 + $0x150] sm:$0xff]   ;;  %v8774_v8 = vld [vmem:[%s9308_s25 + $0x148] sm:$0xff]   ;;  %v8778_v12 = vld [vmem:[%s9308_s25 + $0x140] sm:$0xff]  }
  0x26   : > { %7746 = vmatprep.subr.bf16.mxu1 %v8739_v21  ;;  %v7120_v4 = vcombine.low %v403_v0, %v435_v1  ;;  %v8771_v5 = vld [vmem:[%s9308_s25 + $0x1d0] sm:$0xff]   ;;  %v8775_v9 = vld [vmem:[%s9308_s25 + $0x1c8] sm:$0xff]   ;;  %v8779_v13 = vld [vmem:[%s9308_s25 + $0x1c0] sm:$0xff]  }
  0x27   : > { %v8772_v6 = vld [vmem:[%s9308_s25 + $0x110] sm:$0xff]   ;;  %v8776_v10 = vld [vmem:[%s9308_s25 + $0x108] sm:$0xff]   ;;  %v8780_v14 = vld [vmem:[%s9308_s25 + $0x100] sm:$0xff]  }
  0x28   : > { %7719 = vmatpush3.bf16.msra.mxu0 %v8740_v22  ;;  %v8773_v7 = vld [vmem:[%s9308_s25 + $0x190] sm:$0xff]   ;;  %v8777_v11 = vld [vmem:[%s9308_s25 + $0x188] sm:$0xff]   ;;  %v8781_v15 = vld [vmem:[%s9308_s25 + $0x180] sm:$0xff]  }
  0x29   : > { %7747 = vmatpush3.bf16.msra.mxu1 %v8741_v23  ;;  %7720 = vmatprep.subr.bf16.mxu0 %v8742_v24  ;;  %v340_v16 = vld [vmem:[%s9344_s29 + $0x10] sm:$0xff]  ;;  %v341_v18 = vld [vmem:[%s9344_s29 + $0x18] sm:$0xff]  ;;  %v8790_v36 = vld [vmem:[%s9308_s25 + $0x268] sm:$0xff]  }
  0x2a   : > { %7748 = vmatprep.subr.bf16.mxu1 %v8743_v25  ;;  %v372_v17 = vld [vmem:[%s9344_s29 + $0x110] sm:$0xff]  ;;  %v373_v19 = vld [vmem:[%s9344_s29 + $0x118] sm:$0xff]  ;;  %v8791_v37 = vld [vmem:[%s9308_s25 + $0x2e8] sm:$0xff]  }
  0x2b   : > { %v7058_v20 = vcombine.low %v340_v16, %v372_v17  ;;  %v7059_v21 = vcombine.high %v340_v16, %v372_v17  ;;  %v7060_v22 = vcombine.low %v341_v18, %v373_v19  ;;  %v7061_v23 = vcombine.high %v341_v18, %v373_v19  ;;  %v8782_v24 = vld [vmem:[%s9308_s25 + $0x278] sm:$0xff]   ;;  %v404_v32 = vld [vmem:[%s9344_s29 + $0x210] sm:$0xff]  ;;  %v8810_v60 = vld [vmem:[%s9308_s25 + $0x240] sm:$0xff]  }
  0x2c   : > { %7721 = vmatpush3.bf16.msra.mxu0 %v8744_v26  ;;  %v8783_v25 = vld [vmem:[%s9308_s25 + $0x2f8] sm:$0xff]   ;;  %v436_v33 = vld [vmem:[%s9344_s29 + $0x310] sm:$0xff]  ;;  %v8811_v61 = vld [vmem:[%s9308_s25 + $0x2c0] sm:$0xff]  }
  0x2d   : > { %7749 = vmatpush3.bf16.msra.mxu1 %v8745_v27  ;;  %7722 = vmatprep.subr.bf16.mxu0 %v8746_v28  ;;  %v8784_v26 = vld [vmem:[%s9308_s25 + $0x238] sm:$0xff]   ;;  %v8786_v28 = vld [vmem:[%s9308_s25 + $0x270] sm:$0xff]   ;;  %v7123_v34 = vcombine.high %v404_v32, %v436_v33  ;;  %v342_v0 = vld [vmem:[%s9344_s29 + $0x20] sm:$0xff] }
  0x2e   : > { %7750 = vmatprep.subr.bf16.mxu1 %v8747_v29  ;;  %v8785_v27 = vld [vmem:[%s9308_s25 + $0x2b8] sm:$0xff]   ;;  %v8787_v29 = vld [vmem:[%s9308_s25 + $0x2f0] sm:$0xff]   ;;  %v374_v1 = vld [vmem:[%s9344_s29 + $0x120] sm:$0xff] }
  0x2f   : > { %v437_v39 = vld [vmem:[%s9344_s29 + $0x318] sm:$0xff]  ;;  %v406_v16 = vld [vmem:[%s9344_s29 + $0x220] sm:$0xff] }
  0x30   : > { %7723 = vmatpush3.bf16.msra.mxu0 %v8748_v30  ;;  %v8788_v30 = vld [vmem:[%s9308_s25 + $0x230] sm:$0xff]   ;;  %v438_v17 = vld [vmem:[%s9344_s29 + $0x320] sm:$0xff] }
  0x31   : > { %7751 = vmatpush3.bf16.msra.mxu1 %v8749_v31  ;;  %7764 = vmatprep.subr.bf16.mxu0 %v8750_v40  ;;  %v8789_v31 = vld [vmem:[%s9308_s25 + $0x2b0] sm:$0xff]   ;;  %v7127_v18 = vcombine.high %v406_v16, %v438_v17  ;;  %v7126_v19 = vcombine.low %v406_v16, %v438_v17  ;;  %v8862_v16 = vld [vmem:[%s9308_s25 + $0x458] sm:$0xff]  }
  0x32   : > { %7792 = vmatprep.subr.bf16.mxu1 %v8751_v41  ;;  %v8792_v41 = vld [vmem:[%s9308_s25 + $0x228] sm:$0xff]   ;;  %v8863_v17 = vld [vmem:[%s9308_s25 + $0x4d8] sm:$0xff]  }
  0x33   : > { %5242 = vmatmul.mubr.bf16.vlgmr.msra.gmra.mxu0 %v7054_v35  ;;  %v7122_v35 = vcombine.low %v404_v32, %v436_v33  ;;  %v8830_v32 = vld [vmem:[%s9308_s25 + $0x358] sm:$0xff]  }
  0x34   : > { %5291 = vmatmul.mubr.bf16.vlgmr.msra.gmra.mxu1 %v7056_v38  ;;  %7765 = vmatpush3.bf16.msra.mxu0 %v8752_v42  ;;  %v405_v38 = vld [vmem:[%s9344_s29 + $0x218] sm:$0xff] }
  0x35   : > { %7793 = vmatpush3.bf16.msra.mxu1 %v8753_v43  ;;  %7766 = vmatprep.subr.bf16.mxu0 %v8754_v44  ;;  %v7125_v40 = vcombine.high %v405_v38, %v437_v39  ;;  %v7124_v42 = vcombine.low %v405_v38, %v437_v39  ;;  %v8793_v43 = vld [vmem:[%s9308_s25 + $0x2a8] sm:$0xff]   ;;  %v8794_v44 = vld [vmem:[%s9308_s25 + $0x260] sm:$0xff]   ;;  %v8831_v33 = vld [vmem:[%s9308_s25 + $0x3d8] sm:$0xff]  }
  0x36   : > { %7794 = vmatprep.subr.bf16.mxu1 %v8755_v45  ;;  %5249 = vmatprep.mubr.bf16.mxu0 %v7119_v62  ;;  %v8795_v45 = vld [vmem:[%s9308_s25 + $0x2e0] sm:$0xff]   ;;  %v8836_v38 = vld [vmem:[%s9308_s25 + $0x310] sm:$0xff]  }
  0x37   : > { %5298 = vmatprep.mubr.bf16.mxu1 %v7121_v2  ;;  %v8812_v62 = vld [vmem:[%s9308_s25 + $0x200] sm:$0xff]   ;;  %v7062_v2 = vcombine.low %v342_v0, %v374_v1  ;;  %v8837_v39 = vld [vmem:[%s9308_s25 + $0x390] sm:$0xff]  }
  0x38   : > { %7767 = vmatpush3.bf16.msra.mxu0 %v8756_v46  ;;  %v8796_v46 = vld [vmem:[%s9308_s25 + $0x220] sm:$0xff]  }
  0x39   : > { %7795 = vmatpush3.bf16.msra.mxu1 %v8757_v47  ;;  %7768 = vmatprep.subr.bf16.mxu0 %v8758_v48  ;;  %v8797_v47 = vld [vmem:[%s9308_s25 + $0x2a0] sm:$0xff]   ;;  %v8798_v48 = vld [vmem:[%s9308_s25 + $0x258] sm:$0xff]  }
  0x3a   : > { %7796 = vmatprep.subr.bf16.mxu1 %v8759_v49  ;;  %v8799_v49 = vld [vmem:[%s9308_s25 + $0x2d8] sm:$0xff]  }
  0x3b   : > { %5250 = vmatmul.mubr.bf16.gmra.mxu0 %v7118_v63  ;;  %v8813_v63 = vld [vmem:[%s9308_s25 + $0x280] sm:$0xff]  }
  0x3c   : > { %7769 = vmatpush3.bf16.msra.mxu0 %v8760_v50  ;;  %5299 = vmatmul.mubr.bf16.gmra.mxu1 %v7120_v4  ;;  %v8800_v50 = vld [vmem:[%s9308_s25 + $0x218] sm:$0xff]   ;;  %v343_v4 = vld [vmem:[%s9344_s29 + $0x28] sm:$0xff] }
  0x3d   : > { %7797 = vmatpush3.bf16.msra.mxu1 %v8761_v51  ;;  %7770 = vmatprep.subr.bf16.mxu0 %v8762_v52  ;;  %v8801_v51 = vld [vmem:[%s9308_s25 + $0x298] sm:$0xff]   ;;  %v8802_v52 = vld [vmem:[%s9308_s25 + $0x250] sm:$0xff]  }
  0x3e   : > { %7798 = vmatprep.subr.bf16.mxu1 %v8763_v53  ;;  %5339 = vmatprep.mubr.bf16.mxu0 %v7059_v21  ;;  %v8803_v53 = vld [vmem:[%s9308_s25 + $0x2d0] sm:$0xff]   ;;  %v8823_v21 = vld [vmem:[%s9308_s25 + $0x3e8] sm:$0xff]  }
  0x3f   : > { %5388 = vmatprep.mubr.bf16.mxu1 %v7061_v23  ;;  %v439_v23 = vld [vmem:[%s9344_s29 + $0x328] sm:$0xff] }
  0x40   : > { %7771 = vmatpush3.bf16.msra.mxu0 %v8764_v54  ;;  %v8804_v54 = vld [vmem:[%s9308_s25 + $0x210] sm:$0xff]  }
  0x41   : > { %7799 = vmatpush3.bf16.msra.mxu1 %v8765_v55  ;;  %7772 = vmatprep.subr.bf16.mxu0 %v8766_v56  ;;  %v8805_v55 = vld [vmem:[%s9308_s25 + $0x290] sm:$0xff]   ;;  %v8806_v56 = vld [vmem:[%s9308_s25 + $0x248] sm:$0xff]  }
  0x42   : > { %7800 = vmatprep.subr.bf16.mxu1 %v8767_v57  ;;  %v8807_v57 = vld [vmem:[%s9308_s25 + $0x2c8] sm:$0xff]  }
  0x44   : > { %7773 = vmatpush3.bf16.msra.mxu0 %v8768_v58  ;;  %v8808_v58 = vld [vmem:[%s9308_s25 + $0x208] sm:$0xff]  }
  0x45   : > { %7801 = vmatpush3.bf16.msra.mxu1 %v8769_v59  ;;  %7774 = vmatprep.subr.bf16.mxu0 %v8770_v3  ;;  %v8809_v59 = vld [vmem:[%s9308_s25 + $0x288] sm:$0xff]   ;;  %v7063_v3 = vcombine.high %v342_v0, %v374_v1  ;;  %v408_v0 = vld [vmem:[%s9344_s29 + $0x230] sm:$0xff] }
  0x46   : > { %7802 = vmatprep.subr.bf16.mxu1 %v8771_v5  ;;  %v375_v5 = vld [vmem:[%s9344_s29 + $0x128] sm:$0xff]  ;;  %v440_v1 = vld [vmem:[%s9344_s29 + $0x330] sm:$0xff] }
  0x48   : > { %7775 = vmatpush3.bf16.msra.mxu0 %v8772_v6  ;;  %v7064_v6 = vcombine.low %v343_v4, %v375_v5 }
  0x49   : > { %7803 = vmatpush3.bf16.msra.mxu1 %v8773_v7  ;;  %7776 = vmatprep.subr.bf16.mxu0 %v8774_v8  ;;  %v7065_v7 = vcombine.high %v343_v4, %v375_v5  ;;  %v8814_v8 = vld [vmem:[%s9308_s25 + $0x378] sm:$0xff]   ;;  %v8854_v4 = vld [vmem:[%s9308_s25 + $0x468] sm:$0xff]  }
  0x4a   : > { %7804 = vmatprep.subr.bf16.mxu1 %v8775_v9  ;;  %v8815_v9 = vld [vmem:[%s9308_s25 + $0x3f8] sm:$0xff]   ;;  %v8855_v5 = vld [vmem:[%s9308_s25 + $0x4e8] sm:$0xff]  }
  0x4c   : > { %7777 = vmatpush3.bf16.msra.mxu0 %v8776_v10  ;;  %v8816_v10 = vld [vmem:[%s9308_s25 + $0x338] sm:$0xff]  }
  0x4d   : > { %7805 = vmatpush3.bf16.msra.mxu1 %v8777_v11  ;;  %7778 = vmatprep.subr.bf16.mxu0 %v8778_v12  ;;  %v8817_v11 = vld [vmem:[%s9308_s25 + $0x3b8] sm:$0xff]   ;;  %v8818_v12 = vld [vmem:[%s9308_s25 + $0x370] sm:$0xff]  }
  0x4e   : > { %7806 = vmatprep.subr.bf16.mxu1 %v8779_v13  ;;  %v8819_v13 = vld [vmem:[%s9308_s25 + $0x3f0] sm:$0xff]  }
  0x50   : > { %7779 = vmatpush3.bf16.msra.mxu0 %v8780_v14  ;;  %v8820_v14 = vld [vmem:[%s9308_s25 + $0x330] sm:$0xff]  }
  0x51   : > { %7807 = vmatpush3.bf16.msra.mxu1 %v8781_v15  ;;  %7820 = vmatprep.subr.bf16.mxu0 %v8782_v24  ;;  %v8821_v15 = vld [vmem:[%s9308_s25 + $0x3b0] sm:$0xff]  }
  0x52   : > { %7848 = vmatprep.subr.bf16.mxu1 %v8783_v25  ;;  %v8824_v25 = vld [vmem:[%s9308_s25 + $0x328] sm:$0xff]  }
  0x53   : > { %5340 = vmatmul.mubr.bf16.vlgmr.msra.gmra.mxu0 %v7058_v20  ;;  %v8822_v20 = vld [vmem:[%s9308_s25 + $0x368] sm:$0xff]  }
  0x54   : > { %5389 = vmatmul.mubr.bf16.vlgmr.msra.gmra.mxu1 %v7060_v22  ;;  %7821 = vmatpush3.bf16.msra.mxu0 %v8784_v26  ;;  %v407_v22 = vld [vmem:[%s9344_s29 + $0x228] sm:$0xff] }
  0x55   : > { %7849 = vmatpush3.bf16.msra.mxu1 %v8785_v27  ;;  %7822 = vmatprep.subr.bf16.mxu0 %v8786_v28  ;;  %v7129_v24 = vcombine.high %v407_v22, %v439_v23  ;;  %v7128_v26 = vcombine.low %v407_v22, %v439_v23  ;;  %v8825_v27 = vld [vmem:[%s9308_s25 + $0x3a8] sm:$0xff]   ;;  %v8826_v28 = vld [vmem:[%s9308_s25 + $0x360] sm:$0xff]   ;;  %v8868_v22 = vld [vmem:[%s9308_s25 + $0x410] sm:$0xff]  }
  0x56   : > { %7850 = vmatprep.subr.bf16.mxu1 %v8787_v29  ;;  %5347 = vmatprep.mubr.bf16.mxu0 %v7123_v34  ;;  %v8827_v29 = vld [vmem:[%s9308_s25 + $0x3e0] sm:$0xff]   ;;  %v8832_v34 = vld [vmem:[%s9308_s25 + $0x318] sm:$0xff]   ;;  %v8869_v23 = vld [vmem:[%s9308_s25 + $0x490] sm:$0xff]  }
  0x57   : > { %5396 = vmatprep.mubr.bf16.mxu1 %v7125_v40  ;;  %v8838_v40 = vld [vmem:[%s9308_s25 + $0x348] sm:$0xff]  }
  0x58   : > { %7823 = vmatpush3.bf16.msra.mxu0 %v8788_v30  ;;  %v8828_v30 = vld [vmem:[%s9308_s25 + $0x320] sm:$0xff]  }
  0x59   : > { %7851 = vmatpush3.bf16.msra.mxu1 %v8789_v31  ;;  %7824 = vmatprep.subr.bf16.mxu0 %v8790_v36  ;;  %v8829_v31 = vld [vmem:[%s9308_s25 + $0x3a0] sm:$0xff]   ;;  %v8834_v36 = vld [vmem:[%s9308_s25 + $0x350] sm:$0xff]  }
  0x5a   : > { %7852 = vmatprep.subr.bf16.mxu1 %v8791_v37  ;;  %v8835_v37 = vld [vmem:[%s9308_s25 + $0x3d0] sm:$0xff]  }
  0x5b   : > { %5348 = vmatmul.mubr.bf16.gmra.mxu0 %v7122_v35  ;;  %v8833_v35 = vld [vmem:[%s9308_s25 + $0x398] sm:$0xff]  }
  0x5c   : > { %7825 = vmatpush3.bf16.msra.mxu0 %v8792_v41  ;;  %5397 = vmatmul.mubr.bf16.gmra.mxu1 %v7124_v42  ;;  %v8839_v41 = vld [vmem:[%s9308_s25 + $0x3c8] sm:$0xff]  }
  0x5d   : > { %7853 = vmatpush3.bf16.msra.mxu1 %v8793_v43  ;;  %7826 = vmatprep.subr.bf16.mxu0 %v8794_v44  ;;  %v8840_v42 = vld [vmem:[%s9308_s25 + $0x308] sm:$0xff]   ;;  %v8842_v44 = vld [vmem:[%s9308_s25 + $0x340] sm:$0xff]  }
  0x5e   : > { %7854 = vmatprep.subr.bf16.mxu1 %v8795_v45  ;;  %5437 = vmatprep.mubr.bf16.mxu0 %v7063_v3  ;;  %v8841_v43 = vld [vmem:[%s9308_s25 + $0x388] sm:$0xff]   ;;  %v8843_v45 = vld [vmem:[%s9308_s25 + $0x3c0] sm:$0xff]   ;;  %v7130_v3 = vcombine.low %v408_v0, %v440_v1 }
  0x5f   : > { %5486 = vmatprep.mubr.bf16.mxu1 %v7065_v7  ;;  %v441_v7 = vld [vmem:[%s9344_s29 + $0x338] sm:$0xff] }
  0x60   : > { %7827 = vmatpush3.bf16.msra.mxu0 %v8796_v46  ;;  %v8844_v46 = vld [vmem:[%s9308_s25 + $0x300] sm:$0xff]  }
  0x61   : > { %7855 = vmatpush3.bf16.msra.mxu1 %v8797_v47  ;;  %7828 = vmatprep.subr.bf16.mxu0 %v8798_v48  ;;  %v8845_v47 = vld [vmem:[%s9308_s25 + $0x380] sm:$0xff]   ;;  %v344_v48 = vld [vmem:[%s9344_s29 + $0x30] sm:$0xff] }
  0x62   : > { %7856 = vmatprep.subr.bf16.mxu1 %v8799_v49  ;;  %v376_v49 = vld [vmem:[%s9344_s29 + $0x130] sm:$0xff] }
  0x64   : > { %7829 = vmatpush3.bf16.msra.mxu0 %v8800_v50  ;;  %v345_v50 = vld [vmem:[%s9344_s29 + $0x38] sm:$0xff] }
  0x65   : > { %7857 = vmatpush3.bf16.msra.mxu1 %v8801_v51  ;;  %7830 = vmatprep.subr.bf16.mxu0 %v8802_v52  ;;  %v7066_v51 = vcombine.low %v344_v48, %v376_v49  ;;  %v7067_v52 = vcombine.high %v344_v48, %v376_v49  ;;  %v410_v48 = vld [vmem:[%s9344_s29 + $0x240] sm:$0xff] }
  0x66   : > { %7858 = vmatprep.subr.bf16.mxu1 %v8803_v53  ;;  %v377_v53 = vld [vmem:[%s9344_s29 + $0x138] sm:$0xff]  ;;  %v442_v49 = vld [vmem:[%s9344_s29 + $0x340] sm:$0xff] }
  0x68   : > { %7831 = vmatpush3.bf16.msra.mxu0 %v8804_v54  ;;  %v7068_v54 = vcombine.low %v345_v50, %v377_v53 }
  0x69   : > { %7859 = vmatpush3.bf16.msra.mxu1 %v8805_v55  ;;  %7832 = vmatprep.subr.bf16.mxu0 %v8806_v56  ;;  %v7069_v55 = vcombine.high %v345_v50, %v377_v53  ;;  %v8846_v56 = vld [vmem:[%s9308_s25 + $0x478] sm:$0xff]   ;;  %v7135_v50 = vcombine.high %v410_v48, %v442_v49  ;;  %v8887_v53 = vld [vmem:[%s9308_s25 + $0x5e8] sm:$0xff]  }
  0x6a   : > { %7860 = vmatprep.subr.bf16.mxu1 %v8807_v57  ;;  %v8847_v57 = vld [vmem:[%s9308_s25 + $0x4f8] sm:$0xff]  }
  0x6c   : > { %7833 = vmatpush3.bf16.msra.mxu0 %v8808_v58  ;;  %v8848_v58 = vld [vmem:[%s9308_s25 + $0x438] sm:$0xff]  }
  0x6d   : > { %7861 = vmatpush3.bf16.msra.mxu1 %v8809_v59  ;;  %7834 = vmatprep.subr.bf16.mxu0 %v8810_v60  ;;  %v8849_v59 = vld [vmem:[%s9308_s25 + $0x4b8] sm:$0xff]   ;;  %v8850_v60 = vld [vmem:[%s9308_s25 + $0x470] sm:$0xff]  }
  0x6e   : > { %7862 = vmatprep.subr.bf16.mxu1 %v8811_v61  ;;  %v8851_v61 = vld [vmem:[%s9308_s25 + $0x4f0] sm:$0xff]  }
  0x70   : > { %7835 = vmatpush3.bf16.msra.mxu0 %v8812_v62  ;;  %v8852_v62 = vld [vmem:[%s9308_s25 + $0x430] sm:$0xff]  }
  0x71   : > { %7863 = vmatpush3.bf16.msra.mxu1 %v8813_v63  ;;  %7876 = vmatprep.subr.bf16.mxu0 %v8814_v8  ;;  %v8853_v63 = vld [vmem:[%s9308_s25 + $0x4b0] sm:$0xff]  }
  0x72   : > { %7904 = vmatprep.subr.bf16.mxu1 %v8815_v9  ;;  %v8856_v9 = vld [vmem:[%s9308_s25 + $0x428] sm:$0xff]  }
  0x73   : > { %5438 = vmatmul.mubr.bf16.vlgmr.msra.gmra.mxu0 %v7062_v2  ;;  %v7131_v2 = vcombine.high %v408_v0, %v440_v1  ;;  %v8894_v0 = vld [vmem:[%s9308_s25 + $0x558] sm:$0xff]  }
  0x74   : > { %5487 = vmatmul.mubr.bf16.vlgmr.msra.gmra.mxu1 %v7064_v6  ;;  %7877 = vmatpush3.bf16.msra.mxu0 %v8816_v10  ;;  %v409_v6 = vld [vmem:[%s9344_s29 + $0x238] sm:$0xff] }
  0x75   : > { %7905 = vmatpush3.bf16.msra.mxu1 %v8817_v11  ;;  %7878 = vmatprep.subr.bf16.mxu0 %v8818_v12  ;;  %v7133_v8 = vcombine.high %v409_v6, %v441_v7  ;;  %v7132_v10 = vcombine.low %v409_v6, %v441_v7  ;;  %v8857_v11 = vld [vmem:[%s9308_s25 + $0x4a8] sm:$0xff]   ;;  %v8858_v12 = vld [vmem:[%s9308_s25 + $0x460] sm:$0xff]   ;;  %v8895_v1 = vld [vmem:[%s9308_s25 + $0x5d8] sm:$0xff]  }
  0x76   : > { %7906 = vmatprep.subr.bf16.mxu1 %v8819_v13  ;;  %5445 = vmatprep.mubr.bf16.mxu0 %v7127_v18  ;;  %v8859_v13 = vld [vmem:[%s9308_s25 + $0x4e0] sm:$0xff]   ;;  %v8864_v18 = vld [vmem:[%s9308_s25 + $0x418] sm:$0xff]   ;;  %v8900_v6 = vld [vmem:[%s9308_s25 + $0x510] sm:$0xff]  }
  0x77   : > { %5494 = vmatprep.mubr.bf16.mxu1 %v7129_v24  ;;  %v8870_v24 = vld [vmem:[%s9308_s25 + $0x448] sm:$0xff]   ;;  %v8901_v7 = vld [vmem:[%s9308_s25 + $0x590] sm:$0xff]  }
  0x78   : > { %7879 = vmatpush3.bf16.msra.mxu0 %v8820_v14  ;;  %v8860_v14 = vld [vmem:[%s9308_s25 + $0x420] sm:$0xff]  }
  0x79   : > { %7907 = vmatpush3.bf16.msra.mxu1 %v8821_v15  ;;  %7880 = vmatprep.subr.bf16.mxu0 %v8822_v20  ;;  %v8861_v15 = vld [vmem:[%s9308_s25 + $0x4a0] sm:$0xff]   ;;  %v8866_v20 = vld [vmem:[%s9308_s25 + $0x450] sm:$0xff]  }
  0x7a   : > { %7908 = vmatprep.subr.bf16.mxu1 %v8823_v21  ;;  %v8867_v21 = vld [vmem:[%s9308_s25 + $0x4d0] sm:$0xff]  }
  0x7b   : > { %5446 = vmatmul.mubr.bf16.gmra.mxu0 %v7126_v19  ;;  %v8865_v19 = vld [vmem:[%s9308_s25 + $0x498] sm:$0xff]  }
  0x7c   : > { %7881 = vmatpush3.bf16.msra.mxu0 %v8824_v25  ;;  %5495 = vmatmul.mubr.bf16.gmra.mxu1 %v7128_v26  ;;  %v8871_v25 = vld [vmem:[%s9308_s25 + $0x4c8] sm:$0xff]  }
  0x7d   : > { %7909 = vmatpush3.bf16.msra.mxu1 %v8825_v27  ;;  %7882 = vmatprep.subr.bf16.mxu0 %v8826_v28  ;;  %v8872_v26 = vld [vmem:[%s9308_s25 + $0x408] sm:$0xff]   ;;  %v8874_v28 = vld [vmem:[%s9308_s25 + $0x440] sm:$0xff]  }
  0x7e   : > { %7910 = vmatprep.subr.bf16.mxu1 %v8827_v29  ;;  %5535 = vmatprep.mubr.bf16.mxu0 %v7067_v52  ;;  %v8873_v27 = vld [vmem:[%s9308_s25 + $0x488] sm:$0xff]   ;;  %v8875_v29 = vld [vmem:[%s9308_s25 + $0x4c0] sm:$0xff]  }
  0x7f   : > { %5584 = vmatprep.mubr.bf16.mxu1 %v7069_v55  ;;  %v8886_v52 = vld [vmem:[%s9308_s25 + $0x568] sm:$0xff]  }
  0x80   : > { %7883 = vmatpush3.bf16.msra.mxu0 %v8828_v30  ;;  %v8876_v30 = vld [vmem:[%s9308_s25 + $0x400] sm:$0xff]   ;;  %v443_v55 = vld [vmem:[%s9344_s29 + $0x348] sm:$0xff] }
  0x81   : > { %7911 = vmatpush3.bf16.msra.mxu1 %v8829_v31  ;;  %7884 = vmatprep.subr.bf16.mxu0 %v8830_v32  ;;  %v8877_v31 = vld [vmem:[%s9308_s25 + $0x480] sm:$0xff]  }
  0x82   : > { %7912 = vmatprep.subr.bf16.mxu1 %v8831_v33  ;;  %v346_v32 = vld [vmem:[%s9344_s29 + $0x40] sm:$0xff] }
  0x83   : > { %v378_v33 = vld [vmem:[%s9344_s29 + $0x140] sm:$0xff] }
  0x84   : > { %7885 = vmatpush3.bf16.msra.mxu0 %v8832_v34  ;;  %v347_v34 = vld [vmem:[%s9344_s29 + $0x48] sm:$0xff] }
  0x85   : > { %7913 = vmatpush3.bf16.msra.mxu1 %v8833_v35  ;;  %7886 = vmatprep.subr.bf16.mxu0 %v8834_v36  ;;  %v379_v35 = vld [vmem:[%s9344_s29 + $0x148] sm:$0xff]  ;;  %v7070_v36 = vcombine.low %v346_v32, %v378_v33 }
  0x86   : > { %7914 = vmatprep.subr.bf16.mxu1 %v8835_v37  ;;  %v7071_v37 = vcombine.high %v346_v32, %v378_v33  ;;  %v412_v32 = vld [vmem:[%s9344_s29 + $0x250] sm:$0xff] }
  0x87   : > { %v444_v33 = vld [vmem:[%s9344_s29 + $0x350] sm:$0xff] }
  0x88   : > { %7887 = vmatpush3.bf16.msra.mxu0 %v8836_v38  ;;  %v7072_v38 = vcombine.low %v347_v34, %v379_v35 }
  0x89   : > { %7915 = vmatpush3.bf16.msra.mxu1 %v8837_v39  ;;  %7888 = vmatprep.subr.bf16.mxu0 %v8838_v40  ;;  %v7073_v39 = vcombine.high %v347_v34, %v379_v35  ;;  %v8878_v40 = vld [vmem:[%s9308_s25 + $0x578] sm:$0xff]   ;;  %v7139_v34 = vcombine.high %v412_v32, %v444_v33  ;;  %v7138_v35 = vcombine.low %v412_v32, %v444_v33  ;;  %v8949_v32 = vld [vmem:[%s9308_s25 + $0x7b0] sm:$0xff]   ;;  %v414_v33 = vld [vmem:[%s9344_s29 + $0x260] sm:$0xff] }
  0x8a   : > { %7916 = vmatprep.subr.bf16.mxu1 %v8839_v41  ;;  %v8879_v41 = vld [vmem:[%s9308_s25 + $0x5f8] sm:$0xff]  }
  0x8c   : > { %7889 = vmatpush3.bf16.msra.mxu0 %v8840_v42  ;;  %v8880_v42 = vld [vmem:[%s9308_s25 + $0x538] sm:$0xff]  }
  0x8d   : > { %7917 = vmatpush3.bf16.msra.mxu1 %v8841_v43  ;;  %7890 = vmatprep.subr.bf16.mxu0 %v8842_v44  ;;  %v8881_v43 = vld [vmem:[%s9308_s25 + $0x5b8] sm:$0xff]   ;;  %v8882_v44 = vld [vmem:[%s9308_s25 + $0x570] sm:$0xff]  }
  0x8e   : > { %7918 = vmatprep.subr.bf16.mxu1 %v8843_v45  ;;  %v8883_v45 = vld [vmem:[%s9308_s25 + $0x5f0] sm:$0xff]  }
  0x90   : > { %7891 = vmatpush3.bf16.msra.mxu0 %v8844_v46  ;;  %v8884_v46 = vld [vmem:[%s9308_s25 + $0x530] sm:$0xff]  }
  0x91   : > { %7919 = vmatpush3.bf16.msra.mxu1 %v8845_v47  ;;  %7932 = vmatprep.subr.bf16.mxu0 %v8846_v56  ;;  %v8885_v47 = vld [vmem:[%s9308_s25 + $0x5b0] sm:$0xff]  }
  0x92   : > { %7960 = vmatprep.subr.bf16.mxu1 %v8847_v57  ;;  %v8888_v57 = vld [vmem:[%s9308_s25 + $0x528] sm:$0xff]  }
  0x93   : > { %5536 = vmatmul.mubr.bf16.vlgmr.msra.gmra.mxu0 %v7066_v51  ;;  %v7134_v51 = vcombine.low %v410_v48, %v442_v49  ;;  %v8926_v48 = vld [vmem:[%s9308_s25 + $0x658] sm:$0xff]  }
  0x94   : > { %5585 = vmatmul.mubr.bf16.vlgmr.msra.gmra.mxu1 %v7068_v54  ;;  %7933 = vmatpush3.bf16.msra.mxu0 %v8848_v58  ;;  %v411_v54 = vld [vmem:[%s9344_s29 + $0x248] sm:$0xff]  ;;  %v8927_v49 = vld [vmem:[%s9308_s25 + $0x6d8] sm:$0xff]  }
  0x95   : > { %7961 = vmatpush3.bf16.msra.mxu1 %v8849_v59  ;;  %7934 = vmatprep.subr.bf16.mxu0 %v8850_v60  ;;  %v7137_v56 = vcombine.high %v411_v54, %v443_v55  ;;  %v7136_v58 = vcombine.low %v411_v54, %v443_v55  ;;  %v8889_v59 = vld [vmem:[%s9308_s25 + $0x5a8] sm:$0xff]   ;;  %v8890_v60 = vld [vmem:[%s9308_s25 + $0x560] sm:$0xff]   ;;  %v8931_v54 = vld [vmem:[%s9308_s25 + $0x6d0] sm:$0xff]  }
  0x96   : > { %7962 = vmatprep.subr.bf16.mxu1 %v8851_v61  ;;  %5543 = vmatprep.mubr.bf16.mxu0 %v7131_v2  ;;  %v8891_v61 = vld [vmem:[%s9308_s25 + $0x5e0] sm:$0xff]   ;;  %v8896_v2 = vld [vmem:[%s9308_s25 + $0x518] sm:$0xff]  }
  0x97   : > { %5592 = vmatprep.mubr.bf16.mxu1 %v7133_v8  ;;  %v8902_v8 = vld [vmem:[%s9308_s25 + $0x548] sm:$0xff]  }
  0x98   : > { %7935 = vmatpush3.bf16.msra.mxu0 %v8852_v62  ;;  %v8892_v62 = vld [vmem:[%s9308_s25 + $0x520] sm:$0xff]  }
  0x99   : > { %7963 = vmatpush3.bf16.msra.mxu1 %v8853_v63  ;;  %7936 = vmatprep.subr.bf16.mxu0 %v8854_v4  ;;  %v8893_v63 = vld [vmem:[%s9308_s25 + $0x5a0] sm:$0xff]   ;;  %v8898_v4 = vld [vmem:[%s9308_s25 + $0x550] sm:$0xff]  }
  0x9a   : > { %7964 = vmatprep.subr.bf16.mxu1 %v8855_v5  ;;  %v8899_v5 = vld [vmem:[%s9308_s25 + $0x5d0] sm:$0xff]  }
  0x9b   : > { %5544 = vmatmul.mubr.bf16.gmra.mxu0 %v7130_v3  ;;  %v8897_v3 = vld [vmem:[%s9308_s25 + $0x598] sm:$0xff]  }
  0x9c   : > { %7937 = vmatpush3.bf16.msra.mxu0 %v8856_v9  ;;  %5593 = vmatmul.mubr.bf16.gmra.mxu1 %v7132_v10  ;;  %v8903_v9 = vld [vmem:[%s9308_s25 + $0x5c8] sm:$0xff]  }
  0x9d   : > { %7965 = vmatpush3.bf16.msra.mxu1 %v8857_v11  ;;  %7938 = vmatprep.subr.bf16.mxu0 %v8858_v12  ;;  %v8904_v10 = vld [vmem:[%s9308_s25 + $0x508] sm:$0xff]   ;;  %v8906_v12 = vld [vmem:[%s9308_s25 + $0x540] sm:$0xff]  }
  0x9e   : > { %7966 = vmatprep.subr.bf16.mxu1 %v8859_v13  ;;  %5633 = vmatprep.mubr.bf16.mxu0 %v7071_v37  ;;  %v8905_v11 = vld [vmem:[%s9308_s25 + $0x588] sm:$0xff]   ;;  %v8907_v13 = vld [vmem:[%s9308_s25 + $0x5c0] sm:$0xff]  }
  0x9f   : > { %5682 = vmatprep.mubr.bf16.mxu1 %v7073_v39  ;;  %v8919_v37 = vld [vmem:[%s9308_s25 + $0x6e8] sm:$0xff]   ;;  %v445_v39 = vld [vmem:[%s9344_s29 + $0x358] sm:$0xff] }
  0xa0   : > { %7939 = vmatpush3.bf16.msra.mxu0 %v8860_v14  ;;  %v8908_v14 = vld [vmem:[%s9308_s25 + $0x500] sm:$0xff]  }
  0xa1   : > { %7967 = vmatpush3.bf16.msra.mxu1 %v8861_v15  ;;  %7940 = vmatprep.subr.bf16.mxu0 %v8862_v16  ;;  %v8909_v15 = vld [vmem:[%s9308_s25 + $0x580] sm:$0xff]   ;;  %v348_v16 = vld [vmem:[%s9344_s29 + $0x50] sm:$0xff] }
  0xa2   : > { %7968 = vmatprep.subr.bf16.mxu1 %v8863_v17  ;;  %v380_v17 = vld [vmem:[%s9344_s29 + $0x150] sm:$0xff] }
  0xa4   : > { %7941 = vmatpush3.bf16.msra.mxu0 %v8864_v18  ;;  %v7074_v18 = vcombine.low %v348_v16, %v380_v17 }
  0xa5   : > { %7969 = vmatpush3.bf16.msra.mxu1 %v8865_v19  ;;  %7942 = vmatprep.subr.bf16.mxu0 %v8866_v20  ;;  %v7075_v19 = vcombine.high %v348_v16, %v380_v17  ;;  %v349_v20 = vld [vmem:[%s9344_s29 + $0x58] sm:$0xff] }
  0xa6   : > { %7970 = vmatprep.subr.bf16.mxu1 %v8867_v21  ;;  %v381_v21 = vld [vmem:[%s9344_s29 + $0x158] sm:$0xff] }
  0xa7   : > { %v8942_v17 = vld [vmem:[%s9308_s25 + $0x778] sm:$0xff]  }
  0xa8   : > { %7943 = vmatpush3.bf16.msra.mxu0 %v8868_v22  ;;  %v7076_v22 = vcombine.low %v349_v20, %v381_v21 }
  0xa9   : > { %7971 = vmatpush3.bf16.msra.mxu1 %v8869_v23  ;;  %7944 = vmatprep.subr.bf16.mxu0 %v8870_v24  ;;  %v7077_v23 = vcombine.high %v349_v20, %v381_v21  ;;  %v8910_v24 = vld [vmem:[%s9308_s25 + $0x678] sm:$0xff]  }
  0xaa   : > { %7972 = vmatprep.subr.bf16.mxu1 %v8871_v25  ;;  %v8911_v25 = vld [vmem:[%s9308_s25 + $0x6f8] sm:$0xff]  }
  0xab   : > { %v8944_v21 = vld [vmem:[%s9308_s25 + $0x738] sm:$0xff]  }
  0xac   : > { %7945 = vmatpush3.bf16.msra.mxu0 %v8872_v26  ;;  %v8912_v26 = vld [vmem:[%s9308_s25 + $0x638] sm:$0xff]  }
  0xad   : > { %7973 = vmatpush3.bf16.msra.mxu1 %v8873_v27  ;;  %7946 = vmatprep.subr.bf16.mxu0 %v8874_v28  ;;  %v8913_v27 = vld [vmem:[%s9308_s25 + $0x6b8] sm:$0xff]   ;;  %v8914_v28 = vld [vmem:[%s9308_s25 + $0x670] sm:$0xff]  }
  0xae   : > { %7974 = vmatprep.subr.bf16.mxu1 %v8875_v29  ;;  %v8915_v29 = vld [vmem:[%s9308_s25 + $0x6f0] sm:$0xff]  }
  0xb0   : > { %7947 = vmatpush3.bf16.msra.mxu0 %v8876_v30  ;;  %v8916_v30 = vld [vmem:[%s9308_s25 + $0x630] sm:$0xff]  }
  0xb1   : > { %7975 = vmatpush3.bf16.msra.mxu1 %v8877_v31  ;;  %7988 = vmatprep.subr.bf16.mxu0 %v8878_v40  ;;  %v8917_v31 = vld [vmem:[%s9308_s25 + $0x6b0] sm:$0xff]  }
  0xb2   : > { %8016 = vmatprep.subr.bf16.mxu1 %v8879_v41  ;;  %v8920_v41 = vld [vmem:[%s9308_s25 + $0x628] sm:$0xff]  }
  0xb3   : > { %5634 = vmatmul.mubr.bf16.vlgmr.msra.gmra.mxu0 %v7070_v36  ;;  %v8918_v36 = vld [vmem:[%s9308_s25 + $0x668] sm:$0xff]  }
  0xb4   : > { %5683 = vmatmul.mubr.bf16.vlgmr.msra.gmra.mxu1 %v7072_v38  ;;  %7989 = vmatpush3.bf16.msra.mxu0 %v8880_v42  ;;  %v413_v38 = vld [vmem:[%s9344_s29 + $0x258] sm:$0xff] }
  0xb5   : > { %8017 = vmatpush3.bf16.msra.mxu1 %v8881_v43  ;;  %7990 = vmatprep.subr.bf16.mxu0 %v8882_v44  ;;  %v7141_v40 = vcombine.high %v413_v38, %v445_v39  ;;  %v7140_v42 = vcombine.low %v413_v38, %v445_v39  ;;  %v8921_v43 = vld [vmem:[%s9308_s25 + $0x6a8] sm:$0xff]   ;;  %v8922_v44 = vld [vmem:[%s9308_s25 + $0x660] sm:$0xff]  }
  0xb6   : > { %8018 = vmatprep.subr.bf16.mxu1 %v8883_v45  ;;  %5641 = vmatprep.mubr.bf16.mxu0 %v7135_v50  ;;  %v8923_v45 = vld [vmem:[%s9308_s25 + $0x6e0] sm:$0xff]   ;;  %v8928_v50 = vld [vmem:[%s9308_s25 + $0x618] sm:$0xff]   ;;  %v8950_v38 = vld [vmem:[%s9308_s25 + $0x768] sm:$0xff]  }
  0xb7   : > { %5690 = vmatprep.mubr.bf16.mxu1 %v7137_v56  ;;  %v8932_v56 = vld [vmem:[%s9308_s25 + $0x610] sm:$0xff]  }
  0xb8   : > { %7991 = vmatpush3.bf16.msra.mxu0 %v8884_v46  ;;  %v8924_v46 = vld [vmem:[%s9308_s25 + $0x620] sm:$0xff]  }
  0xb9   : > { %8019 = vmatpush3.bf16.msra.mxu1 %v8885_v47  ;;  %7992 = vmatprep.subr.bf16.mxu0 %v8886_v52  ;;  %v8925_v47 = vld [vmem:[%s9308_s25 + $0x6a0] sm:$0xff]   ;;  %v8930_v52 = vld [vmem:[%s9308_s25 + $0x650] sm:$0xff]  }
  0xba   : > { %8020 = vmatprep.subr.bf16.mxu1 %v8887_v53 }
  0xbb   : > { %5642 = vmatmul.mubr.bf16.gmra.mxu0 %v7134_v51  ;;  %v8929_v51 = vld [vmem:[%s9308_s25 + $0x698] sm:$0xff]  }
  0xbc   : > { %7993 = vmatpush3.bf16.msra.mxu0 %v8888_v57  ;;  %5691 = vmatmul.mubr.bf16.gmra.mxu1 %v7136_v58  ;;  %v8933_v58 = vld [vmem:[%s9308_s25 + $0x690] sm:$0xff]  }
  0xbd   : > { %8021 = vmatpush3.bf16.msra.mxu1 %v8889_v59  ;;  %7994 = vmatprep.subr.bf16.mxu0 %v8890_v60 }
  0xbe   : > { %8022 = vmatprep.subr.bf16.mxu1 %v8891_v61  ;;  %5731 = vmatprep.mubr.bf16.mxu0 %v7075_v19  ;;  %v8934_v61 = vld [vmem:[%s9308_s25 + $0x648] sm:$0xff]   ;;  %v8943_v19 = vld [vmem:[%s9308_s25 + $0x7f8] sm:$0xff]  }
  0xbf   : > { %5780 = vmatprep.mubr.bf16.mxu1 %v7077_v23  ;;  %v7053_v23 = vld [vmem:[%s316_s7] ss:$0 sm:$0xff] }
  0xc0   : > { %7995 = vmatpush3.bf16.msra.mxu0 %v8892_v62 }
  0xc1   : > { %8023 = vmatpush3.bf16.msra.mxu1 %v8893_v63  ;;  %7996 = vmatprep.subr.bf16.mxu0 %v8894_v0  ;;  %v8935_v63 = vld [vmem:[%s9308_s25 + $0x6c8] sm:$0xff]  }
  0xc2   : > { %8024 = vmatprep.subr.bf16.mxu1 %v8895_v1  ;;  %v8936_v0 = vld [vmem:[%s9308_s25 + $0x608] sm:$0xff]  }
  0xc3   : > { %v8937_v1 = vld [vmem:[%s9308_s25 + $0x688] sm:$0xff]  }
  0xc4   : > { %7997 = vmatpush3.bf16.msra.mxu0 %v8896_v2 }
  0xc5   : > { %8025 = vmatpush3.bf16.msra.mxu1 %v8897_v3  ;;  %7998 = vmatprep.subr.bf16.mxu0 %v8898_v4  ;;  %v8938_v3 = vld [vmem:[%s9308_s25 + $0x640] sm:$0xff]  }
  0xc6   : > { %8026 = vmatprep.subr.bf16.mxu1 %v8899_v5  ;;  %v8939_v4 = vld [vmem:[%s9308_s25 + $0x6c0] sm:$0xff]  }
  0xc7   : > { %v8940_v5 = vld [vmem:[%s9308_s25 + $0x600] sm:$0xff]  }
  0xc8   : > { %7999 = vmatpush3.bf16.msra.mxu0 %v8900_v6  ;;  %v8941_v6 = vld [vmem:[%s9308_s25 + $0x680] sm:$0xff]  }
  0xc9   : > { %8027 = vmatpush3.bf16.msra.mxu1 %v8901_v7  ;;  %8000 = vmatprep.subr.bf16.mxu0 %v8902_v8 }
  0xca   : > { %8028 = vmatprep.subr.bf16.mxu1 %v8903_v9  ;;  %v350_v9 = vld [vmem:[%s9344_s29 + $0x60] sm:$0xff] }
  0xcc   : > { %8001 = vmatpush3.bf16.msra.mxu0 %v8904_v10  ;;  %v382_v10 = vld [vmem:[%s9344_s29 + $0x160] sm:$0xff] }
  0xcd   : > { %8029 = vmatpush3.bf16.msra.mxu1 %v8905_v11  ;;  %8002 = vmatprep.subr.bf16.mxu0 %v8906_v12  ;;  %v351_v11 = vld [vmem:[%s9344_s29 + $0x68] sm:$0xff]  ;;  %v7078_v12 = vcombine.low %v350_v9, %v382_v10 }
  0xce   : > { %8030 = vmatprep.subr.bf16.mxu1 %v8907_v13  ;;  %v7079_v13 = vcombine.high %v350_v9, %v382_v10  ;;  %v8964_v9 = vld [vmem:[%s9308_s25 + $0x710] sm:$0xff]  }
  0xd0   : > { %8003 = vmatpush3.bf16.msra.mxu0 %v8908_v14  ;;  %v383_v14 = vld [vmem:[%s9344_s29 + $0x168] sm:$0xff] }
  0xd1   : > { %8031 = vmatpush3.bf16.msra.mxu1 %v8909_v15  ;;  %8044 = vmatprep.subr.bf16.mxu0 %v8910_v24  ;;  %v7080_v15 = vcombine.low %v351_v11, %v383_v14  ;;  %v7081_v16 = vcombine.high %v351_v11, %v383_v14 }
  0xd2   : > { %8072 = vmatprep.subr.bf16.mxu1 %v8911_v25  ;;  %v8946_v25 = vld [vmem:[%s9308_s25 + $0x770] sm:$0xff]  }
  0xd3   : > { %5732 = vmatmul.mubr.bf16.vlgmr.msra.gmra.mxu0 %v7074_v18 }
  0xd4   : > { %5781 = vmatmul.mubr.bf16.vlgmr.msra.gmra.mxu1 %v7076_v22  ;;  %8045 = vmatpush3.bf16.msra.mxu0 %v8912_v26  ;;  %v8945_v22 = vld [vmem:[%s9308_s25 + $0x7b8] sm:$0xff]  }
  0xd5   : > { %8073 = vmatpush3.bf16.msra.mxu1 %v8913_v27  ;;  %8046 = vmatprep.subr.bf16.mxu0 %v8914_v28  ;;  %v8947_v28 = vld [vmem:[%s9308_s25 + $0x7f0] sm:$0xff]  }
  0xd6   : > { %8074 = vmatprep.subr.bf16.mxu1 %v8915_v29  ;;  %5739 = vmatprep.mubr.bf16.mxu0 %v7139_v34 }
  0xd7   : > { %5788 = vmatprep.mubr.bf16.mxu1 %v7141_v40 }
  0xd8   : > { %8047 = vmatpush3.bf16.msra.mxu0 %v8916_v30  ;;  %v8948_v30 = vld [vmem:[%s9308_s25 + $0x730] sm:$0xff]  }
  0xd9   : > { %8075 = vmatpush3.bf16.msra.mxu1 %v8917_v31  ;;  %8048 = vmatprep.subr.bf16.mxu0 %v8918_v36 }
  0xda   : > { %8076 = vmatprep.subr.bf16.mxu1 %v8919_v37 }
  0xdb   : > { %5740 = vmatmul.mubr.bf16.gmra.mxu0 %v7138_v35  ;;  %v446_v35 = vld [vmem:[%s9344_s29 + $0x360] sm:$0xff] }
  0xdc   : > { %8049 = vmatpush3.bf16.msra.mxu0 %v8920_v41  ;;  %5789 = vmatmul.mubr.bf16.gmra.mxu1 %v7140_v42  ;;  %v7143_v36 = vcombine.high %v414_v33, %v446_v35  ;;  %v7142_v37 = vcombine.low %v414_v33, %v446_v35  ;;  %v8951_v41 = vld [vmem:[%s9308_s25 + $0x7e8] sm:$0xff]   ;;  %v8973_v33 = vld [vmem:[%s9308_s25 + $0x780] sm:$0xff]  }
  0xdd   : > { %8077 = vmatpush3.bf16.msra.mxu1 %v8921_v43  ;;  %8050 = vmatprep.subr.bf16.mxu0 %v8922_v44  ;;  %v415_v42 = vld [vmem:[%s9344_s29 + $0x268] sm:$0xff] }
  0xde   : > { %8078 = vmatprep.subr.bf16.mxu1 %v8923_v45  ;;  %5829 = vmatprep.mubr.bf16.mxu0 %v7079_v13  ;;  %v447_v43 = vld [vmem:[%s9344_s29 + $0x368] sm:$0xff] }
  0xdf   : > { %5878 = vmatprep.mubr.bf16.mxu1 %v7081_v16  ;;  %v7145_v45 = vcombine.high %v415_v42, %v447_v43 }
  0xe0   : > { %8051 = vmatpush3.bf16.msra.mxu0 %v8924_v46  ;;  %v8952_v46 = vld [vmem:[%s9308_s25 + $0x728] sm:$0xff]  }
  0xe1   : > { %8079 = vmatpush3.bf16.msra.mxu1 %v8925_v47  ;;  %8052 = vmatprep.subr.bf16.mxu0 %v8926_v48  ;;  %v7144_v47 = vcombine.low %v415_v42, %v447_v43 }
  0xe2   : > { %8080 = vmatprep.subr.bf16.mxu1 %v8927_v49 }
  0xe4   : > { %8053 = vmatpush3.bf16.msra.mxu0 %v8928_v50  ;;  %v8953_v50 = vld [vmem:[%s9308_s25 + $0x7a8] sm:$0xff]  }
  0xe5   : > { %8081 = vmatpush3.bf16.msra.mxu1 %v8929_v51  ;;  %8054 = vmatprep.subr.bf16.mxu0 %v8930_v52 }
  0xe6   : > { %8082 = vmatprep.subr.bf16.mxu1 %v8931_v54 }
  0xe8   : > { %8055 = vmatpush3.bf16.msra.mxu0 %v8932_v56  ;;  %v8955_v56 = vld [vmem:[%s9308_s25 + $0x7e0] sm:$0xff]  }
  0xe9   : > { %8083 = vmatpush3.bf16.msra.mxu1 %v8933_v58  ;;  %8056 = vmatprep.subr.bf16.mxu0 %v8934_v61  ;;  %v8957_v61 = vld [vmem:[%s9308_s25 + $0x7a0] sm:$0xff]  }
  0xea   : > { %8084 = vmatprep.subr.bf16.mxu1 %v8935_v63 }
  0xec   : > { %8057 = vmatpush3.bf16.msra.mxu0 %v8936_v0  ;;  %v8958_v0 = vld [vmem:[%s9308_s25 + $0x758] sm:$0xff]  }
  0xed   : > { %8085 = vmatpush3.bf16.msra.mxu1 %v8937_v1  ;;  %8058 = vmatprep.subr.bf16.mxu0 %v8938_v3  ;;  %v8959_v1 = vld [vmem:[%s9308_s25 + $0x7d8] sm:$0xff]  }
  0xee   : > { %8086 = vmatprep.subr.bf16.mxu1 %v8939_v4  ;;  %v8960_v3 = vld [vmem:[%s9308_s25 + $0x718] sm:$0xff]  }
  0xef   : > { %v8961_v4 = vld [vmem:[%s9308_s25 + $0x798] sm:$0xff]  }
  0xf0   : > { %8059 = vmatpush3.bf16.msra.mxu0 %v8940_v5  ;;  %v8962_v5 = vld [vmem:[%s9308_s25 + $0x750] sm:$0xff]  }
  0xf1   : > { %8087 = vmatpush3.bf16.msra.mxu1 %v8941_v6  ;;  %8100 = vmatprep.subr.bf16.mxu0 %v8942_v17 }
  0xf2   : > { %8128 = vmatprep.subr.bf16.mxu1 %v8943_v19 }
  0xf3   : > { %v7724_v53 = vpop.f32.mrf.mxu0  ;;  %5830 = vmatmul.mubr.bf16.vlgmr.msra.gmra.mxu0 %v7078_v12  ;;  %v8965_v12 = vld [vmem:[%s9308_s25 + $0x790] sm:$0xff]  }
  0xf4   : > { %v7752_v55 = vpop.f32.mrf.mxu1  ;;  %5879 = vmatmul.mubr.bf16.vlgmr.msra.gmra.mxu1 %v7080_v15  ;;  %8101 = vmatpush3.bf16.msra.mxu0 %v8944_v21  ;;  %v8966_v15 = vld [vmem:[%s9308_s25 + $0x748] sm:$0xff]  }
  0xf5   : > { %v7725_v57 = vpop.f32.mrf.mxu0  ;;  %8129 = vmatpush3.bf16.msra.mxu1 %v8945_v22  ;;  %8102 = vmatprep.subr.bf16.mxu0 %v8946_v25 }
  0xf6   : > { %v7726_v59 = vadd.f32 %v7725_v57, %v7724_v53  ;;  %v7753_v60 = vpop.f32.mrf.mxu1  ;;  %8130 = vmatprep.subr.bf16.mxu1 %v8947_v28  ;;  %5837 = vmatprep.mubr.bf16.mxu0 %v7143_v36  ;;  %v8954_v53 = vld [vmem:[%s9308_s25 + $0x760] sm:$0xff]   ;;  %v352_v36 = vld [vmem:[%s9344_s29 + $0x70] sm:$0xff] }
  0xf7   : > { %v7754_v62 = vadd.f32 %v7753_v60, %v7752_v55  ;;  %v7727_v2 = vpop.f32.mrf.mxu0  ;;  %5886 = vmatprep.mubr.bf16.mxu1 %v7145_v45 }
  0xf8   : > { %v7755_v7 = vpop.f32.mrf.mxu1  ;;  %v5244_v24 = vadd.f32 %v7726_v59, %v7053_v23  ;;  %8103 = vmatpush3.bf16.msra.mxu0 %v8948_v30  ;;  %v8956_v59 = vld [vmem:[%s9308_s25 + $0x720] sm:$0xff]  }
  0xf9   : > { %v7728_v8 = vpop.f32.mrf.mxu0  ;;  %8131 = vmatpush3.bf16.msra.mxu1 %v8949_v32  ;;  %8104 = vmatprep.subr.bf16.mxu0 %v8950_v38  ;;  %v8972_v32 = vld [vmem:[%s9308_s25 + $0x700] sm:$0xff]   ;;  %v353_v38 = vld [vmem:[%s9344_s29 + $0x78] sm:$0xff] }
  0xfa   : > { %v7729_v18 = vadd.f32 %v7728_v8, %v7727_v2  ;;  %v7756_v20 = vpop.f32.mrf.mxu1  ;;  %v9602_v29 = vadd.f32 %v7754_v62, %v5244_v24  ;;  %8132 = vmatprep.subr.bf16.mxu1 %v8951_v41  ;;  %v8963_v8 = vld [vmem:[%s9308_s25 + $0x7d0] sm:$0xff]   ;;  %v385_v41 = vld [vmem:[%s9344_s29 + $0x178] sm:$0xff] }
  0xfb   : > { %v7757_v27 = vadd.f32 %v7756_v20, %v7755_v7  ;;  %v7730_v34 = vpop.f32.mrf.mxu0  ;;  %5838 = vmatmul.mubr.bf16.gmra.mxu0 %v7142_v37  ;;  %v8968_v20 = vld [vmem:[%s9308_s25 + $0x708] sm:$0xff]   ;;  %v384_v37 = vld [vmem:[%s9344_s29 + $0x170] sm:$0xff]  ;;  %v7085_v45 = vcombine.high %v353_v38, %v385_v41 }
  0xfc   : > { %v5247_v26 = vadd.f32 %v7729_v18, %v7053_v23  ;;  %v7758_v40 = vpop.f32.mrf.mxu1  ;;  %8105 = vmatpush3.bf16.msra.mxu0 %v8952_v46  ;;  %5887 = vmatmul.mubr.bf16.gmra.mxu1 %v7144_v47  ;;  %v8967_v18 = vld [vmem:[%s9308_s25 + $0x7c8] sm:$0xff]   ;;  %v8974_v46 = vld [vmem:[%s9308_s25 + $0x878] sm:$0xff]  }
  0xfd   : > { %v7731_v39 = vpop.f32.mrf.mxu0  ;;  %8133 = vmatpush3.bf16.msra.mxu1 %v8953_v50  ;;  %8106 = vmatprep.subr.bf16.mxu0 %v8954_v53 }
  0xfe   : > { %v9605_v31 = vadd.f32 %v7757_v27, %v5247_v26  ;;  %v7732_v44 = vadd.f32 %v7731_v39, %v7730_v34  ;;  %v7759_v49 = vpop.f32.mrf.mxu1  ;;  %8134 = vmatprep.subr.bf16.mxu1 %v8955_v56  ;;  %v8970_v26 = vld [vmem:[%s9308_s25 + $0x740] sm:$0xff]   ;;  %5976 = vmatprep.mubr.bf16.mxu1 %v7085_v45  ;;  %v8978_v56 = vld [vmem:[%s9308_s25 + $0x870] sm:$0xff]  }
  0xff   : > { %v7733_v48 = vpop.f32.mrf.mxu0  ;;  %v7760_v52 = vadd.f32 %v7759_v49, %v7758_v40  ;;  %v8971_v27 = vld [vmem:[%s9308_s25 + $0x7c0] sm:$0xff]   ;;  %v7083_v40 = vcombine.high %v352_v36, %v384_v37 }
 0x100   : > { %v5252_v51 = vadd.f32 %v7732_v44, %v7053_v23  ;;  %v7761_v55 = vpop.f32.mrf.mxu1  ;;  %8107 = vmatpush3.bf16.msra.mxu0 %v8956_v59  ;;  %v7084_v44 = vcombine.low %v353_v38, %v385_v41  ;;  %v8979_v59 = vld [vmem:[%s9308_s25 + $0x8f0] sm:$0xff]   ;;  %v8999_v38 = vld [vmem:[%s9308_s25 + $0x8c8] sm:$0xff]  }
 0x101   : > { %v7734_v54 = vpop.f32.mrf.mxu0  ;;  %8135 = vmatpush3.bf16.msra.mxu1 %v8957_v61  ;;  %8108 = vmatprep.subr.bf16.mxu0 %v8958_v0  ;;  %v8980_v61 = vld [vmem:[%s9308_s25 + $0x830] sm:$0xff]  }
 0x102   : > { %v9618_v57 = vadd.f32 %v7760_v52, %v5252_v51  ;;  %v7735_v58 = vadd.f32 %v7734_v54, %v7733_v48  ;;  %v7762_v60 = vpop.f32.mrf.mxu1  ;;  %8136 = vmatprep.subr.bf16.mxu1 %v8959_v1  ;;  %5927 = vmatprep.mubr.bf16.mxu0 %v7083_v40  ;;  %v8975_v48 = vld [vmem:[%s9308_s25 + $0x8f8] sm:$0xff]   ;;  %v416_v0 = vld [vmem:[%s9344_s29 + $0x270] sm:$0xff] }
 0x103   : > { %v7763_v63 = vadd.f32 %v7762_v60, %v7761_v55  ;;  %v8976_v51 = vld [vmem:[%s9308_s25 + $0x838] sm:$0xff]   ;;  %v448_v1 = vld [vmem:[%s9344_s29 + $0x370] sm:$0xff] }
 0x104   : > { %v5255_v62 = vadd.f32 %v7735_v58, %v7053_v23  ;;  %8109 = vmatpush3.bf16.msra.mxu0 %v8960_v3  ;;  %v8969_v23 = vld [vmem:[%s9308_s25 + $0x788] sm:$0xff]   ;;  %v8977_v54 = vld [vmem:[%s9308_s25 + $0x8b8] sm:$0xff]   ;;  %v7147_v3 = vcombine.high %v416_v0, %v448_v1 }
 0x105   : > { %8137 = vmatpush3.bf16.msra.mxu1 %v8961_v4  ;;  %8110 = vmatprep.subr.bf16.mxu0 %v8962_v5  ;;  %v7146_v4 = vcombine.low %v416_v0, %v448_v1  ;;  %v8982_v5 = vld [vmem:[%s9308_s25 + $0x868] sm:$0xff]   ;;  %v9007_v0 = vld [vmem:[%s9308_s25 + $0x9f8] sm:$0xff]  }
 0x106   : > { %v9624_v2 = vadd.f32 %v7763_v63, %v5255_v62  ;;  %8138 = vmatprep.subr.bf16.mxu1 %v8963_v8  ;;  %v8981_v63 = vld [vmem:[%s9308_s25 + $0x8b0] sm:$0xff]   ;;  %v449_v8 = vld [vmem:[%s9344_s29 + $0x378] sm:$0xff] }
 0x108   : > { %8111 = vmatpush3.bf16.msra.mxu0 %v8964_v9 }
 0x109   : > { %8139 = vmatpush3.bf16.msra.mxu1 %v8965_v12  ;;  %8112 = vmatprep.subr.bf16.mxu0 %v8966_v15  ;;  %v8985_v12 = vld [vmem:[%s9308_s25 + $0x8a8] sm:$0xff]   ;;  %v8988_v15 = vld [vmem:[%s9308_s25 + $0x820] sm:$0xff]  }
 0x10a   : > { %8140 = vmatprep.subr.bf16.mxu1 %v8967_v18  ;;  %v8991_v18 = vld [vmem:[%s9308_s25 + $0x8d8] sm:$0xff]  }
 0x10c   : > { %8113 = vmatpush3.bf16.msra.mxu0 %v8968_v20  ;;  %v8993_v20 = vld [vmem:[%s9308_s25 + $0x898] sm:$0xff]  }
 0x10d   : > { %8141 = vmatpush3.bf16.msra.mxu1 %v8969_v23  ;;  %8114 = vmatprep.subr.bf16.mxu0 %v8970_v26 }
 0x10e   : > { %8142 = vmatprep.subr.bf16.mxu1 %v8971_v27  ;;  %v8996_v27 = vld [vmem:[%s9308_s25 + $0x810] sm:$0xff]  }
 0x110   : > { %8115 = vmatpush3.bf16.msra.mxu0 %v8972_v32 }
 0x111   : > { %8143 = vmatpush3.bf16.msra.mxu1 %v8973_v33  ;;  %8156 = vmatprep.subr.bf16.mxu0 %v8974_v46  ;;  %v9003_v46 = vld [vmem:[%s9308_s25 + $0x8c0] sm:$0xff]  }
 0x112   : > { %8184 = vmatprep.subr.bf16.mxu1 %v8975_v48  ;;  %v9004_v48 = vld [vmem:[%s9308_s25 + $0x800] sm:$0xff]  }
 0x113   : > { %v7780_v6 = vpop.f32.mrf.mxu0 }
 0x114   : > { %v7808_v7 = vpop.f32.mrf.mxu1  ;;  %5977 = vmatmul.mubr.bf16.vlgmr.msra.gmra.mxu1 %v7084_v44 }
 0x115   : > { %v7781_v10 = vpop.f32.mrf.mxu0  ;;  %8185 = vmatpush3.bf16.msra.mxu1 %v8977_v54  ;;  %v355_v54 = vld [vmem:[%s9344_s29 + $0x88] sm:$0xff] }
 0x116   : > { %v7809_v11 = vpop.f32.mrf.mxu1  ;;  %v7782_v13 = vadd.f32 %v7781_v10, %v7780_v6  ;;  %8186 = vmatprep.subr.bf16.mxu1 %v8979_v59  ;;  %v8983_v6 = vld [vmem:[%s9308_s25 + $0x8e8] sm:$0xff]  }
 0x117   : > { %v7810_v14 = vadd.f32 %v7809_v11, %v7808_v7  ;;  %v7783_v16 = vpop.f32.mrf.mxu0  ;;  %v417_v7 = vld [vmem:[%s9344_s29 + $0x278] sm:$0xff]  ;;  %v8984_v10 = vld [vmem:[%s9308_s25 + $0x828] sm:$0xff]  }
 0x118   : > { %v7811_v17 = vpop.f32.mrf.mxu1  ;;  %v5342_v19 = vadd.f32 %v7782_v13, %v9602_v29  ;;  %v7149_v9 = vcombine.high %v417_v7, %v449_v8  ;;  %v7148_v11 = vcombine.low %v417_v7, %v449_v8  ;;  %v8986_v13 = vld [vmem:[%s9308_s25 + $0x860] sm:$0xff]   ;;  %v9009_v7 = vld [vmem:[%s9308_s25 + $0x9b8] sm:$0xff]  }
 0x119   : > { %v7784_v21 = vpop.f32.mrf.mxu0  ;;  %8187 = vmatpush3.bf16.msra.mxu1 %v8981_v63 }
 0x11a   : > { %v7812_v22 = vpop.f32.mrf.mxu1  ;;  %v9637_v24 = vadd.f32 %v7810_v14, %v5342_v19  ;;  %v7785_v25 = vadd.f32 %v7784_v21, %v7783_v16  ;;  %8188 = vmatprep.subr.bf16.mxu1 %v8983_v6  ;;  %5984 = vmatprep.mubr.bf16.mxu1 %v7149_v9  ;;  %v8987_v14 = vld [vmem:[%s9308_s25 + $0x8e0] sm:$0xff]   ;;  %v8992_v19 = vld [vmem:[%s9308_s25 + $0x818] sm:$0xff]  }
 0x11b   : > { %v7813_v29 = vadd.f32 %v7812_v22, %v7811_v17  ;;  %v7786_v30 = vpop.f32.mrf.mxu0  ;;  %v8989_v16 = vld [vmem:[%s9308_s25 + $0x8a0] sm:$0xff]   ;;  %v8990_v17 = vld [vmem:[%s9308_s25 + $0x858] sm:$0xff]   ;;  %v8994_v22 = vld [vmem:[%s9308_s25 + $0x850] sm:$0xff]  }
 0x11c   : > { %v5345_v28 = vadd.f32 %v7785_v25, %v9605_v31  ;;  %v7082_v31 = vcombine.low %v352_v36, %v384_v37  ;;  %v7814_v42 = vpop.f32.mrf.mxu1  ;;  %5985 = vmatmul.mubr.bf16.gmra.mxu1 %v7148_v11  ;;  %v8995_v25 = vld [vmem:[%s9308_s25 + $0x8d0] sm:$0xff]  }
 0x11d   : > { %v7787_v35 = vpop.f32.mrf.mxu0  ;;  %8189 = vmatpush3.bf16.msra.mxu1 %v8985_v12  ;;  %v9011_v11 = vld [vmem:[%s9308_s25 + $0x9f0] sm:$0xff]  }
 0x11e   : > { %v9644_v34 = vadd.f32 %v7813_v29, %v5345_v28  ;;  %v7788_v39 = vadd.f32 %v7787_v35, %v7786_v30  ;;  %v7815_v49 = vpop.f32.mrf.mxu1  ;;  %5928 = vmatmul.mubr.bf16.vlgmr.msra.gmra.mxu0 %v7082_v31  ;;  %8190 = vmatprep.subr.bf16.mxu1 %v8987_v14  ;;  %v8997_v30 = vld [vmem:[%s9308_s25 + $0x890] sm:$0xff]   ;;  %v8998_v35 = vld [vmem:[%s9308_s25 + $0x848] sm:$0xff]  }
 0x11f   : > { %v7789_v43 = vpop.f32.mrf.mxu0  ;;  %v7816_v52 = vadd.f32 %v7815_v49, %v7814_v42  ;;  %8157 = vmatpush3.bf16.msra.mxu0 %v8976_v51  ;;  %5935 = vmatprep.mubr.bf16.mxu0 %v7147_v3  ;;  %v9000_v31 = vld [vmem:[%s9308_s25 + $0x808] sm:$0xff]   ;;  %v354_v51 = vld [vmem:[%s9344_s29 + $0x80] sm:$0xff]  ;;  %v9012_v14 = vld [vmem:[%s9308_s25 + $0x930] sm:$0xff]  }
 0x120   : > { %v5350_v47 = vadd.f32 %v7788_v39, %v9618_v57  ;;  %v7817_v55 = vpop.f32.mrf.mxu1  ;;  %8158 = vmatprep.subr.bf16.mxu0 %v8978_v56 }
 0x121   : > { %v7790_v50 = vpop.f32.mrf.mxu0  ;;  %8191 = vmatpush3.bf16.msra.mxu1 %v8989_v16  ;;  %v9013_v16 = vld [vmem:[%s9308_s25 + $0x9b0] sm:$0xff]  }
 0x122   : > { %v7791_v53 = vadd.f32 %v7790_v50, %v7789_v43  ;;  %v9656_v57 = vadd.f32 %v7816_v52, %v5350_v47  ;;  %v7818_v60 = vpop.f32.mrf.mxu1  ;;  %8192 = vmatprep.subr.bf16.mxu1 %v8991_v18  ;;  %v9001_v43 = vld [vmem:[%s9308_s25 + $0x888] sm:$0xff]   ;;  %v9005_v50 = vld [vmem:[%s9308_s25 + $0x880] sm:$0xff]  }
 0x123   : > { %v7819_v62 = vadd.f32 %v7818_v60, %v7817_v55  ;;  %8159 = vmatpush3.bf16.msra.mxu0 %v8980_v61  ;;  %v387_v55 = vld [vmem:[%s9344_s29 + $0x188] sm:$0xff]  ;;  %v450_v18 = vld [vmem:[%s9344_s29 + $0x380] sm:$0xff] }
 0x124   : > { %v5353_v58 = vadd.f32 %v7791_v53, %v9624_v2  ;;  %8160 = vmatprep.subr.bf16.mxu0 %v8982_v5  ;;  %v386_v53 = vld [vmem:[%s9344_s29 + $0x180] sm:$0xff]  ;;  %v7088_v60 = vcombine.low %v355_v54, %v387_v55  ;;  %v7089_v61 = vcombine.high %v355_v54, %v387_v55  ;;  %v9031_v54 = vld [vmem:[%s9308_s25 + $0x9c8] sm:$0xff]  }
 0x125   : > { %8193 = vmatpush3.bf16.msra.mxu1 %v8993_v20  ;;  %v7087_v59 = vcombine.high %v354_v51, %v386_v53 }
 0x126   : > { %v9665_v2 = vadd.f32 %v7819_v62, %v5353_v58  ;;  %5936 = vmatmul.mubr.bf16.gmra.mxu0 %v7146_v4  ;;  %8194 = vmatprep.subr.bf16.mxu1 %v8995_v25  ;;  %v7086_v58 = vcombine.low %v354_v51, %v386_v53  ;;  %v9006_v62 = vld [vmem:[%s9308_s25 + $0x978] sm:$0xff]   ;;  %v451_v25 = vld [vmem:[%s9344_s29 + $0x388] sm:$0xff] }
 0x127   : > { %8161 = vmatpush3.bf16.msra.mxu0 %v8984_v10  ;;  %6025 = vmatprep.mubr.bf16.mxu0 %v7087_v59  ;;  %v9008_v4 = vld [vmem:[%s9308_s25 + $0x938] sm:$0xff]   ;;  %v9010_v10 = vld [vmem:[%s9308_s25 + $0x970] sm:$0xff]   ;;  %v9030_v51 = vld [vmem:[%s9308_s25 + $0x948] sm:$0xff]  }
 0x128   : > { %8162 = vmatprep.subr.bf16.mxu0 %v8986_v13  ;;  %6074 = vmatprep.mubr.bf16.mxu1 %v7089_v61 }
 0x129   : > { %8195 = vmatpush3.bf16.msra.mxu1 %v8997_v30  ;;  %v9018_v30 = vld [vmem:[%s9308_s25 + $0x960] sm:$0xff]  }
 0x12a   : > { %8196 = vmatprep.subr.bf16.mxu1 %v8999_v38  ;;  %v9024_v38 = vld [vmem:[%s9308_s25 + $0x918] sm:$0xff]  }
 0x12b   : > { %8163 = vmatpush3.bf16.msra.mxu0 %v8988_v15 }
 0x12c   : > { %8164 = vmatprep.subr.bf16.mxu0 %v8990_v17  ;;  %v418_v17 = vld [vmem:[%s9344_s29 + $0x280] sm:$0xff] }
 0x12d   : > { %8197 = vmatpush3.bf16.msra.mxu1 %v9001_v43  ;;  %v7151_v20 = vcombine.high %v418_v17, %v450_v18  ;;  %v9027_v43 = vld [vmem:[%s9308_s25 + $0x9d0] sm:$0xff]  }
 0x12e   : > { %8198 = vmatprep.subr.bf16.mxu1 %v9003_v46 }
 0x12f   : > { %8165 = vmatpush3.bf16.msra.mxu0 %v8992_v19 }
 0x130   : > { %8166 = vmatprep.subr.bf16.mxu0 %v8994_v22  ;;  %v9015_v22 = vld [vmem:[%s9308_s25 + $0x9e8] sm:$0xff]  }
 0x131   : > { %8199 = vmatpush3.bf16.msra.mxu1 %v9005_v50 }
 0x132   : > { %8240 = vmatprep.subr.bf16.mxu1 %v9007_v0  ;;  %v9035_v0 = vld [vmem:[%s9308_s25 + $0x9c0] sm:$0xff]  }
 0x133   : > { %v7836_v21 = vpop.f32.mrf.mxu0  ;;  %8167 = vmatpush3.bf16.msra.mxu0 %v8996_v27  ;;  %v9016_v27 = vld [vmem:[%s9308_s25 + $0x928] sm:$0xff]  }
 0x134   : > { %v7864_v23 = vpop.f32.mrf.mxu1  ;;  %8168 = vmatprep.subr.bf16.mxu0 %v8998_v35  ;;  %6075 = vmatmul.mubr.bf16.vlgmr.msra.gmra.mxu1 %v7088_v60  ;;  %v9021_v35 = vld [vmem:[%s9308_s25 + $0x9a0] sm:$0xff]   ;;  %v9033_v60 = vld [vmem:[%s9308_s25 + $0x988] sm:$0xff]  }
 0x135   : > { %v7837_v26 = vpop.f32.mrf.mxu0  ;;  %8241 = vmatpush3.bf16.msra.mxu1 %v9009_v7  ;;  %v388_v7 = vld [vmem:[%s9344_s29 + $0x190] sm:$0xff] }
 0x136   : > { %v7838_v28 = vadd.f32 %v7837_v26, %v7836_v21  ;;  %v7865_v29 = vpop.f32.mrf.mxu1  ;;  %8242 = vmatprep.subr.bf16.mxu1 %v9011_v11  ;;  %v7150_v21 = vcombine.low %v418_v17, %v450_v18  ;;  %v389_v11 = vld [vmem:[%s9344_s29 + $0x198] sm:$0xff] }
 0x137   : > { %v7866_v32 = vadd.f32 %v7865_v29, %v7864_v23  ;;  %v7839_v33 = vpop.f32.mrf.mxu0  ;;  %8169 = vmatpush3.bf16.msra.mxu0 %v9000_v31  ;;  %v419_v23 = vld [vmem:[%s9344_s29 + $0x288] sm:$0xff]  ;;  %v9039_v18 = vld [vmem:[%s9308_s25 + $0xaf8] sm:$0xff]  }
 0x138   : > { %v5440_v36 = vadd.f32 %v7838_v28, %v9637_v24  ;;  %v7867_v37 = vpop.f32.mrf.mxu1  ;;  %v9002_v24 = vld [vmem:[%s9308_s25 + $0x840] sm:$0xff]   ;;  %v7153_v26 = vcombine.high %v419_v23, %v451_v25  ;;  %v7152_v28 = vcombine.low %v419_v23, %v451_v25  ;;  %v9017_v29 = vld [vmem:[%s9308_s25 + $0x9a8] sm:$0xff]   ;;  %v9041_v25 = vld [vmem:[%s9308_s25 + $0xab8] sm:$0xff]  }
 0x139   : > { %v7840_v39 = vpop.f32.mrf.mxu0  ;;  %8170 = vmatprep.subr.bf16.mxu0 %v9002_v24  ;;  %8243 = vmatpush3.bf16.msra.mxu1 %v9013_v16  ;;  %v9028_v24 = vld [vmem:[%s9308_s25 + $0x910] sm:$0xff]   ;;  %v9038_v16 = vld [vmem:[%s9308_s25 + $0xa78] sm:$0xff]  }
 0x13a   : > { %v9688_v40 = vadd.f32 %v7866_v32, %v5440_v36  ;;  %v7841_v41 = vadd.f32 %v7840_v39, %v7839_v33  ;;  %v7868_v42 = vpop.f32.mrf.mxu1  ;;  %8244 = vmatprep.subr.bf16.mxu1 %v9015_v22  ;;  %6082 = vmatprep.mubr.bf16.mxu1 %v7153_v26  ;;  %v9019_v32 = vld [vmem:[%s9308_s25 + $0x9e0] sm:$0xff]   ;;  %v9022_v36 = vld [vmem:[%s9308_s25 + $0x958] sm:$0xff]  }
 0x13b   : > { %v7869_v44 = vadd.f32 %v7868_v42, %v7867_v37  ;;  %v7842_v47 = vpop.f32.mrf.mxu0  ;;  %8171 = vmatpush3.bf16.msra.mxu0 %v9004_v48  ;;  %v9020_v33 = vld [vmem:[%s9308_s25 + $0x920] sm:$0xff]   ;;  %v9023_v37 = vld [vmem:[%s9308_s25 + $0x9d8] sm:$0xff]  }
 0x13c   : > { %v5443_v45 = vadd.f32 %v7841_v41, %v9644_v34  ;;  %v7870_v34 = vpop.f32.mrf.mxu1  ;;  %8212 = vmatprep.subr.bf16.mxu0 %v9006_v62  ;;  %6083 = vmatmul.mubr.bf16.gmra.mxu1 %v7152_v28  ;;  %v9025_v39 = vld [vmem:[%s9308_s25 + $0x998] sm:$0xff]   ;;  %v9026_v41 = vld [vmem:[%s9308_s25 + $0x950] sm:$0xff]  }
 0x13d   : > { %v7843_v52 = vpop.f32.mrf.mxu0  ;;  %8245 = vmatpush3.bf16.msra.mxu1 %v9017_v29  ;;  %v9043_v29 = vld [vmem:[%s9308_s25 + $0xaf0] sm:$0xff]  }
 0x13e   : > { %v9695_v49 = vadd.f32 %v7869_v44, %v5443_v45  ;;  %v7844_v56 = vadd.f32 %v7843_v52, %v7842_v47  ;;  %v7871_v3 = vpop.f32.mrf.mxu1  ;;  %6026 = vmatmul.mubr.bf16.vlgmr.msra.gmra.mxu0 %v7086_v58  ;;  %8246 = vmatprep.subr.bf16.mxu1 %v9019_v32  ;;  %v9029_v47 = vld [vmem:[%s9308_s25 + $0x990] sm:$0xff]  }
 0x13f   : > { %v7845_v63 = vpop.f32.mrf.mxu0  ;;  %v7872_v5 = vadd.f32 %v7871_v3, %v7870_v34  ;;  %8213 = vmatpush3.bf16.msra.mxu0 %v9008_v4  ;;  %6033 = vmatprep.mubr.bf16.mxu0 %v7151_v20  ;;  %v9044_v32 = vld [vmem:[%s9308_s25 + $0xa30] sm:$0xff]  }
 0x140   : > { %v5448_v1 = vadd.f32 %v7844_v56, %v9656_v57  ;;  %v7873_v9 = vpop.f32.mrf.mxu1  ;;  %8214 = vmatprep.subr.bf16.mxu0 %v9010_v10  ;;  %v9032_v56 = vld [vmem:[%s9308_s25 + $0x908] sm:$0xff]   ;;  %v357_v10 = vld [vmem:[%s9344_s29 + $0x98] sm:$0xff] }
 0x141   : > { %v7846_v6 = vpop.f32.mrf.mxu0  ;;  %8247 = vmatpush3.bf16.msra.mxu1 %v9021_v35  ;;  %v9045_v35 = vld [vmem:[%s9308_s25 + $0xab0] sm:$0xff]  }
 0x142   : > { %v7847_v8 = vadd.f32 %v7846_v6, %v7845_v63  ;;  %v9708_v57 = vadd.f32 %v7872_v5, %v5448_v1  ;;  %v7874_v13 = vpop.f32.mrf.mxu1  ;;  %8248 = vmatprep.subr.bf16.mxu1 %v9023_v37  ;;  %v9036_v1 = vld [vmem:[%s9308_s25 + $0x900] sm:$0xff]   ;;  %v356_v6 = vld [vmem:[%s9344_s29 + $0x90] sm:$0xff] }
 0x143   : > { %v7875_v15 = vadd.f32 %v7874_v13, %v7873_v9  ;;  %8215 = vmatpush3.bf16.msra.mxu0 %v9012_v14  ;;  %v9037_v5 = vld [vmem:[%s9308_s25 + $0x980] sm:$0xff]   ;;  %v7090_v9 = vcombine.low %v356_v6, %v388_v7  ;;  %v7092_v14 = vcombine.low %v357_v10, %v389_v11  ;;  %v452_v37 = vld [vmem:[%s9344_s29 + $0x390] sm:$0xff] }
 0x144   : > { %v5451_v12 = vadd.f32 %v7847_v8, %v9665_v2  ;;  %v9014_v2 = vld [vmem:[%s9308_s25 + $0x968] sm:$0xff]  }
 0x145   : > { %8216 = vmatprep.subr.bf16.mxu0 %v9014_v2  ;;  %8249 = vmatpush3.bf16.msra.mxu1 %v9025_v39  ;;  %v9040_v2 = vld [vmem:[%s9308_s25 + $0xa38] sm:$0xff]  }
 0x146   : > { %v9716_v19 = vadd.f32 %v7875_v15, %v5451_v12  ;;  %6034 = vmatmul.mubr.bf16.gmra.mxu0 %v7150_v21  ;;  %8250 = vmatprep.subr.bf16.mxu1 %v9027_v43  ;;  %v7093_v15 = vcombine.high %v357_v10, %v389_v11  ;;  %v453_v43 = vld [vmem:[%s9344_s29 + $0x398] sm:$0xff]  ;;  %v9065_v11 = vld [vmem:[%s9308_s25 + $0xa88] sm:$0xff]  }
 0x147   : > { %8217 = vmatpush3.bf16.msra.mxu0 %v9016_v27 }
 0x148   : > { %8218 = vmatprep.subr.bf16.mxu0 %v9018_v30  ;;  %6172 = vmatprep.mubr.bf16.mxu1 %v7093_v15  ;;  %v9066_v15 = vld [vmem:[%s9308_s25 + $0xa40] sm:$0xff]  }
 0x149   : > { %8251 = vmatpush3.bf16.msra.mxu1 %v9029_v47  ;;  %v9050_v47 = vld [vmem:[%s9308_s25 + $0xa60] sm:$0xff]  }
 0x14a   : > { %8252 = vmatprep.subr.bf16.mxu1 %v9031_v54  ;;  %v9056_v54 = vld [vmem:[%s9308_s25 + $0xa18] sm:$0xff]  }
 0x14b   : > { %8219 = vmatpush3.bf16.msra.mxu0 %v9020_v33 }
 0x14c   : > { %8220 = vmatprep.subr.bf16.mxu0 %v9022_v36  ;;  %v420_v36 = vld [vmem:[%s9344_s29 + $0x290] sm:$0xff] }
 0x14d   : > { %8253 = vmatpush3.bf16.msra.mxu1 %v9033_v60  ;;  %v7154_v39 = vcombine.low %v420_v36, %v452_v37  ;;  %v9059_v60 = vld [vmem:[%s9308_s25 + $0xad0] sm:$0xff]  }
 0x14e   : > { %8254 = vmatprep.subr.bf16.mxu1 %v9035_v0 }
 0x14f   : > { %8221 = vmatpush3.bf16.msra.mxu0 %v9024_v38 }
 0x150   : > { %8222 = vmatprep.subr.bf16.mxu0 %v9026_v41  ;;  %v9047_v41 = vld [vmem:[%s9308_s25 + $0xae8] sm:$0xff]  }
 0x151   : > { %8255 = vmatpush3.bf16.msra.mxu1 %v9037_v5 }
 0x152   : > { %8296 = vmatprep.subr.bf16.mxu1 %v9039_v18  ;;  %v9068_v18 = vld [vmem:[%s9308_s25 + $0xa00] sm:$0xff]  }
 0x153   : > { %v7892_v31 = vpop.f32.mrf.mxu0  ;;  %8223 = vmatpush3.bf16.msra.mxu0 %v9028_v24  ;;  %v9048_v24 = vld [vmem:[%s9308_s25 + $0xa28] sm:$0xff]  }
 0x154   : > { %v7920_v42 = vpop.f32.mrf.mxu1  ;;  %8224 = vmatprep.subr.bf16.mxu0 %v9030_v51  ;;  %6173 = vmatmul.mubr.bf16.vlgmr.msra.gmra.mxu1 %v7092_v14  ;;  %v9053_v51 = vld [vmem:[%s9308_s25 + $0xaa0] sm:$0xff]  }
 0x155   : > { %v7893_v44 = vpop.f32.mrf.mxu0  ;;  %8297 = vmatpush3.bf16.msra.mxu1 %v9041_v25  ;;  %v359_v25 = vld [vmem:[%s9344_s29 + $0xa8] sm:$0xff] }
 0x156   : > { %v7894_v45 = vadd.f32 %v7893_v44, %v7892_v31  ;;  %v7921_v46 = vpop.f32.mrf.mxu1  ;;  %8298 = vmatprep.subr.bf16.mxu1 %v9043_v29  ;;  %v9046_v31 = vld [vmem:[%s9308_s25 + $0xa68] sm:$0xff]  }
 0x157   : > { %v7922_v48 = vadd.f32 %v7921_v46, %v7920_v42  ;;  %v7895_v50 = vpop.f32.mrf.mxu0  ;;  %8225 = vmatpush3.bf16.msra.mxu0 %v9032_v56  ;;  %v421_v42 = vld [vmem:[%s9344_s29 + $0x298] sm:$0xff]  ;;  %v9049_v46 = vld [vmem:[%s9308_s25 + $0xaa8] sm:$0xff]   ;;  %v9058_v56 = vld [vmem:[%s9308_s25 + $0xa50] sm:$0xff]  }
 0x158   : > { %v5538_v52 = vadd.f32 %v7894_v45, %v9688_v40  ;;  %v7923_v53 = vpop.f32.mrf.mxu1  ;;  %v9034_v40 = vld [vmem:[%s9308_s25 + $0x940] sm:$0xff]   ;;  %v7157_v44 = vcombine.high %v421_v42, %v453_v43  ;;  %v7156_v45 = vcombine.low %v421_v42, %v453_v43  ;;  %v9073_v43 = vld [vmem:[%s9308_s25 + $0xbb8] sm:$0xff]  }
 0x159   : > { %v7896_v55 = vpop.f32.mrf.mxu0  ;;  %8226 = vmatprep.subr.bf16.mxu0 %v9034_v40  ;;  %8299 = vmatpush3.bf16.msra.mxu1 %v9045_v35  ;;  %v9070_v35 = vld [vmem:[%s9308_s25 + $0xb78] sm:$0xff]  }
 0x15a   : > { %v9740_v34 = vadd.f32 %v7922_v48, %v5538_v52  ;;  %v7897_v58 = vadd.f32 %v7896_v55, %v7895_v50  ;;  %v7924_v59 = vpop.f32.mrf.mxu1  ;;  %8300 = vmatprep.subr.bf16.mxu1 %v9047_v41  ;;  %6180 = vmatprep.mubr.bf16.mxu1 %v7157_v44  ;;  %v9051_v48 = vld [vmem:[%s9308_s25 + $0xae0] sm:$0xff]   ;;  %v9054_v52 = vld [vmem:[%s9308_s25 + $0xa58] sm:$0xff]  }
 0x15b   : > { %v7925_v61 = vadd.f32 %v7924_v59, %v7923_v53  ;;  %v7898_v63 = vpop.f32.mrf.mxu0  ;;  %8227 = vmatpush3.bf16.msra.mxu0 %v9036_v1  ;;  %v9052_v50 = vld [vmem:[%s9308_s25 + $0xa20] sm:$0xff]   ;;  %v9055_v53 = vld [vmem:[%s9308_s25 + $0xad8] sm:$0xff]  }
 0x15c   : > { %v5541_v62 = vadd.f32 %v7897_v58, %v9695_v49  ;;  %v7091_v49 = vcombine.high %v356_v6, %v388_v7  ;;  %v7926_v12 = vpop.f32.mrf.mxu1  ;;  %8268 = vmatprep.subr.bf16.mxu0 %v9038_v16  ;;  %6181 = vmatmul.mubr.bf16.gmra.mxu1 %v7156_v45  ;;  %v9057_v55 = vld [vmem:[%s9308_s25 + $0xa98] sm:$0xff]   ;;  %v9063_v7 = vld [vmem:[%s9308_s25 + $0xac8] sm:$0xff]   ;;  %v9067_v16 = vld [vmem:[%s9308_s25 + $0xac0] sm:$0xff]  }
 0x15d   : > { %v7899_v4 = vpop.f32.mrf.mxu0  ;;  %8301 = vmatpush3.bf16.msra.mxu1 %v9049_v46  ;;  %v9075_v46 = vld [vmem:[%s9308_s25 + $0xbf0] sm:$0xff]  }
 0x15e   : > { %v9747_v3 = vadd.f32 %v7925_v61, %v5541_v62  ;;  %v7900_v8 = vadd.f32 %v7899_v4, %v7898_v63  ;;  %6123 = vmatprep.mubr.bf16.mxu0 %v7091_v49  ;;  %v7927_v20 = vpop.f32.mrf.mxu1  ;;  %8302 = vmatprep.subr.bf16.mxu1 %v9051_v48  ;;  %v9060_v61 = vld [vmem:[%s9308_s25 + $0xa10] sm:$0xff]   ;;  %v9062_v4 = vld [vmem:[%s9308_s25 + $0xa48] sm:$0xff]  }
 0x15f   : > { %v7901_v13 = vpop.f32.mrf.mxu0  ;;  %6124 = vmatmul.mubr.bf16.vlgmr.msra.gmra.mxu0 %v7090_v9  ;;  %v7928_v22 = vadd.f32 %v7927_v20, %v7926_v12  ;;  %v9061_v63 = vld [vmem:[%s9308_s25 + $0xa90] sm:$0xff]   ;;  %v9064_v9 = vld [vmem:[%s9308_s25 + $0xa08] sm:$0xff]   ;;  %v9069_v20 = vld [vmem:[%s9308_s25 + $0xa80] sm:$0xff]  }
 0x160   : > { %v5546_v17 = vadd.f32 %v7900_v8, %v9708_v57  ;;  %v7929_v26 = vpop.f32.mrf.mxu1  ;;  %8269 = vmatpush3.bf16.msra.mxu0 %v9040_v2  ;;  %v9042_v57 = vld [vmem:[%s9308_s25 + $0xa70] sm:$0xff]  }
 0x161   : > { %v7902_v21 = vpop.f32.mrf.mxu0  ;;  %8270 = vmatprep.subr.bf16.mxu0 %v9042_v57  ;;  %8303 = vmatpush3.bf16.msra.mxu1 %v9053_v51  ;;  %v9076_v48 = vld [vmem:[%s9308_s25 + $0xb30] sm:$0xff]  }
 0x162   : > { %v7903_v23 = vadd.f32 %v7902_v21, %v7901_v13  ;;  %v9760_v27 = vadd.f32 %v7928_v22, %v5546_v17  ;;  %v7930_v30 = vpop.f32.mrf.mxu1  ;;  %8304 = vmatprep.subr.bf16.mxu1 %v9055_v53  ;;  %v358_v22 = vld [vmem:[%s9344_s29 + $0xa0] sm:$0xff]  ;;  %v9077_v51 = vld [vmem:[%s9308_s25 + $0xbb0] sm:$0xff]  }
 0x163   : > { %v7931_v33 = vadd.f32 %v7930_v30, %v7929_v26  ;;  %v454_v53 = vld [vmem:[%s9344_s29 + $0x3a0] sm:$0xff] }
 0x164   : > { %v5549_v28 = vadd.f32 %v7903_v23, %v9716_v19  ;;  %8271 = vmatpush3.bf16.msra.mxu0 %v9044_v32  ;;  %v7155_v19 = vcombine.high %v420_v36, %v452_v37  ;;  %v390_v23 = vld [vmem:[%s9344_s29 + $0x1a0] sm:$0xff]  ;;  %v9071_v37 = vld [vmem:[%s9308_s25 + $0xbf8] sm:$0xff]  }
 0x165   : > { %8272 = vmatprep.subr.bf16.mxu0 %v9046_v31  ;;  %8305 = vmatpush3.bf16.msra.mxu1 %v9057_v55  ;;  %v7094_v57 = vcombine.low %v358_v22, %v390_v23  ;;  %v9072_v31 = vld [vmem:[%s9308_s25 + $0xb38] sm:$0xff]  }
 0x166   : > { %v9768_v38 = vadd.f32 %v7931_v33, %v5549_v28  ;;  %6131 = vmatprep.mubr.bf16.mxu0 %v7155_v19  ;;  %8306 = vmatprep.subr.bf16.mxu1 %v9059_v60  ;;  %v391_v28 = vld [vmem:[%s9344_s29 + $0x1a8] sm:$0xff] }
 0x167   : > { %6132 = vmatmul.mubr.bf16.gmra.mxu0 %v7154_v39  ;;  %v7096_v32 = vcombine.low %v359_v25, %v391_v28  ;;  %v7097_v33 = vcombine.high %v359_v25, %v391_v28  ;;  %v455_v60 = vld [vmem:[%s9344_s29 + $0x3a8] sm:$0xff] }
 0x168   : > { %8273 = vmatpush3.bf16.msra.mxu0 %v9048_v24  ;;  %v9095_v25 = vld [vmem:[%s9308_s25 + $0xbc8] sm:$0xff]  }
 0x169   : > { %8274 = vmatprep.subr.bf16.mxu0 %v9050_v47  ;;  %8307 = vmatpush3.bf16.msra.mxu1 %v9061_v63  ;;  %v9081_v63 = vld [vmem:[%s9308_s25 + $0xba8] sm:$0xff]  }
 0x16a   : > { %8308 = vmatprep.subr.bf16.mxu1 %v9063_v7  ;;  %6270 = vmatprep.mubr.bf16.mxu1 %v7097_v33  ;;  %v9087_v7 = vld [vmem:[%s9308_s25 + $0xbd8] sm:$0xff]  }
 0x16c   : > { %8275 = vmatpush3.bf16.msra.mxu0 %v9052_v50 }
 0x16d   : > { %8276 = vmatprep.subr.bf16.mxu0 %v9054_v52  ;;  %8309 = vmatpush3.bf16.msra.mxu1 %v9065_v11  ;;  %v422_v52 = vld [vmem:[%s9344_s29 + $0x2a0] sm:$0xff] }
 0x16e   : > { %8310 = vmatprep.subr.bf16.mxu1 %v9067_v16  ;;  %v7158_v55 = vcombine.low %v422_v52, %v454_v53 }
 0x170   : > { %8277 = vmatpush3.bf16.msra.mxu0 %v9056_v54  ;;  %v7159_v54 = vcombine.high %v422_v52, %v454_v53  ;;  %v9103_v52 = vld [vmem:[%s9308_s25 + $0xcf8] sm:$0xff]  }
 0x171   : > { %8278 = vmatprep.subr.bf16.mxu0 %v9058_v56  ;;  %8311 = vmatpush3.bf16.msra.mxu1 %v9069_v20  ;;  %v9078_v56 = vld [vmem:[%s9308_s25 + $0xb68] sm:$0xff]  }
 0x172   : > { %8352 = vmatprep.subr.bf16.mxu1 %v9071_v37  ;;  %v9100_v37 = vld [vmem:[%s9308_s25 + $0xb00] sm:$0xff]  }
 0x173   : > { %v7948_v58 = vpop.f32.mrf.mxu0 }
 0x174   : > { %v7976_v59 = vpop.f32.mrf.mxu1  ;;  %8279 = vmatpush3.bf16.msra.mxu0 %v9060_v61  ;;  %6271 = vmatmul.mubr.bf16.vlgmr.msra.gmra.mxu1 %v7096_v32 }
 0x175   : > { %v7949_v40 = vpop.f32.mrf.mxu0  ;;  %8280 = vmatprep.subr.bf16.mxu0 %v9062_v4  ;;  %8353 = vmatpush3.bf16.msra.mxu1 %v9073_v43  ;;  %v9084_v4 = vld [vmem:[%s9308_s25 + $0xb20] sm:$0xff]   ;;  %v361_v43 = vld [vmem:[%s9344_s29 + $0xb8] sm:$0xff] }
 0x176   : > { %v7977_v62 = vpop.f32.mrf.mxu1  ;;  %v7950_v0 = vadd.f32 %v7949_v40, %v7948_v58  ;;  %8354 = vmatprep.subr.bf16.mxu1 %v9075_v46  ;;  %v9079_v58 = vld [vmem:[%s9308_s25 + $0xbe8] sm:$0xff]  }
 0x177   : > { %v7978_v1 = vadd.f32 %v7977_v62, %v7976_v59  ;;  %v7951_v5 = vpop.f32.mrf.mxu0  ;;  %v423_v59 = vld [vmem:[%s9344_s29 + $0x2a8] sm:$0xff] }
 0x178   : > { %v7979_v6 = vpop.f32.mrf.mxu1  ;;  %v5636_v8 = vadd.f32 %v7950_v0, %v9740_v34  ;;  %8281 = vmatpush3.bf16.msra.mxu0 %v9064_v9  ;;  %v7161_v61 = vcombine.high %v423_v59, %v455_v60  ;;  %v9080_v40 = vld [vmem:[%s9308_s25 + $0xb28] sm:$0xff]   ;;  %v7160_v62 = vcombine.low %v423_v59, %v455_v60  ;;  %v9082_v0 = vld [vmem:[%s9308_s25 + $0xb60] sm:$0xff]   ;;  %v9089_v9 = vld [vmem:[%s9308_s25 + $0xb98] sm:$0xff]  }
 0x179   : > { %v7952_v49 = vpop.f32.mrf.mxu0  ;;  %8282 = vmatprep.subr.bf16.mxu0 %v9066_v15  ;;  %8355 = vmatpush3.bf16.msra.mxu1 %v9077_v51  ;;  %v9092_v15 = vld [vmem:[%s9308_s25 + $0xb10] sm:$0xff]   ;;  %v9105_v59 = vld [vmem:[%s9308_s25 + $0xcb8] sm:$0xff]  }
 0x17a   : > { %v7980_v10 = vpop.f32.mrf.mxu1  ;;  %v9793_v12 = vadd.f32 %v7978_v1, %v5636_v8  ;;  %v7953_v13 = vadd.f32 %v7952_v49, %v7951_v5  ;;  %8356 = vmatprep.subr.bf16.mxu1 %v9079_v58  ;;  %6278 = vmatprep.mubr.bf16.mxu1 %v7161_v61  ;;  %v9083_v1 = vld [vmem:[%s9308_s25 + $0xbe0] sm:$0xff]   ;;  %v9088_v8 = vld [vmem:[%s9308_s25 + $0xb18] sm:$0xff]  }
 0x17b   : > { %v7981_v14 = vadd.f32 %v7980_v10, %v7979_v6  ;;  %v7954_v17 = vpop.f32.mrf.mxu0  ;;  %v9085_v5 = vld [vmem:[%s9308_s25 + $0xba0] sm:$0xff]   ;;  %v9086_v6 = vld [vmem:[%s9308_s25 + $0xb58] sm:$0xff]   ;;  %v9090_v10 = vld [vmem:[%s9308_s25 + $0xb50] sm:$0xff]  }
 0x17c   : > { %v5639_v34 = vadd.f32 %v7953_v13, %v9747_v3  ;;  %8283 = vmatpush3.bf16.msra.mxu0 %v9068_v18  ;;  %v7095_v3 = vcombine.high %v358_v22, %v390_v23  ;;  %v7982_v29 = vpop.f32.mrf.mxu1  ;;  %6279 = vmatmul.mubr.bf16.gmra.mxu1 %v7160_v62  ;;  %v9091_v13 = vld [vmem:[%s9308_s25 + $0xbd0] sm:$0xff]  }
 0x17d   : > { %v7955_v2 = vpop.f32.mrf.mxu0  ;;  %8324 = vmatprep.subr.bf16.mxu0 %v9070_v35  ;;  %8357 = vmatpush3.bf16.msra.mxu1 %v9081_v63  ;;  %v9099_v35 = vld [vmem:[%s9308_s25 + $0xbc0] sm:$0xff]   ;;  %v9107_v62 = vld [vmem:[%s9308_s25 + $0xcf0] sm:$0xff]  }
 0x17e   : > { %v9800_v21 = vadd.f32 %v7981_v14, %v5639_v34  ;;  %v7956_v26 = vadd.f32 %v7955_v2, %v7954_v17  ;;  %6221 = vmatprep.mubr.bf16.mxu0 %v7095_v3  ;;  %v7983_v19 = vpop.f32.mrf.mxu1  ;;  %8358 = vmatprep.subr.bf16.mxu1 %v9083_v1  ;;  %v9093_v17 = vld [vmem:[%s9308_s25 + $0xb90] sm:$0xff]   ;;  %v9094_v2 = vld [vmem:[%s9308_s25 + $0xb48] sm:$0xff]  }
 0x17f   : > { %v7957_v30 = vpop.f32.mrf.mxu0  ;;  %6222 = vmatmul.mubr.bf16.vlgmr.msra.gmra.mxu0 %v7094_v57  ;;  %v7984_v41 = vadd.f32 %v7983_v19, %v7982_v29  ;;  %v9096_v57 = vld [vmem:[%s9308_s25 + $0xb08] sm:$0xff]   ;;  %v9108_v1 = vld [vmem:[%s9308_s25 + $0xc30] sm:$0xff]  }
 0x180   : > { %v5644_v36 = vadd.f32 %v7956_v26, %v9760_v27  ;;  %v7985_v44 = vpop.f32.mrf.mxu1  ;;  %8325 = vmatpush3.bf16.msra.mxu0 %v9072_v31  ;;  %v9074_v27 = vld [vmem:[%s9308_s25 + $0xb70] sm:$0xff]   ;;  %6229 = vmatprep.mubr.bf16.mxu0 %v7159_v54 }
 0x181   : > { %v7958_v39 = vpop.f32.mrf.mxu0  ;;  %8326 = vmatprep.subr.bf16.mxu0 %v9074_v27  ;;  %8359 = vmatpush3.bf16.msra.mxu1 %v9085_v5  ;;  %v360_v31 = vld [vmem:[%s9344_s29 + $0xb0] sm:$0xff] }
 0x182   : > { %v7959_v42 = vadd.f32 %v7958_v39, %v7957_v30  ;;  %v9812_v24 = vadd.f32 %v7984_v41, %v5644_v36  ;;  %v7986_v47 = vpop.f32.mrf.mxu1  ;;  %8360 = vmatprep.subr.bf16.mxu1 %v9087_v7  ;;  %v9097_v30 = vld [vmem:[%s9308_s25 + $0xb88] sm:$0xff]   ;;  %v9101_v39 = vld [vmem:[%s9308_s25 + $0xb80] sm:$0xff]   ;;  %v9109_v5 = vld [vmem:[%s9308_s25 + $0xcb0] sm:$0xff]  }
 0x183   : > { %v7987_v50 = vadd.f32 %v7986_v47, %v7985_v44  ;;  %v393_v44 = vld [vmem:[%s9344_s29 + $0x1b8] sm:$0xff]  ;;  %v456_v7 = vld [vmem:[%s9344_s29 + $0x3b0] sm:$0xff] }
 0x184   : > { %v5647_v45 = vadd.f32 %v7959_v42, %v9768_v38  ;;  %8327 = vmatpush3.bf16.msra.mxu0 %v9076_v48  ;;  %v392_v42 = vld [vmem:[%s9344_s29 + $0x1b0] sm:$0xff]  ;;  %v7100_v47 = vcombine.low %v361_v43, %v393_v44  ;;  %v7101_v48 = vcombine.high %v361_v43, %v393_v44  ;;  %v9127_v43 = vld [vmem:[%s9308_s25 + $0xcc8] sm:$0xff]  }
 0x185   : > { %8328 = vmatprep.subr.bf16.mxu0 %v9078_v56  ;;  %8361 = vmatpush3.bf16.msra.mxu1 %v9089_v9  ;;  %v7099_v46 = vcombine.high %v360_v31, %v392_v42 }
 0x186   : > { %v9821_v38 = vadd.f32 %v7987_v50, %v5647_v45  ;;  %8362 = vmatprep.subr.bf16.mxu1 %v9091_v13  ;;  %v7098_v45 = vcombine.low %v360_v31, %v392_v42  ;;  %v9102_v50 = vld [vmem:[%s9308_s25 + $0xc78] sm:$0xff]   ;;  %6368 = vmatprep.mubr.bf16.mxu1 %v7101_v48  ;;  %v9126_v31 = vld [vmem:[%s9308_s25 + $0xc48] sm:$0xff]  }
 0x187   : > { %6230 = vmatmul.mubr.bf16.gmra.mxu0 %v7158_v55  ;;  %v9104_v55 = vld [vmem:[%s9308_s25 + $0xc38] sm:$0xff]  }
 0x188   : > { %8329 = vmatpush3.bf16.msra.mxu0 %v9080_v40  ;;  %6319 = vmatprep.mubr.bf16.mxu0 %v7099_v46  ;;  %v9106_v40 = vld [vmem:[%s9308_s25 + $0xc70] sm:$0xff]   ;;  %v457_v13 = vld [vmem:[%s9344_s29 + $0x3b8] sm:$0xff] }
 0x189   : > { %8330 = vmatprep.subr.bf16.mxu0 %v9082_v0  ;;  %8363 = vmatpush3.bf16.msra.mxu1 %v9093_v17  ;;  %v9114_v17 = vld [vmem:[%s9308_s25 + $0xc60] sm:$0xff]  }
 0x18a   : > { %8364 = vmatprep.subr.bf16.mxu1 %v9095_v25  ;;  %v9120_v25 = vld [vmem:[%s9308_s25 + $0xc18] sm:$0xff]  }
 0x18c   : > { %8331 = vmatpush3.bf16.msra.mxu0 %v9084_v4 }
 0x18d   : > { %8332 = vmatprep.subr.bf16.mxu0 %v9086_v6  ;;  %8365 = vmatpush3.bf16.msra.mxu1 %v9097_v30  ;;  %v424_v6 = vld [vmem:[%s9344_s29 + $0x2b0] sm:$0xff] }
 0x18e   : > { %8366 = vmatprep.subr.bf16.mxu1 %v9099_v35  ;;  %v7163_v9 = vcombine.high %v424_v6, %v456_v7  ;;  %v9123_v30 = vld [vmem:[%s9308_s25 + $0xcd0] sm:$0xff]  }
 0x190   : > { %8333 = vmatpush3.bf16.msra.mxu0 %v9088_v8 }
 0x191   : > { %8334 = vmatprep.subr.bf16.mxu0 %v9090_v10  ;;  %8367 = vmatpush3.bf16.msra.mxu1 %v9101_v39  ;;  %v9111_v10 = vld [vmem:[%s9308_s25 + $0xce8] sm:$0xff]  }
 0x192   : > { %8408 = vmatprep.subr.bf16.mxu1 %v9103_v52 }
 0x193   : > { %v8004_v49 = vpop.f32.mrf.mxu0 }
 0x194   : > { %v8032_v11 = vpop.f32.mrf.mxu1  ;;  %8335 = vmatpush3.bf16.msra.mxu0 %v9092_v15  ;;  %6369 = vmatmul.mubr.bf16.vlgmr.msra.gmra.mxu1 %v7100_v47  ;;  %v9112_v15 = vld [vmem:[%s9308_s25 + $0xc28] sm:$0xff]  }
 0x195   : > { %v8005_v14 = vpop.f32.mrf.mxu0  ;;  %8336 = vmatprep.subr.bf16.mxu0 %v9094_v2  ;;  %8409 = vmatpush3.bf16.msra.mxu1 %v9105_v59  ;;  %v9117_v2 = vld [vmem:[%s9308_s25 + $0xca0] sm:$0xff]   ;;  %v9129_v47 = vld [vmem:[%s9308_s25 + $0xc88] sm:$0xff]  }
 0x196   : > { %v8006_v16 = vadd.f32 %v8005_v14, %v8004_v49  ;;  %v8033_v34 = vpop.f32.mrf.mxu1  ;;  %8410 = vmatprep.subr.bf16.mxu1 %v9107_v62  ;;  %v7162_v49 = vcombine.low %v424_v6, %v456_v7  ;;  %v9135_v6 = vld [vmem:[%s9308_s25 + $0xdf8] sm:$0xff]  }
 0x197   : > { %v8034_v18 = vadd.f32 %v8033_v34, %v8032_v11  ;;  %v8007_v20 = vpop.f32.mrf.mxu0  ;;  %v425_v11 = vld [vmem:[%s9344_s29 + $0x2b8] sm:$0xff]  ;;  %v9113_v34 = vld [vmem:[%s9308_s25 + $0xca8] sm:$0xff]  }
 0x198   : > { %v5734_v22 = vadd.f32 %v8006_v16, %v9793_v12  ;;  %v8035_v23 = vpop.f32.mrf.mxu1  ;;  %8337 = vmatpush3.bf16.msra.mxu0 %v9096_v57  ;;  %v9098_v12 = vld [vmem:[%s9308_s25 + $0xb40] sm:$0xff]   ;;  %v7165_v14 = vcombine.high %v425_v11, %v457_v13  ;;  %v7164_v16 = vcombine.low %v425_v11, %v457_v13  ;;  %v9137_v11 = vld [vmem:[%s9308_s25 + $0xdb8] sm:$0xff]  }
 0x199   : > { %v8008_v26 = vpop.f32.mrf.mxu0  ;;  %8338 = vmatprep.subr.bf16.mxu0 %v9098_v12  ;;  %8411 = vmatpush3.bf16.msra.mxu1 %v9109_v5  ;;  %v9124_v12 = vld [vmem:[%s9308_s25 + $0xc10] sm:$0xff]  }
 0x19a   : > { %v9844_v3 = vadd.f32 %v8034_v18, %v5734_v22  ;;  %v8009_v28 = vadd.f32 %v8008_v26, %v8007_v20  ;;  %v8036_v29 = vpop.f32.mrf.mxu1  ;;  %8412 = vmatprep.subr.bf16.mxu1 %v9111_v10  ;;  %6376 = vmatprep.mubr.bf16.mxu1 %v7165_v14  ;;  %v9115_v18 = vld [vmem:[%s9308_s25 + $0xce0] sm:$0xff]   ;;  %v9118_v22 = vld [vmem:[%s9308_s25 + $0xc58] sm:$0xff]  }
 0x19b   : > { %v8037_v32 = vadd.f32 %v8036_v29, %v8035_v23  ;;  %v8010_v36 = vpop.f32.mrf.mxu0  ;;  %v9116_v20 = vld [vmem:[%s9308_s25 + $0xc20] sm:$0xff]   ;;  %v9119_v23 = vld [vmem:[%s9308_s25 + $0xcd8] sm:$0xff]  }
 0x19c   : > { %v5737_v33 = vadd.f32 %v8009_v28, %v9800_v21  ;;  %8339 = vmatpush3.bf16.msra.mxu0 %v9100_v37  ;;  %v8038_v21 = vpop.f32.mrf.mxu1  ;;  %6377 = vmatmul.mubr.bf16.gmra.mxu1 %v7164_v16  ;;  %v9121_v26 = vld [vmem:[%s9308_s25 + $0xc98] sm:$0xff]   ;;  %v9122_v28 = vld [vmem:[%s9308_s25 + $0xc50] sm:$0xff]  }
 0x19d   : > { %v8011_v41 = vpop.f32.mrf.mxu0  ;;  %8380 = vmatprep.subr.bf16.mxu0 %v9102_v50  ;;  %8413 = vmatpush3.bf16.msra.mxu1 %v9113_v34  ;;  %v9139_v16 = vld [vmem:[%s9308_s25 + $0xdf0] sm:$0xff]  }
 0x19e   : > { %v9851_v19 = vadd.f32 %v8037_v32, %v5737_v33  ;;  %v8012_v27 = vadd.f32 %v8011_v41, %v8010_v36  ;;  %v8039_v54 = vpop.f32.mrf.mxu1  ;;  %8414 = vmatprep.subr.bf16.mxu1 %v9115_v18  ;;  %v9125_v36 = vld [vmem:[%s9308_s25 + $0xc90] sm:$0xff]  }
 0x19f   : > { %v8013_v51 = vpop.f32.mrf.mxu0  ;;  %v8040_v56 = vadd.f32 %v8039_v54, %v8038_v21  ;;  %6320 = vmatmul.mubr.bf16.vlgmr.msra.gmra.mxu0 %v7098_v45  ;;  %v9140_v18 = vld [vmem:[%s9308_s25 + $0xd30] sm:$0xff]  }
 0x1a0   : > { %v5742_v53 = vadd.f32 %v8012_v27, %v9812_v24  ;;  %v8041_v61 = vpop.f32.mrf.mxu1  ;;  %8381 = vmatpush3.bf16.msra.mxu0 %v9104_v55  ;;  %6327 = vmatprep.mubr.bf16.mxu0 %v7163_v9  ;;  %v9128_v27 = vld [vmem:[%s9308_s25 + $0xc08] sm:$0xff]   ;;  %v9133_v55 = vld [vmem:[%s9308_s25 + $0xc80] sm:$0xff]  }
 0x1a1   : > { %v8014_v58 = vpop.f32.mrf.mxu0  ;;  %8382 = vmatprep.subr.bf16.mxu0 %v9106_v40  ;;  %8415 = vmatpush3.bf16.msra.mxu1 %v9117_v2  ;;  %v395_v40 = vld [vmem:[%s9344_s29 + $0x1c8] sm:$0xff]  ;;  %v9141_v2 = vld [vmem:[%s9308_s25 + $0xdb0] sm:$0xff]  }
 0x1a2   : > { %v8015_v60 = vadd.f32 %v8014_v58, %v8013_v51  ;;  %v9864_v24 = vadd.f32 %v8040_v56, %v5742_v53  ;;  %v8042_v0 = vpop.f32.mrf.mxu1  ;;  %8416 = vmatprep.subr.bf16.mxu1 %v9119_v23  ;;  %v9131_v51 = vld [vmem:[%s9308_s25 + $0xcc0] sm:$0xff]  }
 0x1a3   : > { %v8043_v4 = vadd.f32 %v8042_v0, %v8041_v61  ;;  %v9132_v53 = vld [vmem:[%s9308_s25 + $0xc00] sm:$0xff]  }
 0x1a4   : > { %v5745_v63 = vadd.f32 %v8015_v60, %v9821_v38  ;;  %8383 = vmatpush3.bf16.msra.mxu0 %v9108_v1  ;;  %v9110_v38 = vld [vmem:[%s9308_s25 + $0xc68] sm:$0xff]   ;;  %v362_v56 = vld [vmem:[%s9344_s29 + $0xc0] sm:$0xff] }
 0x1a5   : > { %8384 = vmatprep.subr.bf16.mxu0 %v9110_v38  ;;  %8417 = vmatpush3.bf16.msra.mxu1 %v9121_v26  ;;  %v394_v58 = vld [vmem:[%s9344_s29 + $0x1c0] sm:$0xff] }
 0x1a6   : > { %v9872_v8 = vadd.f32 %v8043_v4, %v5745_v63  ;;  %8418 = vmatprep.subr.bf16.mxu1 %v9123_v30  ;;  %v7102_v60 = vcombine.low %v362_v56, %v394_v58  ;;  %v7103_v61 = vcombine.high %v362_v56, %v394_v58  ;;  %v9134_v4 = vld [vmem:[%s9308_s25 + $0xd78] sm:$0xff]   ;;  %v458_v23 = vld [vmem:[%s9344_s29 + $0x3c0] sm:$0xff]  ;;  %v459_v30 = vld [vmem:[%s9344_s29 + $0x3c8] sm:$0xff] }
 0x1a7   : > { %6328 = vmatmul.mubr.bf16.gmra.mxu0 %v7162_v49  ;;  %v9136_v49 = vld [vmem:[%s9308_s25 + $0xd38] sm:$0xff]   ;;  %v9159_v58 = vld [vmem:[%s9308_s25 + $0xdc8] sm:$0xff]  }
 0x1a8   : > { %8385 = vmatpush3.bf16.msra.mxu0 %v9112_v15  ;;  %6417 = vmatprep.mubr.bf16.mxu0 %v7103_v61  ;;  %v9138_v15 = vld [vmem:[%s9308_s25 + $0xd70] sm:$0xff]   ;;  %v9160_v61 = vld [vmem:[%s9308_s25 + $0xd08] sm:$0xff]  }
 0x1a9   : > { %8386 = vmatprep.subr.bf16.mxu0 %v9114_v17  ;;  %8419 = vmatpush3.bf16.msra.mxu1 %v9125_v36  ;;  %v9146_v36 = vld [vmem:[%s9308_s25 + $0xd60] sm:$0xff]  }
 0x1aa   : > { %8420 = vmatprep.subr.bf16.mxu1 %v9127_v43  ;;  %v9152_v43 = vld [vmem:[%s9308_s25 + $0xd18] sm:$0xff]  }
 0x1ac   : > { %8387 = vmatpush3.bf16.msra.mxu0 %v9116_v20 }
 0x1ad   : > { %8388 = vmatprep.subr.bf16.mxu0 %v9118_v22  ;;  %8421 = vmatpush3.bf16.msra.mxu1 %v9129_v47  ;;  %v426_v22 = vld [vmem:[%s9344_s29 + $0x2c0] sm:$0xff] }
 0x1ae   : > { %8422 = vmatprep.subr.bf16.mxu1 %v9131_v51  ;;  %v7167_v26 = vcombine.high %v426_v22, %v458_v23 }
 0x1b0   : > { %8389 = vmatpush3.bf16.msra.mxu0 %v9120_v25 }
 0x1b1   : > { %8390 = vmatprep.subr.bf16.mxu0 %v9122_v28  ;;  %8423 = vmatpush3.bf16.msra.mxu1 %v9133_v55  ;;  %v9143_v28 = vld [vmem:[%s9308_s25 + $0xde8] sm:$0xff]  }
 0x1b2   : > { %8464 = vmatprep.subr.bf16.mxu1 %v9135_v6 }
 0x1b3   : > { %v8060_v57 = vpop.f32.mrf.mxu0 }
 0x1b4   : > { %v8088_v29 = vpop.f32.mrf.mxu1  ;;  %8391 = vmatpush3.bf16.msra.mxu0 %v9124_v12  ;;  %v9144_v12 = vld [vmem:[%s9308_s25 + $0xd28] sm:$0xff]  }
 0x1b5   : > { %v8061_v32 = vpop.f32.mrf.mxu0  ;;  %8392 = vmatprep.subr.bf16.mxu0 %v9126_v31  ;;  %v9149_v31 = vld [vmem:[%s9308_s25 + $0xda0] sm:$0xff]  }
 0x1b6   : > { %v8062_v33 = vadd.f32 %v8061_v32, %v8060_v57  ;;  %v8089_v35 = vpop.f32.mrf.mxu1  ;;  %v7166_v57 = vcombine.low %v426_v22, %v458_v23  ;;  %v9167_v23 = vld [vmem:[%s9308_s25 + $0xef8] sm:$0xff]  }
 0x1b7   : > { %v8090_v37 = vadd.f32 %v8089_v35, %v8088_v29  ;;  %v8063_v39 = vpop.f32.mrf.mxu0  ;;  %v427_v29 = vld [vmem:[%s9344_s29 + $0x2c8] sm:$0xff] }
 0x1b8   : > { %v5832_v41 = vadd.f32 %v8062_v33, %v9844_v3  ;;  %v8091_v42 = vpop.f32.mrf.mxu1  ;;  %8393 = vmatpush3.bf16.msra.mxu0 %v9128_v27  ;;  %v9130_v3 = vld [vmem:[%s9308_s25 + $0xc40] sm:$0xff]   ;;  %v7169_v32 = vcombine.high %v427_v29, %v459_v30  ;;  %v7168_v33 = vcombine.low %v427_v29, %v459_v30  ;;  %v9145_v35 = vld [vmem:[%s9308_s25 + $0xda8] sm:$0xff]   ;;  %v9154_v27 = vld [vmem:[%s9308_s25 + $0xd50] sm:$0xff]  }
 0x1b9   : > { %v8064_v44 = vpop.f32.mrf.mxu0  ;;  %8394 = vmatprep.subr.bf16.mxu0 %v9130_v3  ;;  %v9169_v30 = vld [vmem:[%s9308_s25 + $0xeb8] sm:$0xff]  }
 0x1ba   : > { %v9896_v21 = vadd.f32 %v8090_v37, %v5832_v41  ;;  %v8065_v45 = vadd.f32 %v8064_v44, %v8063_v39  ;;  %v8092_v46 = vpop.f32.mrf.mxu1  ;;  %v9147_v37 = vld [vmem:[%s9308_s25 + $0xde0] sm:$0xff]   ;;  %v9150_v41 = vld [vmem:[%s9308_s25 + $0xd58] sm:$0xff]  }
 0x1bb   : > { %v8093_v48 = vadd.f32 %v8092_v46, %v8091_v42  ;;  %v8066_v52 = vpop.f32.mrf.mxu0  ;;  %v9148_v39 = vld [vmem:[%s9308_s25 + $0xd20] sm:$0xff]   ;;  %v9151_v42 = vld [vmem:[%s9308_s25 + $0xdd8] sm:$0xff]   ;;  %v9155_v46 = vld [vmem:[%s9308_s25 + $0xdd0] sm:$0xff]  }
 0x1bc   : > { %v5835_v50 = vadd.f32 %v8065_v45, %v9851_v19  ;;  %8395 = vmatpush3.bf16.msra.mxu0 %v9132_v53  ;;  %v363_v19 = vld [vmem:[%s9344_s29 + $0xc8] sm:$0xff]  ;;  %v8094_v63 = vpop.f32.mrf.mxu1  ;;  %v9153_v44 = vld [vmem:[%s9308_s25 + $0xd98] sm:$0xff]  }
 0x1bd   : > { %v8067_v59 = vpop.f32.mrf.mxu0  ;;  %v7104_v0 = vcombine.low %v363_v19, %v395_v40  ;;  %v7105_v1 = vcombine.high %v363_v19, %v395_v40  ;;  %8436 = vmatprep.subr.bf16.mxu0 %v9134_v4  ;;  %v9158_v53 = vld [vmem:[%s9308_s25 + $0xd48] sm:$0xff]  }
 0x1be   : > { %v9903_v54 = vadd.f32 %v8093_v48, %v5835_v50  ;;  %v8068_v62 = vadd.f32 %v8067_v59, %v8066_v52  ;;  %v8095_v9 = vpop.f32.mrf.mxu1  ;;  %v9156_v48 = vld [vmem:[%s9308_s25 + $0xd10] sm:$0xff]   ;;  %v9161_v40 = vld [vmem:[%s9308_s25 + $0xd88] sm:$0xff]  }
 0x1bf   : > { %v8069_v5 = vpop.f32.mrf.mxu0  ;;  %6466 = vmatprep.mubr.bf16.mxu1 %v7105_v1  ;;  %6418 = vmatmul.mubr.bf16.vlgmr.msra.gmra.mxu0 %v7102_v60  ;;  %v8096_v38 = vadd.f32 %v8095_v9, %v8094_v63  ;;  %v9157_v50 = vld [vmem:[%s9308_s25 + $0xd90] sm:$0xff]   ;;  %v9162_v1 = vld [vmem:[%s9308_s25 + $0xd40] sm:$0xff]  }
 0x1c0   : > { %v5840_v7 = vadd.f32 %v8068_v62, %v9864_v24  ;;  %6467 = vmatmul.mubr.bf16.vlgmr.msra.gmra.mxu1 %v7104_v0  ;;  %v8097_v14 = vpop.f32.mrf.mxu1  ;;  %8437 = vmatpush3.bf16.msra.mxu0 %v9136_v49  ;;  %v9165_v9 = vld [vmem:[%s9308_s25 + $0xd80] sm:$0xff]  }
 0x1c1   : > { %v8070_v10 = vpop.f32.mrf.mxu0  ;;  %8465 = vmatpush3.bf16.msra.mxu1 %v9137_v11  ;;  %8438 = vmatprep.subr.bf16.mxu0 %v9138_v15  ;;  %v396_v11 = vld [vmem:[%s9344_s29 + $0x1d0] sm:$0xff] }
 0x1c2   : > { %v8071_v13 = vadd.f32 %v8070_v10, %v8069_v5  ;;  %v9916_v24 = vadd.f32 %v8096_v38, %v5840_v7  ;;  %v8098_v17 = vpop.f32.mrf.mxu1  ;;  %8466 = vmatprep.subr.bf16.mxu1 %v9139_v16  ;;  %6425 = vmatprep.mubr.bf16.mxu0 %v7167_v26  ;;  %v9164_v7 = vld [vmem:[%s9308_s25 + $0xd00] sm:$0xff]   ;;  %v364_v10 = vld [vmem:[%s9344_s29 + $0xd0] sm:$0xff]  ;;  %v397_v16 = vld [vmem:[%s9344_s29 + $0x1d8] sm:$0xff] }
 0x1c3   : > { %v8099_v20 = vadd.f32 %v8098_v17, %v8097_v14  ;;  %6474 = vmatprep.mubr.bf16.mxu1 %v7169_v32  ;;  %v7106_v15 = vcombine.low %v364_v10, %v396_v11 }
 0x1c4   : > { %v5843_v34 = vadd.f32 %v8071_v13, %v9872_v8  ;;  %8439 = vmatpush3.bf16.msra.mxu0 %v9140_v18  ;;  %v9142_v8 = vld [vmem:[%s9308_s25 + $0xd68] sm:$0xff]   ;;  %v365_v13 = vld [vmem:[%s9344_s29 + $0xd8] sm:$0xff] }
 0x1c5   : > { %8467 = vmatpush3.bf16.msra.mxu1 %v9141_v2  ;;  %8440 = vmatprep.subr.bf16.mxu0 %v9142_v8  ;;  %v7108_v18 = vcombine.low %v365_v13, %v397_v16  ;;  %v9166_v2 = vld [vmem:[%s9308_s25 + $0xe78] sm:$0xff]  }
 0x1c6   : > { %v9924_v25 = vadd.f32 %v8099_v20, %v5843_v34  ;;  %8468 = vmatprep.subr.bf16.mxu1 %v9143_v28  ;;  %v7109_v20 = vcombine.high %v365_v13, %v397_v16  ;;  %v9168_v8 = vld [vmem:[%s9308_s25 + $0xe38] sm:$0xff]   ;;  %v9193_v16 = vld [vmem:[%s9308_s25 + $0xe88] sm:$0xff]  }
 0x1c7   : > { %6426 = vmatmul.mubr.bf16.gmra.mxu0 %v7166_v57 }
 0x1c8   : > { %8441 = vmatpush3.bf16.msra.mxu0 %v9144_v12  ;;  %6475 = vmatmul.mubr.bf16.gmra.mxu1 %v7168_v33 }
 0x1c9   : > { %8469 = vmatpush3.bf16.msra.mxu1 %v9145_v35  ;;  %8442 = vmatprep.subr.bf16.mxu0 %v9146_v36  ;;  %v9171_v35 = vld [vmem:[%s9308_s25 + $0xef0] sm:$0xff]  }
 0x1ca   : > { %8470 = vmatprep.subr.bf16.mxu1 %v9147_v37  ;;  %6564 = vmatprep.mubr.bf16.mxu1 %v7109_v20  ;;  %v9172_v37 = vld [vmem:[%s9308_s25 + $0xe30] sm:$0xff]   ;;  %v9194_v20 = vld [vmem:[%s9308_s25 + $0xe40] sm:$0xff]  }
 0x1cc   : > { %8443 = vmatpush3.bf16.msra.mxu0 %v9148_v39 }
 0x1cd   : > { %8471 = vmatpush3.bf16.msra.mxu1 %v9149_v31  ;;  %8444 = vmatprep.subr.bf16.mxu0 %v9150_v41  ;;  %v9173_v31 = vld [vmem:[%s9308_s25 + $0xeb0] sm:$0xff]  }
 0x1ce   : > { %8472 = vmatprep.subr.bf16.mxu1 %v9151_v42  ;;  %v428_v41 = vld [vmem:[%s9344_s29 + $0x2d0] sm:$0xff] }
 0x1cf   : > { %v460_v42 = vld [vmem:[%s9344_s29 + $0x3d0] sm:$0xff] }
 0x1d0   : > { %8445 = vmatpush3.bf16.msra.mxu0 %v9152_v43  ;;  %v7171_v43 = vcombine.high %v428_v41, %v460_v42 }
 0x1d1   : > { %8473 = vmatpush3.bf16.msra.mxu1 %v9153_v44  ;;  %8446 = vmatprep.subr.bf16.mxu0 %v9154_v27  ;;  %v7170_v44 = vcombine.low %v428_v41, %v460_v42  ;;  %v9174_v27 = vld [vmem:[%s9308_s25 + $0xe68] sm:$0xff]   ;;  %v9199_v41 = vld [vmem:[%s9308_s25 + $0xff8] sm:$0xff]  }
 0x1d2   : > { %8474 = vmatprep.subr.bf16.mxu1 %v9155_v46  ;;  %v429_v46 = vld [vmem:[%s9344_s29 + $0x2d8] sm:$0xff] }
 0x1d4   : > { %v8144_v47 = vpop.f32.mrf.mxu1  ;;  %8447 = vmatpush3.bf16.msra.mxu0 %v9156_v48 }
 0x1d5   : > { %8475 = vmatpush3.bf16.msra.mxu1 %v9157_v50  ;;  %8448 = vmatprep.subr.bf16.mxu0 %v9158_v53  ;;  %v9179_v53 = vld [vmem:[%s9308_s25 + $0xee0] sm:$0xff]  }
 0x1d6   : > { %v8145_v52 = vpop.f32.mrf.mxu1  ;;  %8476 = vmatprep.subr.bf16.mxu1 %v9159_v58  ;;  %v9182_v58 = vld [vmem:[%s9308_s25 + $0xe58] sm:$0xff]  }
 0x1d7   : > { %v8146_v55 = vadd.f32 %v8145_v52, %v8144_v47  ;;  %v461_v47 = vld [vmem:[%s9344_s29 + $0x3d8] sm:$0xff]  ;;  %v9178_v52 = vld [vmem:[%s9308_s25 + $0xe60] sm:$0xff]  }
 0x1d8   : > { %v8147_v60 = vpop.f32.mrf.mxu1  ;;  %8449 = vmatpush3.bf16.msra.mxu0 %v9160_v61  ;;  %v7173_v48 = vcombine.high %v429_v46, %v461_v47  ;;  %v7172_v50 = vcombine.low %v429_v46, %v461_v47  ;;  %v9185_v61 = vld [vmem:[%s9308_s25 + $0xe98] sm:$0xff]  }
 0x1d9   : > { %8477 = vmatpush3.bf16.msra.mxu1 %v9161_v40  ;;  %8450 = vmatprep.subr.bf16.mxu0 %v9162_v1  ;;  %v9188_v1 = vld [vmem:[%s9308_s25 + $0xe10] sm:$0xff]  }
 0x1da   : > { %v8148_v0 = vpop.f32.mrf.mxu1 }
 0x1db   : > { %v8149_v4 = vadd.f32 %v8148_v0, %v8147_v60  ;;  %v9184_v60 = vld [vmem:[%s9308_s25 + $0xe18] sm:$0xff]   ;;  %v9187_v0 = vld [vmem:[%s9308_s25 + $0xed0] sm:$0xff]  }
 0x1dc   : > { %8451 = vmatpush3.bf16.msra.mxu0 %v9164_v7  ;;  %v8150_v34 = vpop.f32.mrf.mxu1 }
 0x1dd   : > { %8492 = vmatprep.subr.bf16.mxu0 %v9166_v2 }
 0x1de   : > { %v8116_v45 = vpop.f32.mrf.mxu0  ;;  %v8151_v26 = vpop.f32.mrf.mxu1 }
 0x1df   : > { %v8152_v28 = vadd.f32 %v8151_v26, %v8150_v34  ;;  %v9197_v26 = vld [vmem:[%s9308_s25 + $0xe80] sm:$0xff]  }
 0x1e0   : > { %v8117_v3 = vpop.f32.mrf.mxu0  ;;  %v8153_v32 = vpop.f32.mrf.mxu1 }
 0x1e1   : > { %v8118_v51 = vadd.f32 %v8117_v3, %v8116_v45  ;;  %v9175_v45 = vld [vmem:[%s9308_s25 + $0xee8] sm:$0xff]  }
 0x1e2   : > { %v8119_v56 = vpop.f32.mrf.mxu0  ;;  %v8154_v36 = vpop.f32.mrf.mxu1  ;;  %v9176_v3 = vld [vmem:[%s9308_s25 + $0xe28] sm:$0xff]  }
 0x1e3   : > { %v5930_v59 = vadd.f32 %v8118_v51, %v9896_v21  ;;  %v9163_v21 = vld [vmem:[%s9308_s25 + $0xdc0] sm:$0xff]   ;;  %v8155_v39 = vadd.f32 %v8154_v36, %v8153_v32  ;;  %v9177_v51 = vld [vmem:[%s9308_s25 + $0xea8] sm:$0xff]  }
 0x1e4   : > { %v8120_v19 = vpop.f32.mrf.mxu0  ;;  %8478 = vmatprep.subr.bf16.mxu1 %v9163_v21  ;;  %v399_v32 = vld [vmem:[%s9344_s29 + $0x1e8] sm:$0xff] }
 0x1e5   : > { %v9949_v62 = vadd.f32 %v8146_v55, %v5930_v59  ;;  %v8121_v63 = vadd.f32 %v8120_v19, %v8119_v56  ;;  %8479 = vmatpush3.bf16.msra.mxu1 %v9165_v9  ;;  %v9180_v55 = vld [vmem:[%s9308_s25 + $0xe20] sm:$0xff]   ;;  %v9183_v59 = vld [vmem:[%s9308_s25 + $0xed8] sm:$0xff]   ;;  %v9186_v19 = vld [vmem:[%s9308_s25 + $0xe50] sm:$0xff]  }
 0x1e6   : > { %v8122_v6 = vpop.f32.mrf.mxu0  ;;  %8520 = vmatprep.subr.bf16.mxu1 %v9167_v23  ;;  %v9181_v56 = vld [vmem:[%s9308_s25 + $0xea0] sm:$0xff]   ;;  %v9190_v9 = vld [vmem:[%s9308_s25 + $0xe48] sm:$0xff]  }
 0x1e7   : > { %v5933_v5 = vadd.f32 %v8121_v63, %v9903_v54  ;;  %v7107_v54 = vcombine.high %v364_v10, %v396_v11  ;;  %v9191_v11 = vld [vmem:[%s9308_s25 + $0xec8] sm:$0xff]   ;;  %v9196_v23 = vld [vmem:[%s9308_s25 + $0xe00] sm:$0xff]  }
 0x1e8   : > { %v8123_v38 = vpop.f32.mrf.mxu0  ;;  %6565 = vmatmul.mubr.bf16.vlgmr.msra.gmra.mxu1 %v7108_v18 }
 0x1e9   : > { %v9956_v49 = vadd.f32 %v8149_v4, %v5933_v5  ;;  %v8124_v14 = vadd.f32 %v8123_v38, %v8122_v6  ;;  %6515 = vmatprep.mubr.bf16.mxu0 %v7107_v54  ;;  %8521 = vmatpush3.bf16.msra.mxu1 %v9169_v30  ;;  %v9189_v5 = vld [vmem:[%s9308_s25 + $0xe90] sm:$0xff]   ;;  %v367_v30 = vld [vmem:[%s9344_s29 + $0xe8] sm:$0xff] }
 0x1ea   : > { %v8125_v17 = vpop.f32.mrf.mxu0  ;;  %6516 = vmatmul.mubr.bf16.vlgmr.msra.gmra.mxu0 %v7106_v15  ;;  %8522 = vmatprep.subr.bf16.mxu1 %v9171_v35  ;;  %v7112_v35 = vcombine.low %v367_v30, %v399_v32  ;;  %v7113_v36 = vcombine.high %v367_v30, %v399_v32  ;;  %v9223_v30 = vld [vmem:[%s9308_s25 + $0xfc8] sm:$0xff]  }
 0x1eb   : > { %v5938_v22 = vadd.f32 %v8124_v14, %v9916_v24  ;;  %8493 = vmatpush3.bf16.msra.mxu0 %v9168_v8  ;;  %v9170_v24 = vld [vmem:[%s9308_s25 + $0xe70] sm:$0xff]   ;;  %6523 = vmatprep.mubr.bf16.mxu0 %v7171_v43  ;;  %v9192_v14 = vld [vmem:[%s9308_s25 + $0xe08] sm:$0xff]   ;;  %v9200_v43 = vld [vmem:[%s9308_s25 + $0xf38] sm:$0xff]  }
 0x1ec   : > { %v8126_v57 = vpop.f32.mrf.mxu0  ;;  %8494 = vmatprep.subr.bf16.mxu0 %v9170_v24  ;;  %6572 = vmatprep.mubr.bf16.mxu1 %v7173_v48  ;;  %v9202_v48 = vld [vmem:[%s9308_s25 + $0xf70] sm:$0xff]  }
 0x1ed   : > { %v8127_v29 = vadd.f32 %v8126_v57, %v8125_v17  ;;  %v9968_v12 = vadd.f32 %v8152_v28, %v5938_v22  ;;  %8523 = vmatpush3.bf16.msra.mxu1 %v9173_v31  ;;  %v366_v57 = vld [vmem:[%s9344_s29 + $0xe0] sm:$0xff] }
 0x1ee   : > { %8524 = vmatprep.subr.bf16.mxu1 %v9175_v45  ;;  %v9201_v45 = vld [vmem:[%s9308_s25 + $0xfb8] sm:$0xff]  }
 0x1ef   : > { %v5941_v33 = vadd.f32 %v8127_v29, %v9924_v25  ;;  %8495 = vmatpush3.bf16.msra.mxu0 %v9172_v37  ;;  %v398_v29 = vld [vmem:[%s9344_s29 + $0x1e0] sm:$0xff]  ;;  %v9198_v37 = vld [vmem:[%s9308_s25 + $0xf78] sm:$0xff]  }
 0x1f0   : > { %8496 = vmatprep.subr.bf16.mxu0 %v9174_v27  ;;  %6573 = vmatmul.mubr.bf16.gmra.mxu1 %v7172_v50 }
 0x1f1   : > { %v9977_v25 = vadd.f32 %v8155_v39, %v5941_v33  ;;  %8525 = vmatpush3.bf16.msra.mxu1 %v9177_v51  ;;  %v7110_v33 = vcombine.low %v366_v57, %v398_v29  ;;  %6662 = vmatprep.mubr.bf16.mxu1 %v7113_v36  ;;  %v9225_v36 = vld [vmem:[%s9308_s25 + $0xf88] sm:$0xff]  }
 0x1f2   : > { %6524 = vmatmul.mubr.bf16.gmra.mxu0 %v7170_v44  ;;  %8526 = vmatprep.subr.bf16.mxu1 %v9179_v53 }
 0x1f3   : > { %8497 = vmatpush3.bf16.msra.mxu0 %v9176_v3 }
 0x1f4   : > { %8498 = vmatprep.subr.bf16.mxu0 %v9178_v52  ;;  %v8200_v63 = vpop.f32.mrf.mxu1  ;;  %v9204_v52 = vld [vmem:[%s9308_s25 + $0xf30] sm:$0xff]  }
 0x1f5   : > { %8527 = vmatpush3.bf16.msra.mxu1 %v9181_v56 }
 0x1f6   : > { %8528 = vmatprep.subr.bf16.mxu1 %v9183_v59  ;;  %v8201_v21 = vpop.f32.mrf.mxu1  ;;  %v462_v59 = vld [vmem:[%s9344_s29 + $0x3e0] sm:$0xff] }
 0x1f7   : > { %8499 = vmatpush3.bf16.msra.mxu0 %v9180_v55  ;;  %v8202_v7 = vadd.f32 %v8201_v21, %v8200_v63  ;;  %v9205_v55 = vld [vmem:[%s9308_s25 + $0xfb0] sm:$0xff]   ;;  %v431_v63 = vld [vmem:[%s9344_s29 + $0x2e8] sm:$0xff] }
 0x1f8   : > { %8500 = vmatprep.subr.bf16.mxu0 %v9182_v58  ;;  %v8203_v10 = vpop.f32.mrf.mxu1  ;;  %v430_v58 = vld [vmem:[%s9344_s29 + $0x2e0] sm:$0xff]  ;;  %v9208_v21 = vld [vmem:[%s9308_s25 + $0xf28] sm:$0xff]  }
 0x1f9   : > { %8529 = vmatpush3.bf16.msra.mxu1 %v9185_v61  ;;  %v7175_v61 = vcombine.high %v430_v58, %v462_v59 }
 0x1fa   : > { %8530 = vmatprep.subr.bf16.mxu1 %v9187_v0  ;;  %v8204_v54 = vpop.f32.mrf.mxu1  ;;  %v463_v0 = vld [vmem:[%s9344_s29 + $0x3e8] sm:$0xff] }
 0x1fb   : > { %8501 = vmatpush3.bf16.msra.mxu0 %v9184_v60  ;;  %v8205_v18 = vadd.f32 %v8204_v54, %v8203_v10  ;;  %v7174_v60 = vcombine.low %v430_v58, %v462_v59  ;;  %v9214_v10 = vld [vmem:[%s9308_s25 + $0xf58] sm:$0xff]   ;;  %v9218_v54 = vld [vmem:[%s9308_s25 + $0xf50] sm:$0xff]  }
 0x1fc   : > { %8502 = vmatprep.subr.bf16.mxu0 %v9186_v19  ;;  %v8206_v39 = vpop.f32.mrf.mxu1  ;;  %v9206_v19 = vld [vmem:[%s9308_s25 + $0xf68] sm:$0xff]   ;;  %v433_v58 = vld [vmem:[%s9344_s29 + $0x2f8] sm:$0xff] }
 0x1fd   : > { %8531 = vmatpush3.bf16.msra.mxu1 %v9189_v5  ;;  %v9209_v5 = vld [vmem:[%s9308_s25 + $0xfa8] sm:$0xff]   ;;  %v465_v59 = vld [vmem:[%s9344_s29 + $0x3f8] sm:$0xff] }
 0x1fe   : > { %v8172_v40 = vpop.f32.mrf.mxu0  ;;  %8532 = vmatprep.subr.bf16.mxu1 %v9191_v11  ;;  %v8207_v44 = vpop.f32.mrf.mxu1  ;;  %v9215_v11 = vld [vmem:[%s9308_s25 + $0xfd8] sm:$0xff]  }
 0x1ff   : > { %8503 = vmatpush3.bf16.msra.mxu0 %v9188_v1  ;;  %v8208_v46 = vadd.f32 %v8207_v44, %v8206_v39  ;;  %v7176_v1 = vcombine.low %v431_v63, %v463_v0  ;;  %v9229_v44 = vld [vmem:[%s9308_s25 + $0xf80] sm:$0xff]  }
 0x200   : > { %v8173_v4 = vpop.f32.mrf.mxu0  ;;  %8504 = vmatprep.subr.bf16.mxu0 %v9190_v9  ;;  %v8209_v3 = vpop.f32.mrf.mxu1  ;;  %v9212_v9 = vld [vmem:[%s9308_s25 + $0xf20] sm:$0xff]  }
 0x201   : > { %v8174_v6 = vadd.f32 %v8173_v4, %v8172_v40  ;;  %8533 = vmatpush3.bf16.msra.mxu1 %v9193_v16  ;;  %v7177_v4 = vcombine.high %v431_v63, %v463_v0 }
 0x202   : > { %v8175_v38 = vpop.f32.mrf.mxu0  ;;  %v8210_v53 = vpop.f32.mrf.mxu1 }
 0x203   : > { %v6028_v13 = vadd.f32 %v8174_v6, %v9949_v62  ;;  %8505 = vmatpush3.bf16.msra.mxu0 %v9192_v14  ;;  %v9195_v62 = vld [vmem:[%s9308_s25 + $0xec0] sm:$0xff]   ;;  %v8211_v56 = vadd.f32 %v8210_v53, %v8209_v3  ;;  %v9217_v14 = vld [vmem:[%s9308_s25 + $0xf98] sm:$0xff]  }
 0x204   : > { %v8176_v15 = vpop.f32.mrf.mxu0  ;;  %8506 = vmatprep.subr.bf16.mxu0 %v9194_v20  ;;  %8534 = vmatprep.subr.bf16.mxu1 %v9195_v62  ;;  %v9210_v6 = vld [vmem:[%s9308_s25 + $0xf60] sm:$0xff]   ;;  %v9220_v20 = vld [vmem:[%s9308_s25 + $0xf10] sm:$0xff]   ;;  %v401_v3 = vld [vmem:[%s9344_s29 + $0x1f8] sm:$0xff] }
 0x205   : > { %v10001_v34 = vadd.f32 %v8202_v7, %v6028_v13  ;;  %v8177_v17 = vadd.f32 %v8176_v15, %v8175_v38  ;;  %8535 = vmatpush3.bf16.msra.mxu1 %v9197_v26  ;;  %v9211_v7 = vld [vmem:[%s9308_s25 + $0xfe0] sm:$0xff]   ;;  %v9216_v13 = vld [vmem:[%s9308_s25 + $0xf18] sm:$0xff]  }
 0x206   : > { %v8178_v22 = vpop.f32.mrf.mxu0  ;;  %8576 = vmatprep.subr.bf16.mxu1 %v9199_v41  ;;  %v9213_v38 = vld [vmem:[%s9308_s25 + $0xfa0] sm:$0xff]  }
 0x207   : > { %v6031_v2 = vadd.f32 %v8177_v17, %v9956_v49  ;;  %8507 = vmatpush3.bf16.msra.mxu0 %v9196_v23  ;;  %v7111_v49 = vcombine.high %v366_v57, %v398_v29  ;;  %v9219_v17 = vld [vmem:[%s9308_s25 + $0xfd0] sm:$0xff]   ;;  %v9222_v57 = vld [vmem:[%s9308_s25 + $0xf48] sm:$0xff]  }
 0x208   : > { %v8179_v28 = vpop.f32.mrf.mxu0  ;;  %6663 = vmatmul.mubr.bf16.vlgmr.msra.gmra.mxu1 %v7112_v35  ;;  %8548 = vmatprep.subr.bf16.mxu0 %v9198_v37 }
 0x209   : > { %v10009_v8 = vadd.f32 %v8205_v18, %v6031_v2  ;;  %v8180_v24 = vadd.f32 %v8179_v28, %v8178_v22  ;;  %6613 = vmatprep.mubr.bf16.mxu0 %v7111_v49  ;;  %8577 = vmatpush3.bf16.msra.mxu1 %v9201_v45  ;;  %v9221_v22 = vld [vmem:[%s9308_s25 + $0xf90] sm:$0xff]  }
 0x20a   : > { %v8181_v31 = vpop.f32.mrf.mxu0  ;;  %6614 = vmatmul.mubr.bf16.vlgmr.msra.gmra.mxu0 %v7110_v33  ;;  %6670 = vmatprep.mubr.bf16.mxu1 %v7177_v4  ;;  %v400_v45 = vld [vmem:[%s9344_s29 + $0x1f0] sm:$0xff] }
 0x20b   : > { %v6036_v42 = vadd.f32 %v8180_v24, %v9968_v12  ;;  %8549 = vmatpush3.bf16.msra.mxu0 %v9200_v43  ;;  %v9203_v12 = vld [vmem:[%s9308_s25 + $0xff0] sm:$0xff]   ;;  %6621 = vmatprep.mubr.bf16.mxu0 %v7175_v61  ;;  %v9224_v24 = vld [vmem:[%s9308_s25 + $0xf08] sm:$0xff]  }
 0x20c   : > { %v8182_v27 = vpop.f32.mrf.mxu0  ;;  %8550 = vmatprep.subr.bf16.mxu0 %v9202_v48  ;;  %8578 = vmatprep.subr.bf16.mxu1 %v9203_v12  ;;  %v369_v48 = vld [vmem:[%s9344_s29 + $0xf8] sm:$0xff]  ;;  %v432_v12 = vld [vmem:[%s9344_s29 + $0x2f0] sm:$0xff] }
 0x20d   : > { %v8183_v47 = vadd.f32 %v8182_v27, %v8181_v31  ;;  %v10021_v50 = vadd.f32 %v8208_v46, %v6036_v42  ;;  %8579 = vmatpush3.bf16.msra.mxu1 %v9205_v55  ;;  %v9227_v31 = vld [vmem:[%s9308_s25 + $0xfc0] sm:$0xff]   ;;  %v368_v27 = vld [vmem:[%s9344_s29 + $0xf0] sm:$0xff]  ;;  %v7116_v53 = vcombine.low %v369_v48, %v401_v3  ;;  %v7117_v55 = vcombine.high %v369_v48, %v401_v3 }
 0x20e   : > { %v9228_v42 = vld [vmem:[%s9308_s25 + $0xf00] sm:$0xff]  }
 0x20f   : > { %v6039_v51 = vadd.f32 %v8183_v47, %v9977_v25  ;;  %8551 = vmatpush3.bf16.msra.mxu0 %v9204_v52  ;;  %v9207_v25 = vld [vmem:[%s9308_s25 + $0xfe8] sm:$0xff]   ;;  %v7114_v47 = vcombine.low %v368_v27, %v400_v45 }
 0x210   : > { %8552 = vmatprep.subr.bf16.mxu0 %v9206_v19  ;;  %8580 = vmatprep.subr.bf16.mxu1 %v9207_v25  ;;  %v7181_v19 = vcombine.high %v433_v58, %v465_v59 }
 0x211   : > { %v10029_v40 = vadd.f32 %v8211_v56, %v6039_v51  ;;  %8581 = vmatpush3.bf16.msra.mxu1 %v9209_v5  ;;  %v464_v56 = vld [vmem:[%s9344_s29 + $0x3f0] sm:$0xff] }
 0x212   : > { %6622 = vmatmul.mubr.bf16.gmra.mxu0 %v7174_v60  ;;  %6671 = vmatmul.mubr.bf16.gmra.mxu1 %v7176_v1  ;;  %v7179_v61 = vcombine.high %v432_v12, %v464_v56 }
 0x213   : > { %8553 = vmatpush3.bf16.msra.mxu0 %v9208_v21  ;;  %8582 = vmatprep.subr.bf16.mxu1 %v9211_v7 }
 0x214   : > { %8554 = vmatprep.subr.bf16.mxu0 %v9210_v6  ;;  %v8256_v16 = vpop.f32.mrf.mxu1  ;;  %6760 = vmatprep.mubr.bf16.mxu1 %v7117_v55 }
 0x215   : > { %8583 = vmatpush3.bf16.msra.mxu1 %v9213_v38 }
 0x216   : > { %8584 = vmatprep.subr.bf16.mxu1 %v9215_v11  ;;  %v8257_v2 = vpop.f32.mrf.mxu1 }
 0x217   : > { %8555 = vmatpush3.bf16.msra.mxu0 %v9212_v9  ;;  %v8258_v23 = vadd.f32 %v8257_v2, %v8256_v16  ;;  %v7178_v9 = vcombine.low %v432_v12, %v464_v56  ;;  %v6799_v2 = vld [vmem:[%s10338_s4 + $0x50] sm:$0xff] }
 0x218   : > { %8556 = vmatprep.subr.bf16.mxu0 %v9214_v10  ;;  %v8259_v29 = vpop.f32.mrf.mxu1  ;;  %v7180_v10 = vcombine.low %v433_v58, %v465_v59 }
 0x219   : > { %8585 = vmatpush3.bf16.msra.mxu1 %v9217_v14  ;;  %v6804_v14 = vld [vmem:[%s10338_s4 + $0x78] sm:$0xff] }
 0x21a   : > { %8586 = vmatprep.subr.bf16.mxu1 %v9219_v17  ;;  %v8260_v35 = vpop.f32.mrf.mxu1  ;;  %v6801_v17 = vld [vmem:[%s10338_s4 + $0x60] sm:$0xff] }
 0x21b   : > { %8557 = vmatpush3.bf16.msra.mxu0 %v9216_v13  ;;  %v8261_v37 = vadd.f32 %v8260_v35, %v8259_v29  ;;  %v6794_v35 = vld [vmem:[%s10338_s4 + $0x28] sm:$0xff] }
 0x21c   : > { %8558 = vmatprep.subr.bf16.mxu0 %v9218_v54  ;;  %v8262_v52 = vpop.f32.mrf.mxu1  ;;  %v6802_v54 = vld [vmem:[%s10338_s4 + $0x68] sm:$0xff] }
 0x21d   : > { %8587 = vmatpush3.bf16.msra.mxu1 %v9221_v22 }
 0x21e   : > { %8588 = vmatprep.subr.bf16.mxu1 %v9223_v30  ;;  %v8263_v25 = vpop.f32.mrf.mxu1  ;;  %v6796_v30 = vld [vmem:[%s10338_s4 + $0x38] sm:$0xff] }
 0x21f   : > { %v8228_v15 = vpop.f32.mrf.mxu0  ;;  %8559 = vmatpush3.bf16.msra.mxu0 %v9220_v20  ;;  %v8264_v0 = vadd.f32 %v8263_v25, %v8262_v52  ;;  %v6800_v20 = vld [vmem:[%s10338_s4 + $0x58] sm:$0xff] }
 0x220   : > { %8560 = vmatprep.subr.bf16.mxu0 %v9222_v57  ;;  %v8265_v21 = vpop.f32.mrf.mxu1  ;;  %v6797_v57 = vld [vmem:[%s10338_s4 + $0x40] sm:$0xff] }
 0x221   : > { %v8229_v18 = vpop.f32.mrf.mxu0  ;;  %8589 = vmatpush3.bf16.msra.mxu1 %v9225_v36 }
 0x222   : > { %v8230_v62 = vadd.f32 %v8229_v18, %v8228_v15  ;;  %8590 = vmatprep.subr.bf16.mxu1 %v9227_v31  ;;  %v8266_v7 = vpop.f32.mrf.mxu1  ;;  %v6792_v31 = vld [vmem:[%s10338_s4 + $0x18] sm:$0xff] }
 0x223   : > { %v8231_v26 = vpop.f32.mrf.mxu0  ;;  %8561 = vmatpush3.bf16.msra.mxu0 %v9224_v24  ;;  %v8267_v38 = vadd.f32 %v8266_v7, %v8265_v21 }
 0x224   : > { %v6126_v28 = vadd.f32 %v8230_v62, %v10001_v34  ;;  %v9226_v34 = vld [vmem:[%s9308_s25 + $0xf40] sm:$0xff]  }
 0x225   : > { %v8232_v32 = vpop.f32.mrf.mxu0  ;;  %8562 = vmatprep.subr.bf16.mxu0 %v9226_v34  ;;  %8591 = vmatpush3.bf16.msra.mxu1 %v9229_v44  ;;  %v6793_v34 = vld [vmem:[%s10338_s4 + $0x20] sm:$0xff] }
 0x226   : > { %v10052_v33 = vadd.f32 %v8258_v23, %v6126_v28  ;;  %v8233_v49 = vadd.f32 %v8232_v32, %v8231_v26  ;;  %8662 = vmatprep.subr.mxu1 %v6804_v14  ;;  %v6798_v23 = vld [vmem:[%s10338_s4 + $0x48] sm:$0xff] }
 0x227   : > { %v8234_v41 = vpop.f32.mrf.mxu0  ;;  %8563 = vmatpush3.bf16.msra.mxu0 %v9228_v42  ;;  %v6791_v42 = vld [vmem:[%s10338_s4 + $0x10] sm:$0xff] }
 0x228   : > { %v6129_v39 = vadd.f32 %v8233_v49, %v10009_v8  ;;  %v7115_v8 = vcombine.high %v368_v27, %v400_v45  ;;  %6761 = vmatmul.mubr.bf16.vlgmr.msra.gmra.mxu1 %v7116_v53  ;;  %8624 = vmatprep.subr.mxu0 %v6804_v14  ;;  %v6795_v49 = vld [vmem:[%s10338_s4 + $0x30] sm:$0xff]  ;;  %v6790_v27 = vld [vmem:[%s10338_s4 + $0x8] sm:$0xff] }
 0x229   : > { %v8235_v46 = vpop.f32.mrf.mxu0  ;;  %6768 = vmatprep.mubr.bf16.mxu1 %v7181_v19  ;;  %8678 = vmatpush3.msra.mxu1 %v6804_v14 }
 0x22a   : > { %v10059_v43 = vadd.f32 %v8261_v37, %v6129_v39  ;;  %v8236_v51 = vadd.f32 %v8235_v46, %v8234_v41  ;;  %6711 = vmatprep.mubr.bf16.mxu0 %v7115_v8  ;;  %v6789_v46 = vld [vmem:[%s10338_s4] sm:$0xff] }
 0x22b   : > { %v8237_v60 = vpop.f32.mrf.mxu0  ;;  %6712 = vmatmul.mubr.bf16.vlgmr.msra.gmra.mxu0 %v7114_v47 }
 0x22c   : > { %v6134_v63 = vadd.f32 %v8236_v51, %v10021_v50  ;;  %6719 = vmatprep.mubr.bf16.mxu0 %v7179_v61  ;;  %8625 = vmatpush3.msra.mxu0 %v6804_v14 }
 0x22d   : > { %v8238_v1 = vpop.f32.mrf.mxu0 }
 0x22e   : > { %v8239_v4 = vadd.f32 %v8238_v1, %v8237_v60  ;;  %v10071_v5 = vadd.f32 %v8264_v0, %v6134_v63 }
 0x230   : > { %v6137_v6 = vadd.f32 %v8239_v4, %v10029_v40  ;;  %6769 = vmatmul.mubr.bf16.gmra.mxu1 %v7180_v10  ;;  %v6803_v40 = vld [vmem:[%s10338_s4 + $0x70] sm:$0xff] }
 0x231   : > { %8626 = vmatprep.subr.mxu0 %v6803_v40  ;;  %8663 = vmatprep.subr.mxu1 %v6803_v40 }
 0x232   : > { %v10074_v11 = vadd.f32 %v8267_v38, %v6137_v6  ;;  %8627 = vmatpush3.msra.mxu0 %v6803_v40  ;;  %8679 = vmatpush3.msra.mxu1 %v6803_v40 }
 0x233   : > { %6720 = vmatmul.mubr.bf16.gmra.mxu0 %v7178_v9  ;;  %8628 = vmatprep.subr.mxu0 %v6802_v54 }
 0x234   : > { %v10091_v16 = vpop.f32.mrf.mxu1  ;;  %8664 = vmatprep.subr.mxu1 %v6802_v54  ;;  %8629 = vmatpush3.msra.mxu0 %v6802_v54 }
 0x235   : > { %8680 = vmatpush3.msra.mxu1 %v6802_v54  ;;  %8630 = vmatprep.subr.mxu0 %v6801_v17 }
 0x236   : > { %8665 = vmatprep.subr.mxu1 %v6801_v17  ;;  %v10101_v62 = vpop.f32.mrf.mxu1  ;;  %8631 = vmatpush3.msra.mxu0 %v6801_v17 }
 0x237   : > { %8681 = vmatpush3.msra.mxu1 %v6801_v17  ;;  %8632 = vmatprep.subr.mxu0 %v6800_v20 }
 0x238   : > { %8666 = vmatprep.subr.mxu1 %v6800_v20  ;;  %8633 = vmatpush3.msra.mxu0 %v6800_v20  ;;  %v10111_v26 = vpop.f32.mrf.mxu1 }
 0x239   : > { %8682 = vmatpush3.msra.mxu1 %v6800_v20  ;;  %8634 = vmatprep.subr.mxu0 %v6799_v2 }
 0x23a   : > { %8667 = vmatprep.subr.mxu1 %v6799_v2  ;;  %8635 = vmatpush3.msra.mxu0 %v6799_v2  ;;  %v10118_v29 = vpop.f32.mrf.mxu1 }
 0x23b   : > { %8683 = vmatpush3.msra.mxu1 %v6799_v2  ;;  %8636 = vmatprep.subr.mxu0 %v6798_v23 }
 0x23c   : > { %8668 = vmatprep.subr.mxu1 %v6798_v23  ;;  %8637 = vmatpush3.msra.mxu0 %v6798_v23  ;;  %v10125_v24 = vpop.f32.mrf.mxu1 }
 0x23d   : > { %8684 = vmatpush3.msra.mxu1 %v6798_v23  ;;  %8638 = vmatprep.subr.mxu0 %v6797_v57 }
 0x23e   : > { %8669 = vmatprep.subr.mxu1 %v6797_v57  ;;  %8639 = vmatpush3.msra.mxu0 %v6797_v57  ;;  %v10135_v37 = vpop.f32.mrf.mxu1 }
 0x23f   : > { %v10076_v50 = vpop.f32.mrf.mxu0  ;;  %8685 = vmatpush3.msra.mxu1 %v6797_v57  ;;  %8640 = vmatprep.subr.mxu0 %v6796_v30 }
 0x240   : > { %8670 = vmatprep.subr.mxu1 %v6796_v30  ;;  %8641 = vmatpush3.msra.mxu0 %v6796_v30  ;;  %v10145_v41 = vpop.f32.mrf.mxu1 }
 0x241   : > { %v10078_v13 = vpop.f32.mrf.mxu0  ;;  %8686 = vmatpush3.msra.mxu1 %v6796_v30  ;;  %8642 = vmatprep.subr.mxu0 %v6795_v49 }
 0x242   : > { %8671 = vmatprep.subr.mxu1 %v6795_v49  ;;  %8643 = vmatpush3.msra.mxu0 %v6795_v49  ;;  %v10155_v45 = vpop.f32.mrf.mxu1 }
 0x243   : > { %v10083_v15 = vpop.f32.mrf.mxu0  ;;  %8687 = vmatpush3.msra.mxu1 %v6795_v49  ;;  %8644 = vmatprep.subr.mxu0 %v6794_v35 }
 0x244   : > { %8672 = vmatprep.subr.mxu1 %v6794_v35  ;;  %8645 = vmatpush3.msra.mxu0 %v6794_v35 }
 0x245   : > { %v10096_v18 = vpop.f32.mrf.mxu0  ;;  %8688 = vmatpush3.msra.mxu1 %v6794_v35  ;;  %8646 = vmatprep.subr.mxu0 %v6793_v34 }
 0x246   : > { %8673 = vmatprep.subr.mxu1 %v6793_v34  ;;  %8647 = vmatpush3.msra.mxu0 %v6793_v34 }
 0x247   : > { %v10106_v22 = vpop.f32.mrf.mxu0  ;;  %8689 = vmatpush3.msra.mxu1 %v6793_v34  ;;  %8648 = vmatprep.subr.mxu0 %v6792_v31 }
 0x248   : > { %8674 = vmatprep.subr.mxu1 %v6792_v31  ;;  %8649 = vmatpush3.msra.mxu0 %v6792_v31 }
 0x249   : > { %v10116_v28 = vpop.f32.mrf.mxu0  ;;  %8690 = vmatpush3.msra.mxu1 %v6792_v31  ;;  %8650 = vmatprep.subr.mxu0 %v6791_v42 }
 0x24a   : > { %8675 = vmatprep.subr.mxu1 %v6791_v42  ;;  %8651 = vmatpush3.msra.mxu0 %v6791_v42 }
 0x24b   : > { %v10123_v32 = vpop.f32.mrf.mxu0  ;;  %8691 = vmatpush3.msra.mxu1 %v6791_v42  ;;  %8652 = vmatprep.subr.mxu0 %v6790_v27 }
 0x24c   : > { %8676 = vmatprep.subr.mxu1 %v6790_v27  ;;  %8653 = vmatpush3.msra.mxu0 %v6790_v27 }
 0x24d   : > { %v10133_v36 = vpop.f32.mrf.mxu0  ;;  %8692 = vmatpush3.msra.mxu1 %v6790_v27  ;;  %8654 = vmatprep.subr.mxu0 %v6789_v46 }
 0x24e   : > { %8677 = vmatprep.subr.mxu1 %v6789_v46  ;;  %8655 = vmatpush3.msra.mxu0 %v6789_v46 }
 0x24f   : > { %8693 = vmatpush3.msra.mxu1 %v6789_v46 }
 0x254   : > { %v8368_v8 = vpop.f32.mrf.mxu1 }
 0x256   : > { %v8369_v3 = vpop.f32.mrf.mxu1 }
 0x258   : > { %v10164_v51 = vpop.f32.mrf.mxu1 }
 0x25a   : > { %v10168_v53 = vpop.f32.mrf.mxu1 }
 0x25c   : > { %v10170_v55 = vpop.f32.mrf.mxu1 }
 0x25e   : > { %v10174_v58 = vpop.f32.mrf.mxu1 }
 0x25f   : > { %v10140_v39 = vpop.f32.mrf.mxu0 }
 0x260   : > { %v10178_v61 = vpop.f32.mrf.mxu1 }
 0x261   : > { %v10150_v44 = vpop.f32.mrf.mxu0 }
 0x262   : > { %v10180_v25 = vpop.f32.mrf.mxu1 }
 0x263   : > { %v10160_v47 = vpop.f32.mrf.mxu0 }
 0x265   : > { %v8344_v48 = vpop.f32.mrf.mxu0 }
 0x267   : > { %v10162_v12 = vpop.f32.mrf.mxu0 }
 0x269   : > { %v10166_v52 = vpop.f32.mrf.mxu0 }
 0x26b   : > { %v10172_v56 = vpop.f32.mrf.mxu0 }
 0x26d   : > { %v10176_v59 = vpop.f32.mrf.mxu0 }
 0x27f   : > { %v8396_v60 = vpop.f32.mrf.mxu0 }
 0x280   : > { %v10182_v63 = vpop.f32.mrf.mxu1 }
 0x281   : > { %v8397_v19 = vpop.f32.mrf.mxu0 }
 0x282   : > { %v8425_v1 = vpop.f32.mrf.mxu1 }
 0x283   : > { %v10184_v0 = vpop.f32.mrf.mxu0 }
 0x284   : > { %v10186_v21 = vpop.f32.mrf.mxu1 }
 0x285   : > { %v8400_v4 = vpop.f32.mrf.mxu0 }
 0x286   : > { %v10190_v7 = vpop.f32.mrf.mxu1 }
 0x287   : > { %v10188_v6 = vpop.f32.mrf.mxu0 }
 0x288   : > { %v10194_v38 = vpop.f32.mrf.mxu1 }
 0x289   : > { %v10192_v9 = vpop.f32.mrf.mxu0 }
 0x28a   : > { %v10198_v14 = vpop.f32.mrf.mxu1 }
 0x28b   : > { %v10196_v10 = vpop.f32.mrf.mxu0  ;;  %10341 = vst [vmem:[#allocation3_spill] sm:$0xff] %v10198_v14 }
 0x28c   : > { %10340 = vst [vmem:[#allocation2_spill] sm:$0xff] %v10196_v10  ;;  %v10202_v54 = vpop.f32.mrf.mxu1 }
 0x28d   : > { %v10200_v40 = vpop.f32.mrf.mxu0  ;;  %10343 = vst [vmem:[#allocation5_spill] sm:$0xff] %v10202_v54 }
 0x28e   : > { %10342 = vst [vmem:[#allocation4_spill] sm:$0xff] %v10200_v40  ;;  %v10204_v20 = vpop.f32.mrf.mxu1 }
 0x28f   : > { %10344 = vst [vmem:[#allocation6_spill] sm:$0xff] %v10204_v20 }
 0x2a8   : > { %v10206_v23 = vpop.f32.mrf.mxu1 }
 0x2aa   : > { %v8452_v17 = vpop.f32.mrf.mxu0  ;;  %v10210_v30 = vpop.f32.mrf.mxu1 }
 0x2ac   : > { %v8453_v2 = vpop.f32.mrf.mxu0  ;;  %v10214_v35 = vpop.f32.mrf.mxu1 }
 0x2ad   : > { %10345 = vst [vmem:[#allocation7_spill] sm:$0xff] %v10214_v35  ;;  %v8286_v35 = vadd.f32 %v10078_v13, %v10076_v50  ;;  %v8292_v50 = vadd.f32 %v10116_v28, %v10106_v22  ;;  %v8295_v22 = vadd.f32 %v10133_v36, %v10123_v32  ;;  %v8373_v32 = vadd.f32 %v10168_v53, %v10164_v51 }
 0x2ae   : > { %v10208_v57 = vpop.f32.mrf.mxu0  ;;  %v10218_v31 = vpop.f32.mrf.mxu1  ;;  %v8404_v51 = vadd.f32 %v10192_v9, %v10188_v6  ;;  %v10355_v9 = vld [vmem:[#allocation3_spill] sm:$0xff] }
 0x2af   : > { %10347 = vst [vmem:[#allocation9_spill] sm:$0xff] %v10218_v31 }
 0x2b0   : > { %v10212_v49 = vpop.f32.mrf.mxu0  ;;  %v10220_v42 = vpop.f32.mrf.mxu1 }
 0x2b1   : > { %10348 = vst [vmem:[#allocation10_spill] sm:$0xff] %v10220_v42  ;;  %v6224_v42 = vadd.f32 %v8286_v35, %v10052_v33  ;;  %v8317_v33 = vadd.f32 %v10118_v29, %v10111_v26  ;;  %v8348_v26 = vadd.f32 %v10166_v52, %v10162_v12 }
 0x2b2   : > { %v10216_v34 = vpop.f32.mrf.mxu0  ;;  %v10224_v46 = vpop.f32.mrf.mxu1 }
 0x2b3   : > { %10346 = vst [vmem:[#allocation8_spill] sm:$0xff] %v10216_v34  ;;  %10349 = vst [vmem:[#allocation11_spill] sm:$0xff] %v10224_v46  ;;  %v8314_v46 = vadd.f32 %v10101_v62, %v10091_v16  ;;  %v8370_v62 = vadd.f32 %v8369_v3, %v8368_v8 }
 0x2b4   : > { %v10222_v27 = vpop.f32.mrf.mxu0  ;;  %v10228_v54 = vpop.f32.mrf.mxu1 }
 0x2b5   : > { %10351 = vst [vmem:[#allocation13_spill] sm:$0xff] %v10228_v54  ;;  %v8342_v54 = vadd.f32 %v10150_v44, %v10140_v39  ;;  %v6232_v39 = vadd.f32 %v8292_v50, %v10071_v5  ;;  %v8320_v44 = vadd.f32 %v10135_v37, %v10125_v24  ;;  %v8323_v5 = vadd.f32 %v10155_v45, %v10145_v41 }
 0x2b6   : > { %v10226_v20 = vpop.f32.mrf.mxu0  ;;  %v10234_v14 = vpop.f32.mrf.mxu1  ;;  %v8426_v37 = vadd.f32 %v8425_v1, %v10182_v63  ;;  %v8454_v41 = vadd.f32 %v8453_v2, %v8452_v17  ;;  %v8432_v17 = vadd.f32 %v10355_v9, %v10194_v38  ;;  %v10356_v2 = vld [vmem:[#allocation2_spill] sm:$0xff] }
 0x2b7   : > { %10350 = vst [vmem:[#allocation12_spill] sm:$0xff] %v10226_v20  ;;  %10353 = vst [vmem:[#allocation15_spill] sm:$0xff] %v10234_v14  ;;  %v8289_v20 = vadd.f32 %v10096_v18, %v10083_v15  ;;  %v6273_v14 = vadd.f32 %v8314_v46, %v6224_v42  ;;  %v8345_v15 = vadd.f32 %v8344_v48, %v10160_v47 }
 0x2b8   : > { %v10230_v40 = vpop.f32.mrf.mxu0  ;;  %v6281_v47 = vadd.f32 %v8320_v44, %v6232_v39  ;;  %v6235_v48 = vadd.f32 %v8295_v22, %v10074_v11  ;;  %v8351_v11 = vadd.f32 %v10176_v59, %v10172_v56  ;;  %v8482_v56 = vadd.f32 %v10210_v30, %v10206_v23  ;;  %v10361_v39 = vld [vmem:[#allocation7_spill] sm:$0xff]  ;;  %v10362_v44 = vld [vmem:[#allocation9_spill] sm:$0xff] }
 0x2b9   : > { %10352 = vst [vmem:[#allocation14_spill] sm:$0xff] %v10230_v40  ;;  %v6322_v16 = vadd.f32 %v8342_v54, %v6273_v14  ;;  %v8457_v59 = vadd.f32 %v10212_v49, %v10208_v57  ;;  %v10359_v57 = vld [vmem:[#allocation5_spill] sm:$0xff]  ;;  %v10360_v49 = vld [vmem:[#allocation6_spill] sm:$0xff]  ;;  %v8485_v22 = vadd.f32 %v10362_v44, %v10361_v39 }
 0x2ba   : > { %v6330_v52 = vadd.f32 %v8348_v26, %v6281_v47  ;;  %v6284_v45 = vadd.f32 %v8323_v5, %v6235_v48 }
 0x2bb   : > { %v6371_v29 = vadd.f32 %v8370_v62, %v6322_v16 }
 0x2be   : > { %v10366_v48 = vld [vmem:[#allocation12_spill] sm:$0xff] }
 0x2c0   : > { %v10367_v5 = vld [vmem:[#allocation14_spill] sm:$0xff] }
 0x2c8   : > { %v10236_v34 = vpop.f32.mrf.mxu1 }
 0x2c9   : > { %10354 = vst [vmem:[#allocation16_spill] sm:$0xff] %v10236_v34  ;;  %v6227_v34 = vadd.f32 %v8289_v20, %v10059_v43  ;;  %v8398_v43 = vadd.f32 %v8397_v19, %v8396_v60  ;;  %v8401_v60 = vadd.f32 %v8400_v4, %v10184_v0  ;;  %v8376_v19 = vadd.f32 %v10174_v58, %v10170_v55 }
 0x2ca   : > { %v8508_v10 = vpop.f32.mrf.mxu0  ;;  %v10245_v40 = vpop.f32.mrf.mxu1  ;;  %v6333_v4 = vadd.f32 %v8351_v11, %v6284_v45  ;;  %v8379_v20 = vadd.f32 %v10180_v25, %v10178_v61  ;;  %v8429_v55 = vadd.f32 %v10190_v7, %v10186_v21  ;;  %v10358_v21 = vld [vmem:[#allocation8_spill] sm:$0xff] }
 0x2cb   : > { %v6276_v35 = vadd.f32 %v8317_v33, %v6227_v34  ;;  %v6420_v36 = vadd.f32 %v8398_v43, %v6371_v29  ;;  %v6379_v0 = vadd.f32 %v8376_v19, %v6330_v52  ;;  %v10357_v34 = vld [vmem:[#allocation4_spill] sm:$0xff]  ;;  %v8460_v7 = vadd.f32 %v10222_v27, %v10358_v21  ;;  %v10364_v29 = vld [vmem:[#allocation10_spill] sm:$0xff] }
 0x2cc   : > { %v8509_v31 = vpop.f32.mrf.mxu0  ;;  %v10255_v18 = vpop.f32.mrf.mxu1  ;;  %v8407_v42 = vadd.f32 %v10357_v34, %v10356_v2  ;;  %v6382_v33 = vadd.f32 %v8379_v20, %v6333_v4  ;;  %v6781_v34 = vld [vmem:[%s10314_s26] sm:$0xff] }
 0x2cd   : > { %v6325_v8 = vadd.f32 %v8345_v15, %v6276_v35  ;;  %v6469_v54 = vadd.f32 %v8426_v37, %v6420_v36  ;;  %v6428_v6 = vadd.f32 %v8404_v51, %v6379_v0  ;;  %v8510_v61 = vadd.f32 %v8509_v31, %v8508_v10  ;;  %v10368_v51 = vld [vmem:[#allocation13_spill] sm:$0xff] }
 0x2ce   : > { %v10249_v13 = vpop.f32.mrf.mxu0  ;;  %v10264_v3 = vpop.f32.mrf.mxu1  ;;  %v6431_v62 = vadd.f32 %v8407_v42, %v6382_v33  ;;  %v8435_v15 = vadd.f32 %v10360_v49, %v10359_v57 }
 0x2cf   : > { %v6374_v14 = vadd.f32 %v8373_v32, %v6325_v8  ;;  %v6518_v58 = vadd.f32 %v8454_v41, %v6469_v54  ;;  %v6477_v30 = vadd.f32 %v8432_v17, %v6428_v6  ;;  %v10365_v8 = vld [vmem:[#allocation11_spill] sm:$0xff]  ;;  %v8463_v32 = vadd.f32 %v10367_v5, %v10366_v48  ;;  %v6784_v48 = vld [vmem:[%s10314_s26 + $0x18] sm:$0xff] }
 0x2d0   : > { %v8512_v28 = vpop.f32.mrf.mxu0  ;;  %v10363_v43 = vld [vmem:[#allocation16_spill] sm:$0xff]  ;;  %v8488_v47 = vadd.f32 %v10365_v8, %v10364_v29  ;;  %v6480_v52 = vadd.f32 %v8435_v15, %v6431_v62  ;;  %v10369_v54 = vld [vmem:[#allocation15_spill] sm:$0xff]  ;;  %v8541_v4 = vadd.f32 %v10264_v3, %v10255_v18 }
 0x2d1   : > { %v6423_v63 = vadd.f32 %v8401_v60, %v6374_v14  ;;  %v6567_v16 = vadd.f32 %v8482_v56, %v6518_v58  ;;  %v8538_v10 = vadd.f32 %v10245_v40, %v10363_v43  ;;  %v8513_v31 = vadd.f32 %v8512_v28, %v10249_v13  ;;  %v6782_v62 = vld [vmem:[%s10314_s26 + $0x8] sm:$0xff] }
 0x2d2   : > { %v8514_v24 = vpop.f32.mrf.mxu0  ;;  %v10273_v12 = vpop.f32.mrf.mxu1  ;;  %v6526_v27 = vadd.f32 %v8460_v7, %v6477_v30  ;;  %v6529_v28 = vadd.f32 %v8463_v32, %v6480_v52 }
 0x2d3   : > { %v6472_v50 = vadd.f32 %v8429_v55, %v6423_v63  ;;  %v6616_v35 = vadd.f32 %v8510_v61, %v6567_v16  ;;  %v8491_v63 = vadd.f32 %v10369_v54, %v10368_v51 }
 0x2d4   : > { %v8515_v53 = vpop.f32.mrf.mxu0  ;;  %v8543_v1 = vpop.f32.mrf.mxu1  ;;  %v6575_v13 = vadd.f32 %v8488_v47, %v6526_v27 }
 0x2d5   : > { %v6521_v23 = vadd.f32 %v8457_v59, %v6472_v50  ;;  %v8516_v19 = vadd.f32 %v8515_v53, %v8514_v24  ;;  %v6665_v14 = vadd.f32 %v8538_v10, %v6616_v35  ;;  %v8544_v53 = vadd.f32 %v8543_v1, %v10273_v12 }
 0x2d6   : > { %v8517_v46 = vpop.f32.mrf.mxu0  ;;  %v8545_v25 = vpop.f32.mrf.mxu1  ;;  %v6578_v18 = vadd.f32 %v8491_v63, %v6529_v28 }
 0x2d7   : > { %v6570_v37 = vadd.f32 %v8485_v22, %v6521_v23  ;;  %v6624_v24 = vadd.f32 %v8516_v19, %v6575_v13 }
 0x2d8   : > { %v8518_v38 = vpop.f32.mrf.mxu0  ;;  %v8546_v26 = vpop.f32.mrf.mxu1 }
 0x2d9   : > { %v6619_v41 = vadd.f32 %v8513_v31, %v6570_v37  ;;  %v8519_v56 = vadd.f32 %v8518_v38, %v8517_v46  ;;  %v6673_v21 = vadd.f32 %v8544_v53, %v6624_v24  ;;  %v8547_v23 = vadd.f32 %v8546_v26, %v8545_v25  ;;  %v6783_v31 = vld [vmem:[%s10314_s26 + $0x10] sm:$0xff] }
 0x2db   : > { %v6668_v6 = vadd.f32 %v8541_v4, %v6619_v41  ;;  %v6627_v7 = vadd.f32 %v8519_v56, %v6578_v18 }
 0x2dd   : > { %v6676_v22 = vadd.f32 %v8547_v23, %v6627_v7 }
 0x2e8   : > { %v8592_v60 = vpop.f32.mrf.mxu1 }
 0x2ea   : > { %v8593_v45 = vpop.f32.mrf.mxu1 }
 0x2eb   : > { %v8564_v36 = vpop.f32.mrf.mxu0  ;;  %v8594_v55 = vadd.f32 %v8593_v45, %v8592_v60 }
 0x2ec   : > { %v8595_v58 = vpop.f32.mrf.mxu1 }
 0x2ed   : > { %v8565_v11 = vpop.f32.mrf.mxu0 }
 0x2ee   : > { %v8566_v40 = vadd.f32 %v8565_v11, %v8564_v36  ;;  %v8596_v2 = vpop.f32.mrf.mxu1 }
 0x2ef   : > { %v8567_v0 = vpop.f32.mrf.mxu0  ;;  %v8597_v61 = vadd.f32 %v8596_v2, %v8595_v58 }
 0x2f0   : > { %v6714_v20 = vadd.f32 %v8566_v40, %v6665_v14  ;;  %v8598_v33 = vpop.f32.mrf.mxu1 }
 0x2f1   : > { %v8568_v59 = vpop.f32.mrf.mxu0 }
 0x2f2   : > { %v6763_v9 = vadd.f32 %v8594_v55, %v6714_v20  ;;  %v8569_v17 = vadd.f32 %v8568_v59, %v8567_v0  ;;  %v8599_v1 = vpop.f32.mrf.mxu1 }
 0x2f3   : > { %v8570_v3 = vpop.f32.mrf.mxu0  ;;  %v8600_v38 = vadd.f32 %v8599_v1, %v8598_v33 }
 0x2f4   : > { %v6777_v42 = vmax.f32 %v6763_v9, 0.0  ;;  %v6717_v50 = vadd.f32 %v8569_v17, %v6668_v6  ;;  %v8601_v39 = vpop.f32.mrf.mxu1 }
 0x2f5   : > { %v8571_v16 = vpop.f32.mrf.mxu0 }
 0x2f6   : > { %v6766_v30 = vadd.f32 %v8597_v61, %v6717_v50  ;;  %v8572_v12 = vadd.f32 %v8571_v16, %v8570_v3  ;;  %v6785_v46 = vmul.f32 %v6781_v34, %v6777_v42  ;;  %v8602_v25 = vpop.f32.mrf.mxu1 }
 0x2f7   : > { %v8573_v57 = vpop.f32.mrf.mxu0  ;;  %v8603_v29 = vadd.f32 %v8602_v25, %v8601_v39 }
 0x2f8   : > { %v6778_v49 = vmax.f32 %v6766_v30, 0.0  ;;  %v6722_v15 = vadd.f32 %v8572_v12, %v6673_v21  ;;  %8656 = vmatprep.mubr.f32.mxu0 %v6785_v46 }
 0x2f9   : > { %v8574_v44 = vpop.f32.mrf.mxu0 }
 0x2fa   : > { %v6786_v35 = vmul.f32 %v6782_v62, %v6778_v49  ;;  %v6771_v43 = vadd.f32 %v8600_v38, %v6722_v15  ;;  %v8575_v10 = vadd.f32 %v8574_v44, %v8573_v57 }
 0x2fc   : > { %v6779_v26 = vmax.f32 %v6771_v43, 0.0  ;;  %v6725_v27 = vadd.f32 %v8575_v10, %v6676_v22  ;;  %8657 = vmatmul.mubr.f32.vlgmr.msra.gmra.mxu0 %v6786_v35 }
 0x2fe   : > { %v6774_v8 = vadd.f32 %v8603_v29, %v6725_v27  ;;  %v6787_v47 = vmul.f32 %v6783_v31, %v6779_v26 }
 0x300   : > { %v6780_v5 = vmax.f32 %v6774_v8, 0.0  ;;  %8659 = vmatprep.mubr.f32.mxu1 %v6787_v47 }
 0x302   : > { %v6788_v32 = vmul.f32 %v6784_v48, %v6780_v5 }
 0x304   : > { %8660 = vmatmul.mubr.f32.vlgmr.msra.gmra.mxu1 %v6788_v32 }
 0x3bc   : > { %v8658_v36 = vpop.f32.mrf.mxu0 }
 0x3bd   : > { %v7705_v37 = vpack.c.bf16 %v8658_v36, %v8658_v36 }
 0x3be   : > { %v6871_v60 = vpop.f32.mrf.mxu0 }
 0x3bf   : > { %6908 = vst.msk [vmem:[%s335_s30 + $0x4] sm:$0xf] %vm6906_vm0, %v7705_v37  ;;  %v7704_v52 = vpack.c.bf16 %v6871_v60, %v6871_v60 }
 0x3c1   : > { %6907 = vst.msk [vmem:[%s335_s30] sm:$0xf] %vm6906_vm0, %v7704_v52 }
 0x3c4   : > { %v8661_v19 = vpop.f32.mrf.mxu1 }
 0x3c5   : > { %v7707_v11 = vpack.c.bf16 %v8661_v19, %v8661_v19 }
 0x3c6   : > { %v6881_v14 = vpop.f32.mrf.mxu1 }
 0x3c7   : > { %6910 = vst.msk [vmem:[%s335_s30 + $0xc] sm:$0xf] %vm6906_vm0, %v7707_v11  ;;  %v7706_v41 = vpack.c.bf16 %v6881_v14, %v6881_v14 }
 0x3c9   : > { %6909 = vst.msk [vmem:[%s335_s30 + $0x8] sm:$0xf] %vm6906_vm0, %v7706_v41 }
 0x3ca PF: > { %s15_s20 = sadd.s32 1, %s9252_s20   ;;  %s10370_s18 = smov %s9248_s19 }
 0x3cb   : > { %p12_p5 = scmp.ge.s32.totalorder %s15_s20, 4   ;;  %s10371_s19 = smov %s10373_s21 }
 0x3cd   :  { %14 = sbr.rel (!%p12_p5) target bundleno = 2 (0x2), region = 79 }

// kernel: afe_forward.11
= control target key start
LH: loop header
LB: loop body
LE: loop exit
PB: predicated region body
PF: predicated region fallthrough
CT: control target
= control target key end

     0   :  { %s5044_s18 = smov 0   ;;  %s5046_s19 = smov 0   ;;  %s5678_s0 = inlined_call_operand.vmem [shape: bf16[2,32,4096], index: 0, kind: input, shape index: {}]   ;;  %s5679_s1 = inlined_call_operand.vmem [shape: bf16[2,4096,128], index: 1, kind: input, shape index: {}]   ;;  %s5680_s2 = inlined_call_operand.vmem [shape: f32[2,1,128], index: 2, kind: input, shape index: {}]   ;;  %s5681_s3 = inlined_call_operand.vmem [shape: f32[2,32,128], index: 3, kind: input, shape index: {}]   ;;  %s5682_s4 = inlined_call_operand.vmem [shape: f32[128,32], index: 4, kind: input, shape index: {}]   ;;  %s5683_s5 = inlined_call_operand.vmem [shape: bf16[2,32,32], index: 5, kind: output, shape index: {}]  }
   0x1   :  { %s5048_s20 = smov 0  }
   0x2 LB: > { %s27_s21 = sadd.s32 1, %s5008_s19  ;;  %p3828_p0 = scmp.ge.s32.totalorder %s5012_s20, 1  ;;  %s5012_s20 = sphi %s5048_s20, %s15_s20   ;;  %s5008_s19 = sphi %s5046_s19, %s5715_s19   ;;  %s5004_s18 = sphi %s5044_s18, %s5714_s18  }
   0x3   : > { %p29_p1 = scmp.ge.s32.totalorder %s27_s21, 2  ;;  %p244_p2 = scmp.lt.s32.totalorder %s5012_s20, 3 }
   0x5   : > { %s5717_s21 = smov (%p29_p1, %s27_s21), 0  ;;  %p245_p3 = pnand %p3828_p0, %p244_p2 }
   0x7   : > { %248 = sbr.rel (%p245_p3) target bundleno = 701 (0x2bd), region = 40 }
   0xc   : > { %p299_p4 = scmp.lt.s32.totalorder %s5004_s18, 1  ;;  %vm3690_vm0 = vcmask 257024  }
   0xe   : > { %s5719_s18 = smov (!%p299_p4, %s5004_s18), 1 }
   0xf   : > { %s4165_s22 = sshll.u32 %s5719_s18, 11  ;;  %s4164_s26 = sshll.u32 %s5719_s18, 9 }
  0x10   : > { %s5068_s25 = scalar_lea.vmem %s5679_s1, %s4165_s22  ;;  %s5104_s29 = scalar_lea.vmem %s5678_s0, %s4164_s26 }
  0x11   : > { %v4734_v0 = vld [vmem:[%s5068_s25 + $0x78] sm:$0xff]   ;;  %v4738_v4 = vld [vmem:[%s5068_s25 + $0x70] sm:$0xff]   ;;  %v4742_v8 = vld [vmem:[%s5068_s25 + $0x68] sm:$0xff]   ;;  %s316_s7 = scalar_lea.vmem %s5680_s2, %s5719_s18  ;;  %s4166_s23 = sshll.u32 %s5719_s18, 5 }
  0x12   : > { %v4735_v1 = vld [vmem:[%s5068_s25 + $0xf8] sm:$0xff]   ;;  %4172 = vmatprep.subr.bf16.mxu0 %v4734_v0  ;;  %v4739_v5 = vld [vmem:[%s5068_s25 + $0xf0] sm:$0xff]   ;;  %v4743_v9 = vld [vmem:[%s5068_s25 + $0xe8] sm:$0xff]   ;;  %s5658_s26 = scalar_lea.vmem %s5681_s3, %s4166_s23  ;;  %s4167_s27 = sshll.u32 %s5719_s18, 4 }
  0x13   : > { %v4736_v2 = vld [vmem:[%s5068_s25 + $0x38] sm:$0xff]   ;;  %4200 = vmatprep.subr.bf16.mxu1 %v4735_v1  ;;  %v4740_v6 = vld [vmem:[%s5068_s25 + $0x30] sm:$0xff]   ;;  %v4744_v10 = vld [vmem:[%s5068_s25 + $0x28] sm:$0xff]   ;;  %s335_s30 = scalar_lea.vmem %s5683_s5, %s4167_s27 }
  0x14   : > { %v4737_v3 = vld [vmem:[%s5068_s25 + $0xb8] sm:$0xff]   ;;  %4173 = vmatpush3.bf16.msra.mxu0 %v4736_v2  ;;  %v4741_v7 = vld [vmem:[%s5068_s25 + $0xb0] sm:$0xff]   ;;  %v4745_v11 = vld [vmem:[%s5068_s25 + $0xa8] sm:$0xff]  }
  0x15   : > { %4201 = vmatpush3.bf16.msra.mxu1 %v4737_v3  ;;  %4174 = vmatprep.subr.bf16.mxu0 %v4738_v4  ;;  %v4746_v12 = vld [vmem:[%s5068_s25 + $0x60] sm:$0xff]   ;;  %v4750_v16 = vld [vmem:[%s5068_s25 + $0x58] sm:$0xff]   ;;  %v4754_v20 = vld [vmem:[%s5068_s25 + $0x50] sm:$0xff]  }
  0x16   : > { %4202 = vmatprep.subr.bf16.mxu1 %v4739_v5  ;;  %v4747_v13 = vld [vmem:[%s5068_s25 + $0xe0] sm:$0xff]   ;;  %v4751_v17 = vld [vmem:[%s5068_s25 + $0xd8] sm:$0xff]   ;;  %v4755_v21 = vld [vmem:[%s5068_s25 + $0xd0] sm:$0xff]  }
  0x17   : > { %v4748_v14 = vld [vmem:[%s5068_s25 + $0x20] sm:$0xff]   ;;  %v4752_v18 = vld [vmem:[%s5068_s25 + $0x18] sm:$0xff]   ;;  %v4756_v22 = vld [vmem:[%s5068_s25 + $0x10] sm:$0xff]  }
  0x18   : > { %4175 = vmatpush3.bf16.msra.mxu0 %v4740_v6  ;;  %v4749_v15 = vld [vmem:[%s5068_s25 + $0xa0] sm:$0xff]   ;;  %v4753_v19 = vld [vmem:[%s5068_s25 + $0x98] sm:$0xff]   ;;  %v4757_v23 = vld [vmem:[%s5068_s25 + $0x90] sm:$0xff]  }
  0x19   : > { %4203 = vmatpush3.bf16.msra.mxu1 %v4741_v7  ;;  %4176 = vmatprep.subr.bf16.mxu0 %v4742_v8  ;;  %v4758_v24 = vld [vmem:[%s5068_s25 + $0x48] sm:$0xff]   ;;  %v4762_v28 = vld [vmem:[%s5068_s25 + $0x40] sm:$0xff]   ;;  %v4766_v40 = vld [vmem:[%s5068_s25 + $0x178] sm:$0xff]  }
  0x1a   : > { %4204 = vmatprep.subr.bf16.mxu1 %v4743_v9  ;;  %v4759_v25 = vld [vmem:[%s5068_s25 + $0xc8] sm:$0xff]   ;;  %v4763_v29 = vld [vmem:[%s5068_s25 + $0xc0] sm:$0xff]   ;;  %v4767_v41 = vld [vmem:[%s5068_s25 + $0x1f8] sm:$0xff]  }
  0x1b   : > { %v4760_v26 = vld [vmem:[%s5068_s25 + $0x8] sm:$0xff]   ;;  %v4764_v30 = vld [vmem:[%s5068_s25] sm:$0xff]   ;;  %v4768_v42 = vld [vmem:[%s5068_s25 + $0x138] sm:$0xff]  }
  0x1c   : > { %4177 = vmatpush3.bf16.msra.mxu0 %v4744_v10  ;;  %v4761_v27 = vld [vmem:[%s5068_s25 + $0x88] sm:$0xff]   ;;  %v4765_v31 = vld [vmem:[%s5068_s25 + $0x80] sm:$0xff]   ;;  %v4769_v43 = vld [vmem:[%s5068_s25 + $0x1b8] sm:$0xff]  }
  0x1d   : > { %4205 = vmatpush3.bf16.msra.mxu1 %v4745_v11  ;;  %4178 = vmatprep.subr.bf16.mxu0 %v4746_v12  ;;  %v338_v32 = vld [vmem:[%s5104_s29] sm:$0xff]  ;;  %v339_v34 = vld [vmem:[%s5104_s29 + $0x8] sm:$0xff]  ;;  %v4770_v44 = vld [vmem:[%s5068_s25 + $0x170] sm:$0xff]  }
  0x1e   : > { %4206 = vmatprep.subr.bf16.mxu1 %v4747_v13  ;;  %v354_v33 = vld [vmem:[%s5104_s29 + $0x80] sm:$0xff]  ;;  %v355_v37 = vld [vmem:[%s5104_s29 + $0x88] sm:$0xff]  ;;  %v4771_v45 = vld [vmem:[%s5068_s25 + $0x1f0] sm:$0xff]  }
  0x1f   : > { %v3838_v35 = vcombine.low %v338_v32, %v354_v33  ;;  %v3839_v36 = vcombine.high %v338_v32, %v354_v33  ;;  %v3840_v38 = vcombine.low %v339_v34, %v355_v37  ;;  %v3841_v39 = vcombine.high %v339_v34, %v355_v37  ;;  %v4772_v46 = vld [vmem:[%s5068_s25 + $0x130] sm:$0xff]   ;;  %v4774_v48 = vld [vmem:[%s5068_s25 + $0x168] sm:$0xff]   ;;  %v4778_v52 = vld [vmem:[%s5068_s25 + $0x160] sm:$0xff]  }
  0x20   : > { %4179 = vmatpush3.bf16.msra.mxu0 %v4748_v14  ;;  %v4773_v47 = vld [vmem:[%s5068_s25 + $0x1b0] sm:$0xff]   ;;  %v4775_v49 = vld [vmem:[%s5068_s25 + $0x1e8] sm:$0xff]   ;;  %v4779_v53 = vld [vmem:[%s5068_s25 + $0x1e0] sm:$0xff]  }
  0x21   : > { %4207 = vmatpush3.bf16.msra.mxu1 %v4749_v15  ;;  %4180 = vmatprep.subr.bf16.mxu0 %v4750_v16  ;;  %v4776_v50 = vld [vmem:[%s5068_s25 + $0x128] sm:$0xff]   ;;  %v4780_v54 = vld [vmem:[%s5068_s25 + $0x120] sm:$0xff]   ;;  %v4782_v56 = vld [vmem:[%s5068_s25 + $0x158] sm:$0xff]  }
  0x22   : > { %4208 = vmatprep.subr.bf16.mxu1 %v4751_v17  ;;  %2809 = vmatprep.mubr.bf16.mxu0 %v3839_v36  ;;  %v4777_v51 = vld [vmem:[%s5068_s25 + $0x1a8] sm:$0xff]   ;;  %v4781_v55 = vld [vmem:[%s5068_s25 + $0x1a0] sm:$0xff]   ;;  %v4783_v57 = vld [vmem:[%s5068_s25 + $0x1d8] sm:$0xff]  }
  0x23   : > { %2858 = vmatprep.mubr.bf16.mxu1 %v3841_v39  ;;  %v4784_v58 = vld [vmem:[%s5068_s25 + $0x118] sm:$0xff]   ;;  %v370_v60 = vld [vmem:[%s5104_s29 + $0x100] sm:$0xff]  ;;  %v371_v0 = vld [vmem:[%s5104_s29 + $0x108] sm:$0xff] }
  0x24   : > { %4181 = vmatpush3.bf16.msra.mxu0 %v4752_v18  ;;  %v4785_v59 = vld [vmem:[%s5068_s25 + $0x198] sm:$0xff]   ;;  %v386_v61 = vld [vmem:[%s5104_s29 + $0x180] sm:$0xff]  ;;  %v387_v1 = vld [vmem:[%s5104_s29 + $0x188] sm:$0xff] }
  0x25   : > { %4209 = vmatpush3.bf16.msra.mxu1 %v4753_v19  ;;  %4182 = vmatprep.subr.bf16.mxu0 %v4754_v20  ;;  %v3871_v62 = vcombine.high %v370_v60, %v386_v61  ;;  %v3870_v63 = vcombine.low %v370_v60, %v386_v61  ;;  %v3873_v2 = vcombine.high %v371_v0, %v387_v1  ;;  %v4786_v3 = vld [vmem:[%s5068_s25 + $0x150] sm:$0xff]   ;;  %v4790_v8 = vld [vmem:[%s5068_s25 + $0x148] sm:$0xff]   ;;  %v4794_v12 = vld [vmem:[%s5068_s25 + $0x140] sm:$0xff]  }
  0x26   : > { %4210 = vmatprep.subr.bf16.mxu1 %v4755_v21  ;;  %v3872_v4 = vcombine.low %v371_v0, %v387_v1  ;;  %v4787_v5 = vld [vmem:[%s5068_s25 + $0x1d0] sm:$0xff]   ;;  %v4791_v9 = vld [vmem:[%s5068_s25 + $0x1c8] sm:$0xff]   ;;  %v4795_v13 = vld [vmem:[%s5068_s25 + $0x1c0] sm:$0xff]  }
  0x27   : > { %v4788_v6 = vld [vmem:[%s5068_s25 + $0x110] sm:$0xff]   ;;  %v4792_v10 = vld [vmem:[%s5068_s25 + $0x108] sm:$0xff]   ;;  %v4796_v14 = vld [vmem:[%s5068_s25 + $0x100] sm:$0xff]  }
  0x28   : > { %4183 = vmatpush3.bf16.msra.mxu0 %v4756_v22  ;;  %v4789_v7 = vld [vmem:[%s5068_s25 + $0x190] sm:$0xff]   ;;  %v4793_v11 = vld [vmem:[%s5068_s25 + $0x188] sm:$0xff]   ;;  %v4797_v15 = vld [vmem:[%s5068_s25 + $0x180] sm:$0xff]  }
  0x29   : > { %4211 = vmatpush3.bf16.msra.mxu1 %v4757_v23  ;;  %4184 = vmatprep.subr.bf16.mxu0 %v4758_v24  ;;  %v340_v16 = vld [vmem:[%s5104_s29 + $0x10] sm:$0xff]  ;;  %v341_v18 = vld [vmem:[%s5104_s29 + $0x18] sm:$0xff]  ;;  %v4806_v36 = vld [vmem:[%s5068_s25 + $0x268] sm:$0xff]  }
  0x2a   : > { %4212 = vmatprep.subr.bf16.mxu1 %v4759_v25  ;;  %v356_v17 = vld [vmem:[%s5104_s29 + $0x90] sm:$0xff]  ;;  %v357_v19 = vld [vmem:[%s5104_s29 + $0x98] sm:$0xff]  ;;  %v4807_v37 = vld [vmem:[%s5068_s25 + $0x2e8] sm:$0xff]  }
  0x2b   : > { %v3842_v20 = vcombine.low %v340_v16, %v356_v17  ;;  %v3843_v21 = vcombine.high %v340_v16, %v356_v17  ;;  %v3844_v22 = vcombine.low %v341_v18, %v357_v19  ;;  %v3845_v23 = vcombine.high %v341_v18, %v357_v19  ;;  %v4798_v24 = vld [vmem:[%s5068_s25 + $0x278] sm:$0xff]   ;;  %v372_v32 = vld [vmem:[%s5104_s29 + $0x110] sm:$0xff]  ;;  %v4826_v60 = vld [vmem:[%s5068_s25 + $0x240] sm:$0xff]  }
  0x2c   : > { %4185 = vmatpush3.bf16.msra.mxu0 %v4760_v26  ;;  %v4799_v25 = vld [vmem:[%s5068_s25 + $0x2f8] sm:$0xff]   ;;  %v388_v33 = vld [vmem:[%s5104_s29 + $0x190] sm:$0xff]  ;;  %v4827_v61 = vld [vmem:[%s5068_s25 + $0x2c0] sm:$0xff]  }
  0x2d   : > { %4213 = vmatpush3.bf16.msra.mxu1 %v4761_v27  ;;  %4186 = vmatprep.subr.bf16.mxu0 %v4762_v28  ;;  %v4800_v26 = vld [vmem:[%s5068_s25 + $0x238] sm:$0xff]   ;;  %v4802_v28 = vld [vmem:[%s5068_s25 + $0x270] sm:$0xff]   ;;  %v3875_v34 = vcombine.high %v372_v32, %v388_v33  ;;  %v342_v0 = vld [vmem:[%s5104_s29 + $0x20] sm:$0xff] }
  0x2e   : > { %4214 = vmatprep.subr.bf16.mxu1 %v4763_v29  ;;  %v4801_v27 = vld [vmem:[%s5068_s25 + $0x2b8] sm:$0xff]   ;;  %v4803_v29 = vld [vmem:[%s5068_s25 + $0x2f0] sm:$0xff]   ;;  %v358_v1 = vld [vmem:[%s5104_s29 + $0xa0] sm:$0xff] }
  0x2f   : > { %v389_v39 = vld [vmem:[%s5104_s29 + $0x198] sm:$0xff]  ;;  %v374_v16 = vld [vmem:[%s5104_s29 + $0x120] sm:$0xff] }
  0x30   : > { %4187 = vmatpush3.bf16.msra.mxu0 %v4764_v30  ;;  %v4804_v30 = vld [vmem:[%s5068_s25 + $0x230] sm:$0xff]   ;;  %v390_v17 = vld [vmem:[%s5104_s29 + $0x1a0] sm:$0xff] }
  0x31   : > { %4215 = vmatpush3.bf16.msra.mxu1 %v4765_v31  ;;  %4228 = vmatprep.subr.bf16.mxu0 %v4766_v40  ;;  %v4805_v31 = vld [vmem:[%s5068_s25 + $0x2b0] sm:$0xff]   ;;  %v3879_v18 = vcombine.high %v374_v16, %v390_v17  ;;  %v3878_v19 = vcombine.low %v374_v16, %v390_v17  ;;  %v4878_v16 = vld [vmem:[%s5068_s25 + $0x458] sm:$0xff]  }
  0x32   : > { %4256 = vmatprep.subr.bf16.mxu1 %v4767_v41  ;;  %v4808_v41 = vld [vmem:[%s5068_s25 + $0x228] sm:$0xff]   ;;  %v4879_v17 = vld [vmem:[%s5068_s25 + $0x4d8] sm:$0xff]  }
  0x33   : > { %2810 = vmatmul.mubr.bf16.vlgmr.msra.gmra.mxu0 %v3838_v35  ;;  %v3874_v35 = vcombine.low %v372_v32, %v388_v33  ;;  %v4846_v32 = vld [vmem:[%s5068_s25 + $0x358] sm:$0xff]  }
  0x34   : > { %2859 = vmatmul.mubr.bf16.vlgmr.msra.gmra.mxu1 %v3840_v38  ;;  %4229 = vmatpush3.bf16.msra.mxu0 %v4768_v42  ;;  %v373_v38 = vld [vmem:[%s5104_s29 + $0x118] sm:$0xff] }
  0x35   : > { %4257 = vmatpush3.bf16.msra.mxu1 %v4769_v43  ;;  %4230 = vmatprep.subr.bf16.mxu0 %v4770_v44  ;;  %v3877_v40 = vcombine.high %v373_v38, %v389_v39  ;;  %v3876_v42 = vcombine.low %v373_v38, %v389_v39  ;;  %v4809_v43 = vld [vmem:[%s5068_s25 + $0x2a8] sm:$0xff]   ;;  %v4810_v44 = vld [vmem:[%s5068_s25 + $0x260] sm:$0xff]   ;;  %v4847_v33 = vld [vmem:[%s5068_s25 + $0x3d8] sm:$0xff]  }
  0x36   : > { %4258 = vmatprep.subr.bf16.mxu1 %v4771_v45  ;;  %2817 = vmatprep.mubr.bf16.mxu0 %v3871_v62  ;;  %v4811_v45 = vld [vmem:[%s5068_s25 + $0x2e0] sm:$0xff]   ;;  %v4852_v38 = vld [vmem:[%s5068_s25 + $0x310] sm:$0xff]  }
  0x37   : > { %2866 = vmatprep.mubr.bf16.mxu1 %v3873_v2  ;;  %v4828_v62 = vld [vmem:[%s5068_s25 + $0x200] sm:$0xff]   ;;  %v3846_v2 = vcombine.low %v342_v0, %v358_v1  ;;  %v4853_v39 = vld [vmem:[%s5068_s25 + $0x390] sm:$0xff]  }
  0x38   : > { %4231 = vmatpush3.bf16.msra.mxu0 %v4772_v46  ;;  %v4812_v46 = vld [vmem:[%s5068_s25 + $0x220] sm:$0xff]  }
  0x39   : > { %4259 = vmatpush3.bf16.msra.mxu1 %v4773_v47  ;;  %4232 = vmatprep.subr.bf16.mxu0 %v4774_v48  ;;  %v4813_v47 = vld [vmem:[%s5068_s25 + $0x2a0] sm:$0xff]   ;;  %v4814_v48 = vld [vmem:[%s5068_s25 + $0x258] sm:$0xff]  }
  0x3a   : > { %4260 = vmatprep.subr.bf16.mxu1 %v4775_v49  ;;  %v4815_v49 = vld [vmem:[%s5068_s25 + $0x2d8] sm:$0xff]  }
  0x3b   : > { %2818 = vmatmul.mubr.bf16.gmra.mxu0 %v3870_v63  ;;  %v4829_v63 = vld [vmem:[%s5068_s25 + $0x280] sm:$0xff]  }
  0x3c   : > { %4233 = vmatpush3.bf16.msra.mxu0 %v4776_v50  ;;  %2867 = vmatmul.mubr.bf16.gmra.mxu1 %v3872_v4  ;;  %v4816_v50 = vld [vmem:[%s5068_s25 + $0x218] sm:$0xff]   ;;  %v343_v4 = vld [vmem:[%s5104_s29 + $0x28] sm:$0xff] }
  0x3d   : > { %4261 = vmatpush3.bf16.msra.mxu1 %v4777_v51  ;;  %4234 = vmatprep.subr.bf16.mxu0 %v4778_v52  ;;  %v4817_v51 = vld [vmem:[%s5068_s25 + $0x298] sm:$0xff]   ;;  %v4818_v52 = vld [vmem:[%s5068_s25 + $0x250] sm:$0xff]  }
  0x3e   : > { %4262 = vmatprep.subr.bf16.mxu1 %v4779_v53  ;;  %2907 = vmatprep.mubr.bf16.mxu0 %v3843_v21  ;;  %v4819_v53 = vld [vmem:[%s5068_s25 + $0x2d0] sm:$0xff]   ;;  %v4839_v21 = vld [vmem:[%s5068_s25 + $0x3e8] sm:$0xff]  }
  0x3f   : > { %2956 = vmatprep.mubr.bf16.mxu1 %v3845_v23  ;;  %v391_v23 = vld [vmem:[%s5104_s29 + $0x1a8] sm:$0xff] }
  0x40   : > { %4235 = vmatpush3.bf16.msra.mxu0 %v4780_v54  ;;  %v4820_v54 = vld [vmem:[%s5068_s25 + $0x210] sm:$0xff]  }
  0x41   : > { %4263 = vmatpush3.bf16.msra.mxu1 %v4781_v55  ;;  %4236 = vmatprep.subr.bf16.mxu0 %v4782_v56  ;;  %v4821_v55 = vld [vmem:[%s5068_s25 + $0x290] sm:$0xff]   ;;  %v4822_v56 = vld [vmem:[%s5068_s25 + $0x248] sm:$0xff]  }
  0x42   : > { %4264 = vmatprep.subr.bf16.mxu1 %v4783_v57  ;;  %v4823_v57 = vld [vmem:[%s5068_s25 + $0x2c8] sm:$0xff]  }
  0x44   : > { %4237 = vmatpush3.bf16.msra.mxu0 %v4784_v58  ;;  %v4824_v58 = vld [vmem:[%s5068_s25 + $0x208] sm:$0xff]  }
  0x45   : > { %4265 = vmatpush3.bf16.msra.mxu1 %v4785_v59  ;;  %4238 = vmatprep.subr.bf16.mxu0 %v4786_v3  ;;  %v4825_v59 = vld [vmem:[%s5068_s25 + $0x288] sm:$0xff]   ;;  %v3847_v3 = vcombine.high %v342_v0, %v358_v1  ;;  %v376_v0 = vld [vmem:[%s5104_s29 + $0x130] sm:$0xff] }
  0x46   : > { %4266 = vmatprep.subr.bf16.mxu1 %v4787_v5  ;;  %v359_v5 = vld [vmem:[%s5104_s29 + $0xa8] sm:$0xff]  ;;  %v392_v1 = vld [vmem:[%s5104_s29 + $0x1b0] sm:$0xff] }
  0x48   : > { %4239 = vmatpush3.bf16.msra.mxu0 %v4788_v6  ;;  %v3848_v6 = vcombine.low %v343_v4, %v359_v5 }
  0x49   : > { %4267 = vmatpush3.bf16.msra.mxu1 %v4789_v7  ;;  %4240 = vmatprep.subr.bf16.mxu0 %v4790_v8  ;;  %v3849_v7 = vcombine.high %v343_v4, %v359_v5  ;;  %v4830_v8 = vld [vmem:[%s5068_s25 + $0x378] sm:$0xff]   ;;  %v4870_v4 = vld [vmem:[%s5068_s25 + $0x468] sm:$0xff]  }
  0x4a   : > { %4268 = vmatprep.subr.bf16.mxu1 %v4791_v9  ;;  %v4831_v9 = vld [vmem:[%s5068_s25 + $0x3f8] sm:$0xff]   ;;  %v4871_v5 = vld [vmem:[%s5068_s25 + $0x4e8] sm:$0xff]  }
  0x4c   : > { %4241 = vmatpush3.bf16.msra.mxu0 %v4792_v10  ;;  %v4832_v10 = vld [vmem:[%s5068_s25 + $0x338] sm:$0xff]  }
  0x4d   : > { %4269 = vmatpush3.bf16.msra.mxu1 %v4793_v11  ;;  %4242 = vmatprep.subr.bf16.mxu0 %v4794_v12  ;;  %v4833_v11 = vld [vmem:[%s5068_s25 + $0x3b8] sm:$0xff]   ;;  %v4834_v12 = vld [vmem:[%s5068_s25 + $0x370] sm:$0xff]  }
  0x4e   : > { %4270 = vmatprep.subr.bf16.mxu1 %v4795_v13  ;;  %v4835_v13 = vld [vmem:[%s5068_s25 + $0x3f0] sm:$0xff]  }
  0x50   : > { %4243 = vmatpush3.bf16.msra.mxu0 %v4796_v14  ;;  %v4836_v14 = vld [vmem:[%s5068_s25 + $0x330] sm:$0xff]  }
  0x51   : > { %4271 = vmatpush3.bf16.msra.mxu1 %v4797_v15  ;;  %4284 = vmatprep.subr.bf16.mxu0 %v4798_v24  ;;  %v4837_v15 = vld [vmem:[%s5068_s25 + $0x3b0] sm:$0xff]  }
  0x52   : > { %4312 = vmatprep.subr.bf16.mxu1 %v4799_v25  ;;  %v4840_v25 = vld [vmem:[%s5068_s25 + $0x328] sm:$0xff]  }
  0x53   : > { %2908 = vmatmul.mubr.bf16.vlgmr.msra.gmra.mxu0 %v3842_v20  ;;  %v4838_v20 = vld [vmem:[%s5068_s25 + $0x368] sm:$0xff]  }
  0x54   : > { %2957 = vmatmul.mubr.bf16.vlgmr.msra.gmra.mxu1 %v3844_v22  ;;  %4285 = vmatpush3.bf16.msra.mxu0 %v4800_v26  ;;  %v375_v22 = vld [vmem:[%s5104_s29 + $0x128] sm:$0xff] }
  0x55   : > { %4313 = vmatpush3.bf16.msra.mxu1 %v4801_v27  ;;  %4286 = vmatprep.subr.bf16.mxu0 %v4802_v28  ;;  %v3881_v24 = vcombine.high %v375_v22, %v391_v23  ;;  %v3880_v26 = vcombine.low %v375_v22, %v391_v23  ;;  %v4841_v27 = vld [vmem:[%s5068_s25 + $0x3a8] sm:$0xff]   ;;  %v4842_v28 = vld [vmem:[%s5068_s25 + $0x360] sm:$0xff]   ;;  %v4884_v22 = vld [vmem:[%s5068_s25 + $0x410] sm:$0xff]  }
  0x56   : > { %4314 = vmatprep.subr.bf16.mxu1 %v4803_v29  ;;  %2915 = vmatprep.mubr.bf16.mxu0 %v3875_v34  ;;  %v4843_v29 = vld [vmem:[%s5068_s25 + $0x3e0] sm:$0xff]   ;;  %v4848_v34 = vld [vmem:[%s5068_s25 + $0x318] sm:$0xff]   ;;  %v4885_v23 = vld [vmem:[%s5068_s25 + $0x490] sm:$0xff]  }
  0x57   : > { %2964 = vmatprep.mubr.bf16.mxu1 %v3877_v40  ;;  %v4854_v40 = vld [vmem:[%s5068_s25 + $0x348] sm:$0xff]  }
  0x58   : > { %4287 = vmatpush3.bf16.msra.mxu0 %v4804_v30  ;;  %v4844_v30 = vld [vmem:[%s5068_s25 + $0x320] sm:$0xff]  }
  0x59   : > { %4315 = vmatpush3.bf16.msra.mxu1 %v4805_v31  ;;  %4288 = vmatprep.subr.bf16.mxu0 %v4806_v36  ;;  %v4845_v31 = vld [vmem:[%s5068_s25 + $0x3a0] sm:$0xff]   ;;  %v4850_v36 = vld [vmem:[%s5068_s25 + $0x350] sm:$0xff]  }
  0x5a   : > { %4316 = vmatprep.subr.bf16.mxu1 %v4807_v37  ;;  %v4851_v37 = vld [vmem:[%s5068_s25 + $0x3d0] sm:$0xff]  }
  0x5b   : > { %2916 = vmatmul.mubr.bf16.gmra.mxu0 %v3874_v35  ;;  %v4849_v35 = vld [vmem:[%s5068_s25 + $0x398] sm:$0xff]  }
  0x5c   : > { %4289 = vmatpush3.bf16.msra.mxu0 %v4808_v41  ;;  %2965 = vmatmul.mubr.bf16.gmra.mxu1 %v3876_v42  ;;  %v4855_v41 = vld [vmem:[%s5068_s25 + $0x3c8] sm:$0xff]  }
  0x5d   : > { %4317 = vmatpush3.bf16.msra.mxu1 %v4809_v43  ;;  %4290 = vmatprep.subr.bf16.mxu0 %v4810_v44  ;;  %v4856_v42 = vld [vmem:[%s5068_s25 + $0x308] sm:$0xff]   ;;  %v4858_v44 = vld [vmem:[%s5068_s25 + $0x340] sm:$0xff]  }
  0x5e   : > { %4318 = vmatprep.subr.bf16.mxu1 %v4811_v45  ;;  %3005 = vmatprep.mubr.bf16.mxu0 %v3847_v3  ;;  %v4857_v43 = vld [vmem:[%s5068_s25 + $0x388] sm:$0xff]   ;;  %v4859_v45 = vld [vmem:[%s5068_s25 + $0x3c0] sm:$0xff]   ;;  %v3882_v3 = vcombine.low %v376_v0, %v392_v1 }
  0x5f   : > { %3054 = vmatprep.mubr.bf16.mxu1 %v3849_v7  ;;  %v393_v7 = vld [vmem:[%s5104_s29 + $0x1b8] sm:$0xff] }
  0x60   : > { %4291 = vmatpush3.bf16.msra.mxu0 %v4812_v46  ;;  %v4860_v46 = vld [vmem:[%s5068_s25 + $0x300] sm:$0xff]  }
  0x61   : > { %4319 = vmatpush3.bf16.msra.mxu1 %v4813_v47  ;;  %4292 = vmatprep.subr.bf16.mxu0 %v4814_v48  ;;  %v4861_v47 = vld [vmem:[%s5068_s25 + $0x380] sm:$0xff]   ;;  %v344_v48 = vld [vmem:[%s5104_s29 + $0x30] sm:$0xff] }
  0x62   : > { %4320 = vmatprep.subr.bf16.mxu1 %v4815_v49  ;;  %v360_v49 = vld [vmem:[%s5104_s29 + $0xb0] sm:$0xff] }
  0x64   : > { %4293 = vmatpush3.bf16.msra.mxu0 %v4816_v50  ;;  %v345_v50 = vld [vmem:[%s5104_s29 + $0x38] sm:$0xff] }
  0x65   : > { %4321 = vmatpush3.bf16.msra.mxu1 %v4817_v51  ;;  %4294 = vmatprep.subr.bf16.mxu0 %v4818_v52  ;;  %v3850_v51 = vcombine.low %v344_v48, %v360_v49  ;;  %v3851_v52 = vcombine.high %v344_v48, %v360_v49  ;;  %v378_v48 = vld [vmem:[%s5104_s29 + $0x140] sm:$0xff] }
  0x66   : > { %4322 = vmatprep.subr.bf16.mxu1 %v4819_v53  ;;  %v361_v53 = vld [vmem:[%s5104_s29 + $0xb8] sm:$0xff]  ;;  %v394_v49 = vld [vmem:[%s5104_s29 + $0x1c0] sm:$0xff] }
  0x68   : > { %4295 = vmatpush3.bf16.msra.mxu0 %v4820_v54  ;;  %v3852_v54 = vcombine.low %v345_v50, %v361_v53 }
  0x69   : > { %4323 = vmatpush3.bf16.msra.mxu1 %v4821_v55  ;;  %4296 = vmatprep.subr.bf16.mxu0 %v4822_v56  ;;  %v3853_v55 = vcombine.high %v345_v50, %v361_v53  ;;  %v4862_v56 = vld [vmem:[%s5068_s25 + $0x478] sm:$0xff]   ;;  %v3887_v50 = vcombine.high %v378_v48, %v394_v49  ;;  %v4903_v53 = vld [vmem:[%s5068_s25 + $0x5e8] sm:$0xff]  }
  0x6a   : > { %4324 = vmatprep.subr.bf16.mxu1 %v4823_v57  ;;  %v4863_v57 = vld [vmem:[%s5068_s25 + $0x4f8] sm:$0xff]  }
  0x6c   : > { %4297 = vmatpush3.bf16.msra.mxu0 %v4824_v58  ;;  %v4864_v58 = vld [vmem:[%s5068_s25 + $0x438] sm:$0xff]  }
  0x6d   : > { %4325 = vmatpush3.bf16.msra.mxu1 %v4825_v59  ;;  %4298 = vmatprep.subr.bf16.mxu0 %v4826_v60  ;;  %v4865_v59 = vld [vmem:[%s5068_s25 + $0x4b8] sm:$0xff]   ;;  %v4866_v60 = vld [vmem:[%s5068_s25 + $0x470] sm:$0xff]  }
  0x6e   : > { %4326 = vmatprep.subr.bf16.mxu1 %v4827_v61  ;;  %v4867_v61 = vld [vmem:[%s5068_s25 + $0x4f0] sm:$0xff]  }
  0x70   : > { %4299 = vmatpush3.bf16.msra.mxu0 %v4828_v62  ;;  %v4868_v62 = vld [vmem:[%s5068_s25 + $0x430] sm:$0xff]  }
  0x71   : > { %4327 = vmatpush3.bf16.msra.mxu1 %v4829_v63  ;;  %4340 = vmatprep.subr.bf16.mxu0 %v4830_v8  ;;  %v4869_v63 = vld [vmem:[%s5068_s25 + $0x4b0] sm:$0xff]  }
  0x72   : > { %4368 = vmatprep.subr.bf16.mxu1 %v4831_v9  ;;  %v4872_v9 = vld [vmem:[%s5068_s25 + $0x428] sm:$0xff]  }
  0x73   : > { %3006 = vmatmul.mubr.bf16.vlgmr.msra.gmra.mxu0 %v3846_v2  ;;  %v3883_v2 = vcombine.high %v376_v0, %v392_v1  ;;  %v4910_v0 = vld [vmem:[%s5068_s25 + $0x558] sm:$0xff]  }
  0x74   : > { %3055 = vmatmul.mubr.bf16.vlgmr.msra.gmra.mxu1 %v3848_v6  ;;  %4341 = vmatpush3.bf16.msra.mxu0 %v4832_v10  ;;  %v377_v6 = vld [vmem:[%s5104_s29 + $0x138] sm:$0xff] }
  0x75   : > { %4369 = vmatpush3.bf16.msra.mxu1 %v4833_v11  ;;  %4342 = vmatprep.subr.bf16.mxu0 %v4834_v12  ;;  %v3885_v8 = vcombine.high %v377_v6, %v393_v7  ;;  %v3884_v10 = vcombine.low %v377_v6, %v393_v7  ;;  %v4873_v11 = vld [vmem:[%s5068_s25 + $0x4a8] sm:$0xff]   ;;  %v4874_v12 = vld [vmem:[%s5068_s25 + $0x460] sm:$0xff]   ;;  %v4911_v1 = vld [vmem:[%s5068_s25 + $0x5d8] sm:$0xff]  }
  0x76   : > { %4370 = vmatprep.subr.bf16.mxu1 %v4835_v13  ;;  %3013 = vmatprep.mubr.bf16.mxu0 %v3879_v18  ;;  %v4875_v13 = vld [vmem:[%s5068_s25 + $0x4e0] sm:$0xff]   ;;  %v4880_v18 = vld [vmem:[%s5068_s25 + $0x418] sm:$0xff]   ;;  %v4916_v6 = vld [vmem:[%s5068_s25 + $0x510] sm:$0xff]  }
  0x77   : > { %3062 = vmatprep.mubr.bf16.mxu1 %v3881_v24  ;;  %v4886_v24 = vld [vmem:[%s5068_s25 + $0x448] sm:$0xff]   ;;  %v4917_v7 = vld [vmem:[%s5068_s25 + $0x590] sm:$0xff]  }
  0x78   : > { %4343 = vmatpush3.bf16.msra.mxu0 %v4836_v14  ;;  %v4876_v14 = vld [vmem:[%s5068_s25 + $0x420] sm:$0xff]  }
  0x79   : > { %4371 = vmatpush3.bf16.msra.mxu1 %v4837_v15  ;;  %4344 = vmatprep.subr.bf16.mxu0 %v4838_v20  ;;  %v4877_v15 = vld [vmem:[%s5068_s25 + $0x4a0] sm:$0xff]   ;;  %v4882_v20 = vld [vmem:[%s5068_s25 + $0x450] sm:$0xff]  }
  0x7a   : > { %4372 = vmatprep.subr.bf16.mxu1 %v4839_v21  ;;  %v4883_v21 = vld [vmem:[%s5068_s25 + $0x4d0] sm:$0xff]  }
  0x7b   : > { %3014 = vmatmul.mubr.bf16.gmra.mxu0 %v3878_v19  ;;  %v4881_v19 = vld [vmem:[%s5068_s25 + $0x498] sm:$0xff]  }
  0x7c   : > { %4345 = vmatpush3.bf16.msra.mxu0 %v4840_v25  ;;  %3063 = vmatmul.mubr.bf16.gmra.mxu1 %v3880_v26  ;;  %v4887_v25 = vld [vmem:[%s5068_s25 + $0x4c8] sm:$0xff]  }
  0x7d   : > { %4373 = vmatpush3.bf16.msra.mxu1 %v4841_v27  ;;  %4346 = vmatprep.subr.bf16.mxu0 %v4842_v28  ;;  %v4888_v26 = vld [vmem:[%s5068_s25 + $0x408] sm:$0xff]   ;;  %v4890_v28 = vld [vmem:[%s5068_s25 + $0x440] sm:$0xff]  }
  0x7e   : > { %4374 = vmatprep.subr.bf16.mxu1 %v4843_v29  ;;  %3103 = vmatprep.mubr.bf16.mxu0 %v3851_v52  ;;  %v4889_v27 = vld [vmem:[%s5068_s25 + $0x488] sm:$0xff]   ;;  %v4891_v29 = vld [vmem:[%s5068_s25 + $0x4c0] sm:$0xff]  }
  0x7f   : > { %3152 = vmatprep.mubr.bf16.mxu1 %v3853_v55  ;;  %v4902_v52 = vld [vmem:[%s5068_s25 + $0x568] sm:$0xff]  }
  0x80   : > { %4347 = vmatpush3.bf16.msra.mxu0 %v4844_v30  ;;  %v4892_v30 = vld [vmem:[%s5068_s25 + $0x400] sm:$0xff]   ;;  %v395_v55 = vld [vmem:[%s5104_s29 + $0x1c8] sm:$0xff] }
  0x81   : > { %4375 = vmatpush3.bf16.msra.mxu1 %v4845_v31  ;;  %4348 = vmatprep.subr.bf16.mxu0 %v4846_v32  ;;  %v4893_v31 = vld [vmem:[%s5068_s25 + $0x480] sm:$0xff]  }
  0x82   : > { %4376 = vmatprep.subr.bf16.mxu1 %v4847_v33  ;;  %v346_v32 = vld [vmem:[%s5104_s29 + $0x40] sm:$0xff] }
  0x83   : > { %v362_v33 = vld [vmem:[%s5104_s29 + $0xc0] sm:$0xff] }
  0x84   : > { %4349 = vmatpush3.bf16.msra.mxu0 %v4848_v34  ;;  %v347_v34 = vld [vmem:[%s5104_s29 + $0x48] sm:$0xff] }
  0x85   : > { %4377 = vmatpush3.bf16.msra.mxu1 %v4849_v35  ;;  %4350 = vmatprep.subr.bf16.mxu0 %v4850_v36  ;;  %v363_v35 = vld [vmem:[%s5104_s29 + $0xc8] sm:$0xff]  ;;  %v3854_v36 = vcombine.low %v346_v32, %v362_v33 }
  0x86   : > { %4378 = vmatprep.subr.bf16.mxu1 %v4851_v37  ;;  %v3855_v37 = vcombine.high %v346_v32, %v362_v33  ;;  %v380_v32 = vld [vmem:[%s5104_s29 + $0x150] sm:$0xff] }
  0x87   : > { %v396_v33 = vld [vmem:[%s5104_s29 + $0x1d0] sm:$0xff] }
  0x88   : > { %4351 = vmatpush3.bf16.msra.mxu0 %v4852_v38  ;;  %v3856_v38 = vcombine.low %v347_v34, %v363_v35 }
  0x89   : > { %4379 = vmatpush3.bf16.msra.mxu1 %v4853_v39  ;;  %4352 = vmatprep.subr.bf16.mxu0 %v4854_v40  ;;  %v3857_v39 = vcombine.high %v347_v34, %v363_v35  ;;  %v4894_v40 = vld [vmem:[%s5068_s25 + $0x578] sm:$0xff]   ;;  %v3891_v34 = vcombine.high %v380_v32, %v396_v33  ;;  %v3890_v35 = vcombine.low %v380_v32, %v396_v33  ;;  %v4965_v32 = vld [vmem:[%s5068_s25 + $0x7b0] sm:$0xff]   ;;  %v382_v33 = vld [vmem:[%s5104_s29 + $0x160] sm:$0xff] }
  0x8a   : > { %4380 = vmatprep.subr.bf16.mxu1 %v4855_v41  ;;  %v4895_v41 = vld [vmem:[%s5068_s25 + $0x5f8] sm:$0xff]  }
  0x8c   : > { %4353 = vmatpush3.bf16.msra.mxu0 %v4856_v42  ;;  %v4896_v42 = vld [vmem:[%s5068_s25 + $0x538] sm:$0xff]  }
  0x8d   : > { %4381 = vmatpush3.bf16.msra.mxu1 %v4857_v43  ;;  %4354 = vmatprep.subr.bf16.mxu0 %v4858_v44  ;;  %v4897_v43 = vld [vmem:[%s5068_s25 + $0x5b8] sm:$0xff]   ;;  %v4898_v44 = vld [vmem:[%s5068_s25 + $0x570] sm:$0xff]  }
  0x8e   : > { %4382 = vmatprep.subr.bf16.mxu1 %v4859_v45  ;;  %v4899_v45 = vld [vmem:[%s5068_s25 + $0x5f0] sm:$0xff]  }
  0x90   : > { %4355 = vmatpush3.bf16.msra.mxu0 %v4860_v46  ;;  %v4900_v46 = vld [vmem:[%s5068_s25 + $0x530] sm:$0xff]  }
  0x91   : > { %4383 = vmatpush3.bf16.msra.mxu1 %v4861_v47  ;;  %4396 = vmatprep.subr.bf16.mxu0 %v4862_v56  ;;  %v4901_v47 = vld [vmem:[%s5068_s25 + $0x5b0] sm:$0xff]  }
  0x92   : > { %4424 = vmatprep.subr.bf16.mxu1 %v4863_v57  ;;  %v4904_v57 = vld [vmem:[%s5068_s25 + $0x528] sm:$0xff]  }
  0x93   : > { %3104 = vmatmul.mubr.bf16.vlgmr.msra.gmra.mxu0 %v3850_v51  ;;  %v3886_v51 = vcombine.low %v378_v48, %v394_v49  ;;  %v4942_v48 = vld [vmem:[%s5068_s25 + $0x658] sm:$0xff]  }
  0x94   : > { %3153 = vmatmul.mubr.bf16.vlgmr.msra.gmra.mxu1 %v3852_v54  ;;  %4397 = vmatpush3.bf16.msra.mxu0 %v4864_v58  ;;  %v379_v54 = vld [vmem:[%s5104_s29 + $0x148] sm:$0xff]  ;;  %v4943_v49 = vld [vmem:[%s5068_s25 + $0x6d8] sm:$0xff]  }
  0x95   : > { %4425 = vmatpush3.bf16.msra.mxu1 %v4865_v59  ;;  %4398 = vmatprep.subr.bf16.mxu0 %v4866_v60  ;;  %v3889_v56 = vcombine.high %v379_v54, %v395_v55  ;;  %v3888_v58 = vcombine.low %v379_v54, %v395_v55  ;;  %v4905_v59 = vld [vmem:[%s5068_s25 + $0x5a8] sm:$0xff]   ;;  %v4906_v60 = vld [vmem:[%s5068_s25 + $0x560] sm:$0xff]   ;;  %v4947_v54 = vld [vmem:[%s5068_s25 + $0x6d0] sm:$0xff]  }
  0x96   : > { %4426 = vmatprep.subr.bf16.mxu1 %v4867_v61  ;;  %3111 = vmatprep.mubr.bf16.mxu0 %v3883_v2  ;;  %v4907_v61 = vld [vmem:[%s5068_s25 + $0x5e0] sm:$0xff]   ;;  %v4912_v2 = vld [vmem:[%s5068_s25 + $0x518] sm:$0xff]  }
  0x97   : > { %3160 = vmatprep.mubr.bf16.mxu1 %v3885_v8  ;;  %v4918_v8 = vld [vmem:[%s5068_s25 + $0x548] sm:$0xff]  }
  0x98   : > { %4399 = vmatpush3.bf16.msra.mxu0 %v4868_v62  ;;  %v4908_v62 = vld [vmem:[%s5068_s25 + $0x520] sm:$0xff]  }
  0x99   : > { %4427 = vmatpush3.bf16.msra.mxu1 %v4869_v63  ;;  %4400 = vmatprep.subr.bf16.mxu0 %v4870_v4  ;;  %v4909_v63 = vld [vmem:[%s5068_s25 + $0x5a0] sm:$0xff]   ;;  %v4914_v4 = vld [vmem:[%s5068_s25 + $0x550] sm:$0xff]  }
  0x9a   : > { %4428 = vmatprep.subr.bf16.mxu1 %v4871_v5  ;;  %v4915_v5 = vld [vmem:[%s5068_s25 + $0x5d0] sm:$0xff]  }
  0x9b   : > { %3112 = vmatmul.mubr.bf16.gmra.mxu0 %v3882_v3  ;;  %v4913_v3 = vld [vmem:[%s5068_s25 + $0x598] sm:$0xff]  }
  0x9c   : > { %4401 = vmatpush3.bf16.msra.mxu0 %v4872_v9  ;;  %3161 = vmatmul.mubr.bf16.gmra.mxu1 %v3884_v10  ;;  %v4919_v9 = vld [vmem:[%s5068_s25 + $0x5c8] sm:$0xff]  }
  0x9d   : > { %4429 = vmatpush3.bf16.msra.mxu1 %v4873_v11  ;;  %4402 = vmatprep.subr.bf16.mxu0 %v4874_v12  ;;  %v4920_v10 = vld [vmem:[%s5068_s25 + $0x508] sm:$0xff]   ;;  %v4922_v12 = vld [vmem:[%s5068_s25 + $0x540] sm:$0xff]  }
  0x9e   : > { %4430 = vmatprep.subr.bf16.mxu1 %v4875_v13  ;;  %3201 = vmatprep.mubr.bf16.mxu0 %v3855_v37  ;;  %v4921_v11 = vld [vmem:[%s5068_s25 + $0x588] sm:$0xff]   ;;  %v4923_v13 = vld [vmem:[%s5068_s25 + $0x5c0] sm:$0xff]  }
  0x9f   : > { %3250 = vmatprep.mubr.bf16.mxu1 %v3857_v39  ;;  %v4935_v37 = vld [vmem:[%s5068_s25 + $0x6e8] sm:$0xff]   ;;  %v397_v39 = vld [vmem:[%s5104_s29 + $0x1d8] sm:$0xff] }
  0xa0   : > { %4403 = vmatpush3.bf16.msra.mxu0 %v4876_v14  ;;  %v4924_v14 = vld [vmem:[%s5068_s25 + $0x500] sm:$0xff]  }
  0xa1   : > { %4431 = vmatpush3.bf16.msra.mxu1 %v4877_v15  ;;  %4404 = vmatprep.subr.bf16.mxu0 %v4878_v16  ;;  %v4925_v15 = vld [vmem:[%s5068_s25 + $0x580] sm:$0xff]   ;;  %v348_v16 = vld [vmem:[%s5104_s29 + $0x50] sm:$0xff] }
  0xa2   : > { %4432 = vmatprep.subr.bf16.mxu1 %v4879_v17  ;;  %v364_v17 = vld [vmem:[%s5104_s29 + $0xd0] sm:$0xff] }
  0xa4   : > { %4405 = vmatpush3.bf16.msra.mxu0 %v4880_v18  ;;  %v3858_v18 = vcombine.low %v348_v16, %v364_v17 }
  0xa5   : > { %4433 = vmatpush3.bf16.msra.mxu1 %v4881_v19  ;;  %4406 = vmatprep.subr.bf16.mxu0 %v4882_v20  ;;  %v3859_v19 = vcombine.high %v348_v16, %v364_v17  ;;  %v349_v20 = vld [vmem:[%s5104_s29 + $0x58] sm:$0xff]  ;;  %v367_v17 = vld [vmem:[%s5104_s29 + $0xe8] sm:$0xff] }
  0xa6   : > { %4434 = vmatprep.subr.bf16.mxu1 %v4883_v21  ;;  %v365_v21 = vld [vmem:[%s5104_s29 + $0xd8] sm:$0xff] }
  0xa8   : > { %4407 = vmatpush3.bf16.msra.mxu0 %v4884_v22  ;;  %v3860_v22 = vcombine.low %v349_v20, %v365_v21 }
  0xa9   : > { %4435 = vmatpush3.bf16.msra.mxu1 %v4885_v23  ;;  %4408 = vmatprep.subr.bf16.mxu0 %v4886_v24  ;;  %v3861_v23 = vcombine.high %v349_v20, %v365_v21  ;;  %v4926_v24 = vld [vmem:[%s5068_s25 + $0x678] sm:$0xff]  }
  0xaa   : > { %4436 = vmatprep.subr.bf16.mxu1 %v4887_v25  ;;  %v4927_v25 = vld [vmem:[%s5068_s25 + $0x6f8] sm:$0xff]  }
  0xab   : > { %v4958_v20 = vld [vmem:[%s5068_s25 + $0x778] sm:$0xff]  }
  0xac   : > { %4409 = vmatpush3.bf16.msra.mxu0 %v4888_v26  ;;  %v4928_v26 = vld [vmem:[%s5068_s25 + $0x638] sm:$0xff]  }
  0xad   : > { %4437 = vmatpush3.bf16.msra.mxu1 %v4889_v27  ;;  %4410 = vmatprep.subr.bf16.mxu0 %v4890_v28  ;;  %v4929_v27 = vld [vmem:[%s5068_s25 + $0x6b8] sm:$0xff]   ;;  %v4930_v28 = vld [vmem:[%s5068_s25 + $0x670] sm:$0xff]  }
  0xae   : > { %4438 = vmatprep.subr.bf16.mxu1 %v4891_v29  ;;  %v4931_v29 = vld [vmem:[%s5068_s25 + $0x6f0] sm:$0xff]   ;;  %v4959_v21 = vld [vmem:[%s5068_s25 + $0x7f8] sm:$0xff]  }
  0xb0   : > { %4411 = vmatpush3.bf16.msra.mxu0 %v4892_v30  ;;  %v4932_v30 = vld [vmem:[%s5068_s25 + $0x630] sm:$0xff]  }
  0xb1   : > { %4439 = vmatpush3.bf16.msra.mxu1 %v4893_v31  ;;  %4452 = vmatprep.subr.bf16.mxu0 %v4894_v40  ;;  %v4933_v31 = vld [vmem:[%s5068_s25 + $0x6b0] sm:$0xff]  }
  0xb2   : > { %4480 = vmatprep.subr.bf16.mxu1 %v4895_v41  ;;  %v4936_v41 = vld [vmem:[%s5068_s25 + $0x628] sm:$0xff]  }
  0xb3   : > { %3202 = vmatmul.mubr.bf16.vlgmr.msra.gmra.mxu0 %v3854_v36  ;;  %v4934_v36 = vld [vmem:[%s5068_s25 + $0x668] sm:$0xff]  }
  0xb4   : > { %3251 = vmatmul.mubr.bf16.vlgmr.msra.gmra.mxu1 %v3856_v38  ;;  %4453 = vmatpush3.bf16.msra.mxu0 %v4896_v42  ;;  %v381_v38 = vld [vmem:[%s5104_s29 + $0x158] sm:$0xff] }
  0xb5   : > { %4481 = vmatpush3.bf16.msra.mxu1 %v4897_v43  ;;  %4454 = vmatprep.subr.bf16.mxu0 %v4898_v44  ;;  %v3893_v40 = vcombine.high %v381_v38, %v397_v39  ;;  %v3892_v42 = vcombine.low %v381_v38, %v397_v39  ;;  %v4937_v43 = vld [vmem:[%s5068_s25 + $0x6a8] sm:$0xff]   ;;  %v4938_v44 = vld [vmem:[%s5068_s25 + $0x660] sm:$0xff]  }
  0xb6   : > { %4482 = vmatprep.subr.bf16.mxu1 %v4899_v45  ;;  %3209 = vmatprep.mubr.bf16.mxu0 %v3887_v50  ;;  %v4939_v45 = vld [vmem:[%s5068_s25 + $0x6e0] sm:$0xff]   ;;  %v4944_v50 = vld [vmem:[%s5068_s25 + $0x618] sm:$0xff]   ;;  %v4966_v38 = vld [vmem:[%s5068_s25 + $0x768] sm:$0xff]  }
  0xb7   : > { %3258 = vmatprep.mubr.bf16.mxu1 %v3889_v56  ;;  %v4948_v56 = vld [vmem:[%s5068_s25 + $0x610] sm:$0xff]  }
  0xb8   : > { %4455 = vmatpush3.bf16.msra.mxu0 %v4900_v46  ;;  %v4940_v46 = vld [vmem:[%s5068_s25 + $0x620] sm:$0xff]  }
  0xb9   : > { %4483 = vmatpush3.bf16.msra.mxu1 %v4901_v47  ;;  %4456 = vmatprep.subr.bf16.mxu0 %v4902_v52  ;;  %v4941_v47 = vld [vmem:[%s5068_s25 + $0x6a0] sm:$0xff]   ;;  %v4946_v52 = vld [vmem:[%s5068_s25 + $0x650] sm:$0xff]  }
  0xba   : > { %4484 = vmatprep.subr.bf16.mxu1 %v4903_v53 }
  0xbb   : > { %3210 = vmatmul.mubr.bf16.gmra.mxu0 %v3886_v51  ;;  %v4945_v51 = vld [vmem:[%s5068_s25 + $0x698] sm:$0xff]  }
  0xbc   : > { %4457 = vmatpush3.bf16.msra.mxu0 %v4904_v57  ;;  %3259 = vmatmul.mubr.bf16.gmra.mxu1 %v3888_v58  ;;  %v4949_v58 = vld [vmem:[%s5068_s25 + $0x690] sm:$0xff]  }
  0xbd   : > { %4485 = vmatpush3.bf16.msra.mxu1 %v4905_v59  ;;  %4458 = vmatprep.subr.bf16.mxu0 %v4906_v60 }
  0xbe   : > { %4486 = vmatprep.subr.bf16.mxu1 %v4907_v61  ;;  %3299 = vmatprep.mubr.bf16.mxu0 %v3859_v19  ;;  %v4950_v61 = vld [vmem:[%s5068_s25 + $0x648] sm:$0xff]  }
  0xbf   : > { %3348 = vmatprep.mubr.bf16.mxu1 %v3861_v23  ;;  %v4961_v23 = vld [vmem:[%s5068_s25 + $0x7b8] sm:$0xff]  }
  0xc0   : > { %4459 = vmatpush3.bf16.msra.mxu0 %v4908_v62 }
  0xc1   : > { %4487 = vmatpush3.bf16.msra.mxu1 %v4909_v63  ;;  %4460 = vmatprep.subr.bf16.mxu0 %v4910_v0  ;;  %v4951_v0 = vld [vmem:[%s5068_s25 + $0x6c8] sm:$0xff]  }
  0xc2   : > { %4488 = vmatprep.subr.bf16.mxu1 %v4911_v1 }
  0xc4   : > { %4461 = vmatpush3.bf16.msra.mxu0 %v4912_v2  ;;  %v4952_v2 = vld [vmem:[%s5068_s25 + $0x608] sm:$0xff]  }
  0xc5   : > { %4489 = vmatpush3.bf16.msra.mxu1 %v4913_v3  ;;  %4462 = vmatprep.subr.bf16.mxu0 %v4914_v4  ;;  %v4953_v4 = vld [vmem:[%s5068_s25 + $0x688] sm:$0xff]  }
  0xc6   : > { %4490 = vmatprep.subr.bf16.mxu1 %v4915_v5 }
  0xc8   : > { %4463 = vmatpush3.bf16.msra.mxu0 %v4916_v6 }
  0xc9   : > { %4491 = vmatpush3.bf16.msra.mxu1 %v4917_v7  ;;  %4464 = vmatprep.subr.bf16.mxu0 %v4918_v8  ;;  %v4954_v7 = vld [vmem:[%s5068_s25 + $0x640] sm:$0xff]  }
  0xca   : > { %4492 = vmatprep.subr.bf16.mxu1 %v4919_v9  ;;  %v4955_v9 = vld [vmem:[%s5068_s25 + $0x6c0] sm:$0xff]  }
  0xcc   : > { %4465 = vmatpush3.bf16.msra.mxu0 %v4920_v10  ;;  %v4956_v10 = vld [vmem:[%s5068_s25 + $0x600] sm:$0xff]  }
  0xcd   : > { %4493 = vmatpush3.bf16.msra.mxu1 %v4921_v11  ;;  %4466 = vmatprep.subr.bf16.mxu0 %v4922_v12  ;;  %v4957_v11 = vld [vmem:[%s5068_s25 + $0x680] sm:$0xff]  }
  0xce   : > { %4494 = vmatprep.subr.bf16.mxu1 %v4923_v13  ;;  %v350_v12 = vld [vmem:[%s5104_s29 + $0x60] sm:$0xff] }
  0xcf   : > { %v366_v13 = vld [vmem:[%s5104_s29 + $0xe0] sm:$0xff] }
  0xd0   : > { %4467 = vmatpush3.bf16.msra.mxu0 %v4924_v14  ;;  %v351_v14 = vld [vmem:[%s5104_s29 + $0x68] sm:$0xff]  ;;  %v3863_v16 = vcombine.high %v350_v12, %v366_v13 }
  0xd1   : > { %4495 = vmatpush3.bf16.msra.mxu1 %v4925_v15  ;;  %4508 = vmatprep.subr.bf16.mxu0 %v4926_v24  ;;  %v3862_v15 = vcombine.low %v350_v12, %v366_v13  ;;  %v3865_v19 = vcombine.high %v351_v14, %v367_v17  ;;  %v3837_v24 = vld [vmem:[%s316_s7] ss:$0 sm:$0xff]  ;;  %v4981_v12 = vld [vmem:[%s5068_s25 + $0x790] sm:$0xff]  }
  0xd2   : > { %4536 = vmatprep.subr.bf16.mxu1 %v4927_v25 }
  0xd3   : > { %3300 = vmatmul.mubr.bf16.vlgmr.msra.gmra.mxu0 %v3858_v18  ;;  %v3864_v18 = vcombine.low %v351_v14, %v367_v17 }
  0xd4   : > { %3349 = vmatmul.mubr.bf16.vlgmr.msra.gmra.mxu1 %v3860_v22  ;;  %4509 = vmatpush3.bf16.msra.mxu0 %v4928_v26  ;;  %v4960_v22 = vld [vmem:[%s5068_s25 + $0x738] sm:$0xff]   ;;  %v4962_v26 = vld [vmem:[%s5068_s25 + $0x770] sm:$0xff]  }
  0xd5   : > { %4537 = vmatpush3.bf16.msra.mxu1 %v4929_v27  ;;  %4510 = vmatprep.subr.bf16.mxu0 %v4930_v28  ;;  %v4963_v28 = vld [vmem:[%s5068_s25 + $0x7f0] sm:$0xff]  }
  0xd6   : > { %4538 = vmatprep.subr.bf16.mxu1 %v4931_v29  ;;  %3307 = vmatprep.mubr.bf16.mxu0 %v3891_v34 }
  0xd7   : > { %3356 = vmatprep.mubr.bf16.mxu1 %v3893_v40 }
  0xd8   : > { %4511 = vmatpush3.bf16.msra.mxu0 %v4932_v30  ;;  %v4964_v30 = vld [vmem:[%s5068_s25 + $0x730] sm:$0xff]  }
  0xd9   : > { %4539 = vmatpush3.bf16.msra.mxu1 %v4933_v31  ;;  %4512 = vmatprep.subr.bf16.mxu0 %v4934_v36 }
  0xda   : > { %4540 = vmatprep.subr.bf16.mxu1 %v4935_v37 }
  0xdb   : > { %3308 = vmatmul.mubr.bf16.gmra.mxu0 %v3890_v35  ;;  %v398_v35 = vld [vmem:[%s5104_s29 + $0x1e0] sm:$0xff] }
  0xdc   : > { %4513 = vmatpush3.bf16.msra.mxu0 %v4936_v41  ;;  %3357 = vmatmul.mubr.bf16.gmra.mxu1 %v3892_v42  ;;  %v3895_v36 = vcombine.high %v382_v33, %v398_v35  ;;  %v3894_v37 = vcombine.low %v382_v33, %v398_v35  ;;  %v4967_v41 = vld [vmem:[%s5068_s25 + $0x7e8] sm:$0xff]   ;;  %v4989_v33 = vld [vmem:[%s5068_s25 + $0x780] sm:$0xff]  }
  0xdd   : > { %4541 = vmatpush3.bf16.msra.mxu1 %v4937_v43  ;;  %4514 = vmatprep.subr.bf16.mxu0 %v4938_v44  ;;  %v383_v42 = vld [vmem:[%s5104_s29 + $0x168] sm:$0xff] }
  0xde   : > { %4542 = vmatprep.subr.bf16.mxu1 %v4939_v45  ;;  %3397 = vmatprep.mubr.bf16.mxu0 %v3863_v16  ;;  %v399_v43 = vld [vmem:[%s5104_s29 + $0x1e8] sm:$0xff] }
  0xdf   : > { %3446 = vmatprep.mubr.bf16.mxu1 %v3865_v19  ;;  %v3897_v45 = vcombine.high %v383_v42, %v399_v43 }
  0xe0   : > { %4515 = vmatpush3.bf16.msra.mxu0 %v4940_v46  ;;  %v4968_v46 = vld [vmem:[%s5068_s25 + $0x728] sm:$0xff]  }
  0xe1   : > { %4543 = vmatpush3.bf16.msra.mxu1 %v4941_v47  ;;  %4516 = vmatprep.subr.bf16.mxu0 %v4942_v48  ;;  %v3896_v47 = vcombine.low %v383_v42, %v399_v43  ;;  %v384_v42 = vld [vmem:[%s5104_s29 + $0x170] sm:$0xff] }
  0xe2   : > { %4544 = vmatprep.subr.bf16.mxu1 %v4943_v49  ;;  %v400_v43 = vld [vmem:[%s5104_s29 + $0x1f0] sm:$0xff] }
  0xe4   : > { %4517 = vmatpush3.bf16.msra.mxu0 %v4944_v50  ;;  %v4969_v50 = vld [vmem:[%s5068_s25 + $0x7a8] sm:$0xff]  }
  0xe5   : > { %4545 = vmatpush3.bf16.msra.mxu1 %v4945_v51  ;;  %4518 = vmatprep.subr.bf16.mxu0 %v4946_v52 }
  0xe6   : > { %4546 = vmatprep.subr.bf16.mxu1 %v4947_v54 }
  0xe8   : > { %4519 = vmatpush3.bf16.msra.mxu0 %v4948_v56  ;;  %v4971_v56 = vld [vmem:[%s5068_s25 + $0x7e0] sm:$0xff]  }
  0xe9   : > { %4547 = vmatpush3.bf16.msra.mxu1 %v4949_v58  ;;  %4520 = vmatprep.subr.bf16.mxu0 %v4950_v61  ;;  %v4973_v61 = vld [vmem:[%s5068_s25 + $0x7a0] sm:$0xff]  }
  0xea   : > { %4548 = vmatprep.subr.bf16.mxu1 %v4951_v0  ;;  %v4974_v0 = vld [vmem:[%s5068_s25 + $0x758] sm:$0xff]  }
  0xec   : > { %4521 = vmatpush3.bf16.msra.mxu0 %v4952_v2 }
  0xed   : > { %4549 = vmatpush3.bf16.msra.mxu1 %v4953_v4  ;;  %4522 = vmatprep.subr.bf16.mxu0 %v4954_v7  ;;  %v4977_v4 = vld [vmem:[%s5068_s25 + $0x798] sm:$0xff]  }
  0xee   : > { %4550 = vmatprep.subr.bf16.mxu1 %v4955_v9  ;;  %v4980_v9 = vld [vmem:[%s5068_s25 + $0x710] sm:$0xff]  }
  0xf0   : > { %4523 = vmatpush3.bf16.msra.mxu0 %v4956_v10 }
  0xf1   : > { %4551 = vmatpush3.bf16.msra.mxu1 %v4957_v11  ;;  %4564 = vmatprep.subr.bf16.mxu0 %v4958_v20  ;;  %v4984_v20 = vld [vmem:[%s5068_s25 + $0x708] sm:$0xff]  }
  0xf2   : > { %4592 = vmatprep.subr.bf16.mxu1 %v4959_v21 }
  0xf3   : > { %v4188_v53 = vpop.f32.mrf.mxu0  ;;  %3398 = vmatmul.mubr.bf16.vlgmr.msra.gmra.mxu0 %v3862_v15  ;;  %v4982_v15 = vld [vmem:[%s5068_s25 + $0x748] sm:$0xff]  }
  0xf4   : > { %v4216_v55 = vpop.f32.mrf.mxu1  ;;  %3447 = vmatmul.mubr.bf16.vlgmr.msra.gmra.mxu1 %v3864_v18  ;;  %4565 = vmatpush3.bf16.msra.mxu0 %v4960_v22  ;;  %v4983_v18 = vld [vmem:[%s5068_s25 + $0x7c8] sm:$0xff]  }
  0xf5   : > { %v4189_v57 = vpop.f32.mrf.mxu0  ;;  %4593 = vmatpush3.bf16.msra.mxu1 %v4961_v23  ;;  %4566 = vmatprep.subr.bf16.mxu0 %v4962_v26  ;;  %v4985_v23 = vld [vmem:[%s5068_s25 + $0x788] sm:$0xff]  }
  0xf6   : > { %v4190_v59 = vadd.f32 %v4189_v57, %v4188_v53  ;;  %v4217_v60 = vpop.f32.mrf.mxu1  ;;  %4594 = vmatprep.subr.bf16.mxu1 %v4963_v28  ;;  %3405 = vmatprep.mubr.bf16.mxu0 %v3895_v36  ;;  %v4970_v53 = vld [vmem:[%s5068_s25 + $0x760] sm:$0xff]   ;;  %v352_v36 = vld [vmem:[%s5104_s29 + $0x70] sm:$0xff] }
  0xf7   : > { %v4218_v62 = vadd.f32 %v4217_v60, %v4216_v55  ;;  %v4191_v63 = vpop.f32.mrf.mxu0  ;;  %3454 = vmatprep.mubr.bf16.mxu1 %v3897_v45  ;;  %v4987_v28 = vld [vmem:[%s5068_s25 + $0x7c0] sm:$0xff]  }
  0xf8   : > { %v4219_v1 = vpop.f32.mrf.mxu1  ;;  %v2812_v25 = vadd.f32 %v4190_v59, %v3837_v24  ;;  %4567 = vmatpush3.bf16.msra.mxu0 %v4964_v30  ;;  %v4972_v59 = vld [vmem:[%s5068_s25 + $0x720] sm:$0xff]  }
  0xf9   : > { %v4192_v3 = vpop.f32.mrf.mxu0  ;;  %4595 = vmatpush3.bf16.msra.mxu1 %v4965_v32  ;;  %4568 = vmatprep.subr.bf16.mxu0 %v4966_v38  ;;  %v4988_v32 = vld [vmem:[%s5068_s25 + $0x700] sm:$0xff]   ;;  %v353_v38 = vld [vmem:[%s5104_s29 + $0x78] sm:$0xff] }
  0xfa   : > { %v4193_v5 = vadd.f32 %v4192_v3, %v4191_v63  ;;  %v4220_v6 = vpop.f32.mrf.mxu1  ;;  %v5362_v29 = vadd.f32 %v4218_v62, %v2812_v25  ;;  %4596 = vmatprep.subr.bf16.mxu1 %v4967_v41  ;;  %v4976_v3 = vld [vmem:[%s5068_s25 + $0x718] sm:$0xff]  }
  0xfb   : > { %v4221_v8 = vadd.f32 %v4220_v6, %v4219_v1  ;;  %v4194_v34 = vpop.f32.mrf.mxu0  ;;  %3406 = vmatmul.mubr.bf16.gmra.mxu0 %v3894_v37  ;;  %v4975_v1 = vld [vmem:[%s5068_s25 + $0x7d8] sm:$0xff]   ;;  %v368_v37 = vld [vmem:[%s5104_s29 + $0xf0] sm:$0xff] }
  0xfc   : > { %v2815_v27 = vadd.f32 %v4193_v5, %v3837_v24  ;;  %v4222_v40 = vpop.f32.mrf.mxu1  ;;  %4569 = vmatpush3.bf16.msra.mxu0 %v4968_v46  ;;  %3455 = vmatmul.mubr.bf16.gmra.mxu1 %v3896_v47  ;;  %v4978_v5 = vld [vmem:[%s5068_s25 + $0x750] sm:$0xff]   ;;  %v369_v41 = vld [vmem:[%s5104_s29 + $0xf8] sm:$0xff] }
  0xfd   : > { %v4195_v39 = vpop.f32.mrf.mxu0  ;;  %4597 = vmatpush3.bf16.msra.mxu1 %v4969_v50  ;;  %4570 = vmatprep.subr.bf16.mxu0 %v4970_v53  ;;  %v3868_v46 = vcombine.low %v353_v38, %v369_v41  ;;  %v3869_v47 = vcombine.high %v353_v38, %v369_v41  ;;  %v401_v50 = vld [vmem:[%s5104_s29 + $0x1f8] sm:$0xff] }
  0xfe   : > { %v5365_v31 = vadd.f32 %v4221_v8, %v2815_v27  ;;  %v4196_v44 = vadd.f32 %v4195_v39, %v4194_v34  ;;  %v4223_v49 = vpop.f32.mrf.mxu1  ;;  %4598 = vmatprep.subr.bf16.mxu1 %v4971_v56  ;;  %v4979_v8 = vld [vmem:[%s5068_s25 + $0x7d0] sm:$0xff]   ;;  %v4986_v27 = vld [vmem:[%s5068_s25 + $0x740] sm:$0xff]  }
  0xff   : > { %v4197_v48 = vpop.f32.mrf.mxu0  ;;  %v4224_v52 = vadd.f32 %v4223_v49, %v4222_v40  ;;  %v3867_v40 = vcombine.high %v352_v36, %v368_v37  ;;  %v385_v49 = vld [vmem:[%s5104_s29 + $0x178] sm:$0xff]  ;;  %3544 = vmatprep.mubr.bf16.mxu1 %v3869_v47 }
 0x100   : > { %v2820_v51 = vadd.f32 %v4196_v44, %v3837_v24  ;;  %v4225_v55 = vpop.f32.mrf.mxu1  ;;  %4571 = vmatpush3.bf16.msra.mxu0 %v4972_v59 }
 0x101   : > { %v4198_v54 = vpop.f32.mrf.mxu0  ;;  %4599 = vmatpush3.bf16.msra.mxu1 %v4973_v61  ;;  %4572 = vmatprep.subr.bf16.mxu0 %v4974_v0  ;;  %v3900_v0 = vcombine.low %v385_v49, %v401_v50 }
 0x102   : > { %v5378_v57 = vadd.f32 %v4224_v52, %v2820_v51  ;;  %v4199_v58 = vadd.f32 %v4198_v54, %v4197_v48  ;;  %v4226_v60 = vpop.f32.mrf.mxu1  ;;  %4600 = vmatprep.subr.bf16.mxu1 %v4975_v1  ;;  %v3899_v48 = vcombine.high %v384_v42, %v400_v43  ;;  %3495 = vmatprep.mubr.bf16.mxu0 %v3867_v40 }
 0x103   : > { %v4227_v63 = vadd.f32 %v4226_v60, %v4225_v55  ;;  %v3901_v51 = vcombine.high %v385_v49, %v401_v50 }
 0x104   : > { %v2823_v62 = vadd.f32 %v4199_v58, %v3837_v24  ;;  %4573 = vmatpush3.bf16.msra.mxu0 %v4976_v3 }
 0x105   : > { %4601 = vmatpush3.bf16.msra.mxu1 %v4977_v4  ;;  %4574 = vmatprep.subr.bf16.mxu0 %v4978_v5  ;;  %v3588_v4 = vld [vmem:[%s5682_s4 + $0x78] sm:$0xff] }
 0x106   : > { %v5384_v2 = vadd.f32 %v4227_v63, %v2823_v62  ;;  %4602 = vmatprep.subr.bf16.mxu1 %v4979_v8  ;;  %v3898_v62 = vcombine.low %v384_v42, %v400_v43  ;;  %v3585_v8 = vld [vmem:[%s5682_s4 + $0x60] sm:$0xff] }
 0x108   : > { %4575 = vmatpush3.bf16.msra.mxu0 %v4980_v9 }
 0x109   : > { %4603 = vmatpush3.bf16.msra.mxu1 %v4981_v12  ;;  %4576 = vmatprep.subr.bf16.mxu0 %v4982_v15  ;;  %v3583_v12 = vld [vmem:[%s5682_s4 + $0x50] sm:$0xff] }
 0x10a   : > { %4604 = vmatprep.subr.bf16.mxu1 %v4983_v18 }
 0x10c   : > { %4577 = vmatpush3.bf16.msra.mxu0 %v4984_v20 }
 0x10d   : > { %4605 = vmatpush3.bf16.msra.mxu1 %v4985_v23  ;;  %4578 = vmatprep.subr.bf16.mxu0 %v4986_v27  ;;  %v3578_v23 = vld [vmem:[%s5682_s4 + $0x28] sm:$0xff]  ;;  %v3577_v27 = vld [vmem:[%s5682_s4 + $0x20] sm:$0xff] }
 0x10e   : > { %4606 = vmatprep.subr.bf16.mxu1 %v4987_v28 }
 0x110   : > { %4579 = vmatpush3.bf16.msra.mxu0 %v4988_v32  ;;  %v3575_v32 = vld [vmem:[%s5682_s4 + $0x10] sm:$0xff] }
 0x111   : > { %4607 = vmatpush3.bf16.msra.mxu1 %v4989_v33  ;;  %4640 = vmatprep.subr.mxu0 %v3588_v4 }
 0x112   : > { %4678 = vmatprep.subr.mxu1 %v3588_v4 }
 0x113   : > { %v4244_v6 = vpop.f32.mrf.mxu0 }
 0x114   : > { %v4272_v7 = vpop.f32.mrf.mxu1  ;;  %3545 = vmatmul.mubr.bf16.vlgmr.msra.gmra.mxu1 %v3868_v46 }
 0x115   : > { %v4245_v10 = vpop.f32.mrf.mxu0  ;;  %3552 = vmatprep.mubr.bf16.mxu1 %v3901_v51  ;;  %4694 = vmatpush3.msra.mxu1 %v3588_v4 }
 0x116   : > { %v4273_v11 = vpop.f32.mrf.mxu1  ;;  %v4246_v13 = vadd.f32 %v4245_v10, %v4244_v6  ;;  %v3586_v6 = vld [vmem:[%s5682_s4 + $0x68] sm:$0xff]  ;;  %v3584_v10 = vld [vmem:[%s5682_s4 + $0x58] sm:$0xff] }
 0x117   : > { %v4274_v14 = vadd.f32 %v4273_v11, %v4272_v7  ;;  %v4247_v16 = vpop.f32.mrf.mxu0 }
 0x118   : > { %v4275_v17 = vpop.f32.mrf.mxu1  ;;  %v2910_v19 = vadd.f32 %v4246_v13, %v5362_v29 }
 0x119   : > { %v4248_v21 = vpop.f32.mrf.mxu0 }
 0x11a   : > { %v4276_v22 = vpop.f32.mrf.mxu1  ;;  %v5397_v24 = vadd.f32 %v4274_v14, %v2910_v19  ;;  %v4249_v25 = vadd.f32 %v4248_v21, %v4247_v16  ;;  %v3582_v14 = vld [vmem:[%s5682_s4 + $0x48] sm:$0xff]  ;;  %v3581_v16 = vld [vmem:[%s5682_s4 + $0x40] sm:$0xff]  ;;  %v3580_v19 = vld [vmem:[%s5682_s4 + $0x38] sm:$0xff] }
 0x11b   : > { %v4277_v26 = vadd.f32 %v4276_v22, %v4275_v17  ;;  %v4250_v30 = vpop.f32.mrf.mxu0  ;;  %v3579_v22 = vld [vmem:[%s5682_s4 + $0x30] sm:$0xff] }
 0x11c   : > { %v2913_v29 = vadd.f32 %v4249_v25, %v5365_v31  ;;  %v3866_v31 = vcombine.low %v352_v36, %v368_v37  ;;  %v4278_v44 = vpop.f32.mrf.mxu1  ;;  %3553 = vmatmul.mubr.bf16.gmra.mxu1 %v3900_v0  ;;  %v3573_v37 = vld [vmem:[%s5682_s4] sm:$0xff] }
 0x11d   : > { %v4251_v35 = vpop.f32.mrf.mxu0 }
 0x11e   : > { %v5404_v34 = vadd.f32 %v4277_v26, %v2913_v29  ;;  %v4252_v39 = vadd.f32 %v4251_v35, %v4250_v30  ;;  %v4279_v53 = vpop.f32.mrf.mxu1  ;;  %3496 = vmatmul.mubr.bf16.vlgmr.msra.gmra.mxu0 %v3866_v31  ;;  %v3576_v29 = vld [vmem:[%s5682_s4 + $0x18] sm:$0xff]  ;;  %v3574_v35 = vld [vmem:[%s5682_s4 + $0x8] sm:$0xff] }
 0x11f   : > { %v4253_v45 = vpop.f32.mrf.mxu0  ;;  %v4280_v55 = vadd.f32 %v4279_v53, %v4278_v44  ;;  %3503 = vmatprep.mubr.bf16.mxu0 %v3899_v48  ;;  %4641 = vmatpush3.msra.mxu0 %v3588_v4 }
 0x120   : > { %v2918_v52 = vadd.f32 %v4252_v39, %v5378_v57  ;;  %v4281_v58 = vpop.f32.mrf.mxu1 }
 0x121   : > { %v4254_v54 = vpop.f32.mrf.mxu0 }
 0x122   : > { %v4255_v56 = vadd.f32 %v4254_v54, %v4253_v45  ;;  %v5415_v59 = vadd.f32 %v4280_v55, %v2918_v52  ;;  %v4282_v61 = vpop.f32.mrf.mxu1 }
 0x123   : > { %v4283_v63 = vadd.f32 %v4282_v61, %v4281_v58 }
 0x124   : > { %v2921_v60 = vadd.f32 %v4255_v56, %v5384_v2  ;;  %v3587_v2 = vld [vmem:[%s5682_s4 + $0x70] sm:$0xff] }
 0x125   : > { %4642 = vmatprep.subr.mxu0 %v3587_v2  ;;  %4679 = vmatprep.subr.mxu1 %v3587_v2 }
 0x126   : > { %v5418_v1 = vadd.f32 %v4283_v63, %v2921_v60  ;;  %3504 = vmatmul.mubr.bf16.gmra.mxu0 %v3898_v62  ;;  %4695 = vmatpush3.msra.mxu1 %v3587_v2 }
 0x127   : > { %4643 = vmatpush3.msra.mxu0 %v3587_v2  ;;  %4680 = vmatprep.subr.mxu1 %v3586_v6 }
 0x128   : > { %4644 = vmatprep.subr.mxu0 %v3586_v6  ;;  %4696 = vmatpush3.msra.mxu1 %v3586_v6 }
 0x129   : > { %4645 = vmatpush3.msra.mxu0 %v3586_v6  ;;  %4681 = vmatprep.subr.mxu1 %v3585_v8 }
 0x12a   : > { %4646 = vmatprep.subr.mxu0 %v3585_v8  ;;  %4697 = vmatpush3.msra.mxu1 %v3585_v8 }
 0x12b   : > { %4647 = vmatpush3.msra.mxu0 %v3585_v8  ;;  %4682 = vmatprep.subr.mxu1 %v3584_v10 }
 0x12c   : > { %4648 = vmatprep.subr.mxu0 %v3584_v10  ;;  %4698 = vmatpush3.msra.mxu1 %v3584_v10 }
 0x12d   : > { %4649 = vmatpush3.msra.mxu0 %v3584_v10  ;;  %4683 = vmatprep.subr.mxu1 %v3583_v12 }
 0x12e   : > { %4650 = vmatprep.subr.mxu0 %v3583_v12  ;;  %4699 = vmatpush3.msra.mxu1 %v3583_v12 }
 0x12f   : > { %4651 = vmatpush3.msra.mxu0 %v3583_v12  ;;  %4684 = vmatprep.subr.mxu1 %v3582_v14 }
 0x130   : > { %4652 = vmatprep.subr.mxu0 %v3582_v14  ;;  %4700 = vmatpush3.msra.mxu1 %v3582_v14 }
 0x131   : > { %4653 = vmatpush3.msra.mxu0 %v3582_v14  ;;  %4685 = vmatprep.subr.mxu1 %v3581_v16 }
 0x132   : > { %4654 = vmatprep.subr.mxu0 %v3581_v16  ;;  %4701 = vmatpush3.msra.mxu1 %v3581_v16 }
 0x133   : > { %v5420_v57 = vpop.f32.mrf.mxu0  ;;  %4655 = vmatpush3.msra.mxu0 %v3581_v16  ;;  %4686 = vmatprep.subr.mxu1 %v3580_v19 }
 0x134   : > { %v5435_v7 = vpop.f32.mrf.mxu1  ;;  %4656 = vmatprep.subr.mxu0 %v3580_v19  ;;  %4702 = vmatpush3.msra.mxu1 %v3580_v19 }
 0x135   : > { %v5422_v3 = vpop.f32.mrf.mxu0  ;;  %4657 = vmatpush3.msra.mxu0 %v3580_v19  ;;  %4687 = vmatprep.subr.mxu1 %v3579_v22 }
 0x136   : > { %v5445_v11 = vpop.f32.mrf.mxu1  ;;  %4658 = vmatprep.subr.mxu0 %v3579_v22  ;;  %4703 = vmatpush3.msra.mxu1 %v3579_v22 }
 0x137   : > { %v5427_v5 = vpop.f32.mrf.mxu0  ;;  %4659 = vmatpush3.msra.mxu0 %v3579_v22  ;;  %4688 = vmatprep.subr.mxu1 %v3578_v23 }
 0x138   : > { %v5455_v15 = vpop.f32.mrf.mxu1  ;;  %4660 = vmatprep.subr.mxu0 %v3578_v23  ;;  %4704 = vmatpush3.msra.mxu1 %v3578_v23 }
 0x139   : > { %v5440_v9 = vpop.f32.mrf.mxu0  ;;  %4661 = vmatpush3.msra.mxu0 %v3578_v23  ;;  %4689 = vmatprep.subr.mxu1 %v3577_v27 }
 0x13a   : > { %v5462_v18 = vpop.f32.mrf.mxu1  ;;  %4662 = vmatprep.subr.mxu0 %v3577_v27  ;;  %4705 = vmatpush3.msra.mxu1 %v3577_v27 }
 0x13b   : > { %v5450_v13 = vpop.f32.mrf.mxu0  ;;  %4663 = vmatpush3.msra.mxu0 %v3577_v27  ;;  %4690 = vmatprep.subr.mxu1 %v3576_v29 }
 0x13c   : > { %v5469_v21 = vpop.f32.mrf.mxu1  ;;  %4664 = vmatprep.subr.mxu0 %v3576_v29  ;;  %4706 = vmatpush3.msra.mxu1 %v3576_v29 }
 0x13d   : > { %v5460_v17 = vpop.f32.mrf.mxu0  ;;  %4665 = vmatpush3.msra.mxu0 %v3576_v29  ;;  %4691 = vmatprep.subr.mxu1 %v3575_v32 }
 0x13e   : > { %v5479_v26 = vpop.f32.mrf.mxu1  ;;  %4666 = vmatprep.subr.mxu0 %v3575_v32  ;;  %4707 = vmatpush3.msra.mxu1 %v3575_v32 }
 0x13f   : > { %v5467_v20 = vpop.f32.mrf.mxu0  ;;  %4667 = vmatpush3.msra.mxu0 %v3575_v32  ;;  %4692 = vmatprep.subr.mxu1 %v3574_v35 }
 0x140   : > { %v5489_v30 = vpop.f32.mrf.mxu1  ;;  %4668 = vmatprep.subr.mxu0 %v3574_v35  ;;  %4708 = vmatpush3.msra.mxu1 %v3574_v35 }
 0x141   : > { %v5477_v25 = vpop.f32.mrf.mxu0  ;;  %4669 = vmatpush3.msra.mxu0 %v3574_v35  ;;  %4693 = vmatprep.subr.mxu1 %v3573_v37 }
 0x142   : > { %v5499_v36 = vpop.f32.mrf.mxu1  ;;  %4670 = vmatprep.subr.mxu0 %v3573_v37  ;;  %4709 = vmatpush3.msra.mxu1 %v3573_v37 }
 0x143   : > { %4671 = vmatpush3.msra.mxu0 %v3573_v37 }
 0x153   : > { %v5484_v28 = vpop.f32.mrf.mxu0 }
 0x154   : > { %v4384_v39 = vpop.f32.mrf.mxu1 }
 0x155   : > { %v5494_v33 = vpop.f32.mrf.mxu0 }
 0x156   : > { %v4385_v40 = vpop.f32.mrf.mxu1 }
 0x157   : > { %v5504_v38 = vpop.f32.mrf.mxu0 }
 0x158   : > { %v5508_v42 = vpop.f32.mrf.mxu1 }
 0x159   : > { %v4360_v31 = vpop.f32.mrf.mxu0 }
 0x15a   : > { %v5512_v44 = vpop.f32.mrf.mxu1 }
 0x15b   : > { %v5506_v41 = vpop.f32.mrf.mxu0 }
 0x15c   : > { %v5514_v45 = vpop.f32.mrf.mxu1 }
 0x15d   : > { %v5510_v43 = vpop.f32.mrf.mxu0 }
 0x15e   : > { %v5518_v47 = vpop.f32.mrf.mxu1 }
 0x15f   : > { %v5516_v46 = vpop.f32.mrf.mxu0 }
 0x160   : > { %v5522_v50 = vpop.f32.mrf.mxu1 }
 0x161   : > { %v5520_v48 = vpop.f32.mrf.mxu0 }
 0x162   : > { %v5524_v52 = vpop.f32.mrf.mxu1 }
 0x173   : > { %v4412_v49 = vpop.f32.mrf.mxu0 }
 0x174   : > { %v5526_v53 = vpop.f32.mrf.mxu1 }
 0x175   : > { %v4413_v51 = vpop.f32.mrf.mxu0 }
 0x176   : > { %v4441_v55 = vpop.f32.mrf.mxu1 }
 0x177   : > { %v5528_v54 = vpop.f32.mrf.mxu0 }
 0x178   : > { %v5530_v58 = vpop.f32.mrf.mxu1 }
 0x179   : > { %v4416_v56 = vpop.f32.mrf.mxu0 }
 0x17a   : > { %v5534_v61 = vpop.f32.mrf.mxu1 }
 0x17b   : > { %v5532_v60 = vpop.f32.mrf.mxu0 }
 0x17c   : > { %v5538_v63 = vpop.f32.mrf.mxu1 }
 0x17d   : > { %v5536_v62 = vpop.f32.mrf.mxu0 }
 0x17e   : > { %v5542_v4 = vpop.f32.mrf.mxu1 }
 0x17f   : > { %v5540_v0 = vpop.f32.mrf.mxu0  ;;  %5685 = vst [vmem:[#allocation3_spill] sm:$0xff] %v5542_v4 }
 0x180   : > { %5684 = vst [vmem:[#allocation2_spill] sm:$0xff] %v5540_v0  ;;  %v5546_v6 = vpop.f32.mrf.mxu1 }
 0x181   : > { %v5544_v2 = vpop.f32.mrf.mxu0  ;;  %5687 = vst [vmem:[#allocation5_spill] sm:$0xff] %v5546_v6 }
 0x182   : > { %5686 = vst [vmem:[#allocation4_spill] sm:$0xff] %v5544_v2  ;;  %v5548_v10 = vpop.f32.mrf.mxu1 }
 0x183   : > { %5688 = vst [vmem:[#allocation6_spill] sm:$0xff] %v5548_v10 }
 0x193   : > { %v4468_v8 = vpop.f32.mrf.mxu0 }
 0x194   : > { %v5550_v14 = vpop.f32.mrf.mxu1 }
 0x195   : > { %v4469_v12 = vpop.f32.mrf.mxu0 }
 0x196   : > { %v5554_v19 = vpop.f32.mrf.mxu1 }
 0x197   : > { %v5552_v16 = vpop.f32.mrf.mxu0 }
 0x198   : > { %v5558_v23 = vpop.f32.mrf.mxu1 }
 0x199   : > { %v5556_v22 = vpop.f32.mrf.mxu0  ;;  %5689 = vst [vmem:[#allocation7_spill] sm:$0xff] %v5558_v23  ;;  %v4302_v23 = vadd.f32 %v5422_v3, %v5420_v57  ;;  %v4308_v57 = vadd.f32 %v5460_v17, %v5450_v13  ;;  %v4311_v13 = vadd.f32 %v5477_v25, %v5467_v20  ;;  %v4389_v20 = vadd.f32 %v5512_v44, %v5508_v42 }
 0x19a   : > { %v5562_v29 = vpop.f32.mrf.mxu1  ;;  %v4420_v42 = vadd.f32 %v5536_v62, %v5532_v60  ;;  %v5699_v62 = vld [vmem:[#allocation3_spill] sm:$0xff] }
 0x19b   : > { %v5560_v27 = vpop.f32.mrf.mxu0  ;;  %5691 = vst [vmem:[#allocation9_spill] sm:$0xff] %v5562_v29 }
 0x19c   : > { %5690 = vst [vmem:[#allocation8_spill] sm:$0xff] %v5560_v27  ;;  %v5564_v32 = vpop.f32.mrf.mxu1 }
 0x19d   : > { %5692 = vst [vmem:[#allocation10_spill] sm:$0xff] %v5564_v32  ;;  %v5566_v35 = vpop.f32.mrf.mxu0  ;;  %v3008_v32 = vadd.f32 %v4302_v23, %v5397_v24  ;;  %v4333_v24 = vadd.f32 %v5462_v18, %v5455_v15  ;;  %v4364_v15 = vadd.f32 %v5510_v43, %v5506_v41 }
 0x19e   : > { %v5568_v37 = vpop.f32.mrf.mxu1 }
 0x19f   : > { %5693 = vst [vmem:[#allocation11_spill] sm:$0xff] %v5568_v37  ;;  %v5570_v10 = vpop.f32.mrf.mxu0  ;;  %v4330_v37 = vadd.f32 %v5445_v11, %v5435_v7  ;;  %v4386_v11 = vadd.f32 %v4385_v40, %v4384_v39 }
 0x1a0   : > { %5694 = vst [vmem:[#allocation12_spill] sm:$0xff] %v5570_v10  ;;  %v5572_v6 = vpop.f32.mrf.mxu1  ;;  %v4305_v10 = vadd.f32 %v5440_v9, %v5427_v5  ;;  %v4361_v5 = vadd.f32 %v4360_v31, %v5504_v38  ;;  %v3019_v31 = vadd.f32 %v4311_v13, %v5418_v1  ;;  %v4367_v1 = vadd.f32 %v5520_v48, %v5516_v46 }
 0x1a1   : > { %5695 = vst [vmem:[#allocation13_spill] sm:$0xff] %v5572_v6  ;;  %v5574_v2 = vpop.f32.mrf.mxu0  ;;  %v4358_v6 = vadd.f32 %v5494_v33, %v5484_v28  ;;  %v3016_v28 = vadd.f32 %v4308_v57, %v5415_v59  ;;  %v4336_v33 = vadd.f32 %v5479_v26, %v5469_v21  ;;  %v4339_v59 = vadd.f32 %v5499_v36, %v5489_v30 }
 0x1a2   : > { %5696 = vst [vmem:[#allocation14_spill] sm:$0xff] %v5574_v2  ;;  %v5578_v4 = vpop.f32.mrf.mxu1  ;;  %v4442_v26 = vadd.f32 %v4441_v55, %v5526_v53  ;;  %v4470_v30 = vadd.f32 %v4469_v12, %v4468_v8  ;;  %v4498_v46 = vadd.f32 %v5554_v19, %v5550_v14  ;;  %v4473_v48 = vadd.f32 %v5556_v22, %v5552_v16  ;;  %v5700_v12 = vld [vmem:[#allocation2_spill] sm:$0xff]  ;;  %v5703_v16 = vld [vmem:[#allocation5_spill] sm:$0xff] }
 0x1a3   : > { %5697 = vst [vmem:[#allocation15_spill] sm:$0xff] %v5578_v4  ;;  %v3057_v4 = vadd.f32 %v4330_v37, %v3008_v32  ;;  %v3065_v38 = vadd.f32 %v4336_v33, %v3016_v28  ;;  %v3068_v36 = vadd.f32 %v4339_v59, %v3019_v31  ;;  %v4448_v8 = vadd.f32 %v5699_v62, %v5538_v63  ;;  %v5704_v22 = vld [vmem:[#allocation6_spill] sm:$0xff]  ;;  %v5705_v28 = vld [vmem:[#allocation7_spill] sm:$0xff]  ;;  %v5706_v33 = vld [vmem:[#allocation9_spill] sm:$0xff] }
 0x1a4   : > { %v4501_v13 = vadd.f32 %v5706_v33, %v5705_v28 }
 0x1a5   : > { %v3106_v7 = vadd.f32 %v4358_v6, %v3057_v4  ;;  %v3114_v43 = vadd.f32 %v4364_v15, %v3065_v38 }
 0x1a7   : > { %v3155_v18 = vadd.f32 %v4386_v11, %v3106_v7  ;;  %v5710_v31 = vld [vmem:[#allocation12_spill] sm:$0xff] }
 0x1a9   : > { %v5711_v59 = vld [vmem:[#allocation14_spill] sm:$0xff] }
 0x1b3   : > { %v4524_v0 = vpop.f32.mrf.mxu0 }
 0x1b4   : > { %v5580_v27 = vpop.f32.mrf.mxu1 }
 0x1b5   : > { %5698 = vst [vmem:[#allocation16_spill] sm:$0xff] %v5580_v27  ;;  %v4525_v29 = vpop.f32.mrf.mxu0  ;;  %v3011_v27 = vadd.f32 %v4305_v10, %v5404_v34  ;;  %v4414_v34 = vadd.f32 %v4413_v51, %v4412_v49  ;;  %v4417_v49 = vadd.f32 %v4416_v56, %v5528_v54  ;;  %v4392_v51 = vadd.f32 %v5518_v47, %v5514_v45 }
 0x1b6   : > { %v5589_v2 = vpop.f32.mrf.mxu1  ;;  %v3117_v56 = vadd.f32 %v4367_v1, %v3068_v36  ;;  %v4395_v10 = vadd.f32 %v5524_v52, %v5522_v50  ;;  %v4445_v45 = vadd.f32 %v5534_v61, %v5530_v58  ;;  %v4526_v50 = vadd.f32 %v4525_v29, %v4524_v0  ;;  %v5702_v58 = vld [vmem:[#allocation8_spill] sm:$0xff] }
 0x1b7   : > { %v5593_v3 = vpop.f32.mrf.mxu0  ;;  %v3060_v23 = vadd.f32 %v4333_v24, %v3011_v27  ;;  %v3204_v25 = vadd.f32 %v4414_v34, %v3155_v18  ;;  %v3163_v54 = vadd.f32 %v4392_v51, %v3114_v43  ;;  %v5701_v27 = vld [vmem:[#allocation4_spill] sm:$0xff]  ;;  %v4476_v61 = vadd.f32 %v5566_v35, %v5702_v58  ;;  %v5708_v18 = vld [vmem:[#allocation10_spill] sm:$0xff] }
 0x1b8   : > { %v5599_v9 = vpop.f32.mrf.mxu1  ;;  %v4423_v32 = vadd.f32 %v5701_v27, %v5700_v12  ;;  %v3166_v24 = vadd.f32 %v4395_v10, %v3117_v56  ;;  %v3565_v27 = vld [vmem:[%s5658_s26] sm:$0xff] }
 0x1b9   : > { %v4528_v17 = vpop.f32.mrf.mxu0  ;;  %v3109_v39 = vadd.f32 %v4361_v5, %v3060_v23  ;;  %v3253_v6 = vadd.f32 %v4442_v26, %v3204_v25  ;;  %v3212_v60 = vadd.f32 %v4420_v42, %v3163_v54  ;;  %v4451_v5 = vadd.f32 %v5704_v22, %v5703_v16  ;;  %v5712_v42 = vld [vmem:[#allocation13_spill] sm:$0xff] }
 0x1ba   : > { %v5608_v40 = vpop.f32.mrf.mxu1  ;;  %v3215_v11 = vadd.f32 %v4423_v32, %v3166_v24  ;;  %v4529_v29 = vadd.f32 %v4528_v17, %v5593_v3 }
 0x1bb   : > { %v4530_v21 = vpop.f32.mrf.mxu0  ;;  %v3158_v4 = vadd.f32 %v4389_v20, %v3109_v39  ;;  %v3302_v47 = vadd.f32 %v4470_v30, %v3253_v6  ;;  %v3261_v19 = vadd.f32 %v4448_v8, %v3212_v60  ;;  %v5709_v39 = vld [vmem:[#allocation11_spill] sm:$0xff]  ;;  %v4479_v20 = vadd.f32 %v5711_v59, %v5710_v31  ;;  %v3568_v31 = vld [vmem:[%s5658_s26 + $0x18] sm:$0xff] }
 0x1bc   : > { %v5617_v41 = vpop.f32.mrf.mxu1  ;;  %v5707_v34 = vld [vmem:[#allocation16_spill] sm:$0xff]  ;;  %v4504_v38 = vadd.f32 %v5709_v39, %v5708_v18  ;;  %v3264_v43 = vadd.f32 %v4451_v5, %v3215_v11  ;;  %v5713_v6 = vld [vmem:[#allocation15_spill] sm:$0xff]  ;;  %v4557_v56 = vadd.f32 %v5608_v40, %v5599_v9 }
 0x1bd   : > { %v4531_v44 = vpop.f32.mrf.mxu0  ;;  %v3207_v53 = vadd.f32 %v4417_v49, %v3158_v4  ;;  %v3351_v7 = vadd.f32 %v4498_v46, %v3302_v47  ;;  %v4554_v0 = vadd.f32 %v5589_v2, %v5707_v34  ;;  %v3310_v35 = vadd.f32 %v4476_v61, %v3261_v19  ;;  %v3566_v11 = vld [vmem:[%s5658_s26 + $0x8] sm:$0xff] }
 0x1be   : > { %v4559_v55 = vpop.f32.mrf.mxu1  ;;  %v4532_v51 = vadd.f32 %v4531_v44, %v4530_v21  ;;  %v3313_v17 = vadd.f32 %v4479_v20, %v3264_v43 }
 0x1bf   : > { %v4533_v37 = vpop.f32.mrf.mxu0  ;;  %v3256_v57 = vadd.f32 %v4445_v45, %v3207_v53  ;;  %v3400_v23 = vadd.f32 %v4526_v50, %v3351_v7  ;;  %v3359_v3 = vadd.f32 %v4504_v38, %v3310_v35  ;;  %v4507_v53 = vadd.f32 %v5713_v6, %v5712_v42 }
 0x1c0   : > { %v4561_v52 = vpop.f32.mrf.mxu1  ;;  %v4560_v44 = vadd.f32 %v4559_v55, %v5617_v41 }
 0x1c1   : > { %v3305_v14 = vadd.f32 %v4473_v48, %v3256_v57  ;;  %v4534_v63 = vpop.f32.mrf.mxu0  ;;  %v3449_v4 = vadd.f32 %v4554_v0, %v3400_v23  ;;  %v3408_v21 = vadd.f32 %v4532_v51, %v3359_v3  ;;  %v3362_v9 = vadd.f32 %v4507_v53, %v3313_v17 }
 0x1c2   : > { %v4562_v15 = vpop.f32.mrf.mxu1  ;;  %v4535_v46 = vadd.f32 %v4534_v63, %v4533_v37 }
 0x1c3   : > { %v3354_v26 = vadd.f32 %v4501_v13, %v3305_v14  ;;  %v3457_v58 = vadd.f32 %v4560_v44, %v3408_v21  ;;  %v4563_v14 = vadd.f32 %v4562_v15, %v4561_v52 }
 0x1c4   : > { %v3411_v61 = vadd.f32 %v4535_v46, %v3362_v9 }
 0x1c5   : > { %v3403_v30 = vadd.f32 %v4529_v29, %v3354_v26  ;;  %v3567_v29 = vld [vmem:[%s5658_s26 + $0x10] sm:$0xff] }
 0x1c6   : > { %v3460_v13 = vadd.f32 %v4563_v14, %v3411_v61 }
 0x1c7   : > { %v3452_v60 = vadd.f32 %v4557_v56, %v3403_v30 }
 0x1d4   : > { %v4608_v49 = vpop.f32.mrf.mxu1 }
 0x1d6   : > { %v4609_v36 = vpop.f32.mrf.mxu1 }
 0x1d7   : > { %v4610_v45 = vadd.f32 %v4609_v36, %v4608_v49 }
 0x1d8   : > { %v4611_v47 = vpop.f32.mrf.mxu1 }
 0x1da   : > { %v4612_v12 = vpop.f32.mrf.mxu1 }
 0x1db   : > { %v4613_v50 = vadd.f32 %v4612_v12, %v4611_v47 }
 0x1dc   : > { %v4614_v24 = vpop.f32.mrf.mxu1 }
 0x1de   : > { %v4580_v25 = vpop.f32.mrf.mxu0  ;;  %v4615_v55 = vpop.f32.mrf.mxu1 }
 0x1df   : > { %v4616_v63 = vadd.f32 %v4615_v55, %v4614_v24 }
 0x1e0   : > { %v4581_v1 = vpop.f32.mrf.mxu0  ;;  %v4617_v28 = vpop.f32.mrf.mxu1 }
 0x1e1   : > { %v4582_v2 = vadd.f32 %v4581_v1, %v4580_v25 }
 0x1e2   : > { %v4583_v54 = vpop.f32.mrf.mxu0  ;;  %v4618_v52 = vpop.f32.mrf.mxu1 }
 0x1e3   : > { %v3498_v10 = vadd.f32 %v4582_v2, %v3449_v4  ;;  %v4619_v18 = vadd.f32 %v4618_v52, %v4617_v28 }
 0x1e4   : > { %v4584_v48 = vpop.f32.mrf.mxu0 }
 0x1e5   : > { %v3547_v62 = vadd.f32 %v4610_v45, %v3498_v10  ;;  %v4585_v8 = vadd.f32 %v4584_v48, %v4583_v54 }
 0x1e6   : > { %v4586_v40 = vpop.f32.mrf.mxu0 }
 0x1e7   : > { %v3561_v32 = vmax.f32 %v3547_v62, 0.0  ;;  %v3501_v57 = vadd.f32 %v4585_v8, %v3452_v60 }
 0x1e8   : > { %v4587_v7 = vpop.f32.mrf.mxu0 }
 0x1e9   : > { %v3550_v19 = vadd.f32 %v4613_v50, %v3501_v57  ;;  %v4588_v41 = vadd.f32 %v4587_v7, %v4586_v40  ;;  %v3569_v37 = vmul.f32 %v3565_v27, %v3561_v32 }
 0x1ea   : > { %v4589_v16 = vpop.f32.mrf.mxu0 }
 0x1eb   : > { %v3562_v22 = vmax.f32 %v3550_v19, 0.0  ;;  %v3506_v5 = vadd.f32 %v4588_v41, %v3457_v58  ;;  %4672 = vmatprep.mubr.f32.mxu0 %v3569_v37 }
 0x1ec   : > { %v4590_v33 = vpop.f32.mrf.mxu0 }
 0x1ed   : > { %v3570_v23 = vmul.f32 %v3566_v11, %v3562_v22  ;;  %v3555_v34 = vadd.f32 %v4616_v63, %v3506_v5  ;;  %v4591_v0 = vadd.f32 %v4590_v33, %v4589_v16 }
 0x1ef   : > { %v3563_v15 = vmax.f32 %v3555_v34, 0.0  ;;  %v3509_v35 = vadd.f32 %v4591_v0, %v3460_v13  ;;  %4673 = vmatmul.mubr.f32.vlgmr.msra.gmra.mxu0 %v3570_v23 }
 0x1f1   : > { %v3558_v39 = vadd.f32 %v4619_v18, %v3509_v35  ;;  %v3571_v38 = vmul.f32 %v3567_v29, %v3563_v15 }
 0x1f3   : > { %v3564_v59 = vmax.f32 %v3558_v39, 0.0  ;;  %4675 = vmatprep.mubr.f32.mxu1 %v3571_v38 }
 0x1f5   : > { %v3572_v20 = vmul.f32 %v3568_v31, %v3564_v59 }
 0x1f7   : > { %4676 = vmatmul.mubr.f32.vlgmr.msra.gmra.mxu1 %v3572_v20 }
 0x2af   : > { %v4674_v25 = vpop.f32.mrf.mxu0 }
 0x2b0   : > { %v4169_v26 = vpack.c.bf16 %v4674_v25, %v4674_v25 }
 0x2b1   : > { %v3655_v49 = vpop.f32.mrf.mxu0 }
 0x2b2   : > { %3692 = vst.msk [vmem:[%s335_s30 + $0x4] sm:$0xf] %vm3690_vm0, %v4169_v26  ;;  %v4168_v43 = vpack.c.bf16 %v3655_v49, %v3655_v49 }
 0x2b4   : > { %3691 = vst.msk [vmem:[%s335_s30] sm:$0xf] %vm3690_vm0, %v4168_v43 }
 0x2b7   : > { %v4677_v51 = vpop.f32.mrf.mxu1 }
 0x2b8   : > { %v4171_v1 = vpack.c.bf16 %v4677_v51, %v4677_v51 }
 0x2b9   : > { %v3665_v4 = vpop.f32.mrf.mxu1 }
 0x2ba   : > { %3694 = vst.msk [vmem:[%s335_s30 + $0xc] sm:$0xf] %vm3690_vm0, %v4171_v1  ;;  %v4170_v30 = vpack.c.bf16 %v3665_v4, %v3665_v4 }
 0x2bc   : > { %3693 = vst.msk [vmem:[%s335_s30 + $0x8] sm:$0xf] %vm3690_vm0, %v4170_v30 }
 0x2bd PF: > { %s15_s20 = sadd.s32 1, %s5012_s20   ;;  %s5714_s18 = smov %s5008_s19 }
 0x2be   : > { %p12_p5 = scmp.ge.s32.totalorder %s15_s20, 4   ;;  %s5715_s19 = smov %s5717_s21 }
 0x2c0   :  { %14 = sbr.rel (!%p12_p5) target bundleno = 2 (0x2), region = 79 }

// kernel: afe_forward.10
= control target key start
LH: loop header
LB: loop body
LE: loop exit
PB: predicated region body
PF: predicated region fallthrough
CT: control target
= control target key end

     0   :  { %s2924_s18 = smov 0   ;;  %s2926_s19 = smov 0   ;;  %s3194_s0 = inlined_call_operand.vmem [shape: bf16[2,32,2048], index: 0, kind: input, shape index: {}]   ;;  %s3195_s1 = inlined_call_operand.vmem [shape: bf16[2,2048,128], index: 1, kind: input, shape index: {}]   ;;  %s3196_s2 = inlined_call_operand.vmem [shape: f32[2,1,128], index: 2, kind: input, shape index: {}]   ;;  %s3197_s3 = inlined_call_operand.vmem [shape: f32[2,32,128], index: 3, kind: input, shape index: {}]   ;;  %s3198_s4 = inlined_call_operand.vmem [shape: f32[128,32], index: 4, kind: input, shape index: {}]   ;;  %s3199_s5 = inlined_call_operand.vmem [shape: bf16[2,32,32], index: 5, kind: output, shape index: {}]  }
   0x1   :  { %s2928_s20 = smov 0  }
   0x2 LB: > { %s27_s21 = sadd.s32 1, %s2888_s19  ;;  %p2220_p0 = scmp.ge.s32.totalorder %s2892_s20, 1  ;;  %s2892_s20 = sphi %s2928_s20, %s15_s20   ;;  %s2888_s19 = sphi %s2926_s19, %s3201_s19   ;;  %s2884_s18 = sphi %s2924_s18, %s3200_s18  }
   0x3   : > { %p29_p1 = scmp.ge.s32.totalorder %s27_s21, 2  ;;  %p244_p2 = scmp.lt.s32.totalorder %s2892_s20, 3 }
   0x5   : > { %s3203_s21 = smov (%p29_p1, %s27_s21), 0  ;;  %p245_p3 = pnand %p2220_p0, %p244_p2 }
   0x6   : > { %p299_p4 = scmp.lt.s32.totalorder (!%p245_p3), %s2884_s18, 1 }
   0x7   : > { %248 = sbr.rel (%p245_p3) target bundleno = 560 (0x230), region = 40 }
   0xc   : > { %s3205_s18 = smov (!%p299_p4, %s2884_s18), 1  ;;  %vm2082_vm0 = vcmask 257024  }
   0xd   : > { %s2397_s22 = sshll.u32 %s3205_s18, 10  ;;  %s2396_s26 = sshll.u32 %s3205_s18, 8 }
   0xe   : > { %s2948_s25 = scalar_lea.vmem %s3195_s1, %s2397_s22  ;;  %s2984_s29 = scalar_lea.vmem %s3194_s0, %s2396_s26 }
   0xf   : > { %v2742_v0 = vld [vmem:[%s2948_s25 + $0x78] sm:$0xff]   ;;  %v2746_v4 = vld [vmem:[%s2948_s25 + $0x70] sm:$0xff]   ;;  %v2750_v8 = vld [vmem:[%s2948_s25 + $0x68] sm:$0xff]   ;;  %s316_s22 = scalar_lea.vmem %s3196_s2, %s3205_s18  ;;  %s2398_s23 = sshll.u32 %s3205_s18, 5 }
  0x10   : > { %v2743_v1 = vld [vmem:[%s2948_s25 + $0xf8] sm:$0xff]   ;;  %2404 = vmatprep.subr.bf16.mxu0 %v2742_v0  ;;  %v2747_v5 = vld [vmem:[%s2948_s25 + $0xf0] sm:$0xff]   ;;  %v2751_v9 = vld [vmem:[%s2948_s25 + $0xe8] sm:$0xff]   ;;  %s3175_s26 = scalar_lea.vmem %s3197_s3, %s2398_s23  ;;  %s2399_s27 = sshll.u32 %s3205_s18, 4 }
  0x11   : > { %v2744_v2 = vld [vmem:[%s2948_s25 + $0x38] sm:$0xff]   ;;  %2432 = vmatprep.subr.bf16.mxu1 %v2743_v1  ;;  %v2748_v6 = vld [vmem:[%s2948_s25 + $0x30] sm:$0xff]   ;;  %v2752_v10 = vld [vmem:[%s2948_s25 + $0x28] sm:$0xff]   ;;  %s335_s30 = scalar_lea.vmem %s3199_s5, %s2399_s27 }
  0x12   : > { %v2745_v3 = vld [vmem:[%s2948_s25 + $0xb8] sm:$0xff]   ;;  %2405 = vmatpush3.bf16.msra.mxu0 %v2744_v2  ;;  %v2749_v7 = vld [vmem:[%s2948_s25 + $0xb0] sm:$0xff]   ;;  %v2753_v11 = vld [vmem:[%s2948_s25 + $0xa8] sm:$0xff]  }
  0x13   : > { %2433 = vmatpush3.bf16.msra.mxu1 %v2745_v3  ;;  %2406 = vmatprep.subr.bf16.mxu0 %v2746_v4  ;;  %v2754_v12 = vld [vmem:[%s2948_s25 + $0x60] sm:$0xff]   ;;  %v2758_v16 = vld [vmem:[%s2948_s25 + $0x58] sm:$0xff]   ;;  %v2762_v20 = vld [vmem:[%s2948_s25 + $0x50] sm:$0xff]  }
  0x14   : > { %2434 = vmatprep.subr.bf16.mxu1 %v2747_v5  ;;  %v2755_v13 = vld [vmem:[%s2948_s25 + $0xe0] sm:$0xff]   ;;  %v2759_v17 = vld [vmem:[%s2948_s25 + $0xd8] sm:$0xff]   ;;  %v2763_v21 = vld [vmem:[%s2948_s25 + $0xd0] sm:$0xff]  }
  0x15   : > { %v2756_v14 = vld [vmem:[%s2948_s25 + $0x20] sm:$0xff]   ;;  %v2760_v18 = vld [vmem:[%s2948_s25 + $0x18] sm:$0xff]   ;;  %v2764_v22 = vld [vmem:[%s2948_s25 + $0x10] sm:$0xff]  }
  0x16   : > { %2407 = vmatpush3.bf16.msra.mxu0 %v2748_v6  ;;  %v2757_v15 = vld [vmem:[%s2948_s25 + $0xa0] sm:$0xff]   ;;  %v2761_v19 = vld [vmem:[%s2948_s25 + $0x98] sm:$0xff]   ;;  %v2765_v23 = vld [vmem:[%s2948_s25 + $0x90] sm:$0xff]  }
  0x17   : > { %2435 = vmatpush3.bf16.msra.mxu1 %v2749_v7  ;;  %2408 = vmatprep.subr.bf16.mxu0 %v2750_v8  ;;  %v2766_v24 = vld [vmem:[%s2948_s25 + $0x48] sm:$0xff]   ;;  %v2770_v28 = vld [vmem:[%s2948_s25 + $0x40] sm:$0xff]   ;;  %v2774_v40 = vld [vmem:[%s2948_s25 + $0x178] sm:$0xff]  }
  0x18   : > { %2436 = vmatprep.subr.bf16.mxu1 %v2751_v9  ;;  %v2767_v25 = vld [vmem:[%s2948_s25 + $0xc8] sm:$0xff]   ;;  %v2771_v29 = vld [vmem:[%s2948_s25 + $0xc0] sm:$0xff]   ;;  %v2775_v41 = vld [vmem:[%s2948_s25 + $0x1f8] sm:$0xff]  }
  0x19   : > { %v2768_v26 = vld [vmem:[%s2948_s25 + $0x8] sm:$0xff]   ;;  %v2772_v30 = vld [vmem:[%s2948_s25] sm:$0xff]   ;;  %v2776_v42 = vld [vmem:[%s2948_s25 + $0x138] sm:$0xff]  }
  0x1a   : > { %2409 = vmatpush3.bf16.msra.mxu0 %v2752_v10  ;;  %v2769_v27 = vld [vmem:[%s2948_s25 + $0x88] sm:$0xff]   ;;  %v2773_v31 = vld [vmem:[%s2948_s25 + $0x80] sm:$0xff]   ;;  %v2777_v43 = vld [vmem:[%s2948_s25 + $0x1b8] sm:$0xff]  }
  0x1b   : > { %2437 = vmatpush3.bf16.msra.mxu1 %v2753_v11  ;;  %2410 = vmatprep.subr.bf16.mxu0 %v2754_v12  ;;  %v338_v32 = vld [vmem:[%s2984_s29] sm:$0xff]  ;;  %v339_v34 = vld [vmem:[%s2984_s29 + $0x8] sm:$0xff]  ;;  %v2778_v44 = vld [vmem:[%s2948_s25 + $0x170] sm:$0xff]  }
  0x1c   : > { %2438 = vmatprep.subr.bf16.mxu1 %v2755_v13  ;;  %v346_v33 = vld [vmem:[%s2984_s29 + $0x40] sm:$0xff]  ;;  %v347_v37 = vld [vmem:[%s2984_s29 + $0x48] sm:$0xff]  ;;  %v2779_v45 = vld [vmem:[%s2948_s25 + $0x1f0] sm:$0xff]  }
  0x1d   : > { %v2230_v35 = vcombine.low %v338_v32, %v346_v33  ;;  %v2231_v36 = vcombine.high %v338_v32, %v346_v33  ;;  %v2232_v38 = vcombine.low %v339_v34, %v347_v37  ;;  %v2233_v39 = vcombine.high %v339_v34, %v347_v37  ;;  %v2780_v46 = vld [vmem:[%s2948_s25 + $0x130] sm:$0xff]   ;;  %v2782_v48 = vld [vmem:[%s2948_s25 + $0x168] sm:$0xff]   ;;  %v2786_v52 = vld [vmem:[%s2948_s25 + $0x160] sm:$0xff]  }
  0x1e   : > { %2411 = vmatpush3.bf16.msra.mxu0 %v2756_v14  ;;  %v2781_v47 = vld [vmem:[%s2948_s25 + $0x1b0] sm:$0xff]   ;;  %v2783_v49 = vld [vmem:[%s2948_s25 + $0x1e8] sm:$0xff]   ;;  %v2787_v53 = vld [vmem:[%s2948_s25 + $0x1e0] sm:$0xff]  }
  0x1f   : > { %2439 = vmatpush3.bf16.msra.mxu1 %v2757_v15  ;;  %2412 = vmatprep.subr.bf16.mxu0 %v2758_v16  ;;  %v2784_v50 = vld [vmem:[%s2948_s25 + $0x128] sm:$0xff]   ;;  %v2788_v54 = vld [vmem:[%s2948_s25 + $0x120] sm:$0xff]   ;;  %v2790_v56 = vld [vmem:[%s2948_s25 + $0x158] sm:$0xff]  }
  0x20   : > { %2440 = vmatprep.subr.bf16.mxu1 %v2759_v17  ;;  %1593 = vmatprep.mubr.bf16.mxu0 %v2231_v36  ;;  %v2785_v51 = vld [vmem:[%s2948_s25 + $0x1a8] sm:$0xff]   ;;  %v2789_v55 = vld [vmem:[%s2948_s25 + $0x1a0] sm:$0xff]   ;;  %v2791_v57 = vld [vmem:[%s2948_s25 + $0x1d8] sm:$0xff]  }
  0x21   : > { %1642 = vmatprep.mubr.bf16.mxu1 %v2233_v39  ;;  %v2792_v58 = vld [vmem:[%s2948_s25 + $0x118] sm:$0xff]   ;;  %v354_v60 = vld [vmem:[%s2984_s29 + $0x80] sm:$0xff]  ;;  %v355_v0 = vld [vmem:[%s2984_s29 + $0x88] sm:$0xff] }
  0x22   : > { %2413 = vmatpush3.bf16.msra.mxu0 %v2760_v18  ;;  %v2793_v59 = vld [vmem:[%s2948_s25 + $0x198] sm:$0xff]   ;;  %v362_v61 = vld [vmem:[%s2984_s29 + $0xc0] sm:$0xff]  ;;  %v363_v1 = vld [vmem:[%s2984_s29 + $0xc8] sm:$0xff] }
  0x23   : > { %2441 = vmatpush3.bf16.msra.mxu1 %v2761_v19  ;;  %2414 = vmatprep.subr.bf16.mxu0 %v2762_v20  ;;  %v2247_v62 = vcombine.high %v354_v60, %v362_v61  ;;  %v2246_v63 = vcombine.low %v354_v60, %v362_v61  ;;  %v2249_v2 = vcombine.high %v355_v0, %v363_v1  ;;  %v2794_v3 = vld [vmem:[%s2948_s25 + $0x150] sm:$0xff]   ;;  %v2798_v8 = vld [vmem:[%s2948_s25 + $0x148] sm:$0xff]   ;;  %v2802_v12 = vld [vmem:[%s2948_s25 + $0x140] sm:$0xff]  }
  0x24   : > { %2442 = vmatprep.subr.bf16.mxu1 %v2763_v21  ;;  %v2248_v4 = vcombine.low %v355_v0, %v363_v1  ;;  %v2795_v5 = vld [vmem:[%s2948_s25 + $0x1d0] sm:$0xff]   ;;  %v2799_v9 = vld [vmem:[%s2948_s25 + $0x1c8] sm:$0xff]   ;;  %v2803_v13 = vld [vmem:[%s2948_s25 + $0x1c0] sm:$0xff]  }
  0x25   : > { %v2796_v6 = vld [vmem:[%s2948_s25 + $0x110] sm:$0xff]   ;;  %v2800_v10 = vld [vmem:[%s2948_s25 + $0x108] sm:$0xff]   ;;  %v2804_v14 = vld [vmem:[%s2948_s25 + $0x100] sm:$0xff]  }
  0x26   : > { %2415 = vmatpush3.bf16.msra.mxu0 %v2764_v22  ;;  %v2797_v7 = vld [vmem:[%s2948_s25 + $0x190] sm:$0xff]   ;;  %v2801_v11 = vld [vmem:[%s2948_s25 + $0x188] sm:$0xff]   ;;  %v2805_v15 = vld [vmem:[%s2948_s25 + $0x180] sm:$0xff]  }
  0x27   : > { %2443 = vmatpush3.bf16.msra.mxu1 %v2765_v23  ;;  %2416 = vmatprep.subr.bf16.mxu0 %v2766_v24  ;;  %v340_v16 = vld [vmem:[%s2984_s29 + $0x10] sm:$0xff]  ;;  %v341_v18 = vld [vmem:[%s2984_s29 + $0x18] sm:$0xff]  ;;  %v2814_v36 = vld [vmem:[%s2948_s25 + $0x268] sm:$0xff]  }
  0x28   : > { %2444 = vmatprep.subr.bf16.mxu1 %v2767_v25  ;;  %v348_v17 = vld [vmem:[%s2984_s29 + $0x50] sm:$0xff]  ;;  %v349_v19 = vld [vmem:[%s2984_s29 + $0x58] sm:$0xff]  ;;  %v2815_v37 = vld [vmem:[%s2948_s25 + $0x2e8] sm:$0xff]  }
  0x29   : > { %v2234_v20 = vcombine.low %v340_v16, %v348_v17  ;;  %v2235_v21 = vcombine.high %v340_v16, %v348_v17  ;;  %v2236_v22 = vcombine.low %v341_v18, %v349_v19  ;;  %v2237_v23 = vcombine.high %v341_v18, %v349_v19  ;;  %v2806_v24 = vld [vmem:[%s2948_s25 + $0x278] sm:$0xff]   ;;  %v356_v32 = vld [vmem:[%s2984_s29 + $0x90] sm:$0xff]  ;;  %v2834_v60 = vld [vmem:[%s2948_s25 + $0x240] sm:$0xff]  }
  0x2a   : > { %2417 = vmatpush3.bf16.msra.mxu0 %v2768_v26  ;;  %v2807_v25 = vld [vmem:[%s2948_s25 + $0x2f8] sm:$0xff]   ;;  %v364_v33 = vld [vmem:[%s2984_s29 + $0xd0] sm:$0xff]  ;;  %v2835_v61 = vld [vmem:[%s2948_s25 + $0x2c0] sm:$0xff]  }
  0x2b   : > { %2445 = vmatpush3.bf16.msra.mxu1 %v2769_v27  ;;  %2418 = vmatprep.subr.bf16.mxu0 %v2770_v28  ;;  %v2808_v26 = vld [vmem:[%s2948_s25 + $0x238] sm:$0xff]   ;;  %v2810_v28 = vld [vmem:[%s2948_s25 + $0x270] sm:$0xff]   ;;  %v2251_v34 = vcombine.high %v356_v32, %v364_v33  ;;  %v342_v0 = vld [vmem:[%s2984_s29 + $0x20] sm:$0xff] }
  0x2c   : > { %2446 = vmatprep.subr.bf16.mxu1 %v2771_v29  ;;  %v2809_v27 = vld [vmem:[%s2948_s25 + $0x2b8] sm:$0xff]   ;;  %v2811_v29 = vld [vmem:[%s2948_s25 + $0x2f0] sm:$0xff]   ;;  %v350_v1 = vld [vmem:[%s2984_s29 + $0x60] sm:$0xff] }
  0x2d   : > { %v365_v39 = vld [vmem:[%s2984_s29 + $0xd8] sm:$0xff]  ;;  %v358_v16 = vld [vmem:[%s2984_s29 + $0xa0] sm:$0xff] }
  0x2e   : > { %2419 = vmatpush3.bf16.msra.mxu0 %v2772_v30  ;;  %v2812_v30 = vld [vmem:[%s2948_s25 + $0x230] sm:$0xff]   ;;  %v366_v17 = vld [vmem:[%s2984_s29 + $0xe0] sm:$0xff] }
  0x2f   : > { %2447 = vmatpush3.bf16.msra.mxu1 %v2773_v31  ;;  %2460 = vmatprep.subr.bf16.mxu0 %v2774_v40  ;;  %v2813_v31 = vld [vmem:[%s2948_s25 + $0x2b0] sm:$0xff]   ;;  %v2255_v18 = vcombine.high %v358_v16, %v366_v17  ;;  %v2254_v19 = vcombine.low %v358_v16, %v366_v17 }
  0x30   : > { %2488 = vmatprep.subr.bf16.mxu1 %v2775_v41  ;;  %v2816_v41 = vld [vmem:[%s2948_s25 + $0x228] sm:$0xff]  }
  0x31   : > { %1594 = vmatmul.mubr.bf16.vlgmr.msra.gmra.mxu0 %v2230_v35  ;;  %v2250_v35 = vcombine.low %v356_v32, %v364_v33  ;;  %v2854_v32 = vld [vmem:[%s2948_s25 + $0x358] sm:$0xff]  }
  0x32   : > { %1643 = vmatmul.mubr.bf16.vlgmr.msra.gmra.mxu1 %v2232_v38  ;;  %2461 = vmatpush3.bf16.msra.mxu0 %v2776_v42  ;;  %v357_v38 = vld [vmem:[%s2984_s29 + $0x98] sm:$0xff] }
  0x33   : > { %2489 = vmatpush3.bf16.msra.mxu1 %v2777_v43  ;;  %2462 = vmatprep.subr.bf16.mxu0 %v2778_v44  ;;  %v2253_v40 = vcombine.high %v357_v38, %v365_v39  ;;  %v2252_v42 = vcombine.low %v357_v38, %v365_v39  ;;  %v2817_v43 = vld [vmem:[%s2948_s25 + $0x2a8] sm:$0xff]   ;;  %v2818_v44 = vld [vmem:[%s2948_s25 + $0x260] sm:$0xff]   ;;  %v2855_v33 = vld [vmem:[%s2948_s25 + $0x3d8] sm:$0xff]  }
  0x34   : > { %2490 = vmatprep.subr.bf16.mxu1 %v2779_v45  ;;  %1601 = vmatprep.mubr.bf16.mxu0 %v2247_v62  ;;  %v2819_v45 = vld [vmem:[%s2948_s25 + $0x2e0] sm:$0xff]   ;;  %v2860_v38 = vld [vmem:[%s2948_s25 + $0x310] sm:$0xff]  }
  0x35   : > { %1650 = vmatprep.mubr.bf16.mxu1 %v2249_v2  ;;  %v2836_v62 = vld [vmem:[%s2948_s25 + $0x200] sm:$0xff]   ;;  %v2238_v2 = vcombine.low %v342_v0, %v350_v1  ;;  %v2861_v39 = vld [vmem:[%s2948_s25 + $0x390] sm:$0xff]  }
  0x36   : > { %2463 = vmatpush3.bf16.msra.mxu0 %v2780_v46  ;;  %v2820_v46 = vld [vmem:[%s2948_s25 + $0x220] sm:$0xff]  }
  0x37   : > { %2491 = vmatpush3.bf16.msra.mxu1 %v2781_v47  ;;  %2464 = vmatprep.subr.bf16.mxu0 %v2782_v48  ;;  %v2821_v47 = vld [vmem:[%s2948_s25 + $0x2a0] sm:$0xff]   ;;  %v2822_v48 = vld [vmem:[%s2948_s25 + $0x258] sm:$0xff]  }
  0x38   : > { %2492 = vmatprep.subr.bf16.mxu1 %v2783_v49  ;;  %v2823_v49 = vld [vmem:[%s2948_s25 + $0x2d8] sm:$0xff]  }
  0x39   : > { %1602 = vmatmul.mubr.bf16.gmra.mxu0 %v2246_v63  ;;  %v2837_v63 = vld [vmem:[%s2948_s25 + $0x280] sm:$0xff]  }
  0x3a   : > { %2465 = vmatpush3.bf16.msra.mxu0 %v2784_v50  ;;  %1651 = vmatmul.mubr.bf16.gmra.mxu1 %v2248_v4  ;;  %v2824_v50 = vld [vmem:[%s2948_s25 + $0x218] sm:$0xff]   ;;  %v343_v4 = vld [vmem:[%s2984_s29 + $0x28] sm:$0xff] }
  0x3b   : > { %2493 = vmatpush3.bf16.msra.mxu1 %v2785_v51  ;;  %2466 = vmatprep.subr.bf16.mxu0 %v2786_v52  ;;  %v2825_v51 = vld [vmem:[%s2948_s25 + $0x298] sm:$0xff]   ;;  %v2826_v52 = vld [vmem:[%s2948_s25 + $0x250] sm:$0xff]  }
  0x3c   : > { %2494 = vmatprep.subr.bf16.mxu1 %v2787_v53  ;;  %1691 = vmatprep.mubr.bf16.mxu0 %v2235_v21  ;;  %v2827_v53 = vld [vmem:[%s2948_s25 + $0x2d0] sm:$0xff]   ;;  %v2847_v21 = vld [vmem:[%s2948_s25 + $0x3e8] sm:$0xff]  }
  0x3d   : > { %1740 = vmatprep.mubr.bf16.mxu1 %v2237_v23  ;;  %v367_v23 = vld [vmem:[%s2984_s29 + $0xe8] sm:$0xff] }
  0x3e   : > { %2467 = vmatpush3.bf16.msra.mxu0 %v2788_v54  ;;  %v2828_v54 = vld [vmem:[%s2948_s25 + $0x210] sm:$0xff]  }
  0x3f   : > { %2495 = vmatpush3.bf16.msra.mxu1 %v2789_v55  ;;  %2468 = vmatprep.subr.bf16.mxu0 %v2790_v56  ;;  %v2829_v55 = vld [vmem:[%s2948_s25 + $0x290] sm:$0xff]   ;;  %v2830_v56 = vld [vmem:[%s2948_s25 + $0x248] sm:$0xff]  }
  0x40   : > { %2496 = vmatprep.subr.bf16.mxu1 %v2791_v57  ;;  %v2831_v57 = vld [vmem:[%s2948_s25 + $0x2c8] sm:$0xff]  }
  0x42   : > { %2469 = vmatpush3.bf16.msra.mxu0 %v2792_v58  ;;  %v2832_v58 = vld [vmem:[%s2948_s25 + $0x208] sm:$0xff]  }
  0x43   : > { %2497 = vmatpush3.bf16.msra.mxu1 %v2793_v59  ;;  %2470 = vmatprep.subr.bf16.mxu0 %v2794_v3  ;;  %v2833_v59 = vld [vmem:[%s2948_s25 + $0x288] sm:$0xff]   ;;  %v2239_v3 = vcombine.high %v342_v0, %v350_v1  ;;  %v1980_v0 = vld [vmem:[%s3198_s4 + $0x78] sm:$0xff]  ;;  %v1979_v1 = vld [vmem:[%s3198_s4 + $0x70] sm:$0xff] }
  0x44   : > { %2498 = vmatprep.subr.bf16.mxu1 %v2795_v5  ;;  %v351_v5 = vld [vmem:[%s2984_s29 + $0x68] sm:$0xff] }
  0x46   : > { %2471 = vmatpush3.bf16.msra.mxu0 %v2796_v6  ;;  %v2240_v6 = vcombine.low %v343_v4, %v351_v5 }
  0x47   : > { %2499 = vmatpush3.bf16.msra.mxu1 %v2797_v7  ;;  %2472 = vmatprep.subr.bf16.mxu0 %v2798_v8  ;;  %v2241_v7 = vcombine.high %v343_v4, %v351_v5  ;;  %v2838_v8 = vld [vmem:[%s2948_s25 + $0x378] sm:$0xff]   ;;  %v1975_v5 = vld [vmem:[%s3198_s4 + $0x50] sm:$0xff] }
  0x48   : > { %2500 = vmatprep.subr.bf16.mxu1 %v2799_v9  ;;  %v2839_v9 = vld [vmem:[%s2948_s25 + $0x3f8] sm:$0xff]  }
  0x49   : > { %v1976_v4 = vld [vmem:[%s3198_s4 + $0x58] sm:$0xff] }
  0x4a   : > { %2473 = vmatpush3.bf16.msra.mxu0 %v2800_v10  ;;  %v2840_v10 = vld [vmem:[%s2948_s25 + $0x338] sm:$0xff]  }
  0x4b   : > { %2501 = vmatpush3.bf16.msra.mxu1 %v2801_v11  ;;  %2474 = vmatprep.subr.bf16.mxu0 %v2802_v12  ;;  %v2841_v11 = vld [vmem:[%s2948_s25 + $0x3b8] sm:$0xff]   ;;  %v2842_v12 = vld [vmem:[%s2948_s25 + $0x370] sm:$0xff]  }
  0x4c   : > { %2502 = vmatprep.subr.bf16.mxu1 %v2803_v13  ;;  %v2843_v13 = vld [vmem:[%s2948_s25 + $0x3f0] sm:$0xff]  }
  0x4e   : > { %2475 = vmatpush3.bf16.msra.mxu0 %v2804_v14  ;;  %v2844_v14 = vld [vmem:[%s2948_s25 + $0x330] sm:$0xff]  }
  0x4f   : > { %2503 = vmatpush3.bf16.msra.mxu1 %v2805_v15  ;;  %2516 = vmatprep.subr.bf16.mxu0 %v2806_v24  ;;  %v2845_v15 = vld [vmem:[%s2948_s25 + $0x3b0] sm:$0xff]  }
  0x50   : > { %2544 = vmatprep.subr.bf16.mxu1 %v2807_v25  ;;  %v2848_v25 = vld [vmem:[%s2948_s25 + $0x328] sm:$0xff]  }
  0x51   : > { %1692 = vmatmul.mubr.bf16.vlgmr.msra.gmra.mxu0 %v2234_v20  ;;  %v2846_v20 = vld [vmem:[%s2948_s25 + $0x368] sm:$0xff]  }
  0x52   : > { %1741 = vmatmul.mubr.bf16.vlgmr.msra.gmra.mxu1 %v2236_v22  ;;  %2517 = vmatpush3.bf16.msra.mxu0 %v2808_v26  ;;  %v359_v22 = vld [vmem:[%s2984_s29 + $0xa8] sm:$0xff] }
  0x53   : > { %2545 = vmatpush3.bf16.msra.mxu1 %v2809_v27  ;;  %2518 = vmatprep.subr.bf16.mxu0 %v2810_v28  ;;  %v2257_v24 = vcombine.high %v359_v22, %v367_v23  ;;  %v2256_v26 = vcombine.low %v359_v22, %v367_v23  ;;  %v2849_v27 = vld [vmem:[%s2948_s25 + $0x3a8] sm:$0xff]   ;;  %v2850_v28 = vld [vmem:[%s2948_s25 + $0x360] sm:$0xff]  }
  0x54   : > { %2546 = vmatprep.subr.bf16.mxu1 %v2811_v29  ;;  %1699 = vmatprep.mubr.bf16.mxu0 %v2251_v34  ;;  %v2851_v29 = vld [vmem:[%s2948_s25 + $0x3e0] sm:$0xff]   ;;  %v2856_v34 = vld [vmem:[%s2948_s25 + $0x318] sm:$0xff]  }
  0x55   : > { %1748 = vmatprep.mubr.bf16.mxu1 %v2253_v40  ;;  %v2862_v40 = vld [vmem:[%s2948_s25 + $0x348] sm:$0xff]  }
  0x56   : > { %2519 = vmatpush3.bf16.msra.mxu0 %v2812_v30  ;;  %v2852_v30 = vld [vmem:[%s2948_s25 + $0x320] sm:$0xff]  }
  0x57   : > { %2547 = vmatpush3.bf16.msra.mxu1 %v2813_v31  ;;  %2520 = vmatprep.subr.bf16.mxu0 %v2814_v36  ;;  %v2853_v31 = vld [vmem:[%s2948_s25 + $0x3a0] sm:$0xff]   ;;  %v2858_v36 = vld [vmem:[%s2948_s25 + $0x350] sm:$0xff]  }
  0x58   : > { %2548 = vmatprep.subr.bf16.mxu1 %v2815_v37  ;;  %v2859_v37 = vld [vmem:[%s2948_s25 + $0x3d0] sm:$0xff]  }
  0x59   : > { %1700 = vmatmul.mubr.bf16.gmra.mxu0 %v2250_v35  ;;  %v2857_v35 = vld [vmem:[%s2948_s25 + $0x398] sm:$0xff]  }
  0x5a   : > { %2521 = vmatpush3.bf16.msra.mxu0 %v2816_v41  ;;  %1749 = vmatmul.mubr.bf16.gmra.mxu1 %v2252_v42  ;;  %v2863_v41 = vld [vmem:[%s2948_s25 + $0x3c8] sm:$0xff]  }
  0x5b   : > { %2549 = vmatpush3.bf16.msra.mxu1 %v2817_v43  ;;  %2522 = vmatprep.subr.bf16.mxu0 %v2818_v44  ;;  %v2864_v42 = vld [vmem:[%s2948_s25 + $0x308] sm:$0xff]   ;;  %v2866_v44 = vld [vmem:[%s2948_s25 + $0x340] sm:$0xff]  }
  0x5c   : > { %2550 = vmatprep.subr.bf16.mxu1 %v2819_v45  ;;  %1789 = vmatprep.mubr.bf16.mxu0 %v2239_v3  ;;  %v2865_v43 = vld [vmem:[%s2948_s25 + $0x388] sm:$0xff]   ;;  %v2867_v45 = vld [vmem:[%s2948_s25 + $0x3c0] sm:$0xff]  }
  0x5d   : > { %1838 = vmatprep.mubr.bf16.mxu1 %v2241_v7  ;;  %v1977_v3 = vld [vmem:[%s3198_s4 + $0x60] sm:$0xff] }
  0x5e   : > { %2523 = vmatpush3.bf16.msra.mxu0 %v2820_v46  ;;  %v2868_v46 = vld [vmem:[%s2948_s25 + $0x300] sm:$0xff]  }
  0x5f   : > { %2551 = vmatpush3.bf16.msra.mxu1 %v2821_v47  ;;  %2524 = vmatprep.subr.bf16.mxu0 %v2822_v48  ;;  %v2869_v47 = vld [vmem:[%s2948_s25 + $0x380] sm:$0xff]   ;;  %v344_v48 = vld [vmem:[%s2984_s29 + $0x30] sm:$0xff] }
  0x60   : > { %2552 = vmatprep.subr.bf16.mxu1 %v2823_v49  ;;  %v352_v49 = vld [vmem:[%s2984_s29 + $0x70] sm:$0xff]  ;;  %v1973_v7 = vld [vmem:[%s3198_s4 + $0x40] sm:$0xff] }
  0x62   : > { %2525 = vmatpush3.bf16.msra.mxu0 %v2824_v50  ;;  %v345_v50 = vld [vmem:[%s2984_s29 + $0x38] sm:$0xff] }
  0x63   : > { %2553 = vmatpush3.bf16.msra.mxu1 %v2825_v51  ;;  %2526 = vmatprep.subr.bf16.mxu0 %v2826_v52  ;;  %v2242_v51 = vcombine.low %v344_v48, %v352_v49  ;;  %v2243_v52 = vcombine.high %v344_v48, %v352_v49 }
  0x64   : > { %2554 = vmatprep.subr.bf16.mxu1 %v2827_v53  ;;  %v353_v53 = vld [vmem:[%s2984_s29 + $0x78] sm:$0xff] }
  0x66   : > { %2527 = vmatpush3.bf16.msra.mxu0 %v2828_v54  ;;  %v360_v54 = vld [vmem:[%s2984_s29 + $0xb0] sm:$0xff] }
  0x67   : > { %2555 = vmatpush3.bf16.msra.mxu1 %v2829_v55  ;;  %2528 = vmatprep.subr.bf16.mxu0 %v2830_v56  ;;  %v368_v55 = vld [vmem:[%s2984_s29 + $0xf0] sm:$0xff]  ;;  %v2244_v56 = vcombine.low %v345_v50, %v353_v53 }
  0x68   : > { %2556 = vmatprep.subr.bf16.mxu1 %v2831_v57  ;;  %v2245_v57 = vcombine.high %v345_v50, %v353_v53 }
  0x6a   : > { %2529 = vmatpush3.bf16.msra.mxu0 %v2832_v58  ;;  %v2259_v58 = vcombine.high %v360_v54, %v368_v55 }
  0x6b   : > { %2557 = vmatpush3.bf16.msra.mxu1 %v2833_v59  ;;  %2530 = vmatprep.subr.bf16.mxu0 %v2834_v60  ;;  %v361_v59 = vld [vmem:[%s2984_s29 + $0xb8] sm:$0xff] }
  0x6c   : > { %2558 = vmatprep.subr.bf16.mxu1 %v2835_v61  ;;  %v369_v60 = vld [vmem:[%s2984_s29 + $0xf8] sm:$0xff] }
  0x6d   : > { %v2261_v61 = vcombine.high %v361_v59, %v369_v60 }
  0x6e   : > { %2531 = vmatpush3.bf16.msra.mxu0 %v2836_v62  ;;  %v2258_v62 = vcombine.low %v360_v54, %v368_v55 }
  0x6f   : > { %2559 = vmatpush3.bf16.msra.mxu1 %v2837_v63  ;;  %2572 = vmatprep.subr.bf16.mxu0 %v2838_v8  ;;  %v2260_v63 = vcombine.low %v361_v59, %v369_v60  ;;  %v1972_v8 = vld [vmem:[%s3198_s4 + $0x38] sm:$0xff] }
  0x70   : > { %2600 = vmatprep.subr.bf16.mxu1 %v2839_v9  ;;  %v1971_v9 = vld [vmem:[%s3198_s4 + $0x30] sm:$0xff] }
  0x71   : > { %1790 = vmatmul.mubr.bf16.vlgmr.msra.gmra.mxu0 %v2238_v2  ;;  %v1978_v2 = vld [vmem:[%s3198_s4 + $0x68] sm:$0xff] }
  0x72   : > { %1839 = vmatmul.mubr.bf16.vlgmr.msra.gmra.mxu1 %v2240_v6  ;;  %2573 = vmatpush3.bf16.msra.mxu0 %v2840_v10  ;;  %v1974_v6 = vld [vmem:[%s3198_s4 + $0x48] sm:$0xff] }
  0x73   : > { %2601 = vmatpush3.bf16.msra.mxu1 %v2841_v11  ;;  %2574 = vmatprep.subr.bf16.mxu0 %v2842_v12  ;;  %v1970_v10 = vld [vmem:[%s3198_s4 + $0x28] sm:$0xff]  ;;  %v1969_v11 = vld [vmem:[%s3198_s4 + $0x20] sm:$0xff]  ;;  %v1968_v12 = vld [vmem:[%s3198_s4 + $0x18] sm:$0xff] }
  0x74   : > { %2602 = vmatprep.subr.bf16.mxu1 %v2843_v13  ;;  %1797 = vmatprep.mubr.bf16.mxu0 %v2255_v18  ;;  %v1967_v13 = vld [vmem:[%s3198_s4 + $0x10] sm:$0xff] }
  0x75   : > { %1846 = vmatprep.mubr.bf16.mxu1 %v2257_v24 }
  0x76   : > { %2575 = vmatpush3.bf16.msra.mxu0 %v2844_v14  ;;  %v1966_v14 = vld [vmem:[%s3198_s4 + $0x8] sm:$0xff] }
  0x77   : > { %2603 = vmatpush3.bf16.msra.mxu1 %v2845_v15  ;;  %2576 = vmatprep.subr.bf16.mxu0 %v2846_v20  ;;  %v1965_v15 = vld [vmem:[%s3198_s4] sm:$0xff] }
  0x78   : > { %2604 = vmatprep.subr.bf16.mxu1 %v2847_v21 }
  0x79   : > { %1798 = vmatmul.mubr.bf16.gmra.mxu0 %v2254_v19 }
  0x7a   : > { %2577 = vmatpush3.bf16.msra.mxu0 %v2848_v25  ;;  %1847 = vmatmul.mubr.bf16.gmra.mxu1 %v2256_v26 }
  0x7b   : > { %2605 = vmatpush3.bf16.msra.mxu1 %v2849_v27  ;;  %2578 = vmatprep.subr.bf16.mxu0 %v2850_v28 }
  0x7c   : > { %2606 = vmatprep.subr.bf16.mxu1 %v2851_v29  ;;  %1887 = vmatprep.mubr.bf16.mxu0 %v2243_v52 }
  0x7d   : > { %1936 = vmatprep.mubr.bf16.mxu1 %v2245_v57 }
  0x7e   : > { %2579 = vmatpush3.bf16.msra.mxu0 %v2852_v30 }
  0x7f   : > { %2607 = vmatpush3.bf16.msra.mxu1 %v2853_v31  ;;  %2580 = vmatprep.subr.bf16.mxu0 %v2854_v32 }
  0x80   : > { %2608 = vmatprep.subr.bf16.mxu1 %v2855_v33 }
  0x82   : > { %2581 = vmatpush3.bf16.msra.mxu0 %v2856_v34 }
  0x83   : > { %2609 = vmatpush3.bf16.msra.mxu1 %v2857_v35  ;;  %2582 = vmatprep.subr.bf16.mxu0 %v2858_v36 }
  0x84   : > { %2610 = vmatprep.subr.bf16.mxu1 %v2859_v37 }
  0x86   : > { %2583 = vmatpush3.bf16.msra.mxu0 %v2860_v38 }
  0x87   : > { %2611 = vmatpush3.bf16.msra.mxu1 %v2861_v39  ;;  %2584 = vmatprep.subr.bf16.mxu0 %v2862_v40 }
  0x88   : > { %2612 = vmatprep.subr.bf16.mxu1 %v2863_v41 }
  0x8a   : > { %2585 = vmatpush3.bf16.msra.mxu0 %v2864_v42 }
  0x8b   : > { %2613 = vmatpush3.bf16.msra.mxu1 %v2865_v43  ;;  %2586 = vmatprep.subr.bf16.mxu0 %v2866_v44 }
  0x8c   : > { %2614 = vmatprep.subr.bf16.mxu1 %v2867_v45 }
  0x8e   : > { %2587 = vmatpush3.bf16.msra.mxu0 %v2868_v46 }
  0x8f   : > { %2615 = vmatpush3.bf16.msra.mxu1 %v2869_v47  ;;  %2648 = vmatprep.subr.mxu0 %v1980_v0 }
  0x90   : > { %2686 = vmatprep.subr.mxu1 %v1980_v0 }
  0x91   : > { %1888 = vmatmul.mubr.bf16.vlgmr.msra.gmra.mxu0 %v2242_v51 }
  0x92   : > { %1937 = vmatmul.mubr.bf16.vlgmr.msra.gmra.mxu1 %v2244_v56  ;;  %1895 = vmatprep.mubr.bf16.mxu0 %v2259_v58  ;;  %v2229_v56 = vld [vmem:[%s316_s22] ss:$0 sm:$0xff] }
  0x93   : > { %1944 = vmatprep.mubr.bf16.mxu1 %v2261_v61  ;;  %2649 = vmatpush3.msra.mxu0 %v1980_v0 }
  0x94   : > { %2702 = vmatpush3.msra.mxu1 %v1980_v0  ;;  %2650 = vmatprep.subr.mxu0 %v1979_v1 }
  0x95   : > { %2687 = vmatprep.subr.mxu1 %v1979_v1  ;;  %2651 = vmatpush3.msra.mxu0 %v1979_v1 }
  0x96   : > { %2703 = vmatpush3.msra.mxu1 %v1979_v1  ;;  %2652 = vmatprep.subr.mxu0 %v1978_v2 }
  0x97   : > { %2688 = vmatprep.subr.mxu1 %v1978_v2  ;;  %2653 = vmatpush3.msra.mxu0 %v1978_v2 }
  0x98   : > { %2704 = vmatpush3.msra.mxu1 %v1978_v2  ;;  %2654 = vmatprep.subr.mxu0 %v1977_v3 }
  0x99   : > { %1896 = vmatmul.mubr.bf16.gmra.mxu0 %v2258_v62  ;;  %2689 = vmatprep.subr.mxu1 %v1977_v3 }
  0x9a   : > { %1945 = vmatmul.mubr.bf16.gmra.mxu1 %v2260_v63  ;;  %2655 = vmatpush3.msra.mxu0 %v1977_v3 }
  0x9b   : > { %2705 = vmatpush3.msra.mxu1 %v1977_v3  ;;  %2656 = vmatprep.subr.mxu0 %v1976_v4 }
  0x9c   : > { %2690 = vmatprep.subr.mxu1 %v1976_v4  ;;  %2657 = vmatpush3.msra.mxu0 %v1976_v4 }
  0x9d   : > { %2706 = vmatpush3.msra.mxu1 %v1976_v4  ;;  %2658 = vmatprep.subr.mxu0 %v1975_v5 }
  0x9e   : > { %2691 = vmatprep.subr.mxu1 %v1975_v5  ;;  %2659 = vmatpush3.msra.mxu0 %v1975_v5 }
  0x9f   : > { %2707 = vmatpush3.msra.mxu1 %v1975_v5  ;;  %2660 = vmatprep.subr.mxu0 %v1974_v6 }
  0xa0   : > { %2692 = vmatprep.subr.mxu1 %v1974_v6  ;;  %2661 = vmatpush3.msra.mxu0 %v1974_v6 }
  0xa1   : > { %2708 = vmatpush3.msra.mxu1 %v1974_v6  ;;  %2662 = vmatprep.subr.mxu0 %v1973_v7 }
  0xa2   : > { %2693 = vmatprep.subr.mxu1 %v1973_v7  ;;  %2663 = vmatpush3.msra.mxu0 %v1973_v7 }
  0xa3   : > { %2709 = vmatpush3.msra.mxu1 %v1973_v7  ;;  %2664 = vmatprep.subr.mxu0 %v1972_v8 }
  0xa4   : > { %2694 = vmatprep.subr.mxu1 %v1972_v8  ;;  %2665 = vmatpush3.msra.mxu0 %v1972_v8 }
  0xa5   : > { %2710 = vmatpush3.msra.mxu1 %v1972_v8  ;;  %2666 = vmatprep.subr.mxu0 %v1971_v9 }
  0xa6   : > { %2695 = vmatprep.subr.mxu1 %v1971_v9  ;;  %2667 = vmatpush3.msra.mxu0 %v1971_v9 }
  0xa7   : > { %2711 = vmatpush3.msra.mxu1 %v1971_v9  ;;  %2668 = vmatprep.subr.mxu0 %v1970_v10 }
  0xa8   : > { %2696 = vmatprep.subr.mxu1 %v1970_v10  ;;  %2669 = vmatpush3.msra.mxu0 %v1970_v10 }
  0xa9   : > { %2712 = vmatpush3.msra.mxu1 %v1970_v10  ;;  %2670 = vmatprep.subr.mxu0 %v1969_v11 }
  0xaa   : > { %2697 = vmatprep.subr.mxu1 %v1969_v11  ;;  %2671 = vmatpush3.msra.mxu0 %v1969_v11 }
  0xab   : > { %2713 = vmatpush3.msra.mxu1 %v1969_v11  ;;  %2672 = vmatprep.subr.mxu0 %v1968_v12 }
  0xac   : > { %2698 = vmatprep.subr.mxu1 %v1968_v12  ;;  %2673 = vmatpush3.msra.mxu0 %v1968_v12 }
  0xad   : > { %2714 = vmatpush3.msra.mxu1 %v1968_v12  ;;  %2674 = vmatprep.subr.mxu0 %v1967_v13 }
  0xae   : > { %2699 = vmatprep.subr.mxu1 %v1967_v13  ;;  %2675 = vmatpush3.msra.mxu0 %v1967_v13 }
  0xaf   : > { %2715 = vmatpush3.msra.mxu1 %v1967_v13  ;;  %2676 = vmatprep.subr.mxu0 %v1966_v14 }
  0xb0   : > { %2700 = vmatprep.subr.mxu1 %v1966_v14  ;;  %2677 = vmatpush3.msra.mxu0 %v1966_v14 }
  0xb1   : > { %2716 = vmatpush3.msra.mxu1 %v1966_v14  ;;  %2678 = vmatprep.subr.mxu0 %v1965_v15 }
  0xb2   : > { %2701 = vmatprep.subr.mxu1 %v1965_v15  ;;  %2679 = vmatpush3.msra.mxu0 %v1965_v15 }
  0xb3   : > { %2717 = vmatpush3.msra.mxu1 %v1965_v15 }
  0xf1   : > { %v2420_v16 = vpop.f32.mrf.mxu0 }
  0xf2   : > { %v2448_v18 = vpop.f32.mrf.mxu1 }
  0xf3   : > { %v2421_v17 = vpop.f32.mrf.mxu0 }
  0xf4   : > { %v2449_v20 = vpop.f32.mrf.mxu1  ;;  %v2422_v55 = vadd.f32 %v2421_v17, %v2420_v16 }
  0xf5   : > { %v2423_v19 = vpop.f32.mrf.mxu0  ;;  %v2450_v60 = vadd.f32 %v2449_v20, %v2448_v18 }
  0xf6   : > { %v2451_v22 = vpop.f32.mrf.mxu1  ;;  %v1596_v59 = vadd.f32 %v2422_v55, %v2229_v56 }
  0xf7   : > { %v2424_v21 = vpop.f32.mrf.mxu0 }
  0xf8   : > { %v2452_v24 = vpop.f32.mrf.mxu1  ;;  %v2425_v61 = vadd.f32 %v2424_v21, %v2423_v19  ;;  %v1645_v2 = vadd.f32 %v2450_v60, %v1596_v59 }
  0xf9   : > { %v2426_v23 = vpop.f32.mrf.mxu0  ;;  %v2453_v5 = vadd.f32 %v2452_v24, %v2451_v22 }
  0xfa   : > { %v2454_v26 = vpop.f32.mrf.mxu1  ;;  %v1599_v3 = vadd.f32 %v2425_v61, %v2229_v56 }
  0xfb   : > { %v2427_v25 = vpop.f32.mrf.mxu0 }
  0xfc   : > { %v2455_v28 = vpop.f32.mrf.mxu1  ;;  %v2428_v0 = vadd.f32 %v2427_v25, %v2426_v23  ;;  %v1648_v13 = vadd.f32 %v2453_v5, %v1599_v3 }
  0xfd   : > { %v2429_v27 = vpop.f32.mrf.mxu0  ;;  %v2456_v10 = vadd.f32 %v2455_v28, %v2454_v26 }
  0xfe   : > { %v2457_v30 = vpop.f32.mrf.mxu1  ;;  %v1604_v9 = vadd.f32 %v2428_v0, %v2229_v56 }
  0xff   : > { %v2430_v29 = vpop.f32.mrf.mxu0 }
 0x100   : > { %v2458_v32 = vpop.f32.mrf.mxu1  ;;  %v2431_v11 = vadd.f32 %v2430_v29, %v2429_v27  ;;  %v1653_v19 = vadd.f32 %v2456_v10, %v1604_v9 }
 0x101   : > { %v2459_v21 = vadd.f32 %v2458_v32, %v2457_v30 }
 0x102   : > { %v1607_v20 = vadd.f32 %v2431_v11, %v2229_v56 }
 0x111   : > { %v2476_v31 = vpop.f32.mrf.mxu0 }
 0x112   : > { %v2504_v34 = vpop.f32.mrf.mxu1 }
 0x113   : > { %v2477_v33 = vpop.f32.mrf.mxu0 }
 0x114   : > { %v2505_v36 = vpop.f32.mrf.mxu1  ;;  %v2478_v63 = vadd.f32 %v2477_v33, %v2476_v31 }
 0x115   : > { %v2479_v35 = vpop.f32.mrf.mxu0  ;;  %v2506_v7 = vadd.f32 %v2505_v36, %v2504_v34  ;;  %v1656_v36 = vadd.f32 %v2459_v21, %v1607_v20  ;;  %v1959_v20 = vld [vmem:[%s3175_s26 + $0x10] sm:$0xff] }
 0x116   : > { %v2507_v38 = vpop.f32.mrf.mxu1  ;;  %v1694_v6 = vadd.f32 %v2478_v63, %v1645_v2 }
 0x117   : > { %v2480_v37 = vpop.f32.mrf.mxu0 }
 0x118   : > { %v2508_v40 = vpop.f32.mrf.mxu1  ;;  %v2481_v8 = vadd.f32 %v2480_v37, %v2479_v35  ;;  %v1743_v17 = vadd.f32 %v2506_v7, %v1694_v6 }
 0x119   : > { %v2482_v39 = vpop.f32.mrf.mxu0  ;;  %v2509_v25 = vadd.f32 %v2508_v40, %v2507_v38 }
 0x11a   : > { %v2510_v41 = vpop.f32.mrf.mxu1  ;;  %v1697_v18 = vadd.f32 %v2481_v8, %v1648_v13  ;;  %v1958_v8 = vld [vmem:[%s3175_s26 + $0x8] sm:$0xff] }
 0x11b   : > { %v2483_v42 = vpop.f32.mrf.mxu0 }
 0x11c   : > { %v2511_v43 = vpop.f32.mrf.mxu1  ;;  %v2484_v16 = vadd.f32 %v2483_v42, %v2482_v39  ;;  %v1746_v29 = vadd.f32 %v2509_v25, %v1697_v18 }
 0x11d   : > { %v2485_v44 = vpop.f32.mrf.mxu0  ;;  %v2512_v26 = vadd.f32 %v2511_v43, %v2510_v41 }
 0x11e   : > { %v3164_v45 = vpop.f32.mrf.mxu1  ;;  %v1702_v34 = vadd.f32 %v2484_v16, %v1653_v19 }
 0x11f   : > { %v2486_v46 = vpop.f32.mrf.mxu0 }
 0x120   : > { %v2514_v48 = vpop.f32.mrf.mxu1  ;;  %v2487_v27 = vadd.f32 %v2486_v46, %v2485_v44 }
 0x121   : > { %v2515_v40 = vadd.f32 %v2514_v48, %v3164_v45 }
 0x122   : > { %v1705_v38 = vadd.f32 %v2487_v27, %v1656_v36 }
 0x124   : > { %v1754_v45 = vadd.f32 %v2515_v40, %v1705_v38 }
 0x131   : > { %v2532_v47 = vpop.f32.mrf.mxu0 }
 0x132   : > { %v2560_v49 = vpop.f32.mrf.mxu1 }
 0x133   : > { %v2533_v50 = vpop.f32.mrf.mxu0 }
 0x134   : > { %v2561_v51 = vpop.f32.mrf.mxu1  ;;  %v2534_v14 = vadd.f32 %v2533_v50, %v2532_v47  ;;  %v1751_v50 = vadd.f32 %v2512_v26, %v1702_v34 }
 0x135   : > { %v2535_v52 = vpop.f32.mrf.mxu0  ;;  %v2562_v24 = vadd.f32 %v2561_v51, %v2560_v49 }
 0x136   : > { %v2563_v53 = vpop.f32.mrf.mxu1  ;;  %v1792_v22 = vadd.f32 %v2534_v14, %v1743_v17 }
 0x137   : > { %v2536_v54 = vpop.f32.mrf.mxu0 }
 0x138   : > { %v2564_v57 = vpop.f32.mrf.mxu1  ;;  %v2537_v31 = vadd.f32 %v2536_v54, %v2535_v52  ;;  %v1841_v42 = vadd.f32 %v2562_v24, %v1792_v22 }
 0x139   : > { %v2538_v58 = vpop.f32.mrf.mxu0  ;;  %v2565_v51 = vadd.f32 %v2564_v57, %v2563_v53  ;;  %v1957_v53 = vld [vmem:[%s3175_s26] sm:$0xff] }
 0x13a   : > { %v2566_v62 = vpop.f32.mrf.mxu1  ;;  %v1795_v47 = vadd.f32 %v2537_v31, %v1746_v29  ;;  %v1960_v31 = vld [vmem:[%s3175_s26 + $0x18] sm:$0xff] }
 0x13b   : > { %v2539_v1 = vpop.f32.mrf.mxu0 }
 0x13c   : > { %v2567_v4 = vpop.f32.mrf.mxu1  ;;  %v2540_v37 = vadd.f32 %v2539_v1, %v2538_v58  ;;  %v1844_v56 = vadd.f32 %v2565_v51, %v1795_v47 }
 0x13d   : > { %v2541_v12 = vpop.f32.mrf.mxu0  ;;  %v2568_v46 = vadd.f32 %v2567_v4, %v2566_v62 }
 0x13e   : > { %v2569_v15 = vpop.f32.mrf.mxu1  ;;  %v1800_v44 = vadd.f32 %v2540_v37, %v1751_v50 }
 0x13f   : > { %v2542_v23 = vpop.f32.mrf.mxu0 }
 0x140   : > { %v2570_v33 = vpop.f32.mrf.mxu1  ;;  %v2543_v54 = vadd.f32 %v2542_v23, %v2541_v12  ;;  %v1849_v1 = vadd.f32 %v2568_v46, %v1800_v44 }
 0x141   : > { %v2571_v5 = vadd.f32 %v2570_v33, %v2569_v15 }
 0x142   : > { %v1803_v2 = vadd.f32 %v2543_v54, %v1754_v45 }
 0x144   : > { %v1852_v16 = vadd.f32 %v2571_v5, %v1803_v2 }
 0x151   : > { %v2588_v28 = vpop.f32.mrf.mxu0 }
 0x152   : > { %v2616_v35 = vpop.f32.mrf.mxu1 }
 0x153   : > { %v2589_v39 = vpop.f32.mrf.mxu0 }
 0x154   : > { %v2590_v30 = vadd.f32 %v2589_v39, %v2588_v28  ;;  %v2617_v32 = vpop.f32.mrf.mxu1 }
 0x155   : > { %v2591_v49 = vpop.f32.mrf.mxu0  ;;  %v2618_v41 = vadd.f32 %v2617_v32, %v2616_v35 }
 0x156   : > { %v1890_v52 = vadd.f32 %v2590_v30, %v1841_v42  ;;  %v2619_v43 = vpop.f32.mrf.mxu1 }
 0x157   : > { %v2592_v55 = vpop.f32.mrf.mxu0 }
 0x158   : > { %v1939_v58 = vadd.f32 %v2618_v41, %v1890_v52  ;;  %v2593_v59 = vadd.f32 %v2592_v55, %v2591_v49  ;;  %v2620_v60 = vpop.f32.mrf.mxu1 }
 0x159   : > { %v2594_v48 = vpop.f32.mrf.mxu0  ;;  %v2621_v63 = vadd.f32 %v2620_v60, %v2619_v43 }
 0x15a   : > { %v1953_v57 = vmax.f32 %v1939_v58, 0.0  ;;  %v1893_v61 = vadd.f32 %v2593_v59, %v1844_v56  ;;  %v2622_v0 = vpop.f32.mrf.mxu1 }
 0x15b   : > { %v2595_v3 = vpop.f32.mrf.mxu0 }
 0x15c   : > { %v1942_v6 = vadd.f32 %v2621_v63, %v1893_v61  ;;  %v2596_v62 = vadd.f32 %v2595_v3, %v2594_v48  ;;  %v2623_v4 = vpop.f32.mrf.mxu1  ;;  %v1961_v7 = vmul.f32 %v1957_v53, %v1953_v57 }
 0x15d   : > { %v2597_v9 = vpop.f32.mrf.mxu0  ;;  %v2624_v12 = vadd.f32 %v2623_v4, %v2622_v0 }
 0x15e   : > { %v1954_v10 = vmax.f32 %v1942_v6, 0.0  ;;  %v1898_v11 = vadd.f32 %v2596_v62, %v1849_v1  ;;  %v2625_v13 = vpop.f32.mrf.mxu1  ;;  %2680 = vmatprep.mubr.f32.mxu0 %v1961_v7 }
 0x15f   : > { %v2598_v14 = vpop.f32.mrf.mxu0 }
 0x160   : > { %v1962_v17 = vmul.f32 %v1958_v8, %v1954_v10  ;;  %v1947_v18 = vadd.f32 %v2624_v12, %v1898_v11  ;;  %v2599_v19 = vadd.f32 %v2598_v14, %v2597_v9  ;;  %v2626_v15 = vpop.f32.mrf.mxu1 }
 0x161   : > { %v2627_v25 = vadd.f32 %v2626_v15, %v2625_v13 }
 0x162   : > { %v1955_v21 = vmax.f32 %v1947_v18, 0.0  ;;  %v1901_v23 = vadd.f32 %v2599_v19, %v1852_v16  ;;  %2681 = vmatmul.mubr.f32.vlgmr.msra.gmra.mxu0 %v1962_v17 }
 0x164   : > { %v1950_v22 = vadd.f32 %v2627_v25, %v1901_v23  ;;  %v1963_v24 = vmul.f32 %v1959_v20, %v1955_v21 }
 0x166   : > { %v1956_v33 = vmax.f32 %v1950_v22, 0.0  ;;  %2683 = vmatprep.mubr.f32.mxu1 %v1963_v24 }
 0x168   : > { %v1964_v34 = vmul.f32 %v1960_v31, %v1956_v33 }
 0x16a   : > { %2684 = vmatmul.mubr.f32.vlgmr.msra.gmra.mxu1 %v1964_v34 }
 0x222   : > { %v2682_v26 = vpop.f32.mrf.mxu0 }
 0x223   : > { %v2401_v27 = vpack.c.bf16 %v2682_v26, %v2682_v26 }
 0x224   : > { %v2047_v28 = vpop.f32.mrf.mxu0 }
 0x225   : > { %2084 = vst.msk [vmem:[%s335_s30 + $0x4] sm:$0xf] %vm2082_vm0, %v2401_v27  ;;  %v2400_v29 = vpack.c.bf16 %v2047_v28, %v2047_v28 }
 0x227   : > { %2083 = vst.msk [vmem:[%s335_s30] sm:$0xf] %vm2082_vm0, %v2400_v29 }
 0x22a   : > { %v2685_v35 = vpop.f32.mrf.mxu1 }
 0x22b   : > { %v2403_v36 = vpack.c.bf16 %v2685_v35, %v2685_v35 }
 0x22c   : > { %v2057_v37 = vpop.f32.mrf.mxu1 }
 0x22d   : > { %2086 = vst.msk [vmem:[%s335_s30 + $0xc] sm:$0xf] %vm2082_vm0, %v2403_v36  ;;  %v2402_v39 = vpack.c.bf16 %v2057_v37, %v2057_v37 }
 0x22f   : > { %2085 = vst.msk [vmem:[%s335_s30 + $0x8] sm:$0xf] %vm2082_vm0, %v2402_v39 }
 0x230 PF: > { %s15_s20 = sadd.s32 1, %s2892_s20   ;;  %s3200_s18 = smov %s2888_s19 }
 0x231   : > { %p12_p5 = scmp.ge.s32.totalorder %s15_s20, 4   ;;  %s3201_s19 = smov %s3203_s21 }
 0x233   :  { %14 = sbr.rel (!%p12_p5) target bundleno = 2 (0x2), region = 79 }

// kernel: afe_forward.8
= control target key start
LH: loop header
LB: loop body
LE: loop exit
PB: predicated region body
PF: predicated region fallthrough
CT: control target
= control target key end

     0   :  { %vm559_vm0 = vcmask 257024   ;;  %s1032_s1 = inlined_call_operand.vmem [shape: bf16[1,512,128], index: 1, kind: input, shape index: {}]   ;;  %s1033_s0 = inlined_call_operand.vmem [shape: bf16[1,32,512], index: 0, kind: input, shape index: {}]   ;;  %s1034_s4 = inlined_call_operand.vmem [shape: f32[128,32], index: 4, kind: input, shape index: {}]   ;;  %s1035_s2 = inlined_call_operand.vmem [shape: f32[1,1,128], index: 2, kind: input, shape index: {}]   ;;  %s1036_s3 = inlined_call_operand.vmem [shape: f32[1,32,128], index: 3, kind: input, shape index: {}]   ;;  %s1037_s5 = inlined_call_operand.vmem [shape: bf16[1,32,32], index: 5, kind: output, shape index: {}]  }
   0x1   :  { %v763_v0 = vld [vmem:[%s1032_s1 + $0x78] sm:$0xff]   ;;  %v767_v4 = vld [vmem:[%s1032_s1 + $0x70] sm:$0xff]   ;;  %v771_v8 = vld [vmem:[%s1032_s1 + $0x68] sm:$0xff]  }
   0x2   :  { %v764_v1 = vld [vmem:[%s1032_s1 + $0xf8] sm:$0xff]   ;;  %617 = vmatprep.subr.bf16.mxu0 %v763_v0  ;;  %v768_v5 = vld [vmem:[%s1032_s1 + $0xf0] sm:$0xff]   ;;  %v772_v9 = vld [vmem:[%s1032_s1 + $0xe8] sm:$0xff]  }
   0x3   :  { %v765_v2 = vld [vmem:[%s1032_s1 + $0x38] sm:$0xff]   ;;  %645 = vmatprep.subr.bf16.mxu1 %v764_v1  ;;  %v769_v6 = vld [vmem:[%s1032_s1 + $0x30] sm:$0xff]   ;;  %v773_v10 = vld [vmem:[%s1032_s1 + $0x28] sm:$0xff]  }
   0x4   :  { %v766_v3 = vld [vmem:[%s1032_s1 + $0xb8] sm:$0xff]   ;;  %618 = vmatpush3.bf16.msra.mxu0 %v765_v2  ;;  %v770_v7 = vld [vmem:[%s1032_s1 + $0xb0] sm:$0xff]   ;;  %v774_v11 = vld [vmem:[%s1032_s1 + $0xa8] sm:$0xff]  }
   0x5   :  { %646 = vmatpush3.bf16.msra.mxu1 %v766_v3  ;;  %619 = vmatprep.subr.bf16.mxu0 %v767_v4  ;;  %v775_v12 = vld [vmem:[%s1032_s1 + $0x60] sm:$0xff]   ;;  %v779_v16 = vld [vmem:[%s1032_s1 + $0x58] sm:$0xff]   ;;  %v783_v20 = vld [vmem:[%s1032_s1 + $0x50] sm:$0xff]  }
   0x6   :  { %647 = vmatprep.subr.bf16.mxu1 %v768_v5  ;;  %v776_v13 = vld [vmem:[%s1032_s1 + $0xe0] sm:$0xff]   ;;  %v780_v17 = vld [vmem:[%s1032_s1 + $0xd8] sm:$0xff]   ;;  %v784_v21 = vld [vmem:[%s1032_s1 + $0xd0] sm:$0xff]  }
   0x7   :  { %v777_v14 = vld [vmem:[%s1032_s1 + $0x20] sm:$0xff]   ;;  %v781_v18 = vld [vmem:[%s1032_s1 + $0x18] sm:$0xff]   ;;  %v785_v22 = vld [vmem:[%s1032_s1 + $0x10] sm:$0xff]  }
   0x8   :  { %620 = vmatpush3.bf16.msra.mxu0 %v769_v6  ;;  %v778_v15 = vld [vmem:[%s1032_s1 + $0xa0] sm:$0xff]   ;;  %v782_v19 = vld [vmem:[%s1032_s1 + $0x98] sm:$0xff]   ;;  %v786_v23 = vld [vmem:[%s1032_s1 + $0x90] sm:$0xff]  }
   0x9   :  { %648 = vmatpush3.bf16.msra.mxu1 %v770_v7  ;;  %621 = vmatprep.subr.bf16.mxu0 %v771_v8  ;;  %v787_v24 = vld [vmem:[%s1032_s1 + $0x48] sm:$0xff]   ;;  %v791_v28 = vld [vmem:[%s1032_s1 + $0x40] sm:$0xff]   ;;  %v457_v38 = vld [vmem:[%s1034_s4 + $0x78] sm:$0xff] }
   0xa   :  { %649 = vmatprep.subr.bf16.mxu1 %v772_v9  ;;  %v788_v25 = vld [vmem:[%s1032_s1 + $0xc8] sm:$0xff]   ;;  %v792_v29 = vld [vmem:[%s1032_s1 + $0xc0] sm:$0xff]   ;;  %v456_v39 = vld [vmem:[%s1034_s4 + $0x70] sm:$0xff] }
   0xb   :  { %v789_v26 = vld [vmem:[%s1032_s1 + $0x8] sm:$0xff]   ;;  %v793_v30 = vld [vmem:[%s1032_s1] sm:$0xff]   ;;  %v453_v44 = vld [vmem:[%s1034_s4 + $0x58] sm:$0xff] }
   0xc   :  { %622 = vmatpush3.bf16.msra.mxu0 %v773_v10  ;;  %v790_v27 = vld [vmem:[%s1032_s1 + $0x88] sm:$0xff]   ;;  %v794_v31 = vld [vmem:[%s1032_s1 + $0x80] sm:$0xff]   ;;  %v452_v45 = vld [vmem:[%s1034_s4 + $0x50] sm:$0xff] }
   0xd   :  { %650 = vmatpush3.bf16.msra.mxu1 %v774_v11  ;;  %623 = vmatprep.subr.bf16.mxu0 %v775_v12  ;;  %v795_v32 = vld [vmem:[%s1033_s0] ss:$16 sps:$4 sm:$0xff]   ;;  %v797_v33 = vld [vmem:[%s1033_s0 + $0x4] ss:$16 sps:$4 sm:$0xff]   ;;  %v798_v34 = vld [vmem:[%s1033_s0 + $0x8] ss:$16 sps:$4 sm:$0xff]  }
   0xe   :  { %651 = vmatprep.subr.bf16.mxu1 %v776_v13  ;;  %v800_v35 = vld [vmem:[%s1033_s0 + $0xc] ss:$16 sps:$4 sm:$0xff]   ;;  %364 = vmatprep.mubr.bf16.mxu0 %v797_v33  ;;  %v801_v36 = vld [vmem:[%s1033_s0 + $0x24] ss:$16 sps:$4 sm:$0xff]   ;;  %v805_v41 = vld [vmem:[%s1033_s0 + $0x20] ss:$16 sps:$4 sm:$0xff]  }
   0xf   :  { %413 = vmatprep.mubr.bf16.mxu1 %v800_v35  ;;  %v803_v37 = vld [vmem:[%s1033_s0 + $0x2c] ss:$16 sps:$4 sm:$0xff]   ;;  %v806_v42 = vld [vmem:[%s1033_s0 + $0x28] ss:$16 sps:$4 sm:$0xff]   ;;  %v454_v43 = vld [vmem:[%s1034_s4 + $0x60] sm:$0xff] }
  0x10   :  { %624 = vmatpush3.bf16.msra.mxu0 %v777_v14  ;;  %v455_v40 = vld [vmem:[%s1034_s4 + $0x68] sm:$0xff]  ;;  %v450_v47 = vld [vmem:[%s1034_s4 + $0x40] sm:$0xff]  ;;  %v449_v48 = vld [vmem:[%s1034_s4 + $0x38] sm:$0xff] }
  0x11   :  { %652 = vmatpush3.bf16.msra.mxu1 %v778_v15  ;;  %625 = vmatprep.subr.bf16.mxu0 %v779_v16  ;;  %v451_v46 = vld [vmem:[%s1034_s4 + $0x48] sm:$0xff]  ;;  %v448_v49 = vld [vmem:[%s1034_s4 + $0x30] sm:$0xff]  ;;  %v446_v51 = vld [vmem:[%s1034_s4 + $0x20] sm:$0xff] }
  0x12   :  { %653 = vmatprep.subr.bf16.mxu1 %v780_v17  ;;  %v447_v50 = vld [vmem:[%s1034_s4 + $0x28] sm:$0xff]  ;;  %v445_v52 = vld [vmem:[%s1034_s4 + $0x18] sm:$0xff]  ;;  %v444_v53 = vld [vmem:[%s1034_s4 + $0x10] sm:$0xff] }
  0x13   :  { %v443_v54 = vld [vmem:[%s1034_s4 + $0x8] sm:$0xff]  ;;  %v442_v55 = vld [vmem:[%s1034_s4] sm:$0xff] }
  0x14   :  { %626 = vmatpush3.bf16.msra.mxu0 %v781_v18  ;;  %v568_v58 = vld [vmem:[%s1035_s2] ss:$0 sm:$0xff]  ;;  %v435_v17 = vld [vmem:[%s1036_s3 + $0x8] sm:$0xff] }
  0x15   :  { %654 = vmatpush3.bf16.msra.mxu1 %v782_v19  ;;  %627 = vmatprep.subr.bf16.mxu0 %v783_v20  ;;  %v434_v7 = vld [vmem:[%s1036_s3] sm:$0xff] }
  0x16   :  { %655 = vmatprep.subr.bf16.mxu1 %v784_v21 }
  0x18   :  { %628 = vmatpush3.bf16.msra.mxu0 %v785_v22 }
  0x19   :  { %656 = vmatpush3.bf16.msra.mxu1 %v786_v23  ;;  %629 = vmatprep.subr.bf16.mxu0 %v787_v24 }
  0x1a   :  { %657 = vmatprep.subr.bf16.mxu1 %v788_v25 }
  0x1c   :  { %630 = vmatpush3.bf16.msra.mxu0 %v789_v26 }
  0x1d   :  { %658 = vmatpush3.bf16.msra.mxu1 %v790_v27  ;;  %631 = vmatprep.subr.bf16.mxu0 %v791_v28  ;;  %v436_v28 = vld [vmem:[%s1036_s3 + $0x10] sm:$0xff] }
  0x1e   :  { %659 = vmatprep.subr.bf16.mxu1 %v792_v29 }
  0x20   :  { %632 = vmatpush3.bf16.msra.mxu0 %v793_v30 }
  0x21   :  { %660 = vmatpush3.bf16.msra.mxu1 %v794_v31  ;;  %693 = vmatprep.subr.mxu0 %v457_v38 }
  0x22   :  { %731 = vmatprep.subr.mxu1 %v457_v38 }
  0x23   :  { %365 = vmatmul.mubr.bf16.vlgmr.msra.gmra.mxu0 %v795_v32 }
  0x24   :  { %414 = vmatmul.mubr.bf16.vlgmr.msra.gmra.mxu1 %v798_v34  ;;  %372 = vmatprep.mubr.bf16.mxu0 %v801_v36  ;;  %v437_v34 = vld [vmem:[%s1036_s3 + $0x18] sm:$0xff] }
  0x25   :  { %421 = vmatprep.mubr.bf16.mxu1 %v803_v37  ;;  %694 = vmatpush3.msra.mxu0 %v457_v38 }
  0x26   :  { %695 = vmatprep.subr.mxu0 %v456_v39  ;;  %747 = vmatpush3.msra.mxu1 %v457_v38 }
  0x27   :  { %696 = vmatpush3.msra.mxu0 %v456_v39  ;;  %732 = vmatprep.subr.mxu1 %v456_v39 }
  0x28   :  { %697 = vmatprep.subr.mxu0 %v455_v40  ;;  %748 = vmatpush3.msra.mxu1 %v456_v39 }
  0x29   :  { %698 = vmatpush3.msra.mxu0 %v455_v40  ;;  %733 = vmatprep.subr.mxu1 %v455_v40 }
  0x2a   :  { %699 = vmatprep.subr.mxu0 %v454_v43  ;;  %749 = vmatpush3.msra.mxu1 %v455_v40 }
  0x2b   :  { %373 = vmatmul.mubr.bf16.gmra.mxu0 %v805_v41  ;;  %734 = vmatprep.subr.mxu1 %v454_v43 }
  0x2c   :  { %422 = vmatmul.mubr.bf16.gmra.mxu1 %v806_v42  ;;  %700 = vmatpush3.msra.mxu0 %v454_v43 }
  0x2d   :  { %701 = vmatprep.subr.mxu0 %v453_v44  ;;  %750 = vmatpush3.msra.mxu1 %v454_v43 }
  0x2e   :  { %702 = vmatpush3.msra.mxu0 %v453_v44  ;;  %735 = vmatprep.subr.mxu1 %v453_v44 }
  0x2f   :  { %703 = vmatprep.subr.mxu0 %v452_v45  ;;  %751 = vmatpush3.msra.mxu1 %v453_v44 }
  0x30   :  { %704 = vmatpush3.msra.mxu0 %v452_v45  ;;  %736 = vmatprep.subr.mxu1 %v452_v45 }
  0x31   :  { %705 = vmatprep.subr.mxu0 %v451_v46  ;;  %752 = vmatpush3.msra.mxu1 %v452_v45 }
  0x32   :  { %706 = vmatpush3.msra.mxu0 %v451_v46  ;;  %737 = vmatprep.subr.mxu1 %v451_v46 }
  0x33   :  { %707 = vmatprep.subr.mxu0 %v450_v47  ;;  %753 = vmatpush3.msra.mxu1 %v451_v46 }
  0x34   :  { %708 = vmatpush3.msra.mxu0 %v450_v47  ;;  %738 = vmatprep.subr.mxu1 %v450_v47 }
  0x35   :  { %754 = vmatpush3.msra.mxu1 %v450_v47  ;;  %709 = vmatprep.subr.mxu0 %v449_v48 }
  0x36   :  { %739 = vmatprep.subr.mxu1 %v449_v48  ;;  %710 = vmatpush3.msra.mxu0 %v449_v48 }
  0x37   :  { %755 = vmatpush3.msra.mxu1 %v449_v48  ;;  %711 = vmatprep.subr.mxu0 %v448_v49 }
  0x38   :  { %740 = vmatprep.subr.mxu1 %v448_v49  ;;  %712 = vmatpush3.msra.mxu0 %v448_v49 }
  0x39   :  { %756 = vmatpush3.msra.mxu1 %v448_v49  ;;  %713 = vmatprep.subr.mxu0 %v447_v50 }
  0x3a   :  { %741 = vmatprep.subr.mxu1 %v447_v50  ;;  %714 = vmatpush3.msra.mxu0 %v447_v50 }
  0x3b   :  { %757 = vmatpush3.msra.mxu1 %v447_v50  ;;  %715 = vmatprep.subr.mxu0 %v446_v51 }
  0x3c   :  { %742 = vmatprep.subr.mxu1 %v446_v51  ;;  %716 = vmatpush3.msra.mxu0 %v446_v51 }
  0x3d   :  { %758 = vmatpush3.msra.mxu1 %v446_v51  ;;  %717 = vmatprep.subr.mxu0 %v445_v52 }
  0x3e   :  { %743 = vmatprep.subr.mxu1 %v445_v52  ;;  %718 = vmatpush3.msra.mxu0 %v445_v52 }
  0x3f   :  { %759 = vmatpush3.msra.mxu1 %v445_v52  ;;  %719 = vmatprep.subr.mxu0 %v444_v53 }
  0x40   :  { %744 = vmatprep.subr.mxu1 %v444_v53  ;;  %720 = vmatpush3.msra.mxu0 %v444_v53 }
  0x41   :  { %760 = vmatpush3.msra.mxu1 %v444_v53  ;;  %721 = vmatprep.subr.mxu0 %v443_v54 }
  0x42   :  { %745 = vmatprep.subr.mxu1 %v443_v54  ;;  %722 = vmatpush3.msra.mxu0 %v443_v54 }
  0x43   :  { %761 = vmatpush3.msra.mxu1 %v443_v54  ;;  %723 = vmatprep.subr.mxu0 %v442_v55 }
  0x44   :  { %746 = vmatprep.subr.mxu1 %v442_v55  ;;  %724 = vmatpush3.msra.mxu0 %v442_v55 }
  0x45   :  { %762 = vmatpush3.msra.mxu1 %v442_v55 }
  0xe3   :  { %v633_v56 = vpop.f32.mrf.mxu0 }
  0xe4   :  { %v661_v57 = vpop.f32.mrf.mxu1 }
  0xe5   :  { %v634_v59 = vpop.f32.mrf.mxu0 }
  0xe6   :  { %v635_v60 = vadd.f32 %v634_v59, %v633_v56  ;;  %v662_v61 = vpop.f32.mrf.mxu1 }
  0xe7   :  { %v636_v62 = vpop.f32.mrf.mxu0  ;;  %v663_v0 = vadd.f32 %v662_v61, %v661_v57 }
  0xe8   :  { %v367_v63 = vadd.f32 %v635_v60, %v568_v58  ;;  %v664_v1 = vpop.f32.mrf.mxu1 }
  0xe9   :  { %v637_v2 = vpop.f32.mrf.mxu0 }
  0xea   :  { %v416_v3 = vadd.f32 %v663_v0, %v367_v63  ;;  %v638_v4 = vadd.f32 %v637_v2, %v636_v62  ;;  %v665_v5 = vpop.f32.mrf.mxu1 }
  0xeb   :  { %v639_v6 = vpop.f32.mrf.mxu0  ;;  %v666_v10 = vadd.f32 %v665_v5, %v664_v1 }
  0xec   :  { %v430_v8 = vmax.f32 %v416_v3, 0.0  ;;  %v370_v9 = vadd.f32 %v638_v4, %v568_v58  ;;  %v667_v11 = vpop.f32.mrf.mxu1 }
  0xed   :  { %v640_v12 = vpop.f32.mrf.mxu0 }
  0xee   :  { %v419_v13 = vadd.f32 %v666_v10, %v370_v9  ;;  %v641_v14 = vadd.f32 %v640_v12, %v639_v6  ;;  %v668_v15 = vpop.f32.mrf.mxu1  ;;  %v438_v16 = vmul.f32 %v434_v7, %v430_v8 }
  0xef   :  { %v642_v18 = vpop.f32.mrf.mxu0  ;;  %v669_v21 = vadd.f32 %v668_v15, %v667_v11 }
  0xf0   :  { %v431_v19 = vmax.f32 %v419_v13, 0.0  ;;  %v375_v20 = vadd.f32 %v641_v14, %v568_v58  ;;  %v670_v22 = vpop.f32.mrf.mxu1  ;;  %725 = vmatprep.mubr.f32.mxu0 %v438_v16 }
  0xf1   :  { %v643_v23 = vpop.f32.mrf.mxu0 }
  0xf2   :  { %v439_v24 = vmul.f32 %v435_v17, %v431_v19  ;;  %v424_v25 = vadd.f32 %v669_v21, %v375_v20  ;;  %v644_v26 = vadd.f32 %v643_v23, %v642_v18  ;;  %v671_v27 = vpop.f32.mrf.mxu1 }
  0xf3   :  { %v672_v31 = vadd.f32 %v671_v27, %v670_v22 }
  0xf4   :  { %v432_v29 = vmax.f32 %v424_v25, 0.0  ;;  %v378_v30 = vadd.f32 %v644_v26, %v568_v58  ;;  %726 = vmatmul.mubr.f32.vlgmr.msra.gmra.mxu0 %v439_v24 }
  0xf6   :  { %v427_v32 = vadd.f32 %v672_v31, %v378_v30  ;;  %v440_v33 = vmul.f32 %v436_v28, %v432_v29 }
  0xf8   :  { %v433_v35 = vmax.f32 %v427_v32, 0.0  ;;  %728 = vmatprep.mubr.f32.mxu1 %v440_v33 }
  0xfa   :  { %v441_v36 = vmul.f32 %v437_v34, %v433_v35 }
  0xfc   :  { %729 = vmatmul.mubr.f32.vlgmr.msra.gmra.mxu1 %v441_v36 }
 0x1b4   :  { %v727_v37 = vpop.f32.mrf.mxu0 }
 0x1b5   :  { %v614_v38 = vpack.c.bf16 %v727_v37, %v727_v37 }
 0x1b6   :  { %v524_v39 = vpop.f32.mrf.mxu0 }
 0x1b7   :  { %561 = vst.msk [vmem:[%s1037_s5 + $0x4] sm:$0xf] %vm559_vm0, %v614_v38  ;;  %v613_v40 = vpack.c.bf16 %v524_v39, %v524_v39 }
 0x1b9   :  { %560 = vst.msk [vmem:[%s1037_s5] sm:$0xf] %vm559_vm0, %v613_v40 }
 0x1bc   :  { %v730_v41 = vpop.f32.mrf.mxu1 }
 0x1bd   :  { %v616_v42 = vpack.c.bf16 %v730_v41, %v730_v41 }
 0x1be   :  { %v534_v43 = vpop.f32.mrf.mxu1 }
 0x1bf   :  { %563 = vst.msk [vmem:[%s1037_s5 + $0xc] sm:$0xf] %vm559_vm0, %v616_v42  ;;  %v615_v44 = vpack.c.bf16 %v534_v43, %v534_v43 }
 0x1c1   :  { %562 = vst.msk [vmem:[%s1037_s5 + $0x8] sm:$0xf] %vm559_vm0, %v615_v44 }

// kernel: afe_forward.7
= control target key start
LH: loop header
LB: loop body
LE: loop exit
PB: predicated region body
PF: predicated region fallthrough
CT: control target
= control target key end

     0   :  { %vm358_vm0 = vcmask 257024   ;;  %s669_s1 = inlined_call_operand.vmem [shape: bf16[1,256,128], index: 1, kind: input, shape index: {}]   ;;  %s670_s0 = inlined_call_operand.vmem [shape: bf16[1,32,256], index: 0, kind: input, shape index: {}]   ;;  %s671_s4 = inlined_call_operand.vmem [shape: f32[128,32], index: 4, kind: input, shape index: {}]   ;;  %s672_s2 = inlined_call_operand.vmem [shape: f32[1,1,128], index: 2, kind: input, shape index: {}]   ;;  %s673_s3 = inlined_call_operand.vmem [shape: f32[1,32,128], index: 3, kind: input, shape index: {}]   ;;  %s674_s5 = inlined_call_operand.vmem [shape: bf16[1,32,32], index: 5, kind: output, shape index: {}]  }
   0x1   :  { %v482_v0 = vld [vmem:[%s669_s1 + $0x78] sm:$0xff]   ;;  %v484_v2 = vld [vmem:[%s669_s1 + $0x70] sm:$0xff]   ;;  %v486_v4 = vld [vmem:[%s669_s1 + $0x68] sm:$0xff]  }
   0x2   :  { %v483_v1 = vld [vmem:[%s669_s1 + $0x38] sm:$0xff]   ;;  %396 = vmatprep.subr.bf16.mxu0 %v482_v0  ;;  %v485_v3 = vld [vmem:[%s669_s1 + $0x30] sm:$0xff]   ;;  %v487_v5 = vld [vmem:[%s669_s1 + $0x28] sm:$0xff]  }
   0x3   :  { %397 = vmatpush3.bf16.msra.mxu0 %v483_v1  ;;  %v488_v6 = vld [vmem:[%s669_s1 + $0x60] sm:$0xff]   ;;  %v490_v8 = vld [vmem:[%s669_s1 + $0x58] sm:$0xff]   ;;  %v492_v10 = vld [vmem:[%s669_s1 + $0x50] sm:$0xff]  }
   0x4   :  { %398 = vmatprep.subr.bf16.mxu0 %v484_v2  ;;  %v489_v7 = vld [vmem:[%s669_s1 + $0x20] sm:$0xff]   ;;  %v491_v9 = vld [vmem:[%s669_s1 + $0x18] sm:$0xff]   ;;  %v493_v13 = vld [vmem:[%s669_s1 + $0x10] sm:$0xff]  }
   0x5   :  { %v500_v11 = vld [vmem:[%s670_s0 + $0x4] ss:$8 sps:$4 sm:$0xff]   ;;  %v256_v12 = vld [vmem:[%s671_s4 + $0x78] sm:$0xff]  ;;  %v255_v14 = vld [vmem:[%s671_s4 + $0x70] sm:$0xff] }
   0x6   :  { %212 = vmatprep.mubr.bf16.mxu0 %v500_v11  ;;  %v494_v15 = vld [vmem:[%s669_s1 + $0x48] sm:$0xff]   ;;  %444 = vmatprep.subr.mxu1 %v256_v12  ;;  %v253_v18 = vld [vmem:[%s671_s4 + $0x60] sm:$0xff]  ;;  %v252_v20 = vld [vmem:[%s671_s4 + $0x58] sm:$0xff] }
   0x7   :  { %399 = vmatpush3.bf16.msra.mxu0 %v485_v3  ;;  %445 = vmatpush3.msra.mxu1 %v256_v12  ;;  %v254_v16 = vld [vmem:[%s671_s4 + $0x68] sm:$0xff]  ;;  %v496_v19 = vld [vmem:[%s669_s1 + $0x40] sm:$0xff]   ;;  %v251_v22 = vld [vmem:[%s671_s4 + $0x50] sm:$0xff] }
   0x8   :  { %400 = vmatprep.subr.bf16.mxu0 %v486_v4  ;;  %446 = vmatprep.subr.mxu1 %v255_v14  ;;  %v495_v17 = vld [vmem:[%s669_s1 + $0x8] sm:$0xff]   ;;  %v497_v21 = vld [vmem:[%s669_s1] sm:$0xff]   ;;  %v501_v25 = vld [vmem:[%s670_s0 + $0x14] ss:$8 sps:$4 sm:$0xff]  }
   0x9   :  { %447 = vmatpush3.msra.mxu1 %v255_v14  ;;  %v250_v23 = vld [vmem:[%s671_s4 + $0x48] sm:$0xff]  ;;  %v249_v26 = vld [vmem:[%s671_s4 + $0x40] sm:$0xff]  ;;  %v248_v27 = vld [vmem:[%s671_s4 + $0x38] sm:$0xff] }
   0xa   :  { %448 = vmatprep.subr.mxu1 %v254_v16  ;;  %v498_v24 = vld [vmem:[%s670_s0] ss:$8 sps:$4 sm:$0xff]   ;;  %v503_v28 = vld [vmem:[%s670_s0 + $0x10] ss:$8 sps:$4 sm:$0xff]  }
   0xb   :  { %401 = vmatpush3.bf16.msra.mxu0 %v487_v5  ;;  %449 = vmatpush3.msra.mxu1 %v254_v16  ;;  %v247_v29 = vld [vmem:[%s671_s4 + $0x30] sm:$0xff]  ;;  %v246_v30 = vld [vmem:[%s671_s4 + $0x28] sm:$0xff]  ;;  %v245_v31 = vld [vmem:[%s671_s4 + $0x20] sm:$0xff] }
   0xc   :  { %402 = vmatprep.subr.bf16.mxu0 %v488_v6  ;;  %450 = vmatprep.subr.mxu1 %v253_v18  ;;  %v244_v32 = vld [vmem:[%s671_s4 + $0x18] sm:$0xff]  ;;  %v243_v33 = vld [vmem:[%s671_s4 + $0x10] sm:$0xff]  ;;  %v242_v34 = vld [vmem:[%s671_s4 + $0x8] sm:$0xff] }
   0xd   :  { %451 = vmatpush3.msra.mxu1 %v253_v18  ;;  %v241_v35 = vld [vmem:[%s671_s4] sm:$0xff]  ;;  %v234_v50 = vld [vmem:[%s673_s3 + $0x8] sm:$0xff]  ;;  %v235_v57 = vld [vmem:[%s673_s3 + $0x10] sm:$0xff] }
   0xe   :  { %452 = vmatprep.subr.mxu1 %v252_v20  ;;  %v367_v38 = vld [vmem:[%s672_s2] ss:$0 sm:$0xff]  ;;  %v236_v62 = vld [vmem:[%s673_s3 + $0x18] sm:$0xff] }
   0xf   :  { %403 = vmatpush3.bf16.msra.mxu0 %v489_v7  ;;  %453 = vmatpush3.msra.mxu1 %v252_v20  ;;  %v233_v43 = vld [vmem:[%s673_s3] sm:$0xff] }
  0x10   :  { %404 = vmatprep.subr.bf16.mxu0 %v490_v8  ;;  %454 = vmatprep.subr.mxu1 %v251_v22 }
  0x11   :  { %455 = vmatpush3.msra.mxu1 %v251_v22 }
  0x12   :  { %456 = vmatprep.subr.mxu1 %v250_v23 }
  0x13   :  { %405 = vmatpush3.bf16.msra.mxu0 %v491_v9  ;;  %457 = vmatpush3.msra.mxu1 %v250_v23 }
  0x14   :  { %406 = vmatprep.subr.bf16.mxu0 %v492_v10  ;;  %458 = vmatprep.subr.mxu1 %v249_v26 }
  0x15   :  { %459 = vmatpush3.msra.mxu1 %v249_v26 }
  0x16   :  { %460 = vmatprep.subr.mxu1 %v248_v27 }
  0x17   :  { %407 = vmatpush3.bf16.msra.mxu0 %v493_v13  ;;  %461 = vmatpush3.msra.mxu1 %v248_v27 }
  0x18   :  { %408 = vmatprep.subr.bf16.mxu0 %v494_v15  ;;  %462 = vmatprep.subr.mxu1 %v247_v29 }
  0x19   :  { %463 = vmatpush3.msra.mxu1 %v247_v29 }
  0x1a   :  { %464 = vmatprep.subr.mxu1 %v246_v30 }
  0x1b   :  { %409 = vmatpush3.bf16.msra.mxu0 %v495_v17  ;;  %465 = vmatpush3.msra.mxu1 %v246_v30 }
  0x1c   :  { %410 = vmatprep.subr.bf16.mxu0 %v496_v19  ;;  %466 = vmatprep.subr.mxu1 %v245_v31 }
  0x1d   :  { %467 = vmatpush3.msra.mxu1 %v245_v31 }
  0x1e   :  { %468 = vmatprep.subr.mxu1 %v244_v32 }
  0x1f   :  { %411 = vmatpush3.bf16.msra.mxu0 %v497_v21  ;;  %469 = vmatpush3.msra.mxu1 %v244_v32 }
  0x20   :  { %470 = vmatprep.subr.mxu1 %v243_v33 }
  0x21   :  { %471 = vmatpush3.msra.mxu1 %v243_v33 }
  0x22   :  { %213 = vmatmul.mubr.bf16.vlgmr.msra.gmra.mxu0 %v498_v24  ;;  %472 = vmatprep.subr.mxu1 %v242_v34 }
  0x23   :  { %220 = vmatprep.mubr.bf16.mxu0 %v501_v25  ;;  %473 = vmatpush3.msra.mxu1 %v242_v34 }
  0x24   :  { %474 = vmatprep.subr.mxu1 %v241_v35 }
  0x25   :  { %475 = vmatpush3.msra.mxu1 %v241_v35 }
  0x2a   :  { %221 = vmatmul.mubr.bf16.gmra.mxu0 %v503_v28 }
  0xe2   :  { %v412_v36 = vpop.f32.mrf.mxu0 }
  0xe4   :  { %v413_v37 = vpop.f32.mrf.mxu0 }
  0xe5   :  { %v414_v39 = vadd.f32 %v413_v37, %v412_v36 }
  0xe6   :  { %v415_v40 = vpop.f32.mrf.mxu0 }
  0xe7   :  { %v215_v41 = vadd.f32 %v414_v39, %v367_v38 }
  0xe8   :  { %v416_v42 = vpop.f32.mrf.mxu0 }
  0xe9   :  { %v417_v44 = vadd.f32 %v416_v42, %v415_v40  ;;  %v229_v45 = vmax.f32 %v215_v41, 0.0 }
  0xea   :  { %v418_v46 = vpop.f32.mrf.mxu0 }
  0xeb   :  { %v218_v47 = vadd.f32 %v417_v44, %v367_v38  ;;  %v237_v48 = vmul.f32 %v233_v43, %v229_v45 }
  0xec   :  { %v419_v49 = vpop.f32.mrf.mxu0 }
  0xed   :  { %v230_v51 = vmax.f32 %v218_v47, 0.0  ;;  %v420_v52 = vadd.f32 %v419_v49, %v418_v46  ;;  %476 = vmatprep.mubr.f32.mxu1 %v237_v48 }
  0xee   :  { %v421_v53 = vpop.f32.mrf.mxu0 }
  0xef   :  { %v223_v54 = vadd.f32 %v420_v52, %v367_v38  ;;  %v238_v55 = vmul.f32 %v234_v50, %v230_v51 }
  0xf0   :  { %v422_v56 = vpop.f32.mrf.mxu0 }
  0xf1   :  { %v231_v58 = vmax.f32 %v223_v54, 0.0  ;;  %v423_v59 = vadd.f32 %v422_v56, %v421_v53  ;;  %477 = vmatmul.mubr.f32.vlgmr.msra.gmra.mxu1 %v238_v55 }
  0xf3   :  { %v226_v60 = vadd.f32 %v423_v59, %v367_v38  ;;  %v239_v61 = vmul.f32 %v235_v57, %v231_v58 }
  0xf5   :  { %v232_v63 = vmax.f32 %v226_v60, 0.0  ;;  %479 = vmatprep.mubr.f32.mxu1 %v239_v61 }
  0xf7   :  { %v240_v0 = vmul.f32 %v236_v62, %v232_v63 }
  0xf9   :  { %480 = vmatmul.mubr.f32.gmra.mxu1 %v240_v0 }
 0x1b1   :  { %v478_v1 = vpop.f32.mrf.mxu1 }
 0x1b2   :  { %v393_v2 = vpack.c.bf16 %v478_v1, %v478_v1 }
 0x1b3   :  { %v323_v3 = vpop.f32.mrf.mxu1 }
 0x1b4   :  { %360 = vst.msk [vmem:[%s674_s5 + $0x4] sm:$0xf] %vm358_vm0, %v393_v2  ;;  %v392_v4 = vpack.c.bf16 %v323_v3, %v323_v3 }
 0x1b6   :  { %359 = vst.msk [vmem:[%s674_s5] sm:$0xf] %vm358_vm0, %v392_v4 }
 0x1b9   :  { %v481_v5 = vpop.f32.mrf.mxu1 }
 0x1ba   :  { %v395_v6 = vpack.c.bf16 %v481_v5, %v481_v5 }
 0x1bb   :  { %v333_v7 = vpop.f32.mrf.mxu1 }
 0x1bc   :  { %362 = vst.msk [vmem:[%s674_s5 + $0xc] sm:$0xf] %vm358_vm0, %v395_v6  ;;  %v394_v8 = vpack.c.bf16 %v333_v7, %v333_v7 }
 0x1be   :  { %361 = vst.msk [vmem:[%s674_s5 + $0x8] sm:$0xf] %vm358_vm0, %v394_v8 }

// kernel: afe_forward.13
= control target key start
LH: loop header
LB: loop body
LE: loop exit
PB: predicated region body
PF: predicated region fallthrough
CT: control target
= control target key end

     0   :  { %s4489_s27 = smov 0   ;;  %s5670_s0 = inlined_call_operand.vmem [shape: bf16[2,8,416], index: 0, kind: input, shape index: {}]   ;;  %s5671_s1 = inlined_call_operand.vmem [shape: bf16[2,8,416], index: 1, kind: input, shape index: {}]   ;;  %s5672_s2 = inlined_call_operand.vmem [shape: bf16[416,512], index: 2, kind: input, shape index: {}]   ;;  %s5673_s3 = inlined_call_operand.vmem [shape: bf16[416,512], index: 3, kind: input, shape index: {}]   ;;  %s5674_s4 = inlined_call_operand.vmem [shape: f32[1,512], index: 4, kind: input, shape index: {}]   ;;  %s5675_s5 = inlined_call_operand.vmem [shape: bf16[512,256], index: 5, kind: input, shape index: {}]   ;;  %s5676_s6 = inlined_call_operand.vmem [shape: f32[1,256], index: 6, kind: input, shape index: {}]   ;;  %s5677_s7 = inlined_call_operand.vmem [shape: bf16[256,128], index: 7, kind: input, shape index: {}]   ;;  %s5678_s8 = inlined_call_operand.vmem [shape: f32[1,128], index: 8, kind: input, shape index: {}]   ;;  %s5679_s9 = inlined_call_operand.vmem [shape: bf16[128,64], index: 9, kind: input, shape index: {}]   ;;  %s5680_s10 = inlined_call_operand.vmem [shape: f32[1,64], index: 10, kind: input, shape index: {}]   ;;  %s5681_s11 = inlined_call_operand.vmem [shape: f32[1,1,64], index: 11, kind: input, shape index: {}]   ;;  %s5682_s12 = inlined_call_operand.<no memory space> [shape: f32[1,1], index: 12, kind: input, shape index: {}]   ;;  %s5683_s13 = inlined_call_operand.vmem [shape: f32[2,8,8], index: 13, kind: output, shape index: {}]  }
   0x1   :  { %v18_v0 = vstv %s5682_s12 }
   0x2   :  { %19 = vst [vmem:[#allocation2] sm:$0x1] %v18_v0 }
   0x3 LB: > { %s3553_s28 = sadd.s32 4294967295, %s4412_s27   ;;  %p3557_p0 = scmp.ge.s32.totalorder %s4412_s27, 1  ;;  %s4412_s27 = sphi %s4489_s27, %s25_s27  }
   0x4   : > { %p399_p1 = scmp.lt.s32.totalorder %s4412_s27, 3 }
   0x6   : > { %p400_p2 = pnand %p3557_p0, %p399_p1 }
   0x7   : > { %p447_p3 = scmp.lt.s32.totalorder (!%p400_p2), %s3553_s28, 1 }
   0x8   : > { %403 = sbr.rel (%p400_p2) target bundleno = 1230 (0x4ce), region = 72 }
   0xd   : > { %v3966_v1 = vld [vmem:[%s5672_s2 + $0xe4] ss:$16 sps:$4 sm:$0xff]   ;;  %v3970_v3 = vld [vmem:[%s5672_s2 + $0xe0] ss:$16 sps:$4 sm:$0xff]   ;;  %s5685_s28 = smov (!%p447_p3, %s3553_s28), 1  ;;  %vm1103_vm0 = vcmask 261120  }
   0xe   : > { %v3968_v2 = vld [vmem:[%s5672_s2 + $0x2e4] ss:$16 sps:$4 sm:$0xff]   ;;  %1107 = vmatprep.subr.bf16.mxu0 %v3966_v1  ;;  %v3971_v4 = vld [vmem:[%s5672_s2 + $0x2e0] ss:$16 sps:$4 sm:$0xff]   ;;  %s3877_s12 = sshll.u32 %s5685_s28, 4  ;;  %vm3378_vm1 = vcmask 523264  }
   0xf   : > { %1148 = vmatprep.subr.bf16.mxu1 %v3968_v2  ;;  %v3972_v5 = vld [vmem:[%s5672_s2 + $0xc4] ss:$16 sps:$4 sm:$0xff]   ;;  %1108 = vmatpush1.bf16.msra.mxu0 %v3970_v3  ;;  %v3976_v7 = vld [vmem:[%s5672_s2 + $0xc0] ss:$16 sps:$4 sm:$0xff]   ;;  %s4593_s22 = scalar_lea.vmem %s5670_s0, %s3877_s12  ;;  %v4032_v44 = vld [vmem:[%s5672_s2 + $0xec] ss:$16 sps:$4 sm:$0xff]   ;;  %s4839_s29 = scalar_lea.vmem %s5671_s1, %s3877_s12 }
  0x10   : > { %1149 = vmatpush1.bf16.msra.mxu1 %v3971_v4  ;;  %v3974_v6 = vld [vmem:[%s5672_s2 + $0x2c4] ss:$16 sps:$4 sm:$0xff]   ;;  %1109 = vmatprep.subr.bf16.mxu0 %v3972_v5  ;;  %v3977_v8 = vld [vmem:[%s5672_s2 + $0x2c0] ss:$16 sps:$4 sm:$0xff]   ;;  %v463_v31 = vld [vmem:[%s4593_s22 + $0x8] sm:$0xff]  ;;  %vm3471_vm2 = vcmask 1041409  }
  0x11   : > { %1150 = vmatprep.subr.bf16.mxu1 %v3974_v6  ;;  %v3978_v9 = vld [vmem:[%s5672_s2 + $0xa4] ss:$16 sps:$4 sm:$0xff]   ;;  %v3982_v11 = vld [vmem:[%s5672_s2 + $0xa0] ss:$16 sps:$4 sm:$0xff]   ;;  %v4605_v33 = vcombine.high %v463_v31, %v463_v31  ;;  %v4642_v45 = vcombine.low %v463_v31, %v463_v31  ;;  %v4030_v46 = vld [vmem:[%s5672_s2 + $0xe8] ss:$16 sps:$4 sm:$0xff]  }
  0x12   : > { %v3980_v10 = vld [vmem:[%s5672_s2 + $0x2a4] ss:$16 sps:$4 sm:$0xff]   ;;  %v3983_v12 = vld [vmem:[%s5672_s2 + $0x2a0] ss:$16 sps:$4 sm:$0xff]   ;;  %v4038_v49 = vld [vmem:[%s5672_s2 + $0xcc] ss:$16 sps:$4 sm:$0xff]  }
  0x13   : > { %1110 = vmatpush1.bf16.msra.mxu0 %v3976_v7  ;;  %v3984_v13 = vld [vmem:[%s5672_s2 + $0x84] ss:$16 sps:$4 sm:$0xff]   ;;  %v3988_v15 = vld [vmem:[%s5672_s2 + $0x80] ss:$16 sps:$4 sm:$0xff]   ;;  %3671 = vmatprep.mubr.msk.bf16.mxu1 %vm1103_vm0, %v4605_v33  ;;  %v4036_v50 = vld [vmem:[%s5672_s2 + $0xc8] ss:$16 sps:$4 sm:$0xff]  }
  0x14   : > { %1151 = vmatpush1.bf16.msra.mxu1 %v3977_v8  ;;  %1111 = vmatprep.subr.bf16.mxu0 %v3978_v9  ;;  %v3986_v14 = vld [vmem:[%s5672_s2 + $0x284] ss:$16 sps:$4 sm:$0xff]   ;;  %v3989_v16 = vld [vmem:[%s5672_s2 + $0x280] ss:$16 sps:$4 sm:$0xff]   ;;  %v4044_v55 = vld [vmem:[%s5672_s2 + $0xac] ss:$16 sps:$4 sm:$0xff]  }
  0x15   : > { %1152 = vmatprep.subr.bf16.mxu1 %v3980_v10  ;;  %v3990_v17 = vld [vmem:[%s5672_s2 + $0x64] ss:$16 sps:$4 sm:$0xff]   ;;  %v3994_v19 = vld [vmem:[%s5672_s2 + $0x60] ss:$16 sps:$4 sm:$0xff]   ;;  %v4042_v56 = vld [vmem:[%s5672_s2 + $0xa8] ss:$16 sps:$4 sm:$0xff]  }
  0x16   : > { %v3992_v18 = vld [vmem:[%s5672_s2 + $0x264] ss:$16 sps:$4 sm:$0xff]   ;;  %v3995_v20 = vld [vmem:[%s5672_s2 + $0x260] ss:$16 sps:$4 sm:$0xff]   ;;  %v4050_v59 = vld [vmem:[%s5672_s2 + $0x8c] ss:$16 sps:$4 sm:$0xff]  }
  0x17   : > { %1112 = vmatpush1.bf16.msra.mxu0 %v3982_v11  ;;  %v3996_v21 = vld [vmem:[%s5672_s2 + $0x44] ss:$16 sps:$4 sm:$0xff]   ;;  %v4000_v23 = vld [vmem:[%s5672_s2 + $0x40] ss:$16 sps:$4 sm:$0xff]   ;;  %v4048_v60 = vld [vmem:[%s5672_s2 + $0x88] ss:$16 sps:$4 sm:$0xff]  }
  0x18   : > { %1153 = vmatpush1.bf16.msra.mxu1 %v3983_v12  ;;  %1113 = vmatprep.subr.bf16.mxu0 %v3984_v13  ;;  %v3998_v22 = vld [vmem:[%s5672_s2 + $0x244] ss:$16 sps:$4 sm:$0xff]   ;;  %v4001_v24 = vld [vmem:[%s5672_s2 + $0x240] ss:$16 sps:$4 sm:$0xff]   ;;  %v4056_v63 = vld [vmem:[%s5672_s2 + $0x6c] ss:$16 sps:$4 sm:$0xff]  }
  0x19   : > { %1154 = vmatprep.subr.bf16.mxu1 %v3986_v14  ;;  %v4002_v25 = vld [vmem:[%s5672_s2 + $0x24] ss:$16 sps:$4 sm:$0xff]   ;;  %v4006_v27 = vld [vmem:[%s5672_s2 + $0x20] ss:$16 sps:$4 sm:$0xff]   ;;  %v4054_v0 = vld [vmem:[%s5672_s2 + $0x68] ss:$16 sps:$4 sm:$0xff]  }
  0x1a   : > { %v4004_v26 = vld [vmem:[%s5672_s2 + $0x224] ss:$16 sps:$4 sm:$0xff]   ;;  %v4007_v28 = vld [vmem:[%s5672_s2 + $0x220] ss:$16 sps:$4 sm:$0xff]   ;;  %v4062_v3 = vld [vmem:[%s5672_s2 + $0x4c] ss:$16 sps:$4 sm:$0xff]  }
  0x1b   : > { %1114 = vmatpush1.bf16.msra.mxu0 %v3988_v15  ;;  %v4008_v29 = vld [vmem:[%s5672_s2 + $0x4] ss:$16 sps:$4 sm:$0xff]   ;;  %v4012_v32 = vld [vmem:[%s5672_s2] ss:$16 sps:$4 sm:$0xff]   ;;  %v4060_v4 = vld [vmem:[%s5672_s2 + $0x48] ss:$16 sps:$4 sm:$0xff]  }
  0x1c   : > { %1155 = vmatpush1.bf16.msra.mxu1 %v3989_v16  ;;  %1115 = vmatprep.subr.bf16.mxu0 %v3990_v17  ;;  %v4010_v30 = vld [vmem:[%s5672_s2 + $0x204] ss:$16 sps:$4 sm:$0xff]   ;;  %v4013_v34 = vld [vmem:[%s5672_s2 + $0x200] ss:$16 sps:$4 sm:$0xff]   ;;  %v4068_v6 = vld [vmem:[%s5672_s2 + $0x2c] ss:$16 sps:$4 sm:$0xff]  }
  0x1d   : > { %1156 = vmatprep.subr.bf16.mxu1 %v3992_v18  ;;  %v4014_v35 = vld [vmem:[%s5672_s2 + $0x1e4] ss:$16 sps:$4 sm:$0xff]   ;;  %v4018_v37 = vld [vmem:[%s5672_s2 + $0x1e0] ss:$16 sps:$4 sm:$0xff]   ;;  %v4071_v7 = vld [vmem:[%s5672_s2 + $0x2ec] ss:$16 sps:$4 sm:$0xff]  }
  0x1e   : > { %v4016_v36 = vld [vmem:[%s5672_s2 + $0x324] ss:$16 sps:$4 sm:$0xff]   ;;  %v4019_v38 = vld [vmem:[%s5672_s2 + $0x320] ss:$16 sps:$4 sm:$0xff]   ;;  %v4066_v9 = vld [vmem:[%s5672_s2 + $0x28] ss:$16 sps:$4 sm:$0xff]  }
  0x1f   : > { %1116 = vmatpush1.bf16.msra.mxu0 %v3994_v19  ;;  %v4020_v39 = vld [vmem:[%s5672_s2 + $0x1c4] ss:$16 sps:$4 sm:$0xff]   ;;  %v4024_v41 = vld [vmem:[%s5672_s2 + $0x1c0] ss:$16 sps:$4 sm:$0xff]   ;;  %v4069_v10 = vld [vmem:[%s5672_s2 + $0x2e8] ss:$16 sps:$4 sm:$0xff]  }
  0x20   : > { %1157 = vmatpush1.bf16.msra.mxu1 %v3995_v20  ;;  %1117 = vmatprep.subr.bf16.mxu0 %v3996_v21  ;;  %v4022_v40 = vld [vmem:[%s5672_s2 + $0x304] ss:$16 sps:$4 sm:$0xff]   ;;  %v4025_v42 = vld [vmem:[%s5672_s2 + $0x300] ss:$16 sps:$4 sm:$0xff]   ;;  %v4074_v11 = vld [vmem:[%s5672_s2 + $0xc] ss:$16 sps:$4 sm:$0xff]  }
  0x21   : > { %1158 = vmatprep.subr.bf16.mxu1 %v3998_v22  ;;  %v4028_v43 = vld [vmem:[%s5672_s2 + $0x1a4] ss:$16 sps:$4 sm:$0xff]   ;;  %v4033_v47 = vld [vmem:[%s5672_s2 + $0x1a0] ss:$16 sps:$4 sm:$0xff]   ;;  %v4077_v12 = vld [vmem:[%s5672_s2 + $0x2cc] ss:$16 sps:$4 sm:$0xff]  }
  0x22   : > { %v4034_v48 = vld [vmem:[%s5672_s2 + $0x184] ss:$16 sps:$4 sm:$0xff]   ;;  %v4039_v52 = vld [vmem:[%s5672_s2 + $0x180] ss:$16 sps:$4 sm:$0xff]   ;;  %v4072_v13 = vld [vmem:[%s5672_s2 + $0x8] ss:$16 sps:$4 sm:$0xff]  }
  0x23   : > { %1118 = vmatpush1.bf16.msra.mxu0 %v4000_v23  ;;  %v462_v51 = vld [vmem:[%s4593_s22] sm:$0xff]  ;;  %v4075_v14 = vld [vmem:[%s5672_s2 + $0x2c8] ss:$16 sps:$4 sm:$0xff]   ;;  %v4080_v15 = vld [vmem:[%s5672_s2 + $0x1ec] ss:$16 sps:$4 sm:$0xff]   ;;  %vm3473_vm3 = vcmask 1042434  }
  0x24   : > { %1159 = vmatpush1.bf16.msra.mxu1 %v4001_v24  ;;  %1119 = vmatprep.subr.bf16.mxu0 %v4002_v25  ;;  %v4040_v53 = vld [vmem:[%s5672_s2 + $0x164] ss:$16 sps:$4 sm:$0xff]   ;;  %v3564_v54 = vcombine.high %v462_v51, %v462_v51  ;;  %v4045_v57 = vld [vmem:[%s5672_s2 + $0x160] ss:$16 sps:$4 sm:$0xff]   ;;  %v4718_v8 = vcombine.low %v462_v51, %v462_v51  ;;  %v4083_v16 = vld [vmem:[%s5672_s2 + $0x2ac] ss:$16 sps:$4 sm:$0xff]  }
  0x25   : > { %1160 = vmatprep.subr.bf16.mxu1 %v4004_v26  ;;  %v4046_v58 = vld [vmem:[%s5672_s2 + $0x144] ss:$16 sps:$4 sm:$0xff]   ;;  %v4051_v61 = vld [vmem:[%s5672_s2 + $0x140] ss:$16 sps:$4 sm:$0xff]   ;;  %v4078_v17 = vld [vmem:[%s5672_s2 + $0x1e8] ss:$16 sps:$4 sm:$0xff]  }
  0x26   : > { %1139 = vmatprep.mubr.bf16.mxu0 %v3564_v54  ;;  %v4052_v62 = vld [vmem:[%s5672_s2 + $0x124] ss:$16 sps:$4 sm:$0xff]   ;;  %v4057_v1 = vld [vmem:[%s5672_s2 + $0x120] ss:$16 sps:$4 sm:$0xff]   ;;  %v4081_v18 = vld [vmem:[%s5672_s2 + $0x2a8] ss:$16 sps:$4 sm:$0xff]  }
  0x27   : > { %1120 = vmatpush1.bf16.msra.mxu0 %v4006_v27  ;;  %v4058_v2 = vld [vmem:[%s5672_s2 + $0x104] ss:$16 sps:$4 sm:$0xff]   ;;  %v4063_v5 = vld [vmem:[%s5672_s2 + $0x100] ss:$16 sps:$4 sm:$0xff]   ;;  %v4086_v19 = vld [vmem:[%s5672_s2 + $0x1cc] ss:$16 sps:$4 sm:$0xff]  }
  0x28   : > { %1161 = vmatpush1.bf16.msra.mxu1 %v4007_v28  ;;  %1121 = vmatprep.subr.bf16.mxu0 %v4008_v29  ;;  %v4089_v20 = vld [vmem:[%s5672_s2 + $0x28c] ss:$16 sps:$4 sm:$0xff]   ;;  %v4084_v21 = vld [vmem:[%s5672_s2 + $0x1c8] ss:$16 sps:$4 sm:$0xff]   ;;  %v4126_v51 = vld [vmem:[%s5673_s3 + $0xe0] ss:$16 sps:$4 sm:$0xff]  }
  0x29   : > { %1162 = vmatprep.subr.bf16.mxu1 %v4010_v30  ;;  %v4087_v22 = vld [vmem:[%s5672_s2 + $0x288] ss:$16 sps:$4 sm:$0xff]   ;;  %v4092_v23 = vld [vmem:[%s5672_s2 + $0x1ac] ss:$16 sps:$4 sm:$0xff]   ;;  %vm3475_vm4 = vcmask 1043459   ;;  %vm3477_vm5 = vcmask 1044484  }
  0x2a   : > { %v4095_v24 = vld [vmem:[%s5672_s2 + $0x26c] ss:$16 sps:$4 sm:$0xff]   ;;  %v4090_v25 = vld [vmem:[%s5672_s2 + $0x1a8] ss:$16 sps:$4 sm:$0xff]   ;;  %s3562_s25 = sshll.u32 %s5685_s28, 3  ;;  %vm3479_vm6 = vcmask 1045509  }
  0x2b   : > { %1122 = vmatpush1.bf16.msra.mxu0 %v4012_v32  ;;  %v4093_v26 = vld [vmem:[%s5672_s2 + $0x268] ss:$16 sps:$4 sm:$0xff]   ;;  %v4098_v27 = vld [vmem:[%s5672_s2 + $0x18c] ss:$16 sps:$4 sm:$0xff]   ;;  %vm3481_vm7 = vcmask 1046534   ;;  %vm3483_vm8 = vcmask 1047559   ;;  %s460_s14 = scalar_lea.vmem %s5683_s13, %s3562_s25 }
  0x2c   : > { %1163 = vmatpush1.bf16.msra.mxu1 %v4013_v34  ;;  %1123 = vmatprep.subr.bf16.mxu0 %v4014_v35  ;;  %v4101_v28 = vld [vmem:[%s5672_s2 + $0x24c] ss:$16 sps:$4 sm:$0xff]   ;;  %v4096_v29 = vld [vmem:[%s5672_s2 + $0x188] ss:$16 sps:$4 sm:$0xff]   ;;  %vm3486_vm9 = vcmask 64512  }
  0x2d   : > { %1176 = vmatprep.subr.bf16.mxu1 %v4016_v36  ;;  %v4099_v30 = vld [vmem:[%s5672_s2 + $0x248] ss:$16 sps:$4 sm:$0xff]   ;;  %v4104_v31 = vld [vmem:[%s5672_s2 + $0x16c] ss:$16 sps:$4 sm:$0xff]  }
  0x2e   : > { %v4107_v32 = vld [vmem:[%s5672_s2 + $0x22c] ss:$16 sps:$4 sm:$0xff]   ;;  %v4105_v34 = vld [vmem:[%s5672_s2 + $0x228] ss:$16 sps:$4 sm:$0xff]  }
  0x2f   : > { %1124 = vmatpush2.bf16.msra.mxu0 %v4018_v37  ;;  %v4110_v35 = vld [vmem:[%s5672_s2 + $0x14c] ss:$16 sps:$4 sm:$0xff]   ;;  %v4108_v37 = vld [vmem:[%s5672_s2 + $0x148] ss:$16 sps:$4 sm:$0xff]  }
  0x30   : > { %1177 = vmatpush2.bf16.msra.mxu1 %v4019_v38  ;;  %1125 = vmatprep.subr.bf16.mxu0 %v4020_v39  ;;  %v4113_v36 = vld [vmem:[%s5672_s2 + $0x20c] ss:$16 sps:$4 sm:$0xff]   ;;  %v4111_v38 = vld [vmem:[%s5672_s2 + $0x208] ss:$16 sps:$4 sm:$0xff]  }
  0x31   : > { %1178 = vmatprep.subr.bf16.mxu1 %v4022_v40  ;;  %v4116_v39 = vld [vmem:[%s5672_s2 + $0x12c] ss:$16 sps:$4 sm:$0xff]  }
  0x32   : > { %v4119_v40 = vld [vmem:[%s5672_s2 + $0x32c] ss:$16 sps:$4 sm:$0xff]  }
  0x33   : > { %1126 = vmatpush2.bf16.msra.mxu0 %v4024_v41  ;;  %v4114_v41 = vld [vmem:[%s5672_s2 + $0x128] ss:$16 sps:$4 sm:$0xff]  }
  0x34   : > { %1179 = vmatpush2.bf16.msra.mxu1 %v4025_v42  ;;  %1127 = vmatprep.subr.bf16.mxu0 %v4028_v43  ;;  %v4117_v42 = vld [vmem:[%s5672_s2 + $0x328] ss:$16 sps:$4 sm:$0xff]   ;;  %v4122_v43 = vld [vmem:[%s5672_s2 + $0x10c] ss:$16 sps:$4 sm:$0xff]  }
  0x35   : > { %1189 = vmatprep.subr.bf16.mxu1 %v4032_v44  ;;  %v4125_v44 = vld [vmem:[%s5672_s2 + $0x30c] ss:$16 sps:$4 sm:$0xff]  }
  0x37   : > { %1181 = vmatmul.mubr.bf16.vlgmr.msra.gmra.mxu1 %v4642_v45  ;;  %1128 = vmatpush2.bf16.msra.mxu0 %v4033_v47  ;;  %v4123_v47 = vld [vmem:[%s5672_s2 + $0x308] ss:$16 sps:$4 sm:$0xff]  }
  0x38   : > { %1190 = vmatpush1.bf16.msra.mxu1 %v4030_v46  ;;  %1129 = vmatprep.subr.bf16.mxu0 %v4034_v48  ;;  %v4120_v46 = vld [vmem:[%s5672_s2 + $0x108] ss:$16 sps:$4 sm:$0xff]   ;;  %v4128_v48 = vld [vmem:[%s5673_s3 + $0xe4] ss:$16 sps:$4 sm:$0xff]  }
  0x39   : > { %1191 = vmatprep.subr.bf16.mxu1 %v4038_v49  ;;  %1221 = vmatprep.mubr.bf16.mxu1 %v3564_v54  ;;  %v4131_v49 = vld [vmem:[%s5673_s3 + $0x2e4] ss:$16 sps:$4 sm:$0xff]  }
  0x3a   : > { %v4137_v54 = vld [vmem:[%s5673_s3 + $0x2c4] ss:$16 sps:$4 sm:$0xff]  }
  0x3b   : > { %1130 = vmatpush2.bf16.msra.mxu0 %v4039_v52  ;;  %v4129_v52 = vld [vmem:[%s5673_s3 + $0x2e0] ss:$16 sps:$4 sm:$0xff]  }
  0x3c   : > { %1192 = vmatpush1.bf16.msra.mxu1 %v4036_v50  ;;  %1131 = vmatprep.subr.bf16.mxu0 %v4040_v53  ;;  %v4851_v50 = vld [vmem:[%s4839_s29 + $0x8] sm:$0xff]  ;;  %v4134_v53 = vld [vmem:[%s5673_s3 + $0xc4] ss:$16 sps:$4 sm:$0xff]  }
  0x3d   : > { %1193 = vmatprep.subr.bf16.mxu1 %v4044_v55  ;;  %v4867_v55 = vcombine.high %v4851_v50, %v4851_v50 }
  0x3f   : > { %1132 = vmatpush2.bf16.msra.mxu0 %v4045_v57  ;;  %v4135_v57 = vld [vmem:[%s5673_s3 + $0x2c0] ss:$16 sps:$4 sm:$0xff]  }
  0x40   : > { %1194 = vmatpush1.bf16.msra.mxu1 %v4042_v56  ;;  %1133 = vmatprep.subr.bf16.mxu0 %v4046_v58  ;;  %v4132_v56 = vld [vmem:[%s5673_s3 + $0xc0] ss:$16 sps:$4 sm:$0xff]   ;;  %v4140_v58 = vld [vmem:[%s5673_s3 + $0xa4] ss:$16 sps:$4 sm:$0xff]  }
  0x41   : > { %1195 = vmatprep.subr.bf16.mxu1 %v4050_v59  ;;  %v4138_v59 = vld [vmem:[%s5673_s3 + $0xa0] ss:$16 sps:$4 sm:$0xff]  }
  0x43   : > { %1134 = vmatpush2.bf16.msra.mxu0 %v4051_v61  ;;  %v4146_v61 = vld [vmem:[%s5673_s3 + $0x84] ss:$16 sps:$4 sm:$0xff]  }
  0x44   : > { %1196 = vmatpush1.bf16.msra.mxu1 %v4048_v60  ;;  %1135 = vmatprep.subr.bf16.mxu0 %v4052_v62  ;;  %v4141_v60 = vld [vmem:[%s5673_s3 + $0x2a0] ss:$16 sps:$4 sm:$0xff]   ;;  %v4149_v62 = vld [vmem:[%s5673_s3 + $0x284] ss:$16 sps:$4 sm:$0xff]  }
  0x45   : > { %1197 = vmatprep.subr.bf16.mxu1 %v4056_v63  ;;  %v4898_v63 = vld [vmem:[%s4839_s29] sm:$0xff] }
  0x47   : > { %1136 = vmatpush2.bf16.msra.mxu0 %v4057_v1  ;;  %v4144_v1 = vld [vmem:[%s5673_s3 + $0x80] ss:$16 sps:$4 sm:$0xff]  }
  0x48   : > { %1198 = vmatpush1.bf16.msra.mxu1 %v4054_v0  ;;  %1137 = vmatprep.subr.bf16.mxu0 %v4058_v2  ;;  %v4902_v0 = vcombine.high %v4898_v63, %v4898_v63  ;;  %v4147_v2 = vld [vmem:[%s5673_s3 + $0x280] ss:$16 sps:$4 sm:$0xff]  }
  0x49   : > { %1199 = vmatprep.subr.bf16.mxu1 %v4062_v3  ;;  %v4152_v3 = vld [vmem:[%s5673_s3 + $0x64] ss:$16 sps:$4 sm:$0xff]  }
  0x4b   : > { %1138 = vmatpush2.bf16.msra.mxu0 %v4063_v5  ;;  %v4150_v5 = vld [vmem:[%s5673_s3 + $0x60] ss:$16 sps:$4 sm:$0xff]  }
  0x4c   : > { %1200 = vmatpush1.bf16.msra.mxu1 %v4060_v4  ;;  %1230 = vmatprep.subr.bf16.mxu0 %v4071_v7  ;;  %v4155_v4 = vld [vmem:[%s5673_s3 + $0x264] ss:$16 sps:$4 sm:$0xff]  }
  0x4d   : > { %1201 = vmatprep.subr.bf16.mxu1 %v4068_v6  ;;  %v4153_v6 = vld [vmem:[%s5673_s3 + $0x260] ss:$16 sps:$4 sm:$0xff]   ;;  %v4158_v7 = vld [vmem:[%s5673_s3 + $0x44] ss:$16 sps:$4 sm:$0xff]  }
  0x4e   : > { %1140 = vmatmul.mubr.bf16.vlgmr.msra.gmra.mxu0 %v4718_v8 }
  0x4f   : > { %1231 = vmatpush1.bf16.msra.mxu0 %v4069_v10  ;;  %3672 = vmatprep.mubr.msk.bf16.mxu0 %vm1103_vm0, %v4605_v33  ;;  %v4102_v33 = vld [vmem:[%s5672_s2 + $0x168] ss:$16 sps:$4 sm:$0xff]   ;;  %v4159_v10 = vld [vmem:[%s5673_s3 + $0x240] ss:$16 sps:$4 sm:$0xff]  }
  0x50   : > { %1202 = vmatpush1.bf16.msra.mxu1 %v4066_v9  ;;  %1232 = vmatprep.subr.bf16.mxu0 %v4077_v12  ;;  %v4156_v9 = vld [vmem:[%s5673_s3 + $0x40] ss:$16 sps:$4 sm:$0xff]   ;;  %v4167_v12 = vld [vmem:[%s5673_s3 + $0x224] ss:$16 sps:$4 sm:$0xff]  }
  0x51   : > { %1203 = vmatprep.subr.bf16.mxu1 %v4074_v11  ;;  %v4164_v11 = vld [vmem:[%s5673_s3 + $0x24] ss:$16 sps:$4 sm:$0xff]  }
  0x53   : > { %1233 = vmatpush1.bf16.msra.mxu0 %v4075_v14  ;;  %v4165_v14 = vld [vmem:[%s5673_s3 + $0x220] ss:$16 sps:$4 sm:$0xff]  }
  0x54   : > { %1204 = vmatpush1.bf16.msra.mxu1 %v4072_v13  ;;  %1234 = vmatprep.subr.bf16.mxu0 %v4083_v16  ;;  %v4162_v13 = vld [vmem:[%s5673_s3 + $0x20] ss:$16 sps:$4 sm:$0xff]   ;;  %v4173_v16 = vld [vmem:[%s5673_s3 + $0x204] ss:$16 sps:$4 sm:$0xff]  }
  0x55   : > { %1205 = vmatprep.subr.bf16.mxu1 %v4080_v15  ;;  %v4170_v15 = vld [vmem:[%s5673_s3 + $0x4] ss:$16 sps:$4 sm:$0xff]  }
  0x57   : > { %1235 = vmatpush1.bf16.msra.mxu0 %v4081_v18  ;;  %v4171_v18 = vld [vmem:[%s5673_s3 + $0x200] ss:$16 sps:$4 sm:$0xff]  }
  0x58   : > { %1206 = vmatpush2.bf16.msra.mxu1 %v4078_v17  ;;  %1236 = vmatprep.subr.bf16.mxu0 %v4089_v20  ;;  %v4168_v17 = vld [vmem:[%s5673_s3] ss:$16 sps:$4 sm:$0xff]   ;;  %v4179_v20 = vld [vmem:[%s5673_s3 + $0x324] ss:$16 sps:$4 sm:$0xff]  }
  0x59   : > { %1207 = vmatprep.subr.bf16.mxu1 %v4086_v19  ;;  %v4176_v19 = vld [vmem:[%s5673_s3 + $0x1e4] ss:$16 sps:$4 sm:$0xff]  }
  0x5b   : > { %1237 = vmatpush1.bf16.msra.mxu0 %v4087_v22  ;;  %v4177_v22 = vld [vmem:[%s5673_s3 + $0x320] ss:$16 sps:$4 sm:$0xff]  }
  0x5c   : > { %1208 = vmatpush2.bf16.msra.mxu1 %v4084_v21  ;;  %1238 = vmatprep.subr.bf16.mxu0 %v4095_v24  ;;  %v4174_v21 = vld [vmem:[%s5673_s3 + $0x1e0] ss:$16 sps:$4 sm:$0xff]   ;;  %v4185_v24 = vld [vmem:[%s5673_s3 + $0x304] ss:$16 sps:$4 sm:$0xff]  }
  0x5d   : > { %1209 = vmatprep.subr.bf16.mxu1 %v4092_v23  ;;  %v4182_v23 = vld [vmem:[%s5673_s3 + $0x1c4] ss:$16 sps:$4 sm:$0xff]  }
  0x5f   : > { %1239 = vmatpush1.bf16.msra.mxu0 %v4093_v26  ;;  %v4183_v26 = vld [vmem:[%s5673_s3 + $0x300] ss:$16 sps:$4 sm:$0xff]  }
  0x60   : > { %1210 = vmatpush2.bf16.msra.mxu1 %v4090_v25  ;;  %1240 = vmatprep.subr.bf16.mxu0 %v4101_v28  ;;  %v4180_v25 = vld [vmem:[%s5673_s3 + $0x1c0] ss:$16 sps:$4 sm:$0xff]   ;;  %v4193_v28 = vld [vmem:[%s5673_s3 + $0xec] ss:$16 sps:$4 sm:$0xff]  }
  0x61   : > { %1211 = vmatprep.subr.bf16.mxu1 %v4098_v27  ;;  %v4189_v27 = vld [vmem:[%s5673_s3 + $0x1a4] ss:$16 sps:$4 sm:$0xff]  }
  0x63   : > { %1241 = vmatpush1.bf16.msra.mxu0 %v4099_v30  ;;  %v4191_v30 = vld [vmem:[%s5673_s3 + $0xe8] ss:$16 sps:$4 sm:$0xff]  }
  0x64   : > { %1212 = vmatpush2.bf16.msra.mxu1 %v4096_v29  ;;  %1242 = vmatprep.subr.bf16.mxu0 %v4107_v32  ;;  %v4187_v29 = vld [vmem:[%s5673_s3 + $0x1a0] ss:$16 sps:$4 sm:$0xff]   ;;  %v4196_v32 = vld [vmem:[%s5673_s3 + $0x184] ss:$16 sps:$4 sm:$0xff]  }
  0x65   : > { %1213 = vmatprep.subr.bf16.mxu1 %v4104_v31  ;;  %v4997_v31 = vcombine.low %v4851_v50, %v4851_v50  ;;  %v4223_v50 = vld [vmem:[%s5673_s3 + $0x4c] ss:$16 sps:$4 sm:$0xff]  }
  0x67   : > { %1243 = vmatpush1.bf16.msra.mxu0 %v4105_v34  ;;  %v4194_v34 = vld [vmem:[%s5673_s3 + $0x180] ss:$16 sps:$4 sm:$0xff]  }
  0x68   : > { %1214 = vmatpush2.bf16.msra.mxu1 %v4102_v33  ;;  %1244 = vmatprep.subr.bf16.mxu0 %v4113_v36  ;;  %v4199_v33 = vld [vmem:[%s5673_s3 + $0xcc] ss:$16 sps:$4 sm:$0xff]   ;;  %v4202_v36 = vld [vmem:[%s5673_s3 + $0x164] ss:$16 sps:$4 sm:$0xff]  }
  0x69   : > { %1215 = vmatprep.subr.bf16.mxu1 %v4110_v35  ;;  %v4197_v35 = vld [vmem:[%s5673_s3 + $0xc8] ss:$16 sps:$4 sm:$0xff]  }
  0x6b   : > { %1245 = vmatpush1.bf16.msra.mxu0 %v4111_v38  ;;  %v4200_v38 = vld [vmem:[%s5673_s3 + $0x160] ss:$16 sps:$4 sm:$0xff]  }
  0x6c   : > { %1216 = vmatpush2.bf16.msra.mxu1 %v4108_v37  ;;  %1258 = vmatprep.subr.bf16.mxu0 %v4119_v40  ;;  %v4205_v37 = vld [vmem:[%s5673_s3 + $0xac] ss:$16 sps:$4 sm:$0xff]   ;;  %v4208_v40 = vld [vmem:[%s5673_s3 + $0x144] ss:$16 sps:$4 sm:$0xff]  }
  0x6d   : > { %1217 = vmatprep.subr.bf16.mxu1 %v4116_v39  ;;  %v4203_v39 = vld [vmem:[%s5673_s3 + $0xa8] ss:$16 sps:$4 sm:$0xff]  }
  0x6f   : > { %1259 = vmatpush2.bf16.msra.mxu0 %v4117_v42  ;;  %v4206_v42 = vld [vmem:[%s5673_s3 + $0x140] ss:$16 sps:$4 sm:$0xff]  }
  0x70   : > { %1218 = vmatpush2.bf16.msra.mxu1 %v4114_v41  ;;  %1260 = vmatprep.subr.bf16.mxu0 %v4125_v44  ;;  %v4211_v41 = vld [vmem:[%s5673_s3 + $0x8c] ss:$16 sps:$4 sm:$0xff]   ;;  %v4214_v44 = vld [vmem:[%s5673_s3 + $0x124] ss:$16 sps:$4 sm:$0xff]  }
  0x71   : > { %1219 = vmatprep.subr.bf16.mxu1 %v4122_v43  ;;  %v4209_v43 = vld [vmem:[%s5673_s3 + $0x88] ss:$16 sps:$4 sm:$0xff]  }
  0x73   : > { %1261 = vmatpush2.bf16.msra.mxu0 %v4123_v47  ;;  %v4212_v47 = vld [vmem:[%s5673_s3 + $0x120] ss:$16 sps:$4 sm:$0xff]  }
  0x74   : > { %1220 = vmatpush2.bf16.msra.mxu1 %v4120_v46  ;;  %1911 = vmatprep.subr.bf16.mxu0 %v4128_v48  ;;  %v4217_v46 = vld [vmem:[%s5673_s3 + $0x6c] ss:$16 sps:$4 sm:$0xff]   ;;  %v4215_v48 = vld [vmem:[%s5673_s3 + $0x68] ss:$16 sps:$4 sm:$0xff]  }
  0x75   : > { %1952 = vmatprep.subr.bf16.mxu1 %v4131_v49  ;;  %v4220_v49 = vld [vmem:[%s5673_s3 + $0x104] ss:$16 sps:$4 sm:$0xff]  }
  0x76   : > { %1263 = vmatmul.mubr.bf16.vlgmr.msra.gmra.mxu0 %v4642_v45  ;;  %v4143_v45 = vld [vmem:[%s5673_s3 + $0x2a4] ss:$16 sps:$4 sm:$0xff]  }
  0x77   : > { %1222 = vmatmul.mubr.bf16.vlgmr.msra.gmra.mxu1 %v4718_v8  ;;  %1912 = vmatpush1.bf16.msra.mxu0 %v4126_v51  ;;  %v4161_v8 = vld [vmem:[%s5673_s3 + $0x244] ss:$16 sps:$4 sm:$0xff]   ;;  %v4218_v51 = vld [vmem:[%s5673_s3 + $0x100] ss:$16 sps:$4 sm:$0xff]  }
  0x78   : > { %1953 = vmatpush1.bf16.msra.mxu1 %v4129_v52  ;;  %1913 = vmatprep.subr.bf16.mxu0 %v4134_v53  ;;  %v4221_v52 = vld [vmem:[%s5673_s3 + $0x48] ss:$16 sps:$4 sm:$0xff]   ;;  %v4228_v53 = vld [vmem:[%s5673_s3 + $0x2c] ss:$16 sps:$4 sm:$0xff]  }
  0x79   : > { %1954 = vmatprep.subr.bf16.mxu1 %v4137_v54  ;;  %3781 = vmatprep.mubr.msk.bf16.mxu1 %vm1103_vm0, %v4867_v55  ;;  %v4231_v54 = vld [vmem:[%s5673_s3 + $0x2ec] ss:$16 sps:$4 sm:$0xff]  }
  0x7a   : > { %1943 = vmatprep.mubr.bf16.mxu0 %v4902_v0 }
  0x7b   : > { %1914 = vmatpush1.bf16.msra.mxu0 %v4132_v56  ;;  %v4226_v56 = vld [vmem:[%s5673_s3 + $0x28] ss:$16 sps:$4 sm:$0xff]  }
  0x7c   : > { %1955 = vmatpush1.bf16.msra.mxu1 %v4135_v57  ;;  %1915 = vmatprep.subr.bf16.mxu0 %v4140_v58  ;;  %v4229_v57 = vld [vmem:[%s5673_s3 + $0x2e8] ss:$16 sps:$4 sm:$0xff]   ;;  %v5075_v58 = vcombine.low %v4898_v63, %v4898_v63  ;;  %v4243_v63 = vld [vmem:[%s5673_s3 + $0x2ac] ss:$16 sps:$4 sm:$0xff]  }
  0x7d   : > { %1956 = vmatprep.subr.bf16.mxu1 %v4143_v45  ;;  %v4234_v45 = vld [vmem:[%s5673_s3 + $0xc] ss:$16 sps:$4 sm:$0xff]  }
  0x7f   : > { %1916 = vmatpush1.bf16.msra.mxu0 %v4138_v59  ;;  %v4237_v59 = vld [vmem:[%s5673_s3 + $0x2cc] ss:$16 sps:$4 sm:$0xff]  }
  0x80   : > { %1957 = vmatpush1.bf16.msra.mxu1 %v4141_v60  ;;  %1917 = vmatprep.subr.bf16.mxu0 %v4146_v61  ;;  %v4232_v60 = vld [vmem:[%s5673_s3 + $0x8] ss:$16 sps:$4 sm:$0xff]  }
  0x81   : > { %1958 = vmatprep.subr.bf16.mxu1 %v4149_v62  ;;  %v4235_v61 = vld [vmem:[%s5673_s3 + $0x2c8] ss:$16 sps:$4 sm:$0xff]   ;;  %v4240_v62 = vld [vmem:[%s5673_s3 + $0x1ec] ss:$16 sps:$4 sm:$0xff]  }
  0x83   : > { %1918 = vmatpush1.bf16.msra.mxu0 %v4144_v1  ;;  %v4241_v1 = vld [vmem:[%s5673_s3 + $0x2a8] ss:$16 sps:$4 sm:$0xff]  }
  0x84   : > { %1959 = vmatpush1.bf16.msra.mxu1 %v4147_v2  ;;  %1919 = vmatprep.subr.bf16.mxu0 %v4152_v3  ;;  %v4246_v2 = vld [vmem:[%s5673_s3 + $0x1cc] ss:$16 sps:$4 sm:$0xff]  }
  0x85   : > { %1960 = vmatprep.subr.bf16.mxu1 %v4155_v4  ;;  %v4249_v3 = vld [vmem:[%s5673_s3 + $0x28c] ss:$16 sps:$4 sm:$0xff]   ;;  %v4244_v4 = vld [vmem:[%s5673_s3 + $0x1c8] ss:$16 sps:$4 sm:$0xff]  }
  0x87   : > { %1920 = vmatpush1.bf16.msra.mxu0 %v4150_v5  ;;  %v4252_v5 = vld [vmem:[%s5673_s3 + $0x1ac] ss:$16 sps:$4 sm:$0xff]  }
  0x88   : > { %1961 = vmatpush1.bf16.msra.mxu1 %v4153_v6  ;;  %1921 = vmatprep.subr.bf16.mxu0 %v4158_v7  ;;  %v4255_v6 = vld [vmem:[%s5673_s3 + $0x26c] ss:$16 sps:$4 sm:$0xff]   ;;  %v4250_v7 = vld [vmem:[%s5673_s3 + $0x1a8] ss:$16 sps:$4 sm:$0xff]  }
  0x89   : > { %1962 = vmatprep.subr.bf16.mxu1 %v4161_v8  ;;  %v4253_v8 = vld [vmem:[%s5673_s3 + $0x268] ss:$16 sps:$4 sm:$0xff]  }
  0x8b   : > { %1922 = vmatpush1.bf16.msra.mxu0 %v4156_v9  ;;  %v4258_v9 = vld [vmem:[%s5673_s3 + $0x18c] ss:$16 sps:$4 sm:$0xff]  }
  0x8c   : > { %1963 = vmatpush1.bf16.msra.mxu1 %v4159_v10  ;;  %1923 = vmatprep.subr.bf16.mxu0 %v4164_v11  ;;  %v4261_v10 = vld [vmem:[%s5673_s3 + $0x24c] ss:$16 sps:$4 sm:$0xff]   ;;  %v4256_v11 = vld [vmem:[%s5673_s3 + $0x188] ss:$16 sps:$4 sm:$0xff]  }
  0x8d   : > { %1964 = vmatprep.subr.bf16.mxu1 %v4167_v12  ;;  %v4259_v12 = vld [vmem:[%s5673_s3 + $0x248] ss:$16 sps:$4 sm:$0xff]  }
  0x8f   : > { %1924 = vmatpush1.bf16.msra.mxu0 %v4162_v13  ;;  %v4264_v13 = vld [vmem:[%s5673_s3 + $0x16c] ss:$16 sps:$4 sm:$0xff]  }
  0x90   : > { %1965 = vmatpush1.bf16.msra.mxu1 %v4165_v14  ;;  %1925 = vmatprep.subr.bf16.mxu0 %v4170_v15  ;;  %v4267_v14 = vld [vmem:[%s5673_s3 + $0x22c] ss:$16 sps:$4 sm:$0xff]   ;;  %v4262_v15 = vld [vmem:[%s5673_s3 + $0x168] ss:$16 sps:$4 sm:$0xff]  }
  0x91   : > { %1966 = vmatprep.subr.bf16.mxu1 %v4173_v16  ;;  %v4265_v16 = vld [vmem:[%s5673_s3 + $0x228] ss:$16 sps:$4 sm:$0xff]  }
  0x93   : > { %1926 = vmatpush1.bf16.msra.mxu0 %v4168_v17  ;;  %v4270_v17 = vld [vmem:[%s5673_s3 + $0x14c] ss:$16 sps:$4 sm:$0xff]  }
  0x94   : > { %1967 = vmatpush1.bf16.msra.mxu1 %v4171_v18  ;;  %1927 = vmatprep.subr.bf16.mxu0 %v4176_v19  ;;  %v4273_v18 = vld [vmem:[%s5673_s3 + $0x20c] ss:$16 sps:$4 sm:$0xff]   ;;  %v4268_v19 = vld [vmem:[%s5673_s3 + $0x148] ss:$16 sps:$4 sm:$0xff]  }
  0x95   : > { %1980 = vmatprep.subr.bf16.mxu1 %v4179_v20  ;;  %v4271_v20 = vld [vmem:[%s5673_s3 + $0x208] ss:$16 sps:$4 sm:$0xff]  }
  0x97   : > { %1928 = vmatpush2.bf16.msra.mxu0 %v4174_v21  ;;  %v4276_v21 = vld [vmem:[%s5673_s3 + $0x12c] ss:$16 sps:$4 sm:$0xff]  }
  0x98   : > { %1981 = vmatpush2.bf16.msra.mxu1 %v4177_v22  ;;  %1929 = vmatprep.subr.bf16.mxu0 %v4182_v23  ;;  %v4279_v22 = vld [vmem:[%s5673_s3 + $0x32c] ss:$16 sps:$4 sm:$0xff]   ;;  %v4274_v23 = vld [vmem:[%s5673_s3 + $0x128] ss:$16 sps:$4 sm:$0xff]  }
  0x99   : > { %1982 = vmatprep.subr.bf16.mxu1 %v4185_v24  ;;  %v4277_v24 = vld [vmem:[%s5673_s3 + $0x328] ss:$16 sps:$4 sm:$0xff]  }
  0x9b   : > { %1930 = vmatpush2.bf16.msra.mxu0 %v4180_v25  ;;  %v4282_v25 = vld [vmem:[%s5673_s3 + $0x10c] ss:$16 sps:$4 sm:$0xff]  }
  0x9c   : > { %1983 = vmatpush2.bf16.msra.mxu1 %v4183_v26  ;;  %1931 = vmatprep.subr.bf16.mxu0 %v4189_v27  ;;  %v4285_v26 = vld [vmem:[%s5673_s3 + $0x30c] ss:$16 sps:$4 sm:$0xff]   ;;  %v4280_v27 = vld [vmem:[%s5673_s3 + $0x108] ss:$16 sps:$4 sm:$0xff]  }
  0x9d   : > { %1993 = vmatprep.subr.bf16.mxu1 %v4193_v28  ;;  %v4283_v28 = vld [vmem:[%s5673_s3 + $0x308] ss:$16 sps:$4 sm:$0xff]  }
  0x9f   : > { %1985 = vmatmul.mubr.bf16.vlgmr.msra.gmra.mxu1 %v4997_v31  ;;  %1932 = vmatpush2.bf16.msra.mxu0 %v4187_v29  ;;  %v4288_v29 = vld [vmem:[%s5675_s5 + $0x74] ss:$8 sps:$4 sm:$0xff]  }
  0xa0   : > { %1994 = vmatpush1.bf16.msra.mxu1 %v4191_v30  ;;  %1933 = vmatprep.subr.bf16.mxu0 %v4196_v32  ;;  %v4286_v30 = vld [vmem:[%s5675_s5 + $0x70] ss:$8 sps:$4 sm:$0xff]   ;;  %v4291_v32 = vld [vmem:[%s5675_s5 + $0x64] ss:$8 sps:$4 sm:$0xff]  }
  0xa1   : > { %1995 = vmatprep.subr.bf16.mxu1 %v4199_v33  ;;  %2025 = vmatprep.mubr.bf16.mxu1 %v4902_v0  ;;  %v4238_v0 = vld [vmem:[%s5673_s3 + $0x1e8] ss:$16 sps:$4 sm:$0xff]  }
  0xa2   : > { %v4289_v33 = vld [vmem:[%s5675_s5 + $0x60] ss:$8 sps:$4 sm:$0xff]  }
  0xa3   : > { %1934 = vmatpush2.bf16.msra.mxu0 %v4194_v34  ;;  %v4294_v34 = vld [vmem:[%s5675_s5 + $0x54] ss:$8 sps:$4 sm:$0xff]  }
  0xa4   : > { %1996 = vmatpush1.bf16.msra.mxu1 %v4197_v35  ;;  %1935 = vmatprep.subr.bf16.mxu0 %v4202_v36  ;;  %v4292_v35 = vld [vmem:[%s5675_s5 + $0x50] ss:$8 sps:$4 sm:$0xff]  }
  0xa5   : > { %1997 = vmatprep.subr.bf16.mxu1 %v4205_v37  ;;  %v4319_v36 = vld [vmem:[%s5675_s5 + $0x170] ss:$8 sps:$4 sm:$0xff]   ;;  %v4321_v37 = vld [vmem:[%s5675_s5 + $0x174] ss:$8 sps:$4 sm:$0xff]  }
  0xa7   : > { %1936 = vmatpush2.bf16.msra.mxu0 %v4200_v38  ;;  %v4295_v38 = vld [vmem:[%s5675_s5 + $0x40] ss:$8 sps:$4 sm:$0xff]  }
  0xa8   : > { %1998 = vmatpush1.bf16.msra.mxu1 %v4203_v39  ;;  %1937 = vmatprep.subr.bf16.mxu0 %v4208_v40  ;;  %v4327_v39 = vld [vmem:[%s5675_s5 + $0x164] ss:$8 sps:$4 sm:$0xff]   ;;  %v4300_v40 = vld [vmem:[%s5675_s5 + $0x34] ss:$8 sps:$4 sm:$0xff]  }
  0xa9   : > { %1999 = vmatprep.subr.bf16.mxu1 %v4211_v41  ;;  %v4325_v41 = vld [vmem:[%s5675_s5 + $0x160] ss:$8 sps:$4 sm:$0xff]  }
  0xab   : > { %1938 = vmatpush2.bf16.msra.mxu0 %v4206_v42  ;;  %v4333_v42 = vld [vmem:[%s5675_s5 + $0x154] ss:$8 sps:$4 sm:$0xff]  }
  0xac   : > { %2000 = vmatpush1.bf16.msra.mxu1 %v4209_v43  ;;  %1939 = vmatprep.subr.bf16.mxu0 %v4214_v44  ;;  %v4298_v43 = vld [vmem:[%s5675_s5 + $0x30] ss:$8 sps:$4 sm:$0xff]   ;;  %v4303_v44 = vld [vmem:[%s5675_s5 + $0x24] ss:$8 sps:$4 sm:$0xff]  }
  0xad   : > { %2001 = vmatprep.subr.bf16.mxu1 %v4217_v46  ;;  %v4331_v46 = vld [vmem:[%s5675_s5 + $0x150] ss:$8 sps:$4 sm:$0xff]  }
  0xaf   : > { %1940 = vmatpush2.bf16.msra.mxu0 %v4212_v47  ;;  %v4301_v47 = vld [vmem:[%s5675_s5 + $0x20] ss:$8 sps:$4 sm:$0xff]  }
  0xb0   : > { %2002 = vmatpush1.bf16.msra.mxu1 %v4215_v48  ;;  %1941 = vmatprep.subr.bf16.mxu0 %v4220_v49  ;;  %v4306_v48 = vld [vmem:[%s5675_s5 + $0x14] ss:$8 sps:$4 sm:$0xff]   ;;  %v4304_v49 = vld [vmem:[%s5675_s5 + $0x10] ss:$8 sps:$4 sm:$0xff]  }
  0xb1   : > { %2003 = vmatprep.subr.bf16.mxu1 %v4223_v50  ;;  %v4309_v50 = vld [vmem:[%s5675_s5 + $0x4] ss:$8 sps:$4 sm:$0xff]  }
  0xb3   : > { %1942 = vmatpush2.bf16.msra.mxu0 %v4218_v51 }
  0xb4   : > { %2004 = vmatpush1.bf16.msra.mxu1 %v4221_v52  ;;  %2034 = vmatprep.subr.bf16.mxu0 %v4231_v54  ;;  %v4339_v52 = vld [vmem:[%s5675_s5 + $0x144] ss:$8 sps:$4 sm:$0xff]   ;;  %v4337_v54 = vld [vmem:[%s5675_s5 + $0x140] ss:$8 sps:$4 sm:$0xff]  }
  0xb5   : > { %2005 = vmatprep.subr.bf16.mxu1 %v4228_v53  ;;  %v4307_v53 = vld [vmem:[%s5675_s5] ss:$8 sps:$4 sm:$0xff]  }
  0xb6   : > { %1944 = vmatmul.mubr.bf16.vlgmr.msra.gmra.mxu0 %v5075_v58 }
  0xb7   : > { %2035 = vmatpush1.bf16.msra.mxu0 %v4229_v57  ;;  %3782 = vmatprep.mubr.msk.bf16.mxu0 %vm1103_vm0, %v4867_v55  ;;  %v4247_v55 = vld [vmem:[%s5673_s3 + $0x288] ss:$16 sps:$4 sm:$0xff]   ;;  %v4312_v57 = vld [vmem:[%s5675_s5 + $0xf4] ss:$8 sps:$4 sm:$0xff]  }
  0xb8   : > { %2006 = vmatpush1.bf16.msra.mxu1 %v4226_v56  ;;  %2036 = vmatprep.subr.bf16.mxu0 %v4237_v59  ;;  %v4310_v59 = vld [vmem:[%s5675_s5 + $0xf0] ss:$8 sps:$4 sm:$0xff]  }
  0xb9   : > { %2007 = vmatprep.subr.bf16.mxu1 %v4234_v45  ;;  %v4345_v45 = vld [vmem:[%s5675_s5 + $0x134] ss:$8 sps:$4 sm:$0xff]  }
  0xbb   : > { %2037 = vmatpush1.bf16.msra.mxu0 %v4235_v61 }
  0xbc   : > { %2008 = vmatpush1.bf16.msra.mxu1 %v4232_v60  ;;  %2038 = vmatprep.subr.bf16.mxu0 %v4243_v63  ;;  %v4343_v60 = vld [vmem:[%s5675_s5 + $0x130] ss:$8 sps:$4 sm:$0xff]   ;;  %v4349_v63 = vld [vmem:[%s5675_s5 + $0x120] ss:$8 sps:$4 sm:$0xff]  }
  0xbd   : > { %2009 = vmatprep.subr.bf16.mxu1 %v4240_v62  ;;  %v4315_v62 = vld [vmem:[%s5675_s5 + $0xe4] ss:$8 sps:$4 sm:$0xff]  }
  0xbf   : > { %2039 = vmatpush1.bf16.msra.mxu0 %v4241_v1  ;;  %v4313_v1 = vld [vmem:[%s5675_s5 + $0xe0] ss:$8 sps:$4 sm:$0xff]  }
  0xc0   : > { %2010 = vmatpush2.bf16.msra.mxu1 %v4238_v0  ;;  %2040 = vmatprep.subr.bf16.mxu0 %v4249_v3  ;;  %v4351_v0 = vld [vmem:[%s5675_s5 + $0x124] ss:$8 sps:$4 sm:$0xff]   ;;  %v4354_v3 = vld [vmem:[%s5675_s5 + $0x114] ss:$8 sps:$4 sm:$0xff]  }
  0xc1   : > { %2011 = vmatprep.subr.bf16.mxu1 %v4246_v2  ;;  %v4318_v2 = vld [vmem:[%s5675_s5 + $0xd4] ss:$8 sps:$4 sm:$0xff]  }
  0xc3   : > { %2041 = vmatpush1.bf16.msra.mxu0 %v4247_v55  ;;  %v4352_v55 = vld [vmem:[%s5675_s5 + $0x110] ss:$8 sps:$4 sm:$0xff]  }
  0xc4   : > { %2012 = vmatpush2.bf16.msra.mxu1 %v4244_v4  ;;  %2042 = vmatprep.subr.bf16.mxu0 %v4255_v6  ;;  %v4316_v4 = vld [vmem:[%s5675_s5 + $0xd0] ss:$8 sps:$4 sm:$0xff]   ;;  %v4355_v6 = vld [vmem:[%s5675_s5 + $0x100] ss:$8 sps:$4 sm:$0xff]  }
  0xc5   : > { %2013 = vmatprep.subr.bf16.mxu1 %v4252_v5  ;;  %v4324_v5 = vld [vmem:[%s5675_s5 + $0xc4] ss:$8 sps:$4 sm:$0xff]  }
  0xc7   : > { %2043 = vmatpush1.bf16.msra.mxu0 %v4253_v8  ;;  %v4322_v8 = vld [vmem:[%s5675_s5 + $0xc0] ss:$8 sps:$4 sm:$0xff]  }
  0xc8   : > { %2014 = vmatpush2.bf16.msra.mxu1 %v4250_v7  ;;  %2044 = vmatprep.subr.bf16.mxu0 %v4261_v10  ;;  %v4357_v7 = vld [vmem:[%s5675_s5 + $0x104] ss:$8 sps:$4 sm:$0xff]   ;;  %v4328_v10 = vld [vmem:[%s5675_s5 + $0xb0] ss:$8 sps:$4 sm:$0xff]  }
  0xc9   : > { %2015 = vmatprep.subr.bf16.mxu1 %v4258_v9  ;;  %v4330_v9 = vld [vmem:[%s5675_s5 + $0xb4] ss:$8 sps:$4 sm:$0xff]  }
  0xcb   : > { %2045 = vmatpush1.bf16.msra.mxu0 %v4259_v12  ;;  %v4336_v12 = vld [vmem:[%s5675_s5 + $0xa4] ss:$8 sps:$4 sm:$0xff]  }
  0xcc   : > { %2016 = vmatpush2.bf16.msra.mxu1 %v4256_v11  ;;  %2046 = vmatprep.subr.bf16.mxu0 %v4267_v14  ;;  %v4360_v11 = vld [vmem:[%s5675_s5 + $0x1f4] ss:$8 sps:$4 sm:$0xff]   ;;  %v4363_v14 = vld [vmem:[%s5675_s5 + $0x1e4] ss:$8 sps:$4 sm:$0xff]  }
  0xcd   : > { %2017 = vmatprep.subr.bf16.mxu1 %v4264_v13  ;;  %v4358_v13 = vld [vmem:[%s5675_s5 + $0x1f0] ss:$8 sps:$4 sm:$0xff]  }
  0xcf   : > { %2047 = vmatpush1.bf16.msra.mxu0 %v4265_v16  ;;  %v4361_v16 = vld [vmem:[%s5675_s5 + $0x1e0] ss:$8 sps:$4 sm:$0xff]  }
  0xd0   : > { %2018 = vmatpush2.bf16.msra.mxu1 %v4262_v15  ;;  %2048 = vmatprep.subr.bf16.mxu0 %v4273_v18  ;;  %v4334_v18 = vld [vmem:[%s5675_s5 + $0xa0] ss:$8 sps:$4 sm:$0xff]  }
  0xd1   : > { %2019 = vmatprep.subr.bf16.mxu1 %v4270_v17 }
  0xd3   : > { %2049 = vmatpush1.bf16.msra.mxu0 %v4271_v20  ;;  %v4342_v20 = vld [vmem:[%s5675_s5 + $0x94] ss:$8 sps:$4 sm:$0xff]  }
  0xd4   : > { %2020 = vmatpush2.bf16.msra.mxu1 %v4268_v19  ;;  %2062 = vmatprep.subr.bf16.mxu0 %v4279_v22 }
  0xd5   : > { %2021 = vmatprep.subr.bf16.mxu1 %v4276_v21 }
  0xd7   : > { %2063 = vmatpush2.bf16.msra.mxu0 %v4277_v24 }
  0xd8   : > { %2022 = vmatpush2.bf16.msra.mxu1 %v4274_v23  ;;  %2064 = vmatprep.subr.bf16.mxu0 %v4285_v26 }
  0xd9   : > { %2023 = vmatprep.subr.bf16.mxu1 %v4282_v25  ;;  %v4340_v25 = vld [vmem:[%s5675_s5 + $0x90] ss:$8 sps:$4 sm:$0xff]  }
  0xdb   : > { %2065 = vmatpush2.bf16.msra.mxu0 %v4283_v28  ;;  %v4364_v28 = vld [vmem:[%s5675_s5 + $0x1d0] ss:$8 sps:$4 sm:$0xff]  }
  0xdc   : > { %2024 = vmatpush2.bf16.msra.mxu1 %v4280_v27  ;;  %2837 = vmatprep.subr.bf16.mxu0 %v4288_v29  ;;  %v4348_v27 = vld [vmem:[%s5675_s5 + $0x84] ss:$8 sps:$4 sm:$0xff]   ;;  %v4366_v29 = vld [vmem:[%s5675_s5 + $0x1d4] ss:$8 sps:$4 sm:$0xff]  }
  0xdd   : > { %2910 = vmatprep.subr.bf16.mxu1 %v4321_v37  ;;  %v4376_v37 = vld [vmem:[%s5675_s5 + $0x190] ss:$8 sps:$4 sm:$0xff]  }
  0xde   : > { %2067 = vmatmul.mubr.bf16.vlgmr.msra.gmra.mxu0 %v4997_v31  ;;  %v4297_v31 = vld [vmem:[%s5675_s5 + $0x44] ss:$8 sps:$4 sm:$0xff]  }
  0xdf   : > { %2026 = vmatmul.mubr.bf16.vlgmr.msra.gmra.mxu1 %v5075_v58  ;;  %2838 = vmatpush1.bf16.msra.mxu0 %v4286_v30  ;;  %v4369_v30 = vld [vmem:[%s5675_s5 + $0x1c4] ss:$8 sps:$4 sm:$0xff]  }
  0xe0   : > { %2839 = vmatprep.subr.bf16.mxu0 %v4291_v32  ;;  %2911 = vmatpush1.bf16.msra.mxu1 %v4319_v36  ;;  %v4346_v32 = vld [vmem:[%s5675_s5 + $0x80] ss:$8 sps:$4 sm:$0xff]   ;;  %v4375_v36 = vld [vmem:[%s5675_s5 + $0x1a4] ss:$8 sps:$4 sm:$0xff]  }
  0xe1   : > { %2912 = vmatprep.subr.bf16.mxu1 %v4327_v39  ;;  %v4381_v39 = vld [vmem:[%s5675_s5 + $0x184] ss:$8 sps:$4 sm:$0xff]  }
  0xe3   : > { %2840 = vmatpush1.bf16.msra.mxu0 %v4289_v33  ;;  %v4367_v33 = vld [vmem:[%s5675_s5 + $0x1c0] ss:$8 sps:$4 sm:$0xff]  }
  0xe4   : > { %2841 = vmatprep.subr.bf16.mxu0 %v4294_v34  ;;  %2913 = vmatpush1.bf16.msra.mxu1 %v4325_v41  ;;  %v4370_v34 = vld [vmem:[%s5675_s5 + $0x1b0] ss:$8 sps:$4 sm:$0xff]  }
  0xe5   : > { %2914 = vmatprep.subr.bf16.mxu1 %v4333_v42 }
  0xe7   : > { %2842 = vmatpush1.bf16.msra.mxu0 %v4292_v35  ;;  %v4372_v35 = vld [vmem:[%s5675_s5 + $0x1b4] ss:$8 sps:$4 sm:$0xff]  }
  0xe8   : > { %2843 = vmatprep.subr.bf16.mxu0 %v4297_v31  ;;  %2915 = vmatpush1.bf16.msra.mxu1 %v4331_v46  ;;  %v4373_v31 = vld [vmem:[%s5675_s5 + $0x1a0] ss:$8 sps:$4 sm:$0xff]  }
  0xe9   : > { %2916 = vmatprep.subr.bf16.mxu1 %v4339_v52 }
  0xeb   : > { %2844 = vmatpush1.bf16.msra.mxu0 %v4295_v38  ;;  %v4378_v38 = vld [vmem:[%s5675_s5 + $0x194] ss:$8 sps:$4 sm:$0xff]  }
  0xec   : > { %2845 = vmatprep.subr.bf16.mxu0 %v4300_v40  ;;  %2917 = vmatpush1.bf16.msra.mxu1 %v4337_v54  ;;  %v4379_v40 = vld [vmem:[%s5675_s5 + $0x180] ss:$8 sps:$4 sm:$0xff]  }
  0xed   : > { %2918 = vmatprep.subr.bf16.mxu1 %v4345_v45 }
  0xef   : > { %2846 = vmatpush1.bf16.msra.mxu0 %v4298_v43 }
  0xf0   : > { %2847 = vmatprep.subr.bf16.mxu0 %v4303_v44  ;;  %2919 = vmatpush1.bf16.msra.mxu1 %v4343_v60 }
  0xf1   : > { %2920 = vmatprep.subr.bf16.mxu1 %v4351_v0 }
  0xf3   : > { %2848 = vmatpush1.bf16.msra.mxu0 %v4301_v47 }
  0xf4   : > { %2849 = vmatprep.subr.bf16.mxu0 %v4306_v48  ;;  %2921 = vmatpush1.bf16.msra.mxu1 %v4349_v63 }
  0xf5   : > { %2922 = vmatprep.subr.bf16.mxu1 %v4354_v3 }
  0xf7   : > { %v1182_v51 = vpop.f32.mrf.mxu1  ;;  %2850 = vmatpush1.bf16.msra.mxu0 %v4304_v49 }
  0xf8   : > { %2851 = vmatprep.subr.bf16.mxu0 %v4309_v50  ;;  %2923 = vmatpush1.bf16.msra.mxu1 %v4352_v55 }
  0xf9   : > { %v1184_v56 = vpop.f32.mrf.mxu1  ;;  %2924 = vmatprep.subr.bf16.mxu1 %v4357_v7 }
  0xfb   : > { %v1186_v58 = vpop.f32.mrf.mxu1  ;;  %2852 = vmatpush1.bf16.msra.mxu0 %v4307_v53  ;;  %v2086_v53 = vlaneseq }
  0xfc   : > { %2853 = vmatprep.subr.bf16.mxu0 %v4312_v57  ;;  %2925 = vmatpush1.bf16.msra.mxu1 %v4355_v6 }
  0xfd   : > { %v1187_v61 = vpop.f32.mrf.mxu1  ;;  %2926 = vmatprep.subr.bf16.mxu1 %v4360_v11  ;;  %v5407_v11 = vld [vmem:[%s5674_s4] sm:$0xf] }
  0xff   : > { %2854 = vmatpush2.bf16.msra.mxu0 %v4310_v59  ;;  %v5391_v59 = vshrl.u32 %v2086_v53, 7 }
 0x100   : > { %2855 = vmatprep.subr.bf16.mxu0 %v4315_v62  ;;  %2927 = vmatpush2.bf16.msra.mxu1 %v4358_v13 }
 0x101   : > { %2928 = vmatprep.subr.bf16.mxu1 %v4363_v14  ;;  %v5399_v7 = vsub.s32 0, %v5391_v59 }
 0x103   : > { %2856 = vmatpush2.bf16.msra.mxu0 %v4313_v1 }
 0x104   : > { %2857 = vmatprep.subr.bf16.mxu0 %v4318_v2  ;;  %2929 = vmatpush2.bf16.msra.mxu1 %v4361_v16 }
 0x105   : > { %2930 = vmatprep.subr.bf16.mxu1 %v4366_v29 }
 0x107   : > { %2858 = vmatpush2.bf16.msra.mxu0 %v4316_v4 }
 0x108   : > { %2859 = vmatprep.subr.bf16.mxu0 %v4324_v5  ;;  %2931 = vmatpush2.bf16.msra.mxu1 %v4364_v28 }
 0x109   : > { %2932 = vmatprep.subr.bf16.mxu1 %v4369_v30 }
 0x10b   : > { %2860 = vmatpush2.bf16.msra.mxu0 %v4322_v8 }
 0x10c   : > { %2861 = vmatprep.subr.bf16.mxu0 %v4330_v9  ;;  %2933 = vmatpush2.bf16.msra.mxu1 %v4367_v33 }
 0x10d   : > { %2934 = vmatprep.subr.bf16.mxu1 %v4372_v35 }
 0x10e   : > { %v1141_v15 = vpop.f32.mrf.mxu0 }
 0x10f   : > { %v5331_v17 = vadd.f32 %v1182_v51, %v1141_v15  ;;  %2862 = vmatpush2.bf16.msra.mxu0 %v4328_v10  ;;  %v4414_v51 = vmov 1966171168   ;;  %v5402_v10 = vsub.s32 1, %v5391_v59 }
 0x110   : > { %v1143_v19 = vpop.f32.mrf.mxu0  ;;  %2863 = vmatprep.subr.bf16.mxu0 %v4336_v12  ;;  %2935 = vmatpush2.bf16.msra.mxu1 %v4370_v34  ;;  %v2084_v52 = vunpack.c.l.s4 %v4414_v51 }
 0x111   : > { %v5339_v21 = vadd.f32 %v1184_v56, %v1143_v19  ;;  %2936 = vmatprep.subr.bf16.mxu1 %v4375_v36 }
 0x112   : > { %v1145_v22 = vpop.f32.mrf.mxu0  ;;  %v2085_v45 = vunpack.c.0.s8 %v2084_v52 }
 0x113   : > { %v2079_v23 = vcombine.low %v5331_v17, %v5339_v21  ;;  %v2080_v24 = vcombine.high %v5331_v17, %v5339_v21  ;;  %2864 = vmatpush2.bf16.msra.mxu0 %v4334_v18  ;;  %v5425_v18 = vrot.slane %v5407_v11, %v5399_v7 }
 0x114   : > { %v1146_v26 = vpop.f32.mrf.mxu0  ;;  %2865 = vmatprep.subr.bf16.mxu0 %v4342_v20  ;;  %2937 = vmatpush2.bf16.msra.mxu1 %v4373_v31  ;;  %v2088_v62 = vsub.s32 %v2085_v45, %v5391_v59 }
 0x115   : > { %2938 = vmatprep.subr.bf16.mxu1 %v4378_v38 }
 0x116   : > { %v2089_v0 = vrot.slane %v2079_v23, %v2088_v62  ;;  %v2096_v55 = vrot.slane %v2080_v24, %v2088_v62  ;;  %v2348_v23 = vrot.slane %v5407_v11, %v5402_v10 }
 0x117   : > { %2866 = vmatpush2.bf16.msra.mxu0 %v4340_v25 }
 0x118   : > { %2867 = vmatprep.subr.bf16.mxu0 %v4348_v27  ;;  %2939 = vmatpush2.bf16.msra.mxu1 %v4376_v37 }
 0x119   : > { %2940 = vmatprep.subr.bf16.mxu1 %v4381_v39 }
 0x11b   : > { %2868 = vmatpush2.bf16.msra.mxu0 %v4346_v32 }
 0x11c   : > { %2941 = vmatpush2.bf16.msra.mxu1 %v4379_v40 }
 0x136   : > { %v1264_v42 = vpop.f32.mrf.mxu0 }
 0x137   : > { %v1223_v41 = vpop.f32.mrf.mxu1 }
 0x138   : > { %v1266_v44 = vpop.f32.mrf.mxu0  ;;  %v1265_v56 = vadd.f32 %v1264_v42, %v1223_v41 }
 0x139   : > { %v1225_v43 = vpop.f32.mrf.mxu1 }
 0x13a   : > { %v1268_v47 = vpop.f32.mrf.mxu0  ;;  %v1267_v57 = vadd.f32 %v1266_v44, %v1225_v43 }
 0x13b   : > { %v1227_v46 = vpop.f32.mrf.mxu1 }
 0x13c   : > { %v1269_v49 = vpop.f32.mrf.mxu0  ;;  %v2081_v61 = vcombine.low %v1265_v56, %v1267_v57  ;;  %v2082_v1 = vcombine.high %v1265_v56, %v1267_v57 }
 0x13d   : > { %v1228_v48 = vpop.f32.mrf.mxu1 }
 0x13e   : > { %v2103_v63 = vrot.slane %v2081_v61, %v2088_v62  ;;  %v2110_v4 = vrot.slane %v2082_v1, %v2088_v62 }
 0x140   : > { %v2111_v2 = vcombine.low %v2089_v0, %v2103_v63  ;;  %v2112_v3 = vcombine.high %v2089_v0, %v2103_v63  ;;  %v2113_v8 = vcombine.low %v2096_v55, %v2110_v4  ;;  %v2114_v9 = vcombine.high %v2096_v55, %v2110_v4 }
 0x142   : > { %v5394_v5 = vrot.slane %v2111_v2, %v2088_v62  ;;  %v5396_v6 = vrot.slane %v2112_v3, %v2088_v62  ;;  %v5427_v19 = vrot.slane %v2113_v8, %v2088_v62  ;;  %v5429_v20 = vrot.slane %v2114_v9, %v2088_v62 }
 0x144   : > { %v5411_v13 = vcombine.high %v5394_v5, %v5394_v5  ;;  %v5415_v14 = vcombine.high %v5396_v6, %v5396_v6  ;;  %v2150_v16 = vrot.slane %v5394_v5, %v5399_v7  ;;  %v2166_v17 = vrot.slane %v5396_v6, %v5399_v7 }
 0x145   : > { %v2154_v22 = vrot.slane %v5394_v5, %v5402_v10  ;;  %v2170_v25 = vrot.slane %v5396_v6, %v5402_v10  ;;  %v2218_v40 = vrot.slane %v5427_v19, %v5402_v10  ;;  %v2234_v41 = vrot.slane %v5429_v20, %v5402_v10 }
 0x146   : > { %v2186_v29 = vrot.slane %v5411_v13, %v5402_v10  ;;  %v2202_v30 = vrot.slane %v5415_v14, %v5402_v10  ;;  %v2182_v32 = vrot.slane %v5411_v13, %v5399_v7  ;;  %v2198_v33 = vrot.slane %v5415_v14, %v5399_v7 }
 0x147   : > { %v5461_v61 = vcombine.high %v5429_v20, %v5429_v20  ;;  %v2214_v4 = vrot.slane %v5427_v19, %v5399_v7  ;;  %v2230_v55 = vrot.slane %v5429_v20, %v5399_v7 }
 0x149   : > { %v2266_v9 = vrot.slane %v5461_v61, %v5402_v10 }
 0x15f   : > { %v1986_v50 = vpop.f32.mrf.mxu1 }
 0x161   : > { %v1988_v54 = vpop.f32.mrf.mxu1 }
 0x163   : > { %v1990_v58 = vpop.f32.mrf.mxu1 }
 0x165   : > { %v1991_v60 = vpop.f32.mrf.mxu1 }
 0x166   : > { %v5457_v60 = vcombine.high %v5427_v19, %v5427_v19 }
 0x168   : > { %v2250_v8 = vrot.slane %v5457_v60, %v5402_v10 }
 0x176   : > { %v1945_v12 = vpop.f32.mrf.mxu0 }
 0x177   : > { %v5417_v15 = vadd.f32 %v1986_v50, %v1945_v12 }
 0x178   : > { %v1947_v21 = vpop.f32.mrf.mxu0 }
 0x179   : > { %v1989_v24 = vadd.f32 %v1988_v54, %v1947_v21  ;;  %v2307_v26 = vadd.f32 %v2150_v16, %v5417_v15  ;;  %v2311_v27 = vadd.f32 %v2166_v17, %v5417_v15  ;;  %v2315_v44 = vadd.f32 %v2182_v32, %v5417_v15 }
 0x17a   : > { %v1949_v28 = vpop.f32.mrf.mxu0  ;;  %v2319_v46 = vadd.f32 %v2198_v33, %v5417_v15  ;;  %v2323_v17 = vadd.f32 %v2214_v4, %v5417_v15  ;;  %v2327_v21 = vadd.f32 %v2230_v55, %v5417_v15 }
 0x17b   : > { %v2308_v34 = vadd.f32 %v2154_v22, %v1989_v24  ;;  %v2312_v35 = vadd.f32 %v2170_v25, %v1989_v24  ;;  %v2361_v31 = vadd.f32 %v5425_v18, %v2307_v26  ;;  %v2365_v36 = vadd.f32 %v5425_v18, %v2311_v27 }
 0x17c   : > { %v1950_v37 = vpop.f32.mrf.mxu0  ;;  %v2316_v38 = vadd.f32 %v2186_v29, %v1989_v24  ;;  %v2320_v39 = vadd.f32 %v2202_v30, %v1989_v24  ;;  %v2324_v54 = vadd.f32 %v2218_v40, %v1989_v24  ;;  %v2328_v58 = vadd.f32 %v2234_v41, %v1989_v24 }
 0x17d   : > { %v2362_v42 = vadd.f32 %v2348_v23, %v2308_v34  ;;  %v2366_v43 = vadd.f32 %v2348_v23, %v2312_v35  ;;  %v2393_v47 = vmax.f32 %v2361_v31, 0.0  ;;  %v2397_v48 = vmax.f32 %v2365_v36, 0.0 }
 0x17e   : > { %v2370_v49 = vadd.f32 %v2348_v23, %v2316_v38  ;;  %v2374_v50 = vadd.f32 %v2348_v23, %v2320_v39  ;;  %v2369_v63 = vadd.f32 %v5425_v18, %v2315_v44  ;;  %v2373_v0 = vadd.f32 %v5425_v18, %v2319_v46 }
 0x17f   : > { %v2394_v51 = vmax.f32 %v2362_v42, 0.0  ;;  %v2398_v52 = vmax.f32 %v2366_v43, 0.0  ;;  %v2425_v62 = vpack.c.bf16 %v2397_v48, %v2393_v47  ;;  %v2378_v2 = vadd.f32 %v2348_v23, %v2324_v54 }
 0x180   : > { %v2402_v56 = vmax.f32 %v2370_v49, 0.0  ;;  %v2406_v57 = vmax.f32 %v2374_v50, 0.0  ;;  %v2382_v3 = vadd.f32 %v2348_v23, %v2328_v58  ;;  %v2401_v12 = vmax.f32 %v2369_v63, 0.0 }
 0x181   : > { %v2426_v45 = vpack.c.bf16 %v2398_v52, %v2394_v51  ;;  %v2405_v16 = vmax.f32 %v2373_v0, 0.0  ;;  %v2410_v22 = vmax.f32 %v2378_v2, 0.0  ;;  %v2332_v26 = vadd.f32 %v2250_v8, %v1989_v24 }
 0x182   : > { %v2430_v1 = vpack.c.bf16 %v2406_v57, %v2402_v56  ;;  %v2414_v25 = vmax.f32 %v2382_v3, 0.0  ;;  %v2336_v27 = vadd.f32 %v2266_v9, %v1989_v24  ;;  %v2377_v29 = vadd.f32 %v5425_v18, %v2323_v17 }
 0x183   : > { %2869 = vmatprep.mubr.bf16.mxu0 %v2426_v45  ;;  %v2429_v28 = vpack.c.bf16 %v2405_v16, %v2401_v12  ;;  %v2381_v30 = vadd.f32 %v5425_v18, %v2327_v21  ;;  %v2386_v33 = vadd.f32 %v2348_v23, %v2332_v26  ;;  %v2246_v35 = vrot.slane %v5457_v60, %v5399_v7 }
 0x184   : > { %2870 = vmatmul.mubr.bf16.vlgmr.msra.gmra.mxu0 %v2425_v62  ;;  %v2434_v32 = vpack.c.bf16 %v2414_v25, %v2410_v22  ;;  %v2390_v34 = vadd.f32 %v2348_v23, %v2336_v27  ;;  %v2262_v31 = vrot.slane %v5461_v61, %v5399_v7  ;;  %v2409_v36 = vmax.f32 %v2377_v29, 0.0 }
 0x185   : > { %2879 = vmatprep.mubr.bf16.mxu0 %v2430_v1  ;;  %v2413_v37 = vmax.f32 %v2381_v30, 0.0  ;;  %v2331_v24 = vadd.f32 %v2246_v35, %v5417_v15  ;;  %v2418_v39 = vmax.f32 %v2386_v33, 0.0  ;;  %v5486_v48 = vsub.s32 2, %v5391_v59 }
 0x186   : > { %v2335_v38 = vadd.f32 %v2262_v31, %v5417_v15  ;;  %v2422_v40 = vmax.f32 %v2390_v34, 0.0  ;;  %v5489_v49 = vsub.s32 3, %v5391_v59 }
 0x187   : > { %v2433_v41 = vpack.c.bf16 %v2413_v37, %v2409_v36  ;;  %v2385_v42 = vadd.f32 %v5425_v18, %v2331_v24  ;;  %v2174_v52 = vrot.slane %v5396_v6, %v5486_v48  ;;  %v5499_v54 = vrot.slane %v5407_v11, %v5486_v48 }
 0x188   : > { %v2389_v23 = vadd.f32 %v5425_v18, %v2335_v38  ;;  %v2438_v43 = vpack.c.bf16 %v2422_v40, %v2418_v39  ;;  %v2158_v18 = vrot.slane %v5394_v5, %v5486_v48  ;;  %v2162_v58 = vrot.slane %v5394_v5, %v5489_v49 }
 0x189   : > { %v2417_v44 = vmax.f32 %v2385_v42, 0.0  ;;  %v2356_v45 = vrot.slane %v5407_v11, %v5489_v49  ;;  %v2178_v63 = vrot.slane %v5396_v6, %v5489_v49  ;;  %v2194_v4 = vrot.slane %v5411_v13, %v5489_v49 }
 0x18a   : > { %v2421_v46 = vmax.f32 %v2389_v23, 0.0  ;;  %v2210_v55 = vrot.slane %v5415_v14, %v5489_v49  ;;  %v2190_v5 = vrot.slane %v5411_v13, %v5486_v48  ;;  %v2206_v11 = vrot.slane %v5415_v14, %v5486_v48 }
 0x18b   : > { %v2226_v25 = vrot.slane %v5427_v19, %v5489_v49  ;;  %v2242_v26 = vrot.slane %v5429_v20, %v5489_v49 }
 0x18c   : > { %2880 = vmatmul.mubr.bf16.gmra.mxu0 %v2429_v28  ;;  %v2437_v47 = vpack.c.bf16 %v2421_v46, %v2417_v44  ;;  %v2222_v44 = vrot.slane %v5427_v19, %v5486_v48  ;;  %v2238_v46 = vrot.slane %v5429_v20, %v5486_v48 }
 0x18d   : > { %2889 = vmatprep.mubr.bf16.mxu0 %v2434_v32 }
 0x194   : > { %2890 = vmatmul.mubr.bf16.gmra.mxu0 %v2433_v41 }
 0x195   : > { %2899 = vmatprep.mubr.bf16.mxu0 %v2438_v43 }
 0x19c   : > { %2900 = vmatmul.mubr.bf16.gmra.mxu0 %v2437_v47  ;;  %v2258_v47 = vrot.slane %v5457_v60, %v5489_v49 }
 0x19e   : > { %v2068_v50 = vpop.f32.mrf.mxu0 }
 0x19f   : > { %v2027_v15 = vpop.f32.mrf.mxu1 }
 0x1a0   : > { %v5491_v51 = vadd.f32 %v2068_v50, %v2027_v15  ;;  %v2070_v57 = vpop.f32.mrf.mxu0  ;;  %v2274_v15 = vrot.slane %v5461_v61, %v5489_v49  ;;  %v2254_v49 = vrot.slane %v5457_v60, %v5486_v48 }
 0x1a1   : > { %v2029_v56 = vpop.f32.mrf.mxu1 }
 0x1a2   : > { %v2071_v62 = vadd.f32 %v2070_v57, %v2029_v56  ;;  %v2309_v0 = vadd.f32 %v2158_v18, %v5491_v51  ;;  %v2313_v1 = vadd.f32 %v2174_v52, %v5491_v51  ;;  %v2072_v3 = vpop.f32.mrf.mxu0  ;;  %v2317_v14 = vadd.f32 %v2190_v5, %v5491_v51 }
 0x1a3   : > { %v2031_v2 = vpop.f32.mrf.mxu1  ;;  %v2321_v28 = vadd.f32 %v2206_v11, %v5491_v51  ;;  %v2325_v52 = vadd.f32 %v2222_v44, %v5491_v51  ;;  %v2329_v56 = vadd.f32 %v2238_v46, %v5491_v51  ;;  %v2505_v44 = vld [vmem:[%s5676_s6] sm:$0x3] }
 0x1a4   : > { %v2310_v8 = vadd.f32 %v2162_v58, %v2071_v62  ;;  %v2314_v6 = vadd.f32 %v2178_v63, %v2071_v62  ;;  %v2363_v9 = vadd.f32 %v5499_v54, %v2309_v0  ;;  %v2367_v12 = vadd.f32 %v5499_v54, %v2313_v1  ;;  %v2073_v17 = vpop.f32.mrf.mxu0 }
 0x1a5   : > { %v2032_v16 = vpop.f32.mrf.mxu1  ;;  %v2318_v21 = vadd.f32 %v2194_v4, %v2071_v62  ;;  %v2322_v22 = vadd.f32 %v2210_v55, %v2071_v62  ;;  %v2326_v31 = vadd.f32 %v2226_v25, %v2071_v62  ;;  %v2330_v24 = vadd.f32 %v2242_v26, %v2071_v62  ;;  %v4386_v25 = vld [vmem:[%s5677_s7 + $0x68] sm:$0xff]  }
 0x1a6   : > { %v2364_v13 = vadd.f32 %v2356_v45, %v2310_v8  ;;  %v2368_v27 = vadd.f32 %v2356_v45, %v2314_v6  ;;  %v2395_v29 = vmax.f32 %v2363_v9, 0.0  ;;  %v2399_v30 = vmax.f32 %v2367_v12, 0.0  ;;  %v4387_v26 = vld [vmem:[%s5677_s7 + $0x28] sm:$0xff]  }
 0x1a7   : > { %v2372_v32 = vadd.f32 %v2356_v45, %v2318_v21  ;;  %v2376_v33 = vadd.f32 %v2356_v45, %v2322_v22  ;;  %v2371_v40 = vadd.f32 %v5499_v54, %v2317_v14  ;;  %v2375_v41 = vadd.f32 %v5499_v54, %v2321_v28  ;;  %v4385_v22 = vld [vmem:[%s5677_s7 + $0x30] sm:$0xff]   ;;  %v4390_v14 = vld [vmem:[%s5677_s7 + $0x58] sm:$0xff]  }
 0x1a8   : > { %v2396_v34 = vmax.f32 %v2364_v13, 0.0  ;;  %v2400_v35 = vmax.f32 %v2368_v27, 0.0  ;;  %v2427_v39 = vpack.c.bf16 %v2399_v30, %v2395_v29  ;;  %v2380_v23 = vadd.f32 %v2356_v45, %v2326_v31  ;;  %v4388_v13 = vld [vmem:[%s5677_s7 + $0x60] sm:$0xff]   ;;  %v4391_v28 = vld [vmem:[%s5677_s7 + $0x18] sm:$0xff]   ;;  %v4392_v29 = vld [vmem:[%s5677_s7 + $0x50] sm:$0xff]  }
 0x1a9   : > { %v2404_v36 = vmax.f32 %v2372_v32, 0.0  ;;  %v2408_v37 = vmax.f32 %v2376_v33, 0.0  ;;  %v2384_v43 = vadd.f32 %v2356_v45, %v2330_v24  ;;  %v2403_v50 = vmax.f32 %v2371_v40, 0.0  ;;  %v4389_v27 = vld [vmem:[%s5677_s7 + $0x20] sm:$0xff]   ;;  %v4393_v30 = vld [vmem:[%s5677_s7 + $0x10] sm:$0xff]   ;;  %v4394_v32 = vld [vmem:[%s5677_s7 + $0x48] sm:$0xff]  }
 0x1aa   : > { %v2428_v38 = vpack.c.bf16 %v2400_v35, %v2396_v34  ;;  %v2407_v18 = vmax.f32 %v2375_v41, 0.0  ;;  %v2412_v57 = vmax.f32 %v2380_v23, 0.0  ;;  %v2334_v63 = vadd.f32 %v2258_v47, %v2071_v62  ;;  %v4395_v33 = vld [vmem:[%s5677_s7 + $0x8] sm:$0xff]   ;;  %v4396_v34 = vld [vmem:[%s5677_s7 + $0x40] sm:$0xff]   ;;  %v4398_v31 = vld [vmem:[%s5679_s9 + $0x38] sm:$0xff]  }
 0x1ab   : > { %v2432_v42 = vpack.c.bf16 %v2408_v37, %v2404_v36  ;;  %v2416_v58 = vmax.f32 %v2384_v43, 0.0  ;;  %v2338_v19 = vadd.f32 %v2274_v15, %v2071_v62  ;;  %v2379_v20 = vadd.f32 %v5499_v54, %v2325_v52  ;;  %v4397_v35 = vld [vmem:[%s5677_s7] sm:$0xff]   ;;  %v4399_v36 = vld [vmem:[%s5679_s9 + $0x30] sm:$0xff]   ;;  %3931 = vmatprep.subr.bf16.mxu1 %v4398_v31  ;;  %v4400_v37 = vld [vmem:[%s5679_s9 + $0x28] sm:$0xff]  }
 0x1ac   : > { %2942 = vmatprep.mubr.bf16.mxu1 %v2428_v38  ;;  %v2431_v0 = vpack.c.bf16 %v2407_v18, %v2403_v50  ;;  %v2383_v1 = vadd.f32 %v5499_v54, %v2329_v56  ;;  %v2388_v3 = vadd.f32 %v2356_v45, %v2334_v63  ;;  %v2270_v55 = vrot.slane %v5461_v61, %v5486_v48  ;;  %v4382_v48 = vld [vmem:[%s5677_s7 + $0x78] sm:$0xff]  }
 0x1ad   : > { %2943 = vmatmul.mubr.bf16.vlgmr.msra.gmra.mxu1 %v2427_v39  ;;  %v2436_v2 = vpack.c.bf16 %v2416_v58, %v2412_v57  ;;  %v2392_v4 = vadd.f32 %v2356_v45, %v2338_v19  ;;  %v2411_v5 = vmax.f32 %v2379_v20, 0.0  ;;  %v2333_v62 = vadd.f32 %v2254_v49, %v5491_v51  ;;  %3879 = vmatprep.subr.bf16.mxu0 %v4382_v48 }
 0x1ae   : > { %2952 = vmatprep.mubr.bf16.mxu1 %v2432_v42  ;;  %v2415_v11 = vmax.f32 %v2383_v1, 0.0  ;;  %v2337_v8 = vadd.f32 %v2270_v55, %v5491_v51  ;;  %v2420_v6 = vmax.f32 %v2388_v3, 0.0  ;;  %v4383_v51 = vld [vmem:[%s5677_s7 + $0x38] sm:$0xff]   ;;  %3932 = vmatpush3.bf16.msra.mxu1 %v4398_v31  ;;  %v5608_v47 = vrot.slane %v2505_v44, %v5402_v10 }
 0x1af   : > { %v2424_v9 = vmax.f32 %v2392_v4, 0.0  ;;  %v2387_v16 = vadd.f32 %v5499_v54, %v2333_v62  ;;  %3880 = vmatpush3.bf16.msra.mxu0 %v4383_v51  ;;  %3933 = vmatprep.subr.bf16.mxu1 %v4399_v36  ;;  %v5611_v15 = vrot.slane %v2505_v44, %v5399_v7 }
 0x1b0   : > { %v2435_v12 = vpack.c.bf16 %v2415_v11, %v2411_v5  ;;  %v2391_v45 = vadd.f32 %v5499_v54, %v2337_v8  ;;  %v4384_v54 = vld [vmem:[%s5677_s7 + $0x70] sm:$0xff]  }
 0x1b1   : > { %v2440_v17 = vpack.c.bf16 %v2424_v9, %v2420_v6  ;;  %v2419_v60 = vmax.f32 %v2387_v16, 0.0  ;;  %3881 = vmatprep.subr.bf16.mxu0 %v4384_v54 }
 0x1b2   : > { %v2423_v21 = vmax.f32 %v2391_v45, 0.0  ;;  %3934 = vmatpush3.bf16.msra.mxu1 %v4399_v36 }
 0x1b3   : > { %3882 = vmatpush3.bf16.msra.mxu0 %v4385_v22  ;;  %3935 = vmatprep.subr.bf16.mxu1 %v4400_v37 }
 0x1b4   : > { %v2439_v61 = vpack.c.bf16 %v2423_v21, %v2419_v60  ;;  %3883 = vmatprep.subr.bf16.mxu0 %v4386_v25 }
 0x1b5   : > { %2953 = vmatmul.mubr.bf16.gmra.mxu1 %v2431_v0 }
 0x1b6   : > { %2962 = vmatprep.mubr.bf16.mxu1 %v2436_v2  ;;  %3936 = vmatpush3.bf16.msra.mxu1 %v4400_v37 }
 0x1b7   : > { %3884 = vmatpush3.bf16.msra.mxu0 %v4387_v26 }
 0x1b8   : > { %3885 = vmatprep.subr.bf16.mxu0 %v4388_v13 }
 0x1bb   : > { %3886 = vmatpush3.bf16.msra.mxu0 %v4389_v27 }
 0x1bc   : > { %3887 = vmatprep.subr.bf16.mxu0 %v4390_v14 }
 0x1bd   : > { %2963 = vmatmul.mubr.bf16.gmra.mxu1 %v2435_v12 }
 0x1be   : > { %2972 = vmatprep.mubr.bf16.mxu1 %v2440_v17 }
 0x1bf   : > { %3888 = vmatpush3.bf16.msra.mxu0 %v4391_v28 }
 0x1c0   : > { %3889 = vmatprep.subr.bf16.mxu0 %v4392_v29 }
 0x1c3   : > { %3890 = vmatpush3.bf16.msra.mxu0 %v4393_v30 }
 0x1c4   : > { %3891 = vmatprep.subr.bf16.mxu0 %v4394_v32 }
 0x1c5   : > { %2973 = vmatmul.mubr.bf16.gmra.mxu1 %v2439_v61 }
 0x1c7   : > { %3892 = vmatpush3.bf16.msra.mxu0 %v4395_v33 }
 0x1c8   : > { %3893 = vmatprep.subr.bf16.mxu0 %v4396_v34 }
 0x1cb   : > { %3894 = vmatpush3.bf16.msra.mxu0 %v4397_v35 }
 0x244   : > { %v2871_v24 = vpop.f32.mrf.mxu0 }
 0x245   : > { %v2872_v58 = vadd.f32 %v2871_v24, %v5611_v15 }
 0x246   : > { %v2873_v38 = vpop.f32.mrf.mxu0 }
 0x247   : > { %v2874_v56 = vadd.f32 %v2873_v38, %v5608_v47 }
 0x248   : > { %v2875_v39 = vpop.f32.mrf.mxu0 }
 0x249   : > { %v2876_v57 = vadd.f32 %v2875_v39, %v5611_v15 }
 0x24a   : > { %v2877_v40 = vpop.f32.mrf.mxu0 }
 0x24b   : > { %v2878_v19 = vadd.f32 %v2877_v40, %v5608_v47 }
 0x24c   : > { %v2881_v41 = vpop.f32.mrf.mxu0 }
 0x24d   : > { %v2882_v12 = vadd.f32 %v2881_v41, %v5611_v15 }
 0x24e   : > { %v2883_v42 = vpop.f32.mrf.mxu0 }
 0x24f   : > { %v2884_v8 = vadd.f32 %v2883_v42, %v5608_v47 }
 0x250   : > { %v2885_v23 = vpop.f32.mrf.mxu0 }
 0x251   : > { %v2886_v6 = vadd.f32 %v2885_v23, %v5611_v15 }
 0x252   : > { %v2887_v43 = vpop.f32.mrf.mxu0 }
 0x253   : > { %v2888_v17 = vadd.f32 %v2887_v43, %v5608_v47 }
 0x254   : > { %v2891_v46 = vpop.f32.mrf.mxu0 }
 0x255   : > { %v2892_v33 = vadd.f32 %v2891_v46, %v5611_v15 }
 0x256   : > { %v2893_v18 = vpop.f32.mrf.mxu0 }
 0x257   : > { %v2894_v29 = vadd.f32 %v2893_v18, %v5608_v47 }
 0x258   : > { %v2895_v1 = vpop.f32.mrf.mxu0 }
 0x259   : > { %v2896_v30 = vadd.f32 %v2895_v1, %v5611_v15 }
 0x25a   : > { %v2897_v5 = vpop.f32.mrf.mxu0 }
 0x25b   : > { %v2898_v31 = vadd.f32 %v2897_v5, %v5608_v47 }
 0x25c   : > { %v2901_v61 = vpop.f32.mrf.mxu0 }
 0x25e   : > { %v2903_v27 = vpop.f32.mrf.mxu0 }
 0x25f   : > { %v2904_v46 = vadd.f32 %v2903_v27, %v5608_v47 }
 0x260   : > { %v2905_v24 = vpop.f32.mrf.mxu0 }
 0x262   : > { %v2907_v44 = vpop.f32.mrf.mxu0 }
 0x26d   : > { %v2944_v50 = vpop.f32.mrf.mxu1 }
 0x26e   : > { %v2945_v10 = vadd.f32 %v2944_v50, %v2872_v58 }
 0x26f   : > { %v2946_v52 = vpop.f32.mrf.mxu1 }
 0x270   : > { %v2947_v0 = vadd.f32 %v2946_v52, %v2874_v56  ;;  %v2983_v11 = vmax.f32 %v2945_v10, 0.0  ;;  %v2906_v52 = vadd.f32 %v2905_v24, %v5611_v15 }
 0x271   : > { %v2948_v63 = vpop.f32.mrf.mxu1 }
 0x272   : > { %v2949_v20 = vadd.f32 %v2948_v63, %v2876_v57  ;;  %v2984_v49 = vmax.f32 %v2947_v0, 0.0  ;;  %v2902_v57 = vadd.f32 %v2901_v61, %v5611_v15  ;;  %v4401_v15 = vld [vmem:[%s5679_s9 + $0x20] sm:$0xff]  }
 0x273   : > { %v2950_v2 = vpop.f32.mrf.mxu1  ;;  %3937 = vmatprep.subr.bf16.mxu1 %v4401_v15 }
 0x274   : > { %v2951_v3 = vadd.f32 %v2950_v2, %v2878_v19  ;;  %v2985_v7 = vmax.f32 %v2949_v20, 0.0  ;;  %v2908_v19 = vadd.f32 %v2907_v44, %v5608_v47  ;;  %3938 = vmatpush3.bf16.msra.mxu1 %v4401_v15  ;;  %v4402_v47 = vld [vmem:[%s5679_s9 + $0x18] sm:$0xff]  }
 0x275   : > { %v2954_v4 = vpop.f32.mrf.mxu1  ;;  %3939 = vmatprep.subr.bf16.mxu1 %v4402_v47 }
 0x276   : > { %v2986_v55 = vmax.f32 %v2951_v3, 0.0  ;;  %v2999_v16 = vpack.c.bf16 %v2985_v7, %v2983_v11  ;;  %v2955_v48 = vadd.f32 %v2954_v4, %v2882_v12  ;;  %v4403_v11 = vld [vmem:[%s5679_s9 + $0x10] sm:$0xff]  }
 0x277   : > { %v2956_v62 = vpop.f32.mrf.mxu1 }
 0x278   : > { %v3000_v9 = vpack.c.bf16 %v2986_v55, %v2984_v49  ;;  %v2957_v60 = vadd.f32 %v2956_v62, %v2884_v8  ;;  %v2987_v14 = vmax.f32 %v2955_v48, 0.0  ;;  %3940 = vmatpush3.bf16.msra.mxu1 %v4402_v47  ;;  %v4404_v62 = vld [vmem:[%s5679_s9 + $0x8] sm:$0xff]   ;;  %v4405_v8 = vld [vmem:[%s5679_s9] sm:$0xff]  }
 0x279   : > { %v2958_v45 = vpop.f32.mrf.mxu1  ;;  %3941 = vmatprep.subr.bf16.mxu1 %v4403_v11 }
 0x27a   : > { %v2959_v21 = vadd.f32 %v2958_v45, %v2886_v6  ;;  %3174 = vmatprep.mubr.bf16.mxu0 %v3000_v9  ;;  %v2988_v26 = vmax.f32 %v2957_v60, 0.0 }
 0x27b   : > { %v2960_v51 = vpop.f32.mrf.mxu1  ;;  %3175 = vmatmul.mubr.bf16.vlgmr.msra.gmra.mxu0 %v2999_v16  ;;  %v3847_v16 = vld [vmem:[%s5678_s8] ss:$0 sm:$0xff] }
 0x27c   : > { %v2961_v54 = vadd.f32 %v2960_v51, %v2888_v17  ;;  %v2989_v22 = vmax.f32 %v2959_v21, 0.0  ;;  %3942 = vmatpush3.bf16.msra.mxu1 %v4403_v11 }
 0x27d   : > { %v2964_v25 = vpop.f32.mrf.mxu1  ;;  %3943 = vmatprep.subr.bf16.mxu1 %v4404_v62 }
 0x27e   : > { %v2990_v13 = vmax.f32 %v2961_v54, 0.0  ;;  %v3001_v34 = vpack.c.bf16 %v2989_v22, %v2987_v14  ;;  %v2965_v38 = vadd.f32 %v2964_v25, %v2892_v33 }
 0x27f   : > { %v2966_v28 = vpop.f32.mrf.mxu1 }
 0x280   : > { %v3002_v32 = vpack.c.bf16 %v2990_v13, %v2988_v26  ;;  %v2967_v36 = vadd.f32 %v2966_v28, %v2894_v29  ;;  %v2991_v50 = vmax.f32 %v2965_v38, 0.0  ;;  %3944 = vmatpush3.bf16.msra.mxu1 %v4404_v62 }
 0x281   : > { %v2968_v35 = vpop.f32.mrf.mxu1  ;;  %3945 = vmatprep.subr.bf16.mxu1 %v4405_v8 }
 0x282   : > { %v2969_v37 = vadd.f32 %v2968_v35, %v2896_v30  ;;  %3182 = vmatprep.mubr.bf16.mxu0 %v3002_v32  ;;  %v2992_v23 = vmax.f32 %v2967_v36, 0.0 }
 0x283   : > { %v2970_v39 = vpop.f32.mrf.mxu1  ;;  %3183 = vmatmul.mubr.bf16.gmra.mxu0 %v3001_v34 }
 0x284   : > { %v2971_v40 = vadd.f32 %v2970_v39, %v2898_v31  ;;  %v2993_v41 = vmax.f32 %v2969_v37, 0.0  ;;  %3946 = vmatpush3.bf16.msra.mxu1 %v4405_v8 }
 0x285   : > { %v2974_v42 = vpop.f32.mrf.mxu1 }
 0x286   : > { %v2994_v43 = vmax.f32 %v2971_v40, 0.0  ;;  %v3003_v58 = vpack.c.bf16 %v2993_v41, %v2991_v50  ;;  %v2975_v1 = vadd.f32 %v2974_v42, %v2902_v57 }
 0x287   : > { %v2976_v18 = vpop.f32.mrf.mxu1 }
 0x288   : > { %v3004_v56 = vpack.c.bf16 %v2994_v43, %v2992_v23  ;;  %v2977_v0 = vadd.f32 %v2976_v18, %v2904_v46  ;;  %v2995_v49 = vmax.f32 %v2975_v1, 0.0 }
 0x289   : > { %v2978_v63 = vpop.f32.mrf.mxu1 }
 0x28a   : > { %v2979_v20 = vadd.f32 %v2978_v63, %v2906_v52  ;;  %3190 = vmatprep.mubr.bf16.mxu0 %v3004_v56  ;;  %v2996_v7 = vmax.f32 %v2977_v0, 0.0  ;;  %v3864_v0 = vld [vmem:[%s5680_s10] ss:$0 sm:$0xff] }
 0x28b   : > { %v2980_v10 = vpop.f32.mrf.mxu1  ;;  %3191 = vmatmul.mubr.bf16.gmra.mxu0 %v3003_v58 }
 0x28c   : > { %v2981_v2 = vadd.f32 %v2980_v10, %v2908_v19  ;;  %v2997_v3 = vmax.f32 %v2979_v20, 0.0  ;;  %v4415_v19 = vmov 0  }
 0x28d   : > { %3965 = vset.pattern.permute.xlu0 %v4415_v19 }
 0x28e   : > { %v2998_v4 = vmax.f32 %v2981_v2, 0.0  ;;  %v3005_v5 = vpack.c.bf16 %v2997_v3, %v2995_v49  ;;  %v3873_v2 = vld [vmem:[%s5681_s11] ss:$0 sm:$0xff] }
 0x290   : > { %v3006_v55 = vpack.c.bf16 %v2998_v4, %v2996_v7 }
 0x292   : > { %3198 = vmatprep.mubr.bf16.mxu0 %v3006_v55 }
 0x293   : > { %3199 = vmatmul.mubr.bf16.gmra.mxu0 %v3005_v5 }
 0x33b   : > { %v3895_v6 = vpop.f32.mrf.mxu0 }
 0x33d   : > { %v3896_v9 = vpop.f32.mrf.mxu0 }
 0x33e   : > { %v3897_v12 = vadd.f32 %v3896_v9, %v3895_v6 }
 0x33f   : > { %v3898_v45 = vpop.f32.mrf.mxu0 }
 0x340   : > { %v3177_v60 = vadd.f32 %v3897_v12, %v3847_v16 }
 0x341   : > { %v3899_v17 = vpop.f32.mrf.mxu0 }
 0x342   : > { %v3900_v21 = vadd.f32 %v3899_v17, %v3898_v45  ;;  %v3207_v54 = vmax.f32 %v3177_v60, 0.0 }
 0x343   : > { %v3901_v61 = vpop.f32.mrf.mxu0 }
 0x344   : > { %v3180_v48 = vadd.f32 %v3900_v21, %v3847_v16 }
 0x345   : > { %v3902_v51 = vpop.f32.mrf.mxu0 }
 0x346   : > { %v3208_v22 = vmax.f32 %v3180_v48, 0.0  ;;  %v3903_v25 = vadd.f32 %v3902_v51, %v3901_v61 }
 0x347   : > { %v3904_v26 = vpop.f32.mrf.mxu0 }
 0x348   : > { %v3215_v13 = vpack.c.bf16 %v3208_v22, %v3207_v54  ;;  %v3185_v14 = vadd.f32 %v3903_v25, %v3847_v16 }
 0x349   : > { %v3905_v27 = vpop.f32.mrf.mxu0 }
 0x34a   : > { %v3906_v28 = vadd.f32 %v3905_v27, %v3904_v26  ;;  %3947 = vmatprep.mubr.bf16.mxu1 %v3215_v13  ;;  %v3209_v33 = vmax.f32 %v3185_v14, 0.0 }
 0x34b   : > { %v3907_v29 = vpop.f32.mrf.mxu0 }
 0x34c   : > { %v3188_v30 = vadd.f32 %v3906_v28, %v3847_v16 }
 0x34d   : > { %v3908_v32 = vpop.f32.mrf.mxu0 }
 0x34e   : > { %v3210_v34 = vmax.f32 %v3188_v30, 0.0  ;;  %v3909_v35 = vadd.f32 %v3908_v32, %v3907_v29 }
 0x34f   : > { %v3910_v31 = vpop.f32.mrf.mxu0 }
 0x350   : > { %v3216_v36 = vpack.c.bf16 %v3210_v34, %v3209_v33  ;;  %v3193_v24 = vadd.f32 %v3909_v35, %v3847_v16 }
 0x351   : > { %v3911_v37 = vpop.f32.mrf.mxu0 }
 0x352   : > { %v3912_v38 = vadd.f32 %v3911_v37, %v3910_v31  ;;  %3948 = vmatmul.mubr.bf16.vlgmr.msra.gmra.mxu1 %v3216_v36  ;;  %v3211_v42 = vmax.f32 %v3193_v24, 0.0  ;;  %v3874_v36 = vld [vmem:[#allocation2] ss:$0 sm:$0xff] }
 0x353   : > { %v3913_v39 = vpop.f32.mrf.mxu0 }
 0x354   : > { %v3196_v40 = vadd.f32 %v3912_v38, %v3847_v16 }
 0x355   : > { %v3914_v41 = vpop.f32.mrf.mxu0 }
 0x356   : > { %v3212_v23 = vmax.f32 %v3196_v40, 0.0  ;;  %v3915_v43 = vadd.f32 %v3914_v41, %v3913_v39 }
 0x357   : > { %v3916_v44 = vpop.f32.mrf.mxu0 }
 0x358   : > { %v3217_v50 = vpack.c.bf16 %v3212_v23, %v3211_v42  ;;  %v3201_v46 = vadd.f32 %v3915_v43, %v3847_v16  ;;  %v3438_v23 = vand.u32 127, %v2086_v53 }
 0x359   : > { %v3917_v18 = vpop.f32.mrf.mxu0 }
 0x35a   : > { %v3918_v52 = vadd.f32 %v3917_v18, %v3916_v44  ;;  %3951 = vmatprep.mubr.bf16.mxu1 %v3217_v50  ;;  %v3213_v57 = vmax.f32 %v3201_v46, 0.0  ;;  %v3441_v43 = vsub.s32 %v3438_v23, %v5391_v59 }
 0x35c   : > { %v3204_v56 = vadd.f32 %v3918_v52, %v3847_v16 }
 0x35e   : > { %v3214_v58 = vmax.f32 %v3204_v56, 0.0 }
 0x360   : > { %v3218_v63 = vpack.c.bf16 %v3214_v58, %v3213_v57 }
 0x362   : > { %3952 = vmatmul.mubr.bf16.gmra.mxu1 %v3218_v63 }
 0x412   : > { %v3949_v20 = vpop.f32.mrf.mxu1 }
 0x413   : > { %v3333_v1 = vadd.f32 %v3949_v20, %v3864_v0 }
 0x414   : > { %v3324_v10 = vpop.f32.mrf.mxu1 }
 0x415   : > { %v3357_v3 = vmax.f32 %v3333_v1, 0.0  ;;  %v3325_v7 = vadd.f32 %v3864_v0, %v3324_v10 }
 0x416   : > { %v3950_v4 = vpop.f32.mrf.mxu1 }
 0x417   : > { %v3355_v49 = vmax.f32 %v3325_v7, 0.0  ;;  %v3336_v55 = vadd.f32 %v3950_v4, %v3864_v0  ;;  %v3372_v5 = vmul.f32 %v3873_v2, %v3357_v3 }
 0x418   : > { %v3327_v15 = vpop.f32.mrf.mxu1 }
 0x419   : > { %v3358_v47 = vmax.f32 %v3336_v55, 0.0  ;;  %v3328_v11 = vadd.f32 %v3864_v0, %v3327_v15  ;;  %v3385_v62 = vsel %vm3378_vm1, %v3372_v5, 0.0  ;;  %v3370_v8 = vmul.f32 %v3873_v2, %v3355_v49 }
 0x41a   : > { %3386 = vadd.xlane.f32.xlu1 %v3385_v62 }
 0x41b   : > { %v3356_v6 = vmax.f32 %v3328_v11, 0.0  ;;  %v3379_v9 = vsel %vm3378_vm1, %v3370_v8, 0.0  ;;  %v3373_v12 = vmul.f32 %v3873_v2, %v3358_v47 }
 0x41c   : > { %3380 = vadd.xlane.f32.xlu0 %v3379_v9 }
 0x41d   : > { %v3388_v16 = vsel %vm3378_vm1, %v3373_v12, 0.0  ;;  %v3371_v45 = vmul.f32 %v3873_v2, %v3356_v6 }
 0x41e   : > { %3389 = vadd.xlane.f32.xlu1 %v3388_v16 }
 0x41f   : > { %v3382_v17 = vsel %vm3378_vm1, %v3371_v45, 0.0 }
 0x420   : > { %3383 = vadd.xlane.f32.xlu0 %v3382_v17 }
 0x422   : > { %v3953_v60 = vpop.f32.mrf.mxu1 }
 0x423   : > { %v3349_v21 = vadd.f32 %v3953_v60, %v3864_v0 }
 0x424   : > { %v3340_v61 = vpop.f32.mrf.mxu1 }
 0x425   : > { %v3361_v48 = vmax.f32 %v3349_v21, 0.0  ;;  %v3341_v51 = vadd.f32 %v3864_v0, %v3340_v61 }
 0x426   : > { %v3954_v54 = vpop.f32.mrf.mxu1 }
 0x427   : > { %v3359_v22 = vmax.f32 %v3341_v51, 0.0  ;;  %v3352_v25 = vadd.f32 %v3954_v54, %v3864_v0  ;;  %v3376_v26 = vmul.f32 %v3873_v2, %v3361_v48 }
 0x428   : > { %v3343_v13 = vpop.f32.mrf.mxu1 }
 0x429   : > { %v3344_v27 = vadd.f32 %v3864_v0, %v3343_v13  ;;  %v3397_v14 = vsel %vm3378_vm1, %v3376_v26, 0.0  ;;  %v3374_v28 = vmul.f32 %v3873_v2, %v3359_v22  ;;  %v3362_v29 = vmax.f32 %v3352_v25, 0.0 }
 0x42a   : > { %3398 = vadd.xlane.f32.xlu0 %v3397_v14 }
 0x42b   : > { %v3360_v30 = vmax.f32 %v3344_v27, 0.0  ;;  %v3391_v32 = vsel %vm3378_vm1, %v3374_v28, 0.0  ;;  %v3377_v35 = vmul.f32 %v3873_v2, %v3362_v29 }
 0x42d   : > { %v3375_v33 = vmul.f32 %v3873_v2, %v3360_v30  ;;  %v3400_v31 = vsel %vm3378_vm1, %v3377_v35, 0.0 }
 0x42e   : > { %3392 = vadd.xlane.f32.xlu0 %v3391_v32 }
 0x42f   : > { %v3394_v34 = vsel %vm3378_vm1, %v3375_v33, 0.0 }
 0x430   : > { %3395 = vadd.xlane.f32.xlu1 %v3394_v34 }
 0x434   : > { %3401 = vadd.xlane.f32.xlu1 %v3400_v31 }
 0x444   : > { %3410 = vperm.xlu0 %3965, %v3874_v36  }
 0x4a3   : > { %v3387_v24 = vpop.xlane.xlu1 %3386 }
 0x4a5   : > { %v3381_v37 = vpop.xlane.xlu0 %3380 }
 0x4a7   : > { %v3390_v40 = vpop.xlane.xlu1 %3389 }
 0x4a9   : > { %v3384_v38 = vpop.xlane.xlu0 %3383 }
 0x4b3   : > { %v3399_v39 = vpop.xlane.xlu0 %3398 }
 0x4b7   : > { %v3393_v42 = vpop.xlane.xlu0 %3392 }
 0x4b9   : > { %v3396_v41 = vpop.xlane.xlu1 %3395 }
 0x4bd   : > { %v3402_v50 = vpop.xlane.xlu1 %3401 }
 0x4bf   : > { %v3411_v44 = vpop.permute.xlu0 %3410 }
 0x4c0   : > { %v3413_v18 = vadd.f32 %v3411_v44, %v3381_v37  ;;  %v3414_v46 = vadd.f32 %v3411_v44, %v3384_v38  ;;  %v3415_v52 = vadd.f32 %v3411_v44, %v3387_v24  ;;  %v3416_v56 = vadd.f32 %v3411_v44, %v3390_v40 }
 0x4c1   : > { %v3417_v57 = vadd.f32 %v3411_v44, %v3393_v42  ;;  %v3418_v58 = vadd.f32 %v3411_v44, %v3396_v41  ;;  %v3419_v63 = vadd.f32 %v3411_v44, %v3399_v39  ;;  %v3420_v19 = vadd.f32 %v3411_v44, %v3402_v50 }
 0x4c2   : > { %v3421_v0 = vmax.f32 %v3413_v18, 0.0  ;;  %v3422_v20 = vmax.f32 %v3414_v46, 0.0  ;;  %v3423_v1 = vmax.f32 %v3415_v52, 0.0  ;;  %v3424_v10 = vmax.f32 %v3416_v56, 0.0 }
 0x4c3   : > { %v3425_v53 = vmax.f32 %v3417_v57, 0.0  ;;  %v3426_v2 = vmax.f32 %v3418_v58, 0.0  ;;  %v3427_v4 = vmax.f32 %v3419_v63, 0.0  ;;  %v3428_v49 = vmax.f32 %v3420_v19, 0.0 }
 0x4c4   : > { %v3442_v59 = vrot.slane %v3421_v0, %v3441_v43  ;;  %v3446_v3 = vrot.slane %v3422_v20, %v3441_v43  ;;  %v3450_v7 = vrot.slane %v3423_v1, %v3441_v43  ;;  %v3454_v55 = vrot.slane %v3424_v10, %v3441_v43 }
 0x4c5   : > { %v3458_v15 = vrot.slane %v3425_v53, %v3441_v43  ;;  %v3462_v11 = vrot.slane %v3426_v2, %v3441_v43  ;;  %v3466_v8 = vrot.slane %v3427_v4, %v3441_v43  ;;  %v3470_v9 = vrot.slane %v3428_v49, %v3441_v43 }
 0x4c6   : > { %v3472_v5 = vsel %vm3471_vm2, %v3446_v3, %v3442_v59 }
 0x4c7   : > { %v3474_v47 = vsel %vm3473_vm3, %v3450_v7, %v3472_v5 }
 0x4c8   : > { %v3476_v62 = vsel %vm3475_vm4, %v3454_v55, %v3474_v47 }
 0x4c9   : > { %v3478_v6 = vsel %vm3477_vm5, %v3458_v15, %v3476_v62 }
 0x4ca   : > { %v3480_v12 = vsel %vm3479_vm6, %v3462_v11, %v3478_v6 }
 0x4cb   : > { %v3482_v16 = vsel %vm3481_vm7, %v3466_v8, %v3480_v12 }
 0x4cc   : > { %v3484_v45 = vsel %vm3483_vm8, %v3470_v9, %v3482_v16 }
 0x4cd   : > { %3487 = vst.msk [vmem:[%s460_s14] sm:$0xff] %vm3486_vm9, %v3484_v45 }
 0x4ce PF: > { %s25_s27 = sadd.s32 1, %s4412_s27  }
 0x4cf   : > { %p22_p4 = scmp.ge.s32.totalorder %s25_s27, 4  }
 0x4d1   :  { %24 = sbr.rel (!%p22_p4) target bundleno = 3 (0x3), region = 105 }

</bundles_post_ra>
